<compile_context>
chip_gen: v7x
topology: tpu7x:2x2x1
jax: 0.10.0
libtpu: 0.0.40
codegen_flags: <defaults>
</compile_context>

<pallas_src>
import functools
import math

import jax
import jax.numpy as jnp
from jax import lax
from jax.experimental import pallas as pl
from jax.experimental.pallas import tpu as pltpu


# Row indices inside the packed (20, Hd) bias/row operand.
_R_C1W0 = 0          # rows 0..8: conv1 taps (dy*3+dx, cout)
_R_C1B = 9
_R_SMBB = 10
_R_C2B = 11
_R_CHB1 = 12
_R_CHW2 = 13         # channel-MLP second-layer weight row
_R_CHB2 = 14         # scalar at lane 0
_R_BQ, _R_BK, _R_BV = 15, 16, 17
_R_MB1 = 18
_R_MB2 = 19          # first Dout lanes
_N_ROWS = 20


def _sissa_kernel(x_ref, wp_ref, wqkv_ref, rows_ref, o_ref, c1_ref, acc_ref,
                  *, S, Hd, Din, Dout):
    f32 = jnp.float32
    SH = S * Hd
    scale = 1.0 / math.sqrt(Hd)

    # Static sublane offsets into the packed weight slab wp_ref.
    OFF_C2 = 0                   # 9 x (Hd, Hd)  conv2 taps
    OFF_CW1 = 9 * Hd             # (Hd, Hd)      channel-MLP first layer
    OFF_MW1 = OFF_CW1 + Hd       # (S*Hd, Hd)    final MLP first layer
    OFF_SMB = OFF_MW1 + SH       # (Din, Hd)     SMB weight
    OFF_MW2 = OFF_SMB + Din      # (Hd, Hd)      final MLP second layer (lanes >= Dout are 0)

    def row(i):                  # (1, Hd) packed bias / weight row
        return rows_ref[i:i + 1, :]

    def lane_eq(delta):
        # (SH, Hd) f32 mask: [r, j] = [j == x(r) + delta]   (r = y*Hd + x)
        xi = lax.broadcasted_iota(jnp.int32, (S, Hd, Hd), 1)
        ji = lax.broadcasted_iota(jnp.int32, (S, Hd, Hd), 2)
        return (ji == xi + delta).astype(f32).reshape(SH, Hd)

    def src_valid(dy, dx):
        # (SH, Hd) bool: source pixel (y+dy-1, x+dx-1) lies inside the image.
        yi = lax.broadcasted_iota(jnp.int32, (S, Hd, Hd), 0)
        xi = lax.broadcasted_iota(jnp.int32, (S, Hd, Hd), 1)
        ok = ((yi + (dy - 1) >= 0) & (yi + (dy - 1) < S)
              & (xi + (dx - 1) >= 0) & (xi + (dx - 1) < Hd))
        return ok.reshape(SH, Hd)

    # ---- SMB: shared Linear(Din -> Hd) + ReLU  -> image h (S, Hd), x on lanes
    h = jnp.dot(x_ref[0], wp_ref[OFF_SMB:OFF_SMB + Din, :],
                preferred_element_type=f32) + row(_R_SMBB)
    h = jnp.maximum(h, 0.0)

    # ---- conv1: Conv2d(1 -> Hd, 3x3, pad=1) + ReLU --------------------------
    # cin == 1: 9 rank-1 (tap column x weight row) VPU updates on the flat
    # (S*Hd, Hd) slab.  Row shifts are a sublane roll + mask of the tiny (S,Hd)
    # image; per-dx extraction uses an in-kernel iota mask + lane reduce.
    yimg = lax.broadcasted_iota(jnp.int32, (S, Hd), 0)
    acc1 = jnp.zeros((SH, Hd), f32)
    for dy in range(3):
        if dy == 1:
            h_dy = h
        else:
            ysrc = yimg + (dy - 1)
            h_dy = jnp.where((ysrc >= 0) & (ysrc < S),
                             pltpu.roll(h, shift=(1 - dy) % S, axis=0), 0.0)
        # rows_dy[r, :] = h[y(r)+dy-1, :]  (sublane broadcast, free reshape)
        rows_dy = jnp.broadcast_to(h_dy[:, None, :], (S, Hd, Hd)).reshape(SH, Hd)
        for dx in range(3):
            tap = jnp.sum(rows_dy * lane_eq(dx - 1), axis=-1, keepdims=True)   # (SH, 1)
            acc1 = acc1 + tap * row(_R_C1W0 + dy * 3 + dx)
    c1_ref[...] = jnp.maximum(acc1 + row(_R_C1B), 0.0)                         # (SH, Hd)

    # ---- conv2: Conv2d(Hd -> Hd, 3x3, pad=1) + ReLU --------------------------
    # 9 per-tap whole-slab matmuls.  Shifted/zero-padded views of the flat slab
    # are a sublane roll (XLU) + iota mask; accumulator lives in VMEM scratch.
    for dy in range(3):
        for dx in range(3):
            t = dy * 3 + dx
            shift = ((1 - dy) * Hd + (1 - dx)) % SH
            slab = c1_ref[...]
            if shift:
                slab = pltpu.roll(slab, shift=shift, axis=0)
            if (dy, dx) != (1, 1):
                slab = jnp.where(src_valid(dy, dx), slab, 0.0)
            contrib = jnp.dot(slab, wp_ref[OFF_C2 + t * Hd:OFF_C2 + (t + 1) * Hd, :],
                              preferred_element_type=f32)
            if t == 0:
                acc_ref[...] = contrib
            else:
                acc_ref[...] += contrib
    c2 = jnp.maximum(acc_ref[...] + row(_R_C2B), 0.0)                          # (SH, Hd)

    # ---- channel MLP: Linear(Hd->Hd)+ReLU, Linear(Hd->1) as a lane reduce ----
    ch = jnp.dot(c2, wp_ref[OFF_CW1:OFF_CW1 + Hd, :],
                 preferred_element_type=f32) + row(_R_CHB1)
    ch = jnp.maximum(ch, 0.0)
    ycol = (jnp.sum(ch * row(_R_CHW2), axis=-1, keepdims=True)
            + row(_R_CHB2)[:, :1])                                             # (SH, 1)

    # Lane-dense unflatten (SH, 1) -> (S, Hd) with in-kernel selector matmul.
    si = lax.broadcasted_iota(jnp.int32, (S, SH), 0)
    ri = lax.broadcasted_iota(jnp.int32, (S, SH), 1)
    p2 = ((ri >= si * Hd) & (ri < si * Hd + Hd)).astype(f32)                   # (S, SH)
    y = jnp.dot(p2, ycol * lane_eq(0), preferred_element_type=f32)             # (S, Hd)

    # ---- RSAB: fused-QKV single-head attention + residual --------------------
    qkv = jnp.dot(y, wqkv_ref[...], preferred_element_type=f32)                # (S, 3*Hd)
    q = qkv[:, 0:Hd] + row(_R_BQ)
    k = qkv[:, Hd:2 * Hd] + row(_R_BK)
    v = qkv[:, 2 * Hd:3 * Hd] + row(_R_BV)
    sc = lax.dot_general(q, k, (((1,), (1,)), ((), ())),
                         preferred_element_type=f32) * scale                   # (S, S)
    sc = sc - jnp.max(sc, axis=-1, keepdims=True)
    p = jnp.exp(sc)
    p = p * pl.reciprocal(jnp.sum(p, axis=-1, keepdims=True), approx=True)
    att = jnp.dot(p, v, preferred_element_type=f32) + y                        # (S, Hd)

    # ---- final MLP (row-major flatten -> Hd -> Dout), fused as epilogue ------
    # hidden = flat @ W1 with flat[s*Hd + x] = att[s, x]: realised as a single
    # K = S*Hd matmul against a lane-tiled, p2-masked copy of att.
    att_rep = jnp.concatenate([att] * S, axis=1)                               # (S, SH)
    parts = jnp.dot(att_rep * p2, wp_ref[OFF_MW1:OFF_MW1 + SH, :],
                    preferred_element_type=f32)                                # (S, Hd)
    hidden = jnp.maximum(jnp.sum(parts, axis=0, keepdims=True) + row(_R_MB1), 0.0)
    out = jnp.dot(hidden, wp_ref[OFF_MW2:OFF_MW2 + Hd, :],
                  preferred_element_type=f32)                                  # (1, Hd) (padded)
    out = out[:, :Dout] + row(_R_MB2)[:, :Dout]
    o_ref[0] = out.astype(o_ref.dtype)


def sissa_cnn_forward(params, x):
    """Full SISSA_CNN forward.  x: (B, n_seq, input_dim) -> (B, output_dim)."""
    B, S, Din = x.shape
    Hd = params["smb_w"].shape[1]
    Dout = params["mlp_w2"].shape[1]
    SH = S * Hd
    assert Hd % 8 == 0, "hidden_dim must be a multiple of 8 for the flat-slab layout"
    assert Dout <= Hd, "output_dim is packed into the hidden-wide weight slab"

    f32 = jnp.float32
    # ---- pack the ~20 small tensors into 3 DMA-friendly operands -------------
    w2pad = jnp.zeros((Hd, Hd), f32).at[:, :Dout].set(params["mlp_w2"])
    wp = jnp.concatenate([
        params["conv2_w"].reshape(9 * Hd, Hd),      # OFF_C2
        params["ch_w1"],                            # OFF_CW1
        params["mlp_w1"],                           # OFF_MW1
        params["smb_w"],                            # OFF_SMB
        w2pad,                                      # OFF_MW2
    ], axis=0).astype(f32)
    wqkv = jnp.concatenate([params["rsab_wq"], params["rsab_wk"],
                            params["rsab_wv"]], axis=1).astype(f32)            # (Hd, 3*Hd)

    def pad_row(r):
        return jnp.zeros((1, Hd), f32).at[:, :r.shape[1]].set(r)

    rows = jnp.concatenate([
        params["conv1_w"],            # rows 0..8
        params["conv1_b"],            # 9
        params["smb_b"],              # 10
        params["conv2_b"],            # 11
        params["ch_b1"],              # 12
        params["ch_w2"],              # 13
        pad_row(params["ch_b2"]),     # 14
        params["rsab_bq"],            # 15
        params["rsab_bk"],            # 16
        params["rsab_bv"],            # 17
        params["mlp_b1"],             # 18
        pad_row(params["mlp_b2"]),    # 19
    ], axis=0).astype(f32)
    assert rows.shape == (_N_ROWS, Hd)

    kernel = functools.partial(_sissa_kernel, S=S, Hd=Hd, Din=Din, Dout=Dout)
    out = pl.pallas_call(
        kernel,
        out_shape=jax.ShapeDtypeStruct((B, 1, Dout), jnp.float32),
        grid=(B,),
        in_specs=[
            pl.BlockSpec((1, S, Din), lambda i: (i, 0, 0)),
            pl.BlockSpec(wp.shape, lambda i: (0, 0)),
            pl.BlockSpec(wqkv.shape, lambda i: (0, 0)),
            pl.BlockSpec(rows.shape, lambda i: (0, 0)),
        ],
        out_specs=pl.BlockSpec((1, 1, Dout), lambda i: (i, 0, 0)),
        scratch_shapes=[
            pltpu.VMEM((SH, Hd), jnp.float32),   # conv1 output (read by 9 conv2 taps)
            pltpu.VMEM((SH, Hd), jnp.float32),   # conv2 accumulator
        ],
        compiler_params=pltpu.CompilerParams(
            dimension_semantics=("parallel",)),  # batch rows split across v7x's 2 TCs
    )(x.astype(f32), wp, wqkv, rows)
    return out.reshape(B, Dout)


# ----------------------------------------------------------------------------
# Parameters (deterministic synthetic init, PyTorch-style uniform fan-in bounds)
# ----------------------------------------------------------------------------
def init_params(key, n_seq, input_dim, hidden_dim, output_dim):
    ks = jax.random.split(key, 20)

    def u(k, shape, fan_in):
        lim = 1.0 / math.sqrt(fan_in)
        return jax.random.uniform(k, shape, jnp.float32, -lim, lim)

    p = {}
    p["smb_w"] = u(ks[0], (input_dim, hidden_dim), input_dim)
    p["smb_b"] = u(ks[1], (1, hidden_dim), input_dim)
    p["conv1_w"] = u(ks[2], (9, hidden_dim), 9 * 1)
    p["conv1_b"] = u(ks[3], (1, hidden_dim), 9 * 1)
    p["conv2_w"] = u(ks[4], (9, hidden_dim, hidden_dim), 9 * hidden_dim)
    p["conv2_b"] = u(ks[5], (1, hidden_dim), 9 * hidden_dim)
    p["ch_w1"] = u(ks[6], (hidden_dim, hidden_dim), hidden_dim)
    p["ch_b1"] = u(ks[7], (1, hidden_dim), hidden_dim)
    p["ch_w2"] = u(ks[8], (1, hidden_dim), hidden_dim)
    p["ch_b2"] = u(ks[9], (1, 1), hidden_dim)
    p["rsab_wq"] = u(ks[10], (hidden_dim, hidden_dim), hidden_dim)
    p["rsab_bq"] = u(ks[11], (1, hidden_dim), hidden_dim)
    p["rsab_wk"] = u(ks[12], (hidden_dim, hidden_dim), hidden_dim)
    p["rsab_bk"] = u(ks[13], (1, hidden_dim), hidden_dim)
    p["rsab_wv"] = u(ks[14], (hidden_dim, hidden_dim), hidden_dim)
    p["rsab_bv"] = u(ks[15], (1, hidden_dim), hidden_dim)
    n_in = n_seq * hidden_dim
    p["mlp_w1"] = u(ks[16], (n_in, hidden_dim), n_in)
    p["mlp_b1"] = u(ks[17], (1, hidden_dim), n_in)
    p["mlp_w2"] = u(ks[18], (hidden_dim, output_dim), hidden_dim)
    p["mlp_b2"] = u(ks[19], (1, output_dim), hidden_dim)
    return p


# ----------------------------------------------------------------------------
# Pure-JAX reference (same math, via lax.conv) for a correctness sanity check.
# ----------------------------------------------------------------------------
def sissa_reference(params, x):
    B, S, _ = x.shape
    Hd = params["smb_w"].shape[1]
    h = jax.nn.relu(x @ params["smb_w"] + params["smb_b"][0])                  # (B,S,Hd)
    img = h[:, None, :, :]                                                     # NCHW, C=1
    w1 = params["conv1_w"].T.reshape(Hd, 1, 3, 3)                              # OIHW
    c1 = lax.conv_general_dilated(img, w1, (1, 1), ((1, 1), (1, 1)),
                                  dimension_numbers=("NCHW", "OIHW", "NCHW"))
    c1 = jax.nn.relu(c1 + params["conv1_b"][0][None, :, None, None])
    w2 = jnp.transpose(params["conv2_w"].reshape(3, 3, Hd, Hd), (3, 2, 0, 1))  # OIHW
    c2 = lax.conv_general_dilated(c1, w2, (1, 1), ((1, 1), (1, 1)),
                                  dimension_numbers=("NCHW", "OIHW", "NCHW"))
    c2 = jax.nn.relu(c2 + params["conv2_b"][0][None, :, None, None])
    xp = jnp.transpose(c2, (0, 2, 3, 1))                                       # (B,S,Hd,Hd) NHWC
    ch = jax.nn.relu(xp @ params["ch_w1"] + params["ch_b1"][0])
    y = (ch * params["ch_w2"][0]).sum(-1) + params["ch_b2"][0, 0]              # (B,S,Hd)
    q = y @ params["rsab_wq"] + params["rsab_bq"][0]
    k = y @ params["rsab_wk"] + params["rsab_bk"][0]
    v = y @ params["rsab_wv"] + params["rsab_bv"][0]
    s = jnp.einsum("bqd,bkd->bqk", q, k) / math.sqrt(Hd)
    p = jax.nn.softmax(s, axis=-1)
    att = jnp.einsum("bqk,bkd->bqd", p, v) + y
    flat = att.reshape(B, S * Hd)
    hid = jax.nn.relu(flat @ params["mlp_w1"] + params["mlp_b1"][0])
    return hid @ params["mlp_w2"] + params["mlp_b2"][0]


if __name__ == "__main__":
    B, n_seq, input_dim, hidden_dim, output_dim = 2, 8, 16, 32, 4

    key = jax.random.PRNGKey(0)
    kx, kp = jax.random.split(key)
    x = jax.random.normal(kx, (B, n_seq, input_dim), jnp.float32)
    params = init_params(kp, n_seq, input_dim, hidden_dim, output_dim)

    fwd = jax.jit(sissa_cnn_forward)
    out = fwd(params, x)
    jax.block_until_ready(out)
    assert out.shape == (B, output_dim), out.shape
    assert bool(jnp.all(jnp.isfinite(out)))

    ref = sissa_reference(params, x)
    err = float(jnp.max(jnp.abs(out - ref)))
    rel = err / (float(jnp.max(jnp.abs(ref))) + 1e-6)
    assert rel < 1e-2, f"mismatch vs reference: max_abs_err={err}, rel={rel}"
    print("KERNEL_OK")
</pallas_src>

<mosaic_0001>
module attributes {stable_mosaic.version = 11 : i64} {
  func.func @_sissa_kernel(%arg0: i32, %arg1: memref<1x8x16xf32, #tpu.memory_space<vmem>>, %arg2: memref<624x32xf32, #tpu.memory_space<vmem>>, %arg3: memref<32x96xf32, #tpu.memory_space<vmem>>, %arg4: memref<20x32xf32, #tpu.memory_space<vmem>>, %arg5: memref<1x1x4xf32, #tpu.memory_space<vmem>>, %arg6: memref<256x32xf32, #tpu.memory_space<vmem>>, %arg7: memref<256x32xf32, #tpu.memory_space<vmem>>) attributes {dimension_semantics = [#tpu.dimension_semantics<parallel>], iteration_bounds = array<i64: 2>, scalar_prefetch = 0 : i64, scratch_operands = 2 : i64, tpu.core_type = #tpu.core_type<tc>, window_params = [{transform_indices = @transform_0, window_bounds = array<i64: 1, 8, 16>}, {pipeline_mode = #tpu.pipeline_mode<synchronous>, transform_indices = @transform_1, window_bounds = array<i64: 624, 32>}, {pipeline_mode = #tpu.pipeline_mode<synchronous>, transform_indices = @transform_2, window_bounds = array<i64: 32, 96>}, {pipeline_mode = #tpu.pipeline_mode<synchronous>, transform_indices = @transform_3, window_bounds = array<i64: 20, 32>}, {transform_indices = @transform_4, window_bounds = array<i64: 1, 1, 4>}]} {
    %c0 = arith.constant 0 : index
    %c0_0 = arith.constant 0 : index
    %c0_1 = arith.constant 0 : index
    %0 = vector.load %arg1[%c0, %c0_0, %c0_1] : memref<1x8x16xf32, #tpu.memory_space<vmem>>, vector<1x8x16xf32>
    %1 = vector.shape_cast %0 : vector<1x8x16xf32> to vector<8x16xf32>
    %c576 = arith.constant 576 : index
    %c0_2 = arith.constant 0 : index
    %2 = vector.load %arg2[%c576, %c0_2] : memref<624x32xf32, #tpu.memory_space<vmem>>, vector<16x32xf32>
    %cst = arith.constant dense<0.000000e+00> : vector<8x32xf32>
    %3 = tpu.matmul %1, %2, %cst {dimension_numbers = #tpu.dot_dimension_numbers<[1], [0], [0], [1], [0, 0, 1, 1], [], []>} : vector<8x16xf32>, vector<16x32xf32>, vector<8x32xf32> -> vector<8x32xf32>
    %c10 = arith.constant 10 : index
    %c0_3 = arith.constant 0 : index
    %4 = vector.load %arg4[%c10, %c0_3] : memref<20x32xf32, #tpu.memory_space<vmem>>, vector<1x32xf32>
    %5 = vector.broadcast %4 : vector<1x32xf32> to vector<8x32xf32>
    %6 = arith.addf %3, %5 : vector<8x32xf32>
    %cst_4 = arith.constant 0.000000e+00 : f32
    %7 = vector.broadcast %cst_4 : f32 to vector<8x32xf32>
    %8 = arith.maximumf %6, %7 : vector<8x32xf32>
    %9 = tpu.iota {dimensions = array<i32: 0>} : vector<8x32xi32>
    %cst_5 = arith.constant 0.000000e+00 : f32
    %10 = vector.broadcast %cst_5 : f32 to vector<256x32xf32>
    %c-1_i32 = arith.constant -1 : i32
    %11 = vector.broadcast %c-1_i32 : i32 to vector<8x32xi32>
    %12 = arith.addi %9, %11 : vector<8x32xi32>
    %c0_i32 = arith.constant 0 : i32
    %13 = vector.broadcast %c0_i32 : i32 to vector<8x32xi32>
    %14 = arith.cmpi sge, %12, %13 : vector<8x32xi32>
    %c8_i32 = arith.constant 8 : i32
    %15 = vector.broadcast %c8_i32 : i32 to vector<8x32xi32>
    %16 = arith.cmpi slt, %12, %15 : vector<8x32xi32>
    %17 = arith.andi %14, %16 : vector<8x32xi1>
    %c1_i32 = arith.constant 1 : i32
    %18 = tpu.dynamic_rotate %8 by %c1_i32 dim 0 : vector<8x32xf32>, i32 -> vector<8x32xf32>
    %cst_6 = arith.constant 0.000000e+00 : f32
    %19 = vector.broadcast %cst_6 : f32 to vector<8x32xf32>
    %20 = arith.select %17, %18, %19 : vector<8x32xi1>, vector<8x32xf32>
    %21 = vector.shape_cast %20 : vector<8x32xf32> to vector<8x1x32xf32>
    %22 = vector.shape_cast %21 : vector<8x1x32xf32> to vector<8x1x32xf32>
    %23 = vector.broadcast %22 : vector<8x1x32xf32> to vector<8x32x32xf32>
    %24 = vector.shape_cast %23 : vector<8x32x32xf32> to vector<256x32xf32>
    %25 = tpu.iota {dimensions = array<i32: 1>} : vector<8x32x32xi32>
    %26 = tpu.iota {dimensions = array<i32: 2>} : vector<8x32x32xi32>
    %c-1_i32_7 = arith.constant -1 : i32
    %27 = vector.broadcast %c-1_i32_7 : i32 to vector<8x32x32xi32>
    %28 = arith.addi %25, %27 : vector<8x32x32xi32>
    %29 = arith.cmpi eq, %26, %28 : vector<8x32x32xi32>
    %30 = arith.extui %29 : vector<8x32x32xi1> to vector<8x32x32xi32>
    %31 = arith.sitofp %30 : vector<8x32x32xi32> to vector<8x32x32xf32>
    %32 = vector.shape_cast %31 : vector<8x32x32xf32> to vector<256x32xf32>
    %33 = arith.mulf %24, %32 : vector<256x32xf32>
    %cst_8 = arith.constant dense<0.000000e+00> : vector<256xf32>
    %34 = vector.multi_reduction <add>, %33, %cst_8 [1] : vector<256x32xf32> to vector<256xf32>
    %35 = vector.shape_cast %34 : vector<256xf32> to vector<256x1xf32>
    %c0_9 = arith.constant 0 : index
    %c0_10 = arith.constant 0 : index
    %36 = vector.load %arg4[%c0_9, %c0_10] : memref<20x32xf32, #tpu.memory_space<vmem>>, vector<1x32xf32>
    %37 = vector.broadcast %35 : vector<256x1xf32> to vector<256x32xf32>
    %38 = vector.broadcast %36 : vector<1x32xf32> to vector<256x32xf32>
    %39 = arith.mulf %37, %38 : vector<256x32xf32>
    %40 = arith.addf %10, %39 : vector<256x32xf32>
    %41 = tpu.iota {dimensions = array<i32: 1>} : vector<8x32x32xi32>
    %42 = tpu.iota {dimensions = array<i32: 2>} : vector<8x32x32xi32>
    %c0_i32_11 = arith.constant 0 : i32
    %43 = vector.broadcast %c0_i32_11 : i32 to vector<8x32x32xi32>
    %44 = arith.addi %41, %43 : vector<8x32x32xi32>
    %45 = arith.cmpi eq, %42, %44 : vector<8x32x32xi32>
    %46 = arith.extui %45 : vector<8x32x32xi1> to vector<8x32x32xi32>
    %47 = arith.sitofp %46 : vector<8x32x32xi32> to vector<8x32x32xf32>
    %48 = vector.shape_cast %47 : vector<8x32x32xf32> to vector<256x32xf32>
    %49 = arith.mulf %24, %48 : vector<256x32xf32>
    %cst_12 = arith.constant dense<0.000000e+00> : vector<256xf32>
    %50 = vector.multi_reduction <add>, %49, %cst_12 [1] : vector<256x32xf32> to vector<256xf32>
    %51 = vector.shape_cast %50 : vector<256xf32> to vector<256x1xf32>
    %c1 = arith.constant 1 : index
    %c0_13 = arith.constant 0 : index
    %52 = vector.load %arg4[%c1, %c0_13] : memref<20x32xf32, #tpu.memory_space<vmem>>, vector<1x32xf32>
    %53 = vector.broadcast %51 : vector<256x1xf32> to vector<256x32xf32>
    %54 = vector.broadcast %52 : vector<1x32xf32> to vector<256x32xf32>
    %55 = arith.mulf %53, %54 : vector<256x32xf32>
    %56 = arith.addf %40, %55 : vector<256x32xf32>
    %57 = tpu.iota {dimensions = array<i32: 1>} : vector<8x32x32xi32>
    %58 = tpu.iota {dimensions = array<i32: 2>} : vector<8x32x32xi32>
    %c1_i32_14 = arith.constant 1 : i32
    %59 = vector.broadcast %c1_i32_14 : i32 to vector<8x32x32xi32>
    %60 = arith.addi %57, %59 : vector<8x32x32xi32>
    %61 = arith.cmpi eq, %58, %60 : vector<8x32x32xi32>
    %62 = arith.extui %61 : vector<8x32x32xi1> to vector<8x32x32xi32>
    %63 = arith.sitofp %62 : vector<8x32x32xi32> to vector<8x32x32xf32>
    %64 = vector.shape_cast %63 : vector<8x32x32xf32> to vector<256x32xf32>
    %65 = arith.mulf %24, %64 : vector<256x32xf32>
    %cst_15 = arith.constant dense<0.000000e+00> : vector<256xf32>
    %66 = vector.multi_reduction <add>, %65, %cst_15 [1] : vector<256x32xf32> to vector<256xf32>
    %67 = vector.shape_cast %66 : vector<256xf32> to vector<256x1xf32>
    %c2 = arith.constant 2 : index
    %c0_16 = arith.constant 0 : index
    %68 = vector.load %arg4[%c2, %c0_16] : memref<20x32xf32, #tpu.memory_space<vmem>>, vector<1x32xf32>
    %69 = vector.broadcast %67 : vector<256x1xf32> to vector<256x32xf32>
    %70 = vector.broadcast %68 : vector<1x32xf32> to vector<256x32xf32>
    %71 = arith.mulf %69, %70 : vector<256x32xf32>
    %72 = arith.addf %56, %71 : vector<256x32xf32>
    %73 = vector.shape_cast %8 : vector<8x32xf32> to vector<8x1x32xf32>
    %74 = vector.shape_cast %73 : vector<8x1x32xf32> to vector<8x1x32xf32>
    %75 = vector.broadcast %74 : vector<8x1x32xf32> to vector<8x32x32xf32>
    %76 = vector.shape_cast %75 : vector<8x32x32xf32> to vector<256x32xf32>
    %77 = tpu.iota {dimensions = array<i32: 1>} : vector<8x32x32xi32>
    %78 = tpu.iota {dimensions = array<i32: 2>} : vector<8x32x32xi32>
    %c-1_i32_17 = arith.constant -1 : i32
    %79 = vector.broadcast %c-1_i32_17 : i32 to vector<8x32x32xi32>
    %80 = arith.addi %77, %79 : vector<8x32x32xi32>
    %81 = arith.cmpi eq, %78, %80 : vector<8x32x32xi32>
    %82 = arith.extui %81 : vector<8x32x32xi1> to vector<8x32x32xi32>
    %83 = arith.sitofp %82 : vector<8x32x32xi32> to vector<8x32x32xf32>
    %84 = vector.shape_cast %83 : vector<8x32x32xf32> to vector<256x32xf32>
    %85 = arith.mulf %76, %84 : vector<256x32xf32>
    %cst_18 = arith.constant dense<0.000000e+00> : vector<256xf32>
    %86 = vector.multi_reduction <add>, %85, %cst_18 [1] : vector<256x32xf32> to vector<256xf32>
    %87 = vector.shape_cast %86 : vector<256xf32> to vector<256x1xf32>
    %c3 = arith.constant 3 : index
    %c0_19 = arith.constant 0 : index
    %88 = vector.load %arg4[%c3, %c0_19] : memref<20x32xf32, #tpu.memory_space<vmem>>, vector<1x32xf32>
    %89 = vector.broadcast %87 : vector<256x1xf32> to vector<256x32xf32>
    %90 = vector.broadcast %88 : vector<1x32xf32> to vector<256x32xf32>
    %91 = arith.mulf %89, %90 : vector<256x32xf32>
    %92 = arith.addf %72, %91 : vector<256x32xf32>
    %93 = tpu.iota {dimensions = array<i32: 1>} : vector<8x32x32xi32>
    %94 = tpu.iota {dimensions = array<i32: 2>} : vector<8x32x32xi32>
    %c0_i32_20 = arith.constant 0 : i32
    %95 = vector.broadcast %c0_i32_20 : i32 to vector<8x32x32xi32>
    %96 = arith.addi %93, %95 : vector<8x32x32xi32>
    %97 = arith.cmpi eq, %94, %96 : vector<8x32x32xi32>
    %98 = arith.extui %97 : vector<8x32x32xi1> to vector<8x32x32xi32>
    %99 = arith.sitofp %98 : vector<8x32x32xi32> to vector<8x32x32xf32>
    %100 = vector.shape_cast %99 : vector<8x32x32xf32> to vector<256x32xf32>
    %101 = arith.mulf %76, %100 : vector<256x32xf32>
    %cst_21 = arith.constant dense<0.000000e+00> : vector<256xf32>
    %102 = vector.multi_reduction <add>, %101, %cst_21 [1] : vector<256x32xf32> to vector<256xf32>
    %103 = vector.shape_cast %102 : vector<256xf32> to vector<256x1xf32>
    %c4 = arith.constant 4 : index
    %c0_22 = arith.constant 0 : index
    %104 = vector.load %arg4[%c4, %c0_22] : memref<20x32xf32, #tpu.memory_space<vmem>>, vector<1x32xf32>
    %105 = vector.broadcast %103 : vector<256x1xf32> to vector<256x32xf32>
    %106 = vector.broadcast %104 : vector<1x32xf32> to vector<256x32xf32>
    %107 = arith.mulf %105, %106 : vector<256x32xf32>
    %108 = arith.addf %92, %107 : vector<256x32xf32>
    %109 = tpu.iota {dimensions = array<i32: 1>} : vector<8x32x32xi32>
    %110 = tpu.iota {dimensions = array<i32: 2>} : vector<8x32x32xi32>
    %c1_i32_23 = arith.constant 1 : i32
    %111 = vector.broadcast %c1_i32_23 : i32 to vector<8x32x32xi32>
    %112 = arith.addi %109, %111 : vector<8x32x32xi32>
    %113 = arith.cmpi eq, %110, %112 : vector<8x32x32xi32>
    %114 = arith.extui %113 : vector<8x32x32xi1> to vector<8x32x32xi32>
    %115 = arith.sitofp %114 : vector<8x32x32xi32> to vector<8x32x32xf32>
    %116 = vector.shape_cast %115 : vector<8x32x32xf32> to vector<256x32xf32>
    %117 = arith.mulf %76, %116 : vector<256x32xf32>
    %cst_24 = arith.constant dense<0.000000e+00> : vector<256xf32>
    %118 = vector.multi_reduction <add>, %117, %cst_24 [1] : vector<256x32xf32> to vector<256xf32>
    %119 = vector.shape_cast %118 : vector<256xf32> to vector<256x1xf32>
    %c5 = arith.constant 5 : index
    %c0_25 = arith.constant 0 : index
    %120 = vector.load %arg4[%c5, %c0_25] : memref<20x32xf32, #tpu.memory_space<vmem>>, vector<1x32xf32>
    %121 = vector.broadcast %119 : vector<256x1xf32> to vector<256x32xf32>
    %122 = vector.broadcast %120 : vector<1x32xf32> to vector<256x32xf32>
    %123 = arith.mulf %121, %122 : vector<256x32xf32>
    %124 = arith.addf %108, %123 : vector<256x32xf32>
    %c1_i32_26 = arith.constant 1 : i32
    %125 = vector.broadcast %c1_i32_26 : i32 to vector<8x32xi32>
    %126 = arith.addi %9, %125 : vector<8x32xi32>
    %c0_i32_27 = arith.constant 0 : i32
    %127 = vector.broadcast %c0_i32_27 : i32 to vector<8x32xi32>
    %128 = arith.cmpi sge, %126, %127 : vector<8x32xi32>
    %c8_i32_28 = arith.constant 8 : i32
    %129 = vector.broadcast %c8_i32_28 : i32 to vector<8x32xi32>
    %130 = arith.cmpi slt, %126, %129 : vector<8x32xi32>
    %131 = arith.andi %128, %130 : vector<8x32xi1>
    %c7_i32 = arith.constant 7 : i32
    %132 = tpu.dynamic_rotate %8 by %c7_i32 dim 0 : vector<8x32xf32>, i32 -> vector<8x32xf32>
    %cst_29 = arith.constant 0.000000e+00 : f32
    %133 = vector.broadcast %cst_29 : f32 to vector<8x32xf32>
    %134 = arith.select %131, %132, %133 : vector<8x32xi1>, vector<8x32xf32>
    %135 = vector.shape_cast %134 : vector<8x32xf32> to vector<8x1x32xf32>
    %136 = vector.shape_cast %135 : vector<8x1x32xf32> to vector<8x1x32xf32>
    %137 = vector.broadcast %136 : vector<8x1x32xf32> to vector<8x32x32xf32>
    %138 = vector.shape_cast %137 : vector<8x32x32xf32> to vector<256x32xf32>
    %139 = tpu.iota {dimensions = array<i32: 1>} : vector<8x32x32xi32>
    %140 = tpu.iota {dimensions = array<i32: 2>} : vector<8x32x32xi32>
    %c-1_i32_30 = arith.constant -1 : i32
    %141 = vector.broadcast %c-1_i32_30 : i32 to vector<8x32x32xi32>
    %142 = arith.addi %139, %141 : vector<8x32x32xi32>
    %143 = arith.cmpi eq, %140, %142 : vector<8x32x32xi32>
    %144 = arith.extui %143 : vector<8x32x32xi1> to vector<8x32x32xi32>
    %145 = arith.sitofp %144 : vector<8x32x32xi32> to vector<8x32x32xf32>
    %146 = vector.shape_cast %145 : vector<8x32x32xf32> to vector<256x32xf32>
    %147 = arith.mulf %138, %146 : vector<256x32xf32>
    %cst_31 = arith.constant dense<0.000000e+00> : vector<256xf32>
    %148 = vector.multi_reduction <add>, %147, %cst_31 [1] : vector<256x32xf32> to vector<256xf32>
    %149 = vector.shape_cast %148 : vector<256xf32> to vector<256x1xf32>
    %c6 = arith.constant 6 : index
    %c0_32 = arith.constant 0 : index
    %150 = vector.load %arg4[%c6, %c0_32] : memref<20x32xf32, #tpu.memory_space<vmem>>, vector<1x32xf32>
    %151 = vector.broadcast %149 : vector<256x1xf32> to vector<256x32xf32>
    %152 = vector.broadcast %150 : vector<1x32xf32> to vector<256x32xf32>
    %153 = arith.mulf %151, %152 : vector<256x32xf32>
    %154 = arith.addf %124, %153 : vector<256x32xf32>
    %155 = tpu.iota {dimensions = array<i32: 1>} : vector<8x32x32xi32>
    %156 = tpu.iota {dimensions = array<i32: 2>} : vector<8x32x32xi32>
    %c0_i32_33 = arith.constant 0 : i32
    %157 = vector.broadcast %c0_i32_33 : i32 to vector<8x32x32xi32>
    %158 = arith.addi %155, %157 : vector<8x32x32xi32>
    %159 = arith.cmpi eq, %156, %158 : vector<8x32x32xi32>
    %160 = arith.extui %159 : vector<8x32x32xi1> to vector<8x32x32xi32>
    %161 = arith.sitofp %160 : vector<8x32x32xi32> to vector<8x32x32xf32>
    %162 = vector.shape_cast %161 : vector<8x32x32xf32> to vector<256x32xf32>
    %163 = arith.mulf %138, %162 : vector<256x32xf32>
    %cst_34 = arith.constant dense<0.000000e+00> : vector<256xf32>
    %164 = vector.multi_reduction <add>, %163, %cst_34 [1] : vector<256x32xf32> to vector<256xf32>
    %165 = vector.shape_cast %164 : vector<256xf32> to vector<256x1xf32>
    %c7 = arith.constant 7 : index
    %c0_35 = arith.constant 0 : index
    %166 = vector.load %arg4[%c7, %c0_35] : memref<20x32xf32, #tpu.memory_space<vmem>>, vector<1x32xf32>
    %167 = vector.broadcast %165 : vector<256x1xf32> to vector<256x32xf32>
    %168 = vector.broadcast %166 : vector<1x32xf32> to vector<256x32xf32>
    %169 = arith.mulf %167, %168 : vector<256x32xf32>
    %170 = arith.addf %154, %169 : vector<256x32xf32>
    %171 = tpu.iota {dimensions = array<i32: 1>} : vector<8x32x32xi32>
    %172 = tpu.iota {dimensions = array<i32: 2>} : vector<8x32x32xi32>
    %c1_i32_36 = arith.constant 1 : i32
    %173 = vector.broadcast %c1_i32_36 : i32 to vector<8x32x32xi32>
    %174 = arith.addi %171, %173 : vector<8x32x32xi32>
    %175 = arith.cmpi eq, %172, %174 : vector<8x32x32xi32>
    %176 = arith.extui %175 : vector<8x32x32xi1> to vector<8x32x32xi32>
    %177 = arith.sitofp %176 : vector<8x32x32xi32> to vector<8x32x32xf32>
    %178 = vector.shape_cast %177 : vector<8x32x32xf32> to vector<256x32xf32>
    %179 = arith.mulf %138, %178 : vector<256x32xf32>
    %cst_37 = arith.constant dense<0.000000e+00> : vector<256xf32>
    %180 = vector.multi_reduction <add>, %179, %cst_37 [1] : vector<256x32xf32> to vector<256xf32>
    %181 = vector.shape_cast %180 : vector<256xf32> to vector<256x1xf32>
    %c8 = arith.constant 8 : index
    %c0_38 = arith.constant 0 : index
    %182 = vector.load %arg4[%c8, %c0_38] : memref<20x32xf32, #tpu.memory_space<vmem>>, vector<1x32xf32>
    %183 = vector.broadcast %181 : vector<256x1xf32> to vector<256x32xf32>
    %184 = vector.broadcast %182 : vector<1x32xf32> to vector<256x32xf32>
    %185 = arith.mulf %183, %184 : vector<256x32xf32>
    %186 = arith.addf %170, %185 : vector<256x32xf32>
    %c9 = arith.constant 9 : index
    %c0_39 = arith.constant 0 : index
    %187 = vector.load %arg4[%c9, %c0_39] : memref<20x32xf32, #tpu.memory_space<vmem>>, vector<1x32xf32>
    %188 = vector.broadcast %187 : vector<1x32xf32> to vector<256x32xf32>
    %189 = arith.addf %186, %188 : vector<256x32xf32>
    %cst_40 = arith.constant 0.000000e+00 : f32
    %190 = vector.broadcast %cst_40 : f32 to vector<256x32xf32>
    %191 = arith.maximumf %189, %190 : vector<256x32xf32>
    %c0_41 = arith.constant 0 : index
    %c0_42 = arith.constant 0 : index
    %192 = vector.load %arg6[%c0_41, %c0_42] : memref<256x32xf32, #tpu.memory_space<vmem>>, vector<256x32xf32>
    tpu.vector_store %arg6[%c0_41, %c0_42], %191 {strides = array<i32>} : memref<256x32xf32, #tpu.memory_space<vmem>>, vector<256x32xf32>,
    %c0_43 = arith.constant 0 : index
    %c0_44 = arith.constant 0 : index
    %193 = vector.load %arg6[%c0_43, %c0_44] : memref<256x32xf32, #tpu.memory_space<vmem>>, vector<256x32xf32>
    %c33_i32 = arith.constant 33 : i32
    %194 = tpu.dynamic_rotate %193 by %c33_i32 dim 0 : vector<256x32xf32>, i32 -> vector<256x32xf32>
    %195 = tpu.iota {dimensions = array<i32: 0>} : vector<8x32x32xi32>
    %196 = tpu.iota {dimensions = array<i32: 1>} : vector<8x32x32xi32>
    %c-1_i32_45 = arith.constant -1 : i32
    %197 = vector.broadcast %c-1_i32_45 : i32 to vector<8x32x32xi32>
    %198 = arith.addi %195, %197 : vector<8x32x32xi32>
    %c0_i32_46 = arith.constant 0 : i32
    %199 = vector.broadcast %c0_i32_46 : i32 to vector<8x32x32xi32>
    %200 = arith.cmpi sge, %198, %199 : vector<8x32x32xi32>
    %c-1_i32_47 = arith.constant -1 : i32
    %201 = vector.broadcast %c-1_i32_47 : i32 to vector<8x32x32xi32>
    %202 = arith.addi %195, %201 : vector<8x32x32xi32>
    %c8_i32_48 = arith.constant 8 : i32
    %203 = vector.broadcast %c8_i32_48 : i32 to vector<8x32x32xi32>
    %204 = arith.cmpi slt, %202, %203 : vector<8x32x32xi32>
    %205 = arith.andi %200, %204 : vector<8x32x32xi1>
    %c-1_i32_49 = arith.constant -1 : i32
    %206 = vector.broadcast %c-1_i32_49 : i32 to vector<8x32x32xi32>
    %207 = arith.addi %196, %206 : vector<8x32x32xi32>
    %c0_i32_50 = arith.constant 0 : i32
    %208 = vector.broadcast %c0_i32_50 : i32 to vector<8x32x32xi32>
    %209 = arith.cmpi sge, %207, %208 : vector<8x32x32xi32>
    %210 = arith.andi %205, %209 : vector<8x32x32xi1>
    %c-1_i32_51 = arith.constant -1 : i32
    %211 = vector.broadcast %c-1_i32_51 : i32 to vector<8x32x32xi32>
    %212 = arith.addi %196, %211 : vector<8x32x32xi32>
    %c32_i32 = arith.constant 32 : i32
    %213 = vector.broadcast %c32_i32 : i32 to vector<8x32x32xi32>
    %214 = arith.cmpi slt, %212, %213 : vector<8x32x32xi32>
    %215 = arith.andi %210, %214 : vector<8x32x32xi1>
    %216 = vector.shape_cast %215 : vector<8x32x32xi1> to vector<256x32xi1>
    %cst_52 = arith.constant 0.000000e+00 : f32
    %217 = vector.broadcast %cst_52 : f32 to vector<256x32xf32>
    %218 = arith.select %216, %194, %217 : vector<256x32xi1>, vector<256x32xf32>
    %c0_53 = arith.constant 0 : index
    %c0_54 = arith.constant 0 : index
    %219 = vector.load %arg2[%c0_53, %c0_54] : memref<624x32xf32, #tpu.memory_space<vmem>>, vector<32x32xf32>
    %cst_55 = arith.constant dense<0.000000e+00> : vector<256x32xf32>
    %220 = tpu.matmul %218, %219, %cst_55 {dimension_numbers = #tpu.dot_dimension_numbers<[1], [0], [0], [1], [0, 0, 1, 1], [], []>} : vector<256x32xf32>, vector<32x32xf32>, vector<256x32xf32> -> vector<256x32xf32>
    %c0_56 = arith.constant 0 : index
    %c0_57 = arith.constant 0 : index
    %221 = vector.load %arg7[%c0_56, %c0_57] : memref<256x32xf32, #tpu.memory_space<vmem>>, vector<256x32xf32>
    tpu.vector_store %arg7[%c0_56, %c0_57], %220 {strides = array<i32>} : memref<256x32xf32, #tpu.memory_space<vmem>>, vector<256x32xf32>,
    %c0_58 = arith.constant 0 : index
    %c0_59 = arith.constant 0 : index
    %222 = vector.load %arg6[%c0_58, %c0_59] : memref<256x32xf32, #tpu.memory_space<vmem>>, vector<256x32xf32>
    %c32_i32_60 = arith.constant 32 : i32
    %223 = tpu.dynamic_rotate %222 by %c32_i32_60 dim 0 : vector<256x32xf32>, i32 -> vector<256x32xf32>
    %224 = tpu.iota {dimensions = array<i32: 0>} : vector<8x32x32xi32>
    %225 = tpu.iota {dimensions = array<i32: 1>} : vector<8x32x32xi32>
    %c-1_i32_61 = arith.constant -1 : i32
    %226 = vector.broadcast %c-1_i32_61 : i32 to vector<8x32x32xi32>
    %227 = arith.addi %224, %226 : vector<8x32x32xi32>
    %c0_i32_62 = arith.constant 0 : i32
    %228 = vector.broadcast %c0_i32_62 : i32 to vector<8x32x32xi32>
    %229 = arith.cmpi sge, %227, %228 : vector<8x32x32xi32>
    %c-1_i32_63 = arith.constant -1 : i32
    %230 = vector.broadcast %c-1_i32_63 : i32 to vector<8x32x32xi32>
    %231 = arith.addi %224, %230 : vector<8x32x32xi32>
    %c8_i32_64 = arith.constant 8 : i32
    %232 = vector.broadcast %c8_i32_64 : i32 to vector<8x32x32xi32>
    %233 = arith.cmpi slt, %231, %232 : vector<8x32x32xi32>
    %234 = arith.andi %229, %233 : vector<8x32x32xi1>
    %c0_i32_65 = arith.constant 0 : i32
    %235 = vector.broadcast %c0_i32_65 : i32 to vector<8x32x32xi32>
    %236 = arith.addi %225, %235 : vector<8x32x32xi32>
    %c0_i32_66 = arith.constant 0 : i32
    %237 = vector.broadcast %c0_i32_66 : i32 to vector<8x32x32xi32>
    %238 = arith.cmpi sge, %236, %237 : vector<8x32x32xi32>
    %239 = arith.andi %234, %238 : vector<8x32x32xi1>
    %c0_i32_67 = arith.constant 0 : i32
    %240 = vector.broadcast %c0_i32_67 : i32 to vector<8x32x32xi32>
    %241 = arith.addi %225, %240 : vector<8x32x32xi32>
    %c32_i32_68 = arith.constant 32 : i32
    %242 = vector.broadcast %c32_i32_68 : i32 to vector<8x32x32xi32>
    %243 = arith.cmpi slt, %241, %242 : vector<8x32x32xi32>
    %244 = arith.andi %239, %243 : vector<8x32x32xi1>
    %245 = vector.shape_cast %244 : vector<8x32x32xi1> to vector<256x32xi1>
    %cst_69 = arith.constant 0.000000e+00 : f32
    %246 = vector.broadcast %cst_69 : f32 to vector<256x32xf32>
    %247 = arith.select %245, %223, %246 : vector<256x32xi1>, vector<256x32xf32>
    %c32 = arith.constant 32 : index
    %c0_70 = arith.constant 0 : index
    %248 = vector.load %arg2[%c32, %c0_70] : memref<624x32xf32, #tpu.memory_space<vmem>>, vector<32x32xf32>
    %cst_71 = arith.constant dense<0.000000e+00> : vector<256x32xf32>
    %249 = tpu.matmul %247, %248, %cst_71 {dimension_numbers = #tpu.dot_dimension_numbers<[1], [0], [0], [1], [0, 0, 1, 1], [], []>} : vector<256x32xf32>, vector<32x32xf32>, vector<256x32xf32> -> vector<256x32xf32>
    %c0_72 = arith.constant 0 : index
    %c0_73 = arith.constant 0 : index
    %250 = vector.load %arg7[%c0_72, %c0_73] : memref<256x32xf32, #tpu.memory_space<vmem>>, vector<256x32xf32>
    %251 = arith.addf %250, %249 : vector<256x32xf32>
    %c0_74 = arith.constant 0 : index
    %c0_75 = arith.constant 0 : index
    %252 = vector.load %arg7[%c0_74, %c0_75] : memref<256x32xf32, #tpu.memory_space<vmem>>, vector<256x32xf32>
    tpu.vector_store %arg7[%c0_74, %c0_75], %251 {strides = array<i32>} : memref<256x32xf32, #tpu.memory_space<vmem>>, vector<256x32xf32>,
    %c0_76 = arith.constant 0 : index
    %c0_77 = arith.constant 0 : index
    %253 = vector.load %arg6[%c0_76, %c0_77] : memref<256x32xf32, #tpu.memory_space<vmem>>, vector<256x32xf32>
    %c31_i32 = arith.constant 31 : i32
    %254 = tpu.dynamic_rotate %253 by %c31_i32 dim 0 : vector<256x32xf32>, i32 -> vector<256x32xf32>
    %255 = tpu.iota {dimensions = array<i32: 0>} : vector<8x32x32xi32>
    %256 = tpu.iota {dimensions = array<i32: 1>} : vector<8x32x32xi32>
    %c-1_i32_78 = arith.constant -1 : i32
    %257 = vector.broadcast %c-1_i32_78 : i32 to vector<8x32x32xi32>
    %258 = arith.addi %255, %257 : vector<8x32x32xi32>
    %c0_i32_79 = arith.constant 0 : i32
    %259 = vector.broadcast %c0_i32_79 : i32 to vector<8x32x32xi32>
    %260 = arith.cmpi sge, %258, %259 : vector<8x32x32xi32>
    %c-1_i32_80 = arith.constant -1 : i32
    %261 = vector.broadcast %c-1_i32_80 : i32 to vector<8x32x32xi32>
    %262 = arith.addi %255, %261 : vector<8x32x32xi32>
    %c8_i32_81 = arith.constant 8 : i32
    %263 = vector.broadcast %c8_i32_81 : i32 to vector<8x32x32xi32>
    %264 = arith.cmpi slt, %262, %263 : vector<8x32x32xi32>
    %265 = arith.andi %260, %264 : vector<8x32x32xi1>
    %c1_i32_82 = arith.constant 1 : i32
    %266 = vector.broadcast %c1_i32_82 : i32 to vector<8x32x32xi32>
    %267 = arith.addi %256, %266 : vector<8x32x32xi32>
    %c0_i32_83 = arith.constant 0 : i32
    %268 = vector.broadcast %c0_i32_83 : i32 to vector<8x32x32xi32>
    %269 = arith.cmpi sge, %267, %268 : vector<8x32x32xi32>
    %270 = arith.andi %265, %269 : vector<8x32x32xi1>
    %c1_i32_84 = arith.constant 1 : i32
    %271 = vector.broadcast %c1_i32_84 : i32 to vector<8x32x32xi32>
    %272 = arith.addi %256, %271 : vector<8x32x32xi32>
    %c32_i32_85 = arith.constant 32 : i32
    %273 = vector.broadcast %c32_i32_85 : i32 to vector<8x32x32xi32>
    %274 = arith.cmpi slt, %272, %273 : vector<8x32x32xi32>
    %275 = arith.andi %270, %274 : vector<8x32x32xi1>
    %276 = vector.shape_cast %275 : vector<8x32x32xi1> to vector<256x32xi1>
    %cst_86 = arith.constant 0.000000e+00 : f32
    %277 = vector.broadcast %cst_86 : f32 to vector<256x32xf32>
    %278 = arith.select %276, %254, %277 : vector<256x32xi1>, vector<256x32xf32>
    %c64 = arith.constant 64 : index
    %c0_87 = arith.constant 0 : index
    %279 = vector.load %arg2[%c64, %c0_87] : memref<624x32xf32, #tpu.memory_space<vmem>>, vector<32x32xf32>
    %cst_88 = arith.constant dense<0.000000e+00> : vector<256x32xf32>
    %280 = tpu.matmul %278, %279, %cst_88 {dimension_numbers = #tpu.dot_dimension_numbers<[1], [0], [0], [1], [0, 0, 1, 1], [], []>} : vector<256x32xf32>, vector<32x32xf32>, vector<256x32xf32> -> vector<256x32xf32>
    %c0_89 = arith.constant 0 : index
    %c0_90 = arith.constant 0 : index
    %281 = vector.load %arg7[%c0_89, %c0_90] : memref<256x32xf32, #tpu.memory_space<vmem>>, vector<256x32xf32>
    %282 = arith.addf %281, %280 : vector<256x32xf32>
    %c0_91 = arith.constant 0 : index
    %c0_92 = arith.constant 0 : index
    %283 = vector.load %arg7[%c0_91, %c0_92] : memref<256x32xf32, #tpu.memory_space<vmem>>, vector<256x32xf32>
    tpu.vector_store %arg7[%c0_91, %c0_92], %282 {strides = array<i32>} : memref<256x32xf32, #tpu.memory_space<vmem>>, vector<256x32xf32>,
    %c0_93 = arith.constant 0 : index
    %c0_94 = arith.constant 0 : index
    %284 = vector.load %arg6[%c0_93, %c0_94] : memref<256x32xf32, #tpu.memory_space<vmem>>, vector<256x32xf32>
    %c1_i32_95 = arith.constant 1 : i32
    %285 = tpu.dynamic_rotate %284 by %c1_i32_95 dim 0 : vector<256x32xf32>, i32 -> vector<256x32xf32>
    %286 = tpu.iota {dimensions = array<i32: 0>} : vector<8x32x32xi32>
    %287 = tpu.iota {dimensions = array<i32: 1>} : vector<8x32x32xi32>
    %c0_i32_96 = arith.constant 0 : i32
    %288 = vector.broadcast %c0_i32_96 : i32 to vector<8x32x32xi32>
    %289 = arith.addi %286, %288 : vector<8x32x32xi32>
    %c0_i32_97 = arith.constant 0 : i32
    %290 = vector.broadcast %c0_i32_97 : i32 to vector<8x32x32xi32>
    %291 = arith.cmpi sge, %289, %290 : vector<8x32x32xi32>
    %c0_i32_98 = arith.constant 0 : i32
    %292 = vector.broadcast %c0_i32_98 : i32 to vector<8x32x32xi32>
    %293 = arith.addi %286, %292 : vector<8x32x32xi32>
    %c8_i32_99 = arith.constant 8 : i32
    %294 = vector.broadcast %c8_i32_99 : i32 to vector<8x32x32xi32>
    %295 = arith.cmpi slt, %293, %294 : vector<8x32x32xi32>
    %296 = arith.andi %291, %295 : vector<8x32x32xi1>
    %c-1_i32_100 = arith.constant -1 : i32
    %297 = vector.broadcast %c-1_i32_100 : i32 to vector<8x32x32xi32>
    %298 = arith.addi %287, %297 : vector<8x32x32xi32>
    %c0_i32_101 = arith.constant 0 : i32
    %299 = vector.broadcast %c0_i32_101 : i32 to vector<8x32x32xi32>
    %300 = arith.cmpi sge, %298, %299 : vector<8x32x32xi32>
    %301 = arith.andi %296, %300 : vector<8x32x32xi1>
    %c-1_i32_102 = arith.constant -1 : i32
    %302 = vector.broadcast %c-1_i32_102 : i32 to vector<8x32x32xi32>
    %303 = arith.addi %287, %302 : vector<8x32x32xi32>
    %c32_i32_103 = arith.constant 32 : i32
    %304 = vector.broadcast %c32_i32_103 : i32 to vector<8x32x32xi32>
    %305 = arith.cmpi slt, %303, %304 : vector<8x32x32xi32>
    %306 = arith.andi %301, %305 : vector<8x32x32xi1>
    %307 = vector.shape_cast %306 : vector<8x32x32xi1> to vector<256x32xi1>
    %cst_104 = arith.constant 0.000000e+00 : f32
    %308 = vector.broadcast %cst_104 : f32 to vector<256x32xf32>
    %309 = arith.select %307, %285, %308 : vector<256x32xi1>, vector<256x32xf32>
    %c96 = arith.constant 96 : index
    %c0_105 = arith.constant 0 : index
    %310 = vector.load %arg2[%c96, %c0_105] : memref<624x32xf32, #tpu.memory_space<vmem>>, vector<32x32xf32>
    %cst_106 = arith.constant dense<0.000000e+00> : vector<256x32xf32>
    %311 = tpu.matmul %309, %310, %cst_106 {dimension_numbers = #tpu.dot_dimension_numbers<[1], [0], [0], [1], [0, 0, 1, 1], [], []>} : vector<256x32xf32>, vector<32x32xf32>, vector<256x32xf32> -> vector<256x32xf32>
    %c0_107 = arith.constant 0 : index
    %c0_108 = arith.constant 0 : index
    %312 = vector.load %arg7[%c0_107, %c0_108] : memref<256x32xf32, #tpu.memory_space<vmem>>, vector<256x32xf32>
    %313 = arith.addf %312, %311 : vector<256x32xf32>
    %c0_109 = arith.constant 0 : index
    %c0_110 = arith.constant 0 : index
    %314 = vector.load %arg7[%c0_109, %c0_110] : memref<256x32xf32, #tpu.memory_space<vmem>>, vector<256x32xf32>
    tpu.vector_store %arg7[%c0_109, %c0_110], %313 {strides = array<i32>} : memref<256x32xf32, #tpu.memory_space<vmem>>, vector<256x32xf32>,
    %c0_111 = arith.constant 0 : index
    %c0_112 = arith.constant 0 : index
    %315 = vector.load %arg6[%c0_111, %c0_112] : memref<256x32xf32, #tpu.memory_space<vmem>>, vector<256x32xf32>
    %c128 = arith.constant 128 : index
    %c0_113 = arith.constant 0 : index
    %316 = vector.load %arg2[%c128, %c0_113] : memref<624x32xf32, #tpu.memory_space<vmem>>, vector<32x32xf32>
    %cst_114 = arith.constant dense<0.000000e+00> : vector<256x32xf32>
    %317 = tpu.matmul %315, %316, %cst_114 {dimension_numbers = #tpu.dot_dimension_numbers<[1], [0], [0], [1], [0, 0, 1, 1], [], []>} : vector<256x32xf32>, vector<32x32xf32>, vector<256x32xf32> -> vector<256x32xf32>
    %c0_115 = arith.constant 0 : index
    %c0_116 = arith.constant 0 : index
    %318 = vector.load %arg7[%c0_115, %c0_116] : memref<256x32xf32, #tpu.memory_space<vmem>>, vector<256x32xf32>
    %319 = arith.addf %318, %317 : vector<256x32xf32>
    %c0_117 = arith.constant 0 : index
    %c0_118 = arith.constant 0 : index
    %320 = vector.load %arg7[%c0_117, %c0_118] : memref<256x32xf32, #tpu.memory_space<vmem>>, vector<256x32xf32>
    tpu.vector_store %arg7[%c0_117, %c0_118], %319 {strides = array<i32>} : memref<256x32xf32, #tpu.memory_space<vmem>>, vector<256x32xf32>,
    %c0_119 = arith.constant 0 : index
    %c0_120 = arith.constant 0 : index
    %321 = vector.load %arg6[%c0_119, %c0_120] : memref<256x32xf32, #tpu.memory_space<vmem>>, vector<256x32xf32>
    %c255_i32 = arith.constant 255 : i32
    %322 = tpu.dynamic_rotate %321 by %c255_i32 dim 0 : vector<256x32xf32>, i32 -> vector<256x32xf32>
    %323 = tpu.iota {dimensions = array<i32: 0>} : vector<8x32x32xi32>
    %324 = tpu.iota {dimensions = array<i32: 1>} : vector<8x32x32xi32>
    %c0_i32_121 = arith.constant 0 : i32
    %325 = vector.broadcast %c0_i32_121 : i32 to vector<8x32x32xi32>
    %326 = arith.addi %323, %325 : vector<8x32x32xi32>
    %c0_i32_122 = arith.constant 0 : i32
    %327 = vector.broadcast %c0_i32_122 : i32 to vector<8x32x32xi32>
    %328 = arith.cmpi sge, %326, %327 : vector<8x32x32xi32>
    %c0_i32_123 = arith.constant 0 : i32
    %329 = vector.broadcast %c0_i32_123 : i32 to vector<8x32x32xi32>
    %330 = arith.addi %323, %329 : vector<8x32x32xi32>
    %c8_i32_124 = arith.constant 8 : i32
    %331 = vector.broadcast %c8_i32_124 : i32 to vector<8x32x32xi32>
    %332 = arith.cmpi slt, %330, %331 : vector<8x32x32xi32>
    %333 = arith.andi %328, %332 : vector<8x32x32xi1>
    %c1_i32_125 = arith.constant 1 : i32
    %334 = vector.broadcast %c1_i32_125 : i32 to vector<8x32x32xi32>
    %335 = arith.addi %324, %334 : vector<8x32x32xi32>
    %c0_i32_126 = arith.constant 0 : i32
    %336 = vector.broadcast %c0_i32_126 : i32 to vector<8x32x32xi32>
    %337 = arith.cmpi sge, %335, %336 : vector<8x32x32xi32>
    %338 = arith.andi %333, %337 : vector<8x32x32xi1>
    %c1_i32_127 = arith.constant 1 : i32
    %339 = vector.broadcast %c1_i32_127 : i32 to vector<8x32x32xi32>
    %340 = arith.addi %324, %339 : vector<8x32x32xi32>
    %c32_i32_128 = arith.constant 32 : i32
    %341 = vector.broadcast %c32_i32_128 : i32 to vector<8x32x32xi32>
    %342 = arith.cmpi slt, %340, %341 : vector<8x32x32xi32>
    %343 = arith.andi %338, %342 : vector<8x32x32xi1>
    %344 = vector.shape_cast %343 : vector<8x32x32xi1> to vector<256x32xi1>
    %cst_129 = arith.constant 0.000000e+00 : f32
    %345 = vector.broadcast %cst_129 : f32 to vector<256x32xf32>
    %346 = arith.select %344, %322, %345 : vector<256x32xi1>, vector<256x32xf32>
    %c160 = arith.constant 160 : index
    %c0_130 = arith.constant 0 : index
    %347 = vector.load %arg2[%c160, %c0_130] : memref<624x32xf32, #tpu.memory_space<vmem>>, vector<32x32xf32>
    %cst_131 = arith.constant dense<0.000000e+00> : vector<256x32xf32>
    %348 = tpu.matmul %346, %347, %cst_131 {dimension_numbers = #tpu.dot_dimension_numbers<[1], [0], [0], [1], [0, 0, 1, 1], [], []>} : vector<256x32xf32>, vector<32x32xf32>, vector<256x32xf32> -> vector<256x32xf32>
    %c0_132 = arith.constant 0 : index
    %c0_133 = arith.constant 0 : index
    %349 = vector.load %arg7[%c0_132, %c0_133] : memref<256x32xf32, #tpu.memory_space<vmem>>, vector<256x32xf32>
    %350 = arith.addf %349, %348 : vector<256x32xf32>
    %c0_134 = arith.constant 0 : index
    %c0_135 = arith.constant 0 : index
    %351 = vector.load %arg7[%c0_134, %c0_135] : memref<256x32xf32, #tpu.memory_space<vmem>>, vector<256x32xf32>
    tpu.vector_store %arg7[%c0_134, %c0_135], %350 {strides = array<i32>} : memref<256x32xf32, #tpu.memory_space<vmem>>, vector<256x32xf32>,
    %c0_136 = arith.constant 0 : index
    %c0_137 = arith.constant 0 : index
    %352 = vector.load %arg6[%c0_136, %c0_137] : memref<256x32xf32, #tpu.memory_space<vmem>>, vector<256x32xf32>
    %c225_i32 = arith.constant 225 : i32
    %353 = tpu.dynamic_rotate %352 by %c225_i32 dim 0 : vector<256x32xf32>, i32 -> vector<256x32xf32>
    %354 = tpu.iota {dimensions = array<i32: 0>} : vector<8x32x32xi32>
    %355 = tpu.iota {dimensions = array<i32: 1>} : vector<8x32x32xi32>
    %c1_i32_138 = arith.constant 1 : i32
    %356 = vector.broadcast %c1_i32_138 : i32 to vector<8x32x32xi32>
    %357 = arith.addi %354, %356 : vector<8x32x32xi32>
    %c0_i32_139 = arith.constant 0 : i32
    %358 = vector.broadcast %c0_i32_139 : i32 to vector<8x32x32xi32>
    %359 = arith.cmpi sge, %357, %358 : vector<8x32x32xi32>
    %c1_i32_140 = arith.constant 1 : i32
    %360 = vector.broadcast %c1_i32_140 : i32 to vector<8x32x32xi32>
    %361 = arith.addi %354, %360 : vector<8x32x32xi32>
    %c8_i32_141 = arith.constant 8 : i32
    %362 = vector.broadcast %c8_i32_141 : i32 to vector<8x32x32xi32>
    %363 = arith.cmpi slt, %361, %362 : vector<8x32x32xi32>
    %364 = arith.andi %359, %363 : vector<8x32x32xi1>
    %c-1_i32_142 = arith.constant -1 : i32
    %365 = vector.broadcast %c-1_i32_142 : i32 to vector<8x32x32xi32>
    %366 = arith.addi %355, %365 : vector<8x32x32xi32>
    %c0_i32_143 = arith.constant 0 : i32
    %367 = vector.broadcast %c0_i32_143 : i32 to vector<8x32x32xi32>
    %368 = arith.cmpi sge, %366, %367 : vector<8x32x32xi32>
    %369 = arith.andi %364, %368 : vector<8x32x32xi1>
    %c-1_i32_144 = arith.constant -1 : i32
    %370 = vector.broadcast %c-1_i32_144 : i32 to vector<8x32x32xi32>
    %371 = arith.addi %355, %370 : vector<8x32x32xi32>
    %c32_i32_145 = arith.constant 32 : i32
    %372 = vector.broadcast %c32_i32_145 : i32 to vector<8x32x32xi32>
    %373 = arith.cmpi slt, %371, %372 : vector<8x32x32xi32>
    %374 = arith.andi %369, %373 : vector<8x32x32xi1>
    %375 = vector.shape_cast %374 : vector<8x32x32xi1> to vector<256x32xi1>
    %cst_146 = arith.constant 0.000000e+00 : f32
    %376 = vector.broadcast %cst_146 : f32 to vector<256x32xf32>
    %377 = arith.select %375, %353, %376 : vector<256x32xi1>, vector<256x32xf32>
    %c192 = arith.constant 192 : index
    %c0_147 = arith.constant 0 : index
    %378 = vector.load %arg2[%c192, %c0_147] : memref<624x32xf32, #tpu.memory_space<vmem>>, vector<32x32xf32>
    %cst_148 = arith.constant dense<0.000000e+00> : vector<256x32xf32>
    %379 = tpu.matmul %377, %378, %cst_148 {dimension_numbers = #tpu.dot_dimension_numbers<[1], [0], [0], [1], [0, 0, 1, 1], [], []>} : vector<256x32xf32>, vector<32x32xf32>, vector<256x32xf32> -> vector<256x32xf32>
    %c0_149 = arith.constant 0 : index
    %c0_150 = arith.constant 0 : index
    %380 = vector.load %arg7[%c0_149, %c0_150] : memref<256x32xf32, #tpu.memory_space<vmem>>, vector<256x32xf32>
    %381 = arith.addf %380, %379 : vector<256x32xf32>
    %c0_151 = arith.constant 0 : index
    %c0_152 = arith.constant 0 : index
    %382 = vector.load %arg7[%c0_151, %c0_152] : memref<256x32xf32, #tpu.memory_space<vmem>>, vector<256x32xf32>
    tpu.vector_store %arg7[%c0_151, %c0_152], %381 {strides = array<i32>} : memref<256x32xf32, #tpu.memory_space<vmem>>, vector<256x32xf32>,
    %c0_153 = arith.constant 0 : index
    %c0_154 = arith.constant 0 : index
    %383 = vector.load %arg6[%c0_153, %c0_154] : memref<256x32xf32, #tpu.memory_space<vmem>>, vector<256x32xf32>
    %c224_i32 = arith.constant 224 : i32
    %384 = tpu.dynamic_rotate %383 by %c224_i32 dim 0 : vector<256x32xf32>, i32 -> vector<256x32xf32>
    %385 = tpu.iota {dimensions = array<i32: 0>} : vector<8x32x32xi32>
    %386 = tpu.iota {dimensions = array<i32: 1>} : vector<8x32x32xi32>
    %c1_i32_155 = arith.constant 1 : i32
    %387 = vector.broadcast %c1_i32_155 : i32 to vector<8x32x32xi32>
    %388 = arith.addi %385, %387 : vector<8x32x32xi32>
    %c0_i32_156 = arith.constant 0 : i32
    %389 = vector.broadcast %c0_i32_156 : i32 to vector<8x32x32xi32>
    %390 = arith.cmpi sge, %388, %389 : vector<8x32x32xi32>
    %c1_i32_157 = arith.constant 1 : i32
    %391 = vector.broadcast %c1_i32_157 : i32 to vector<8x32x32xi32>
    %392 = arith.addi %385, %391 : vector<8x32x32xi32>
    %c8_i32_158 = arith.constant 8 : i32
    %393 = vector.broadcast %c8_i32_158 : i32 to vector<8x32x32xi32>
    %394 = arith.cmpi slt, %392, %393 : vector<8x32x32xi32>
    %395 = arith.andi %390, %394 : vector<8x32x32xi1>
    %c0_i32_159 = arith.constant 0 : i32
    %396 = vector.broadcast %c0_i32_159 : i32 to vector<8x32x32xi32>
    %397 = arith.addi %386, %396 : vector<8x32x32xi32>
    %c0_i32_160 = arith.constant 0 : i32
    %398 = vector.broadcast %c0_i32_160 : i32 to vector<8x32x32xi32>
    %399 = arith.cmpi sge, %397, %398 : vector<8x32x32xi32>
    %400 = arith.andi %395, %399 : vector<8x32x32xi1>
    %c0_i32_161 = arith.constant 0 : i32
    %401 = vector.broadcast %c0_i32_161 : i32 to vector<8x32x32xi32>
    %402 = arith.addi %386, %401 : vector<8x32x32xi32>
    %c32_i32_162 = arith.constant 32 : i32
    %403 = vector.broadcast %c32_i32_162 : i32 to vector<8x32x32xi32>
    %404 = arith.cmpi slt, %402, %403 : vector<8x32x32xi32>
    %405 = arith.andi %400, %404 : vector<8x32x32xi1>
    %406 = vector.shape_cast %405 : vector<8x32x32xi1> to vector<256x32xi1>
    %cst_163 = arith.constant 0.000000e+00 : f32
    %407 = vector.broadcast %cst_163 : f32 to vector<256x32xf32>
    %408 = arith.select %406, %384, %407 : vector<256x32xi1>, vector<256x32xf32>
    %c224 = arith.constant 224 : index
    %c0_164 = arith.constant 0 : index
    %409 = vector.load %arg2[%c224, %c0_164] : memref<624x32xf32, #tpu.memory_space<vmem>>, vector<32x32xf32>
    %cst_165 = arith.constant dense<0.000000e+00> : vector<256x32xf32>
    %410 = tpu.matmul %408, %409, %cst_165 {dimension_numbers = #tpu.dot_dimension_numbers<[1], [0], [0], [1], [0, 0, 1, 1], [], []>} : vector<256x32xf32>, vector<32x32xf32>, vector<256x32xf32> -> vector<256x32xf32>
    %c0_166 = arith.constant 0 : index
    %c0_167 = arith.constant 0 : index
    %411 = vector.load %arg7[%c0_166, %c0_167] : memref<256x32xf32, #tpu.memory_space<vmem>>, vector<256x32xf32>
    %412 = arith.addf %411, %410 : vector<256x32xf32>
    %c0_168 = arith.constant 0 : index
    %c0_169 = arith.constant 0 : index
    %413 = vector.load %arg7[%c0_168, %c0_169] : memref<256x32xf32, #tpu.memory_space<vmem>>, vector<256x32xf32>
    tpu.vector_store %arg7[%c0_168, %c0_169], %412 {strides = array<i32>} : memref<256x32xf32, #tpu.memory_space<vmem>>, vector<256x32xf32>,
    %c0_170 = arith.constant 0 : index
    %c0_171 = arith.constant 0 : index
    %414 = vector.load %arg6[%c0_170, %c0_171] : memref<256x32xf32, #tpu.memory_space<vmem>>, vector<256x32xf32>
    %c223_i32 = arith.constant 223 : i32
    %415 = tpu.dynamic_rotate %414 by %c223_i32 dim 0 : vector<256x32xf32>, i32 -> vector<256x32xf32>
    %416 = tpu.iota {dimensions = array<i32: 0>} : vector<8x32x32xi32>
    %417 = tpu.iota {dimensions = array<i32: 1>} : vector<8x32x32xi32>
    %c1_i32_172 = arith.constant 1 : i32
    %418 = vector.broadcast %c1_i32_172 : i32 to vector<8x32x32xi32>
    %419 = arith.addi %416, %418 : vector<8x32x32xi32>
    %c0_i32_173 = arith.constant 0 : i32
    %420 = vector.broadcast %c0_i32_173 : i32 to vector<8x32x32xi32>
    %421 = arith.cmpi sge, %419, %420 : vector<8x32x32xi32>
    %c1_i32_174 = arith.constant 1 : i32
    %422 = vector.broadcast %c1_i32_174 : i32 to vector<8x32x32xi32>
    %423 = arith.addi %416, %422 : vector<8x32x32xi32>
    %c8_i32_175 = arith.constant 8 : i32
    %424 = vector.broadcast %c8_i32_175 : i32 to vector<8x32x32xi32>
    %425 = arith.cmpi slt, %423, %424 : vector<8x32x32xi32>
    %426 = arith.andi %421, %425 : vector<8x32x32xi1>
    %c1_i32_176 = arith.constant 1 : i32
    %427 = vector.broadcast %c1_i32_176 : i32 to vector<8x32x32xi32>
    %428 = arith.addi %417, %427 : vector<8x32x32xi32>
    %c0_i32_177 = arith.constant 0 : i32
    %429 = vector.broadcast %c0_i32_177 : i32 to vector<8x32x32xi32>
    %430 = arith.cmpi sge, %428, %429 : vector<8x32x32xi32>
    %431 = arith.andi %426, %430 : vector<8x32x32xi1>
    %c1_i32_178 = arith.constant 1 : i32
    %432 = vector.broadcast %c1_i32_178 : i32 to vector<8x32x32xi32>
    %433 = arith.addi %417, %432 : vector<8x32x32xi32>
    %c32_i32_179 = arith.constant 32 : i32
    %434 = vector.broadcast %c32_i32_179 : i32 to vector<8x32x32xi32>
    %435 = arith.cmpi slt, %433, %434 : vector<8x32x32xi32>
    %436 = arith.andi %431, %435 : vector<8x32x32xi1>
    %437 = vector.shape_cast %436 : vector<8x32x32xi1> to vector<256x32xi1>
    %cst_180 = arith.constant 0.000000e+00 : f32
    %438 = vector.broadcast %cst_180 : f32 to vector<256x32xf32>
    %439 = arith.select %437, %415, %438 : vector<256x32xi1>, vector<256x32xf32>
    %c256 = arith.constant 256 : index
    %c0_181 = arith.constant 0 : index
    %440 = vector.load %arg2[%c256, %c0_181] : memref<624x32xf32, #tpu.memory_space<vmem>>, vector<32x32xf32>
    %cst_182 = arith.constant dense<0.000000e+00> : vector<256x32xf32>
    %441 = tpu.matmul %439, %440, %cst_182 {dimension_numbers = #tpu.dot_dimension_numbers<[1], [0], [0], [1], [0, 0, 1, 1], [], []>} : vector<256x32xf32>, vector<32x32xf32>, vector<256x32xf32> -> vector<256x32xf32>
    %c0_183 = arith.constant 0 : index
    %c0_184 = arith.constant 0 : index
    %442 = vector.load %arg7[%c0_183, %c0_184] : memref<256x32xf32, #tpu.memory_space<vmem>>, vector<256x32xf32>
    %443 = arith.addf %442, %441 : vector<256x32xf32>
    %c0_185 = arith.constant 0 : index
    %c0_186 = arith.constant 0 : index
    %444 = vector.load %arg7[%c0_185, %c0_186] : memref<256x32xf32, #tpu.memory_space<vmem>>, vector<256x32xf32>
    tpu.vector_store %arg7[%c0_185, %c0_186], %443 {strides = array<i32>} : memref<256x32xf32, #tpu.memory_space<vmem>>, vector<256x32xf32>,
    %c0_187 = arith.constant 0 : index
    %c0_188 = arith.constant 0 : index
    %445 = vector.load %arg7[%c0_187, %c0_188] : memref<256x32xf32, #tpu.memory_space<vmem>>, vector<256x32xf32>
    %c11 = arith.constant 11 : index
    %c0_189 = arith.constant 0 : index
    %446 = vector.load %arg4[%c11, %c0_189] : memref<20x32xf32, #tpu.memory_space<vmem>>, vector<1x32xf32>
    %447 = vector.broadcast %446 : vector<1x32xf32> to vector<256x32xf32>
    %448 = arith.addf %445, %447 : vector<256x32xf32>
    %cst_190 = arith.constant 0.000000e+00 : f32
    %449 = vector.broadcast %cst_190 : f32 to vector<256x32xf32>
    %450 = arith.maximumf %448, %449 : vector<256x32xf32>
    %c288 = arith.constant 288 : index
    %c0_191 = arith.constant 0 : index
    %451 = vector.load %arg2[%c288, %c0_191] : memref<624x32xf32, #tpu.memory_space<vmem>>, vector<32x32xf32>
    %cst_192 = arith.constant dense<0.000000e+00> : vector<256x32xf32>
    %452 = tpu.matmul %450, %451, %cst_192 {dimension_numbers = #tpu.dot_dimension_numbers<[1], [0], [0], [1], [0, 0, 1, 1], [], []>} : vector<256x32xf32>, vector<32x32xf32>, vector<256x32xf32> -> vector<256x32xf32>
    %c12 = arith.constant 12 : index
    %c0_193 = arith.constant 0 : index
    %453 = vector.load %arg4[%c12, %c0_193] : memref<20x32xf32, #tpu.memory_space<vmem>>, vector<1x32xf32>
    %454 = vector.broadcast %453 : vector<1x32xf32> to vector<256x32xf32>
    %455 = arith.addf %452, %454 : vector<256x32xf32>
    %cst_194 = arith.constant 0.000000e+00 : f32
    %456 = vector.broadcast %cst_194 : f32 to vector<256x32xf32>
    %457 = arith.maximumf %455, %456 : vector<256x32xf32>
    %c13 = arith.constant 13 : index
    %c0_195 = arith.constant 0 : index
    %458 = vector.load %arg4[%c13, %c0_195] : memref<20x32xf32, #tpu.memory_space<vmem>>, vector<1x32xf32>
    %459 = vector.broadcast %458 : vector<1x32xf32> to vector<256x32xf32>
    %460 = arith.mulf %457, %459 : vector<256x32xf32>
    %cst_196 = arith.constant dense<0.000000e+00> : vector<256xf32>
    %461 = vector.multi_reduction <add>, %460, %cst_196 [1] : vector<256x32xf32> to vector<256xf32>
    %462 = vector.shape_cast %461 : vector<256xf32> to vector<256x1xf32>
    %c14 = arith.constant 14 : index
    %c0_197 = arith.constant 0 : index
    %463 = vector.load %arg4[%c14, %c0_197] : memref<20x32xf32, #tpu.memory_space<vmem>>, vector<1x32xf32>
    %464 = vector.extract_strided_slice %463 {offsets = [0, 0], sizes = [1, 1], strides = [1, 1]} : vector<1x32xf32> to vector<1x1xf32>
    %465 = vector.broadcast %464 : vector<1x1xf32> to vector<256x1xf32>
    %466 = arith.addf %462, %465 : vector<256x1xf32>
    %467 = tpu.iota {dimensions = array<i32: 0>} : vector<8x256xi32>
    %468 = tpu.iota {dimensions = array<i32: 1>} : vector<8x256xi32>
    %c32_i32_198 = arith.constant 32 : i32
    %469 = vector.broadcast %c32_i32_198 : i32 to vector<8x256xi32>
    %470 = arith.muli %467, %469 : vector<8x256xi32>
    %471 = arith.cmpi sge, %468, %470 : vector<8x256xi32>
    %c32_i32_199 = arith.constant 32 : i32
    %472 = vector.broadcast %c32_i32_199 : i32 to vector<8x256xi32>
    %473 = arith.muli %467, %472 : vector<8x256xi32>
    %c32_i32_200 = arith.constant 32 : i32
    %474 = vector.broadcast %c32_i32_200 : i32 to vector<8x256xi32>
    %475 = arith.addi %473, %474 : vector<8x256xi32>
    %476 = arith.cmpi slt, %468, %475 : vector<8x256xi32>
    %477 = arith.andi %471, %476 : vector<8x256xi1>
    %478 = arith.extui %477 : vector<8x256xi1> to vector<8x256xi32>
    %479 = arith.sitofp %478 : vector<8x256xi32> to vector<8x256xf32>
    %480 = tpu.iota {dimensions = array<i32: 1>} : vector<8x32x32xi32>
    %481 = tpu.iota {dimensions = array<i32: 2>} : vector<8x32x32xi32>
    %c0_i32_201 = arith.constant 0 : i32
    %482 = vector.broadcast %c0_i32_201 : i32 to vector<8x32x32xi32>
    %483 = arith.addi %480, %482 : vector<8x32x32xi32>
    %484 = arith.cmpi eq, %481, %483 : vector<8x32x32xi32>
    %485 = arith.extui %484 : vector<8x32x32xi1> to vector<8x32x32xi32>
    %486 = arith.sitofp %485 : vector<8x32x32xi32> to vector<8x32x32xf32>
    %487 = vector.shape_cast %486 : vector<8x32x32xf32> to vector<256x32xf32>
    %488 = vector.broadcast %466 : vector<256x1xf32> to vector<256x32xf32>
    %489 = arith.mulf %488, %487 : vector<256x32xf32>
    %cst_202 = arith.constant dense<0.000000e+00> : vector<8x32xf32>
    %490 = tpu.matmul %479, %489, %cst_202 {dimension_numbers = #tpu.dot_dimension_numbers<[1], [0], [0], [1], [0, 0, 1, 1], [], []>} : vector<8x256xf32>, vector<256x32xf32>, vector<8x32xf32> -> vector<8x32xf32>
    %c0_203 = arith.constant 0 : index
    %c0_204 = arith.constant 0 : index
    %491 = vector.load %arg3[%c0_203, %c0_204] : memref<32x96xf32, #tpu.memory_space<vmem>>, vector<32x96xf32>
    %cst_205 = arith.constant dense<0.000000e+00> : vector<8x96xf32>
    %492 = tpu.matmul %490, %491, %cst_205 {dimension_numbers = #tpu.dot_dimension_numbers<[1], [0], [0], [1], [0, 0, 1, 1], [], []>} : vector<8x32xf32>, vector<32x96xf32>, vector<8x96xf32> -> vector<8x96xf32>
    %493 = vector.extract_strided_slice %492 {offsets = [0, 0], sizes = [8, 32], strides = [1, 1]} : vector<8x96xf32> to vector<8x32xf32>
    %c15 = arith.constant 15 : index
    %c0_206 = arith.constant 0 : index
    %494 = vector.load %arg4[%c15, %c0_206] : memref<20x32xf32, #tpu.memory_space<vmem>>, vector<1x32xf32>
    %495 = vector.broadcast %494 : vector<1x32xf32> to vector<8x32xf32>
    %496 = arith.addf %493, %495 : vector<8x32xf32>
    %497 = vector.extract_strided_slice %492 {offsets = [0, 32], sizes = [8, 32], strides = [1, 1]} : vector<8x96xf32> to vector<8x32xf32>
    %c16 = arith.constant 16 : index
    %c0_207 = arith.constant 0 : index
    %498 = vector.load %arg4[%c16, %c0_207] : memref<20x32xf32, #tpu.memory_space<vmem>>, vector<1x32xf32>
    %499 = vector.broadcast %498 : vector<1x32xf32> to vector<8x32xf32>
    %500 = arith.addf %497, %499 : vector<8x32xf32>
    %501 = vector.extract_strided_slice %492 {offsets = [0, 64], sizes = [8, 32], strides = [1, 1]} : vector<8x96xf32> to vector<8x32xf32>
    %c17 = arith.constant 17 : index
    %c0_208 = arith.constant 0 : index
    %502 = vector.load %arg4[%c17, %c0_208] : memref<20x32xf32, #tpu.memory_space<vmem>>, vector<1x32xf32>
    %503 = vector.broadcast %502 : vector<1x32xf32> to vector<8x32xf32>
    %504 = arith.addf %501, %503 : vector<8x32xf32>
    %cst_209 = arith.constant dense<0.000000e+00> : vector<8x8xf32>
    %505 = tpu.matmul %496, %500, %cst_209 {dimension_numbers = #tpu.dot_dimension_numbers<[1], [1], [0], [0], [0, 0, 1, 0], [], []>} : vector<8x32xf32>, vector<8x32xf32>, vector<8x8xf32> -> vector<8x8xf32>
    %cst_210 = arith.constant 0.176776692 : f32
    %506 = vector.broadcast %cst_210 : f32 to vector<8x8xf32>
    %507 = arith.mulf %505, %506 : vector<8x8xf32>
    %cst_211 = arith.constant dense<0xFF800000> : vector<8xf32>
    %508 = vector.multi_reduction <maximumf>, %507, %cst_211 [1] : vector<8x8xf32> to vector<8xf32>
    %509 = vector.shape_cast %508 : vector<8xf32> to vector<8x1xf32>
    %510 = vector.broadcast %509 : vector<8x1xf32> to vector<8x8xf32>
    %511 = arith.subf %507, %510 : vector<8x8xf32>
    %512 = math.exp %511 : vector<8x8xf32>
    %cst_212 = arith.constant dense<0.000000e+00> : vector<8xf32>
    %513 = vector.multi_reduction <add>, %512, %cst_212 [1] : vector<8x8xf32> to vector<8xf32>
    %514 = vector.shape_cast %513 : vector<8xf32> to vector<8x1xf32>
    %515 = tpu.reciprocal %514 {approx = true} : vector<8x1xf32> -> vector<8x1xf32>
    %516 = vector.broadcast %515 : vector<8x1xf32> to vector<8x8xf32>
    %517 = arith.mulf %512, %516 : vector<8x8xf32>
    %cst_213 = arith.constant dense<0.000000e+00> : vector<8x32xf32>
    %518 = tpu.matmul %517, %504, %cst_213 {dimension_numbers = #tpu.dot_dimension_numbers<[1], [0], [0], [1], [0, 0, 1, 1], [], []>} : vector<8x8xf32>, vector<8x32xf32>, vector<8x32xf32> -> vector<8x32xf32>
    %519 = arith.addf %518, %490 : vector<8x32xf32>
    %520 = tpu.concatenate %519, %519, %519, %519, %519, %519, %519, %519 in 1 : vector<8x32xf32>, vector<8x32xf32>, vector<8x32xf32>, vector<8x32xf32>, vector<8x32xf32>, vector<8x32xf32>, vector<8x32xf32>, vector<8x32xf32> -> vector<8x256xf32>
    %521 = arith.mulf %520, %479 : vector<8x256xf32>
    %c320 = arith.constant 320 : index
    %c0_214 = arith.constant 0 : index
    %522 = vector.load %arg2[%c320, %c0_214] : memref<624x32xf32, #tpu.memory_space<vmem>>, vector<256x32xf32>
    %cst_215 = arith.constant dense<0.000000e+00> : vector<8x32xf32>
    %523 = tpu.matmul %521, %522, %cst_215 {dimension_numbers = #tpu.dot_dimension_numbers<[1], [0], [0], [1], [0, 0, 1, 1], [], []>} : vector<8x256xf32>, vector<256x32xf32>, vector<8x32xf32> -> vector<8x32xf32>
    %cst_216 = arith.constant dense<0.000000e+00> : vector<32xf32>
    %524 = vector.multi_reduction <add>, %523, %cst_216 [0] : vector<8x32xf32> to vector<32xf32>
    %525 = vector.shape_cast %524 : vector<32xf32> to vector<1x32xf32>
    %c18 = arith.constant 18 : index
    %c0_217 = arith.constant 0 : index
    %526 = vector.load %arg4[%c18, %c0_217] : memref<20x32xf32, #tpu.memory_space<vmem>>, vector<1x32xf32>
    %527 = arith.addf %525, %526 : vector<1x32xf32>
    %cst_218 = arith.constant 0.000000e+00 : f32
    %528 = vector.broadcast %cst_218 : f32 to vector<1x32xf32>
    %529 = arith.maximumf %527, %528 : vector<1x32xf32>
    %c592 = arith.constant 592 : index
    %c0_219 = arith.constant 0 : index
    %530 = vector.load %arg2[%c592, %c0_219] : memref<624x32xf32, #tpu.memory_space<vmem>>, vector<32x32xf32>
    %cst_220 = arith.constant dense<0.000000e+00> : vector<1x32xf32>
    %531 = tpu.matmul %529, %530, %cst_220 {dimension_numbers = #tpu.dot_dimension_numbers<[1], [0], [0], [1], [0, 0, 1, 1], [], []>} : vector<1x32xf32>, vector<32x32xf32>, vector<1x32xf32> -> vector<1x32xf32>
    %532 = vector.extract_strided_slice %531 {offsets = [0, 0], sizes = [1, 4], strides = [1, 1]} : vector<1x32xf32> to vector<1x4xf32>
    %c19 = arith.constant 19 : index
    %c0_221 = arith.constant 0 : index
    %533 = vector.load %arg4[%c19, %c0_221] : memref<20x32xf32, #tpu.memory_space<vmem>>, vector<1x32xf32>
    %534 = vector.extract_strided_slice %533 {offsets = [0, 0], sizes = [1, 4], strides = [1, 1]} : vector<1x32xf32> to vector<1x4xf32>
    %535 = arith.addf %532, %534 : vector<1x4xf32>
    %c0_222 = arith.constant 0 : index
    %c0_223 = arith.constant 0 : index
    %c0_224 = arith.constant 0 : index
    %536 = vector.load %arg5[%c0_222, %c0_223, %c0_224] : memref<1x1x4xf32, #tpu.memory_space<vmem>>, vector<1x1x4xf32>
    %537 = vector.shape_cast %536 : vector<1x1x4xf32> to vector<1x4xf32>
    %538 = vector.shape_cast %535 : vector<1x4xf32> to vector<1x1x4xf32>
    tpu.vector_store %arg5[%c0_222, %c0_223, %c0_224], %538 {strides = array<i32>} : memref<1x1x4xf32, #tpu.memory_space<vmem>>, vector<1x1x4xf32>,
    return
  }
  func.func @transform_0(%arg0: i32) -> (i32, i32, i32) {
    %c0_i32 = arith.constant 0 : i32
    %c0_i32_0 = arith.constant 0 : i32
    %c0_i32_1 = arith.constant 0 : i32
    return %arg0, %c0_i32, %c0_i32_0 : i32, i32, i32
  }
  func.func @transform_1(%arg0: i32) -> (i32, i32) {
    %c0_i32 = arith.constant 0 : i32
    %c0_i32_0 = arith.constant 0 : i32
    %c0_i32_1 = arith.constant 0 : i32
    return %c0_i32, %c0_i32_0 : i32, i32
  }
  func.func @transform_2(%arg0: i32) -> (i32, i32) {
    %c0_i32 = arith.constant 0 : i32
    %c0_i32_0 = arith.constant 0 : i32
    %c0_i32_1 = arith.constant 0 : i32
    return %c0_i32, %c0_i32_0 : i32, i32
  }
  func.func @transform_3(%arg0: i32) -> (i32, i32) {
    %c0_i32 = arith.constant 0 : i32
    %c0_i32_0 = arith.constant 0 : i32
    %c0_i32_1 = arith.constant 0 : i32
    return %c0_i32, %c0_i32_0 : i32, i32
  }
  func.func @transform_4(%arg0: i32) -> (i32, i32, i32) {
    %c0_i32 = arith.constant 0 : i32
    %c0_i32_0 = arith.constant 0 : i32
    %c0_i32_1 = arith.constant 0 : i32
    return %arg0, %c0_i32, %c0_i32_0 : i32, i32, i32
  }
}

</mosaic_0001>

<bundles_post_ra>
// kernel: sissa_cnn_forward.1
= control target key start
LH: loop header
LB: loop body
LE: loop exit
PB: predicated region body
PF: predicated region fallthrough
CT: control target
= control target key end

     0   :  { %9 = vsyncpa [#allocation5], 0  ;;  %s14749_s0 = inlined_call_operand.vmem [shape: f32[2,8,16], index: 0, kind: input, shape index: {}]   ;;  %s14750_s1 = inlined_call_operand.vmem [shape: f32[624,32], index: 1, kind: input, shape index: {}]   ;;  %s14751_s2 = inlined_call_operand.vmem [shape: f32[32,96], index: 2, kind: input, shape index: {}]   ;;  %s14752_s3 = inlined_call_operand.vmem [shape: f32[20,32], index: 3, kind: input, shape index: {}]   ;;  %s14753_s4 = inlined_call_operand.hbm [shape: f32[2,1,4], index: 4, kind: output, shape index: {}]  }
   0x1   :  { %11 = vsyncpa [#allocation5 + $0x1], 0  ;;  %s10396_s15 = smov 0   ;;  %s10398_s16 = smov 0  }
   0x2   :  { %s10400_s17 = smov 0   ;;  %s10402_s18 = smov 0  }
   0x3 LB: > { %s10417_s19 = sadd.s32 4294967295, %s10359_s18   ;;  %s8663_s20 = sadd.s32 4294967294, %s10359_s18   ;;  %s10359_s18 = sphi %s10402_s18, %s14958_s18   ;;  %s10355_s17 = sphi %s10400_s17, %s14957_s17   ;;  %s10351_s16 = sphi %s10398_s16, %s14956_s16   ;;  %s10347_s15 = sphi %s10396_s15, %s14955_s15  }
   0x4   : > { %s10421_s21 = sadd.s32 1, %s10359_s18   ;;  %s113_s22 = sadd.s32 1, %s10355_s17 }
   0x5   : > { %s110_s23 = ssub.s32 %s10359_s18, %s10421_s21  ;;  %p123_p0 = scmp.ne.s32.totalorder %s10355_s17, %s10351_s16 }
   0x6   : > { %p111_p1 = scmp.eq.s32.totalorder %s110_s23, 0  ;;  %p124_p2 = scmp.eq.s32.totalorder %s10417_s19, 1 }
   0x7   : > { %p129_p3 = scmp.ne.s32.totalorder %s10351_s16, %s10347_s15  ;;  %p130_p4 = scmp.eq.s32.totalorder %s8663_s20, 1 }
   0x8   : > { %s10432_s24 = scalar_select %p111_p1, %s10355_s17, %s113_s22  }
   0x9   : > { %p10434_p5 = por %p124_p2, %p123_p0  ;;  %p10438_p6 = por %p130_p4, %p129_p3 }
   0xa   : > { %p8666_p7 = scmp.ge.s32.totalorder %s10359_s18, 1  ;;  %p164_p8 = scmp.lt.s32.totalorder %s10359_s18, 3 }
   0xc   : > { %p165_p9 = pnand %p8666_p7, %p164_p8 }
   0xe   : > { %168 = sbr.rel (%p165_p9) target bundleno = 3806 (0xede), region = 36 }
  0x15   : > { %v193_v0 = vld [vmem:[%s14750_s1 + $0x240] sm:$0xff]  ;;  %v194_v1 = vld [vmem:[%s14750_s1 + $0x248] sm:$0xff]  ;;  %p188_p10 = scmp.lt.s32.totalorder %s10417_s19, 1  ;;  %v14754_v2 = vmov 0.0|0.0   ;;  %vm10362_vm0 = vmmov 0   ;;  %v14756_v4 = vmov 0.0   ;;  %v275_v6 = vlaneseq }
  0x16   : > { %10053 = vmatprep.subr.bf16.mxu0 %v14754_v2  ;;  %v10054_v3 = vpack.c.bf16 %v194_v1, %v193_v0  ;;  %9458 = vmatprep.mubr.msk.f32.mxu0 %vm10362_vm0, %v14756_v4  ;;  %vm200_vm1 = vcmask 130048   ;;  %v10364_v8 = vmov 1966171168   ;;  %v8668_v12 = vld [vmem:[%s14752_s3 + $0xa] ss:$0 sm:$0xff]  ;;  %vm425_vm11 = vcmask 261120  }
  0x17   : > { %s189_s5 = scalar_select %p188_p10, %s10417_s19, 1  ;;  %v10459_v7 = vshrl.u32 %v275_v6, 7  ;;  %v286_v9 = vunpack.c.l.s4 %v10364_v8  ;;  %v10471_v15 = vand.u32 127, %v275_v6 }
  0x18   : > { %10055 = vmatpush3.bf16.msra.mxu0 %v10054_v3  ;;  %s10367_s14 = smov 32   ;;  %s10368_s20 = smov 96  }
  0x19   : > { %s8667_s6 = sshll.u32 %s189_s5, 3  ;;  %v373_v10 = vadd.s32 8, %v10459_v7  ;;  %v287_v11 = vunpack.c.0.s8 %v286_v9  ;;  %v10466_v13 = vadd.s32 4294967295, %v10459_v7  ;;  %v10469_v14 = vadd.s32 16, %v10459_v7  ;;  %14820 = vst [vmem:[#allocation8_spill] sm:$0xff] %v10471_v15  ;;  %s10369_s27 = smov 64  }
  0x1a   : > { %s191_s9 = scalar_lea.vmem %s14749_s0, %s8667_s6  ;;  %v10474_v18 = vadd.s32 24, %v10459_v7  ;;  %v10477_v19 = vadd.s32 1, %v10459_v7  ;;  %v10484_v23 = vsub.s32 0, %v10459_v7  ;;  %vm591_vm5 = vcmp.eq.s32.totalorder %v10471_v15, %v10459_v7  ;;  %s186_s5 = sand.u32 1, %s10351_s16  }
  0x1b   : > { %v192_v5 = vld [vmem:[%s191_s9] sm:$0xff]  ;;  %14819 = vst [vmem:[#allocation7_spill] sm:$0xff] %v10466_v13  ;;  %v378_v16 = vadd.s32 4294967295, %v373_v10  ;;  %v10480_v21 = vsub.s32 %v287_v11, %v10459_v7  ;;  %vm278_vm2 = vcmp.ge.s32.totalorder %v10466_v13, 0  ;;  %v10487_v24 = vadd.s32 4294967295, %v10469_v14  ;;  %s9004_s8 = sshll.u32 %s10417_s19, 4 }
  0x1c   : > { %9459 = vmatmul.mubr.msk.f32.vlgmr.msra.gmra.mrb[0].mxu0 %vm200_vm1, %v192_v5  ;;  %vm381_vm3 = vcmp.eq.s32.totalorder %v10471_v15, %v10466_v13  ;;  %v10495_v26 = vadd.s32 4294967295, %v10474_v18  ;;  %vm592_vm6 = vcmp.eq.s32.totalorder %v10471_v15, %v373_v10  ;;  %v801_v27 = vadd.s32 1, %v373_v10  ;;  %s187_s9 = scalar_lea.vmem [#allocation4], %s186_s5  ;;  %s10370_s19 = smov [#allocation4]  }
  0x1d   : > { %9469 = vmatprep.mubr.f32.mxu0 %v14756_v4  ;;  %vm382_vm4 = vcmp.eq.s32.totalorder %v10471_v15, %v378_v16  ;;  %vm1695_vm7 = vcmp.lt.s32.totalorder %v10477_v19, 8  ;;  %v10501_v32 = vsel %vm381_vm3, 1.0, %v14756_v4  ;;  %v10507_v34 = vsel %vm591_vm5, 1.0, %v14756_v4  ;;  %s8608_s10 = sshll.u32 %s187_s9, 4  ;;  %s10301_s13 = sshll.u32 %s10370_s19, 4  ;;  %s14709_s10 = int_to_ptr.vmem [resolvable:$true] %s8608_s10  ;;  %s10302_s13 = int_to_ptr.vmem [resolvable:$false] %s10301_s13 }
  0x1e   : > { %v10504_v33 = vsel %vm382_vm4, 1.0, %v14756_v4  ;;  %14821 = vst [vmem:[#allocation9_spill] sm:$0xff] %v10507_v34  ;;  %v10510_v35 = vadd.s32 1, %v10469_v14  ;;  %v10522_v42 = vsel %vm592_vm6, 1.0, %v14756_v4  ;;  %vm804_vm8 = vcmp.eq.s32.totalorder %v10471_v15, %v10477_v19  ;;  %s10297_s12 = scalar_lea.vmem %s14709_s10, 16  ;;  %s10303_s22 = scalar_lea.vmem %s10302_s13, 32 }
  0x1f   : > { %14822 = vst [vmem:[#allocation10_spill] sm:$0xff] %v10522_v42  ;;  %vm805_vm9 = vcmp.eq.s32.totalorder %v10471_v15, %v801_v27  ;;  %vm594_vm10 = vcmp.eq.s32.totalorder %v10471_v15, %v10474_v18  ;;  %vm383_vm12 = vcmp.eq.s32.totalorder %v10471_v15, %v10487_v24  ;;  %vm384_vm14 = vcmp.eq.s32.totalorder %v10471_v15, %v10495_v26  ;;  %p10298_p11 = scmp.ne.s32.totalorder %s14709_s10, %s10297_s12  ;;  %p10304_p0 = scmp.lt.s32.totalorder %s14709_s10, %s10302_s13 }
  0x20   : > { %v10618_v19 = vsel %vm594_vm10, 1.0, %v14756_v4  ;;  %vm806_vm13 = vcmp.eq.s32.totalorder %v10471_v15, %v10510_v35  ;;  %vm593_vm15 = vcmp.eq.s32.totalorder %v10471_v15, %v10469_v14  ;;  %v10676_v26 = vadd.s32 1, %v10474_v18  ;;  %p10305_p1 = scmp.lt.s32.totalorder %s10303_s22, %s10297_s12 }
  0x21   : > { %14829 = vst [vmem:[#allocation17_spill] sm:$0xff] %v10618_v19  ;;  %v10689_v14 = vsel %vm593_vm15, 1.0, %v14756_v4  ;;  %vm2545_vm3 = vcmp.lt.s32.totalorder %v10459_v7, 1  ;;  %vm3563_vm4 = vcmp.lt.s32.totalorder %v10459_v7, 7  ;;  %p10299_p12 = pnand %p10298_p11, %p10434_p5 }
  0x22   : > { %14834 = vst [vmem:[#allocation22_spill] sm:$0xff] %v10676_v26  ;;  %14835 = vst [vmem:[#allocation23_spill] sm:$0xff] %v10689_v14  ;;  %vm807_vm1 = vcmp.eq.s32.totalorder %v10471_v15, %v10676_v26  ;;  %p10306_p2 = por %p10305_p1, %p10304_p0 }
  0x23   : > { %p10300_p13 = pneg %p10299_p12 }
  0x25   : > { %p10307_p3 = pnand %p10306_p2, %p10300_p13 }
  0xef   : > { %v270_v17 = vpop.f32.mrb[0].mxu0 }
  0xf0   : > { %v271_v20 = vadd.f32 %v8668_v12, %v270_v17  ;;  %v9460_v22 = vpop.f32.mrb[1].mxu0 }
  0xf2   : > { %v274_v25 = vmax.f32 %v271_v20, 0.0 }
  0xf4   : > { %v281_v28 = vrot.slane %v274_v25, 7  ;;  %v1014_v29 = vcombine.high %v274_v25, %v274_v25  ;;  %v1021_v30 = vrot.slane %v274_v25, %v10480_v21  ;;  %v1697_v31 = vrot.slane %v274_v25, 1 }
  0xf6   : > { %v282_v36 = vsel %vm278_vm2, %v281_v28, 0.0  ;;  %v1028_v37 = vrot.slane %v1014_v29, %v10480_v21  ;;  %v1029_v38 = vcombine.high %v1021_v30, %v1021_v30  ;;  %v10516_v39 = vrot.slane %v1021_v30, %v10480_v21 }
  0xf7   : > { %v284_v40 = vcombine.high %v282_v36, %v282_v36  ;;  %v291_v41 = vrot.slane %v282_v36, %v10480_v21  ;;  %v1698_v43 = vsel %vm1695_vm7, %v1697_v31, 0.0  ;;  %v10598_v30 = vsel %vm805_vm9, 1.0, %v14756_v4 }
  0xf8   : > { %v1030_v44 = vcombine.high %v1028_v37, %v1028_v37  ;;  %v1044_v45 = vrot.slane %v1028_v37, %v10480_v21  ;;  %v10530_v46 = vrot.slane %v1029_v38, %v10480_v21  ;;  %v10542_v52 = vrot.slane %v10516_v39, %v10484_v23 }
  0xf9   : > { %v298_v47 = vrot.slane %v284_v40, %v10480_v21  ;;  %v299_v48 = vcombine.high %v291_v41, %v291_v41  ;;  %v307_v49 = vrot.slane %v291_v41, %v10480_v21  ;;  %v1700_v17 = vcombine.high %v1698_v43, %v1698_v43 }
  0xfa   : > { %v1058_v50 = vrot.slane %v1030_v44, %v10480_v21  ;;  %v1061_v51 = vcombine.high %v10530_v46, %v10530_v46  ;;  %v1060_v58 = vcombine.high %v1044_v45, %v1044_v45  ;;  %v10565_v5 = vrot.slane %v1044_v45, %v10484_v23 }
  0xfb   : > { %v300_v53 = vcombine.high %v298_v47, %v298_v47  ;;  %v314_v54 = vrot.slane %v298_v47, %v10480_v21  ;;  %v321_v55 = vrot.slane %v299_v48, %v10480_v21  ;;  %v329_v56 = vcombine.high %v307_v49, %v307_v49 }
  0xfc   : > { %v10547_v57 = vrot.slane %v307_v49, %v10484_v23  ;;  %v1062_v59 = vcombine.high %v1058_v50, %v1058_v50  ;;  %v10550_v60 = vrot.slane %v1061_v51, %v10484_v23  ;;  %v10568_v6 = vrot.slane %v1058_v50, %v10484_v23 }
  0xfd   : > { %v328_v61 = vrot.slane %v300_v53, %v10480_v21  ;;  %v330_v62 = vcombine.high %v314_v54, %v314_v54  ;;  %v331_v63 = vcombine.high %v321_v55, %v321_v55  ;;  %v10554_v0 = vrot.slane %v321_v55, %v10484_v23 }
  0xfe   : > { %v10557_v1 = vrot.slane %v329_v56, %v10484_v23  ;;  %v10560_v3 = vrot.slane %v314_v54, %v10484_v23  ;;  %14823 = vst [vmem:[#allocation11_spill] sm:$0xff] %v10568_v6  ;;  %v10580_v12 = vrot.slane %v1060_v58, %v10484_v23  ;;  %v10583_v16 = vrot.slane %v1062_v59, %v10484_v23 }
  0xff   : > { %v332_v8 = vcombine.high %v328_v61, %v328_v61  ;;  %v10571_v9 = vrot.slane %v331_v63, %v10484_v23  ;;  %v10574_v10 = vrot.slane %v328_v61, %v10484_v23  ;;  %v10577_v11 = vrot.slane %v330_v62, %v10484_v23 }
 0x100   : > { %14826 = vst [vmem:[#allocation14_spill] sm:$0xff] %v10580_v12  ;;  %14827 = vst [vmem:[#allocation15_spill] sm:$0xff] %v10583_v16  ;;  %v1707_v20 = vrot.slane %v1698_v43, %v10480_v21  ;;  %v1300_v25 = vmul.f32 %v10507_v34, %v10542_v52  ;;  %v1103_v28 = vmul.f32 %v10501_v32, %v10542_v52  ;;  %v10606_v38 = vsel %vm804_vm8, 1.0, %v14756_v4 }
 0x101   : > { %14824 = vst [vmem:[#allocation12_spill] sm:$0xff] %v10574_v10  ;;  %14825 = vst [vmem:[#allocation13_spill] sm:$0xff] %v10577_v11  ;;  %v10587_v22 = vrot.slane %v332_v8, %v10484_v23  ;;  %v1301_v29 = vmul.f32 %v10522_v42, %v10542_v52  ;;  %v1714_v31 = vrot.slane %v1700_v17, %v10480_v21  ;;  %v10652_v17 = vsel %vm383_vm12, 1.0, %v14756_v4 }
 0x102   : > { %v1715_v36 = vcombine.high %v1707_v20, %v1707_v20  ;;  %v1723_v37 = vrot.slane %v1707_v20, %v10480_v21  ;;  %v1332_v40 = vsel %vm425_vm11, %v1300_v25, 0.0  ;;  %v1135_v41 = vsel %vm425_vm11, %v1103_v28, 0.0 }
 0x103   : > { %14828 = vst [vmem:[#allocation16_spill] sm:$0xff] %v10587_v22  ;;  %v1104_v27 = vmul.f32 %v10504_v33, %v10542_v52  ;;  %v1716_v43 = vcombine.high %v1714_v31, %v1714_v31  ;;  %v1730_v44 = vrot.slane %v1714_v31, %v10480_v21  ;;  %1333 = vadd.xlane.f32.xlu0 %v1332_v40  ;;  %v1335_v49 = vsel %vm425_vm11, %v1301_v29, 0.0 }
 0x104   : > { %v1737_v45 = vrot.slane %v1715_v36, %v10480_v21  ;;  %v1745_v47 = vcombine.high %v1723_v37, %v1723_v37  ;;  %v10621_v48 = vrot.slane %v1723_v37, %v10484_v23  ;;  %1136 = vadd.xlane.f32.xlu1 %v1135_v41  ;;  %v1498_v50 = vmul.f32 %v10598_v30, %v10542_v52 }
 0x105   : > { %v1744_v51 = vrot.slane %v1716_v43, %v10480_v21  ;;  %v1746_v53 = vcombine.high %v1730_v44, %v1730_v44  ;;  %v10634_v58 = vrot.slane %v1730_v44, %v10484_v23  ;;  %v1138_v59 = vsel %vm425_vm11, %v1104_v27, 0.0 }
 0x106   : > { %v1747_v54 = vcombine.high %v1737_v45, %v1737_v45  ;;  %v10628_v55 = vrot.slane %v1737_v45, %v10484_v23  ;;  %v10631_v56 = vrot.slane %v1745_v47, %v10484_v23  ;;  %v1497_v61 = vmul.f32 %v10606_v38, %v10542_v52 }
 0x107   : > { %14830 = vst [vmem:[#allocation18_spill] sm:$0xff] %v10634_v58  ;;  %v1748_v62 = vcombine.high %v1744_v51, %v1744_v51  ;;  %v10643_v21 = vrot.slane %v1744_v51, %v10484_v23  ;;  %v10646_v8 = vrot.slane %v1746_v53, %v10484_v23  ;;  %1336 = vadd.xlane.f32.xlu0 %v1335_v49  ;;  %v1532_v25 = vsel %vm425_vm11, %v1498_v50, 0.0 }
 0x108   : > { %v10640_v63 = vrot.slane %v1747_v54, %v10484_v23  ;;  %1139 = vadd.xlane.f32.xlu1 %v1138_v59  ;;  %v1303_v28 = vmul.f32 %v10618_v19, %v10542_v52  ;;  %v10665_v29 = vsel %vm806_vm13, 1.0, %v14756_v4  ;;  %v1529_v24 = vsel %vm425_vm11, %v1497_v61, 0.0 }
 0x109   : > { %14831 = vst [vmem:[#allocation19_spill] sm:$0xff] %v10643_v21  ;;  %14832 = vst [vmem:[#allocation20_spill] sm:$0xff] %v10646_v8  ;;  %v10659_v20 = vrot.slane %v1748_v62, %v10484_v23  ;;  %v1105_v35 = vmul.f32 %v10652_v17, %v10542_v52  ;;  %v10671_v31 = vsel %vm384_vm14, 1.0, %v14756_v4  ;;  %v10680_v36 = vrot.slane %v10530_v46, %v10484_v23 }
 0x10a   : > { %v1341_v37 = vsel %vm425_vm11, %v1303_v28, 0.0  ;;  %v1499_v40 = vmul.f32 %v10665_v29, %v10542_v52  ;;  %v1106_v27 = vmul.f32 %v10671_v31, %v10542_v52  ;;  %v1302_v44 = vmul.f32 %v10689_v14, %v10542_v52 }
 0x10b   : > { %14833 = vst [vmem:[#allocation21_spill] sm:$0xff] %v10659_v20  ;;  %1533 = vadd.xlane.f32.xlu0 %v1532_v25  ;;  %v1141_v41 = vsel %vm425_vm11, %v1105_v35, 0.0  ;;  %v1304_v46 = vmul.f32 %v10507_v34, %v10680_v36  ;;  %v10700_v45 = vsel %vm807_vm1, 1.0, %v14756_v4  ;;  %v1305_v49 = vmul.f32 %v10522_v42, %v10680_v36 }
 0x10c   : > { %1530 = vadd.xlane.f32.xlu1 %v1529_v24  ;;  %v1535_v18 = vsel %vm425_vm11, %v1499_v40, 0.0  ;;  %v1144_v43 = vsel %vm425_vm11, %v1106_v27, 0.0  ;;  %v1338_v50 = vsel %vm425_vm11, %v1302_v44, 0.0  ;;  %v1500_v51 = vmul.f32 %v10700_v45, %v10542_v52 }
 0x10d   : > { %v1344_v47 = vsel %vm425_vm11, %v1304_v46, 0.0  ;;  %v1059_v53 = vcombine.high %v10516_v39, %v10516_v39  ;;  %v1347_v54 = vsel %vm425_vm11, %v1305_v49, 0.0  ;;  %v1109_v59 = vmul.f32 %v10652_v17, %v10680_v36 }
 0x10e   : > { %v1538_v61 = vsel %vm425_vm11, %v1500_v51, 0.0  ;;  %v1107_v62 = vmul.f32 %v10501_v32, %v10680_v36  ;;  %v1502_v39 = vmul.f32 %v10598_v30, %v10680_v36  ;;  %v1108_v24 = vmul.f32 %v10504_v33, %v10680_v36 }
 0x10f   : > { %1342 = vadd.xlane.f32.xlu0 %v1341_v37  ;;  %v10717_v25 = vrot.slane %v1059_v53, %v10484_v23  ;;  %v1153_v52 = vsel %vm425_vm11, %v1109_v59, 0.0  ;;  %v1501_v40 = vmul.f32 %v10606_v38, %v10680_v36  ;;  %v1110_v46 = vmul.f32 %v10671_v31, %v10680_v36 }
 0x110   : > { %1142 = vadd.xlane.f32.xlu1 %v1141_v41  ;;  %v1147_v28 = vsel %vm425_vm11, %v1107_v62, 0.0  ;;  %v1544_v35 = vsel %vm425_vm11, %v1502_v39, 0.0  ;;  %v1150_v23 = vsel %vm425_vm11, %v1108_v24, 0.0  ;;  %v1504_v44 = vmul.f32 %v10700_v45, %v10680_v36 }
 0x111   : > { %v1111_v37 = vmul.f32 %v10501_v32, %v10717_v25  ;;  %v1112_v27 = vmul.f32 %v10504_v33, %v10717_v25  ;;  %v1306_v49 = vmul.f32 %v10689_v14, %v10680_v36  ;;  %v1309_v51 = vmul.f32 %v10522_v42, %v10717_v25 }
 0x112   : > { %v2189_v15 = vmul.f32 %v10665_v29, %v10628_v55  ;;  %v1798_v8 = vmul.f32 %v10504_v33, %v10631_v56  ;;  %v2190_v21 = vmul.f32 %v10700_v45, %v10628_v55  ;;  %v1134_v11 = vmul.f32 %v10671_v31, %v10583_v16 }
 0x113   : > { %1536 = vadd.xlane.f32.xlu0 %v1535_v18  ;;  %v1159_v41 = vsel %vm425_vm11, %v1111_v37, 0.0  ;;  %v1541_v18 = vsel %vm425_vm11, %v1501_v40, 0.0  ;;  %v1350_v53 = vsel %vm425_vm11, %v1306_v49, 0.0  ;;  %v1359_v59 = vsel %vm425_vm11, %v1309_v51, 0.0 }
 0x114   : > { %1145 = vadd.xlane.f32.xlu1 %v1144_v43  ;;  %v1162_v43 = vsel %vm425_vm11, %v1112_v27, 0.0  ;;  %v1505_v40 = vmul.f32 %v10606_v38, %v10717_v25  ;;  %v393_v27 = vmul.f32 %v10501_v32, %v10547_v57  ;;  %v1310_v49 = vmul.f32 %v10689_v14, %v10717_v25 }
 0x115   : > { %v816_v51 = vmul.f32 %v10606_v38, %v10547_v57  ;;  %v1528_v6 = vmul.f32 %v10700_v45, %v10583_v16  ;;  %vm8296_vm12 = vcmask 64512   ;;  %vm8398_vm13 = vcmask 785408  }
 0x116   : > { %vm8593_vm14 = vcmask 24576  }
 0x117   : > { %1345 = vadd.xlane.f32.xlu0 %v1344_v47  ;;  %v1156_v47 = vsel %vm425_vm11, %v1110_v46, 0.0  ;;  %v1114_v46 = vmul.f32 %v10671_v31, %v10717_v25 }
 0x118   : > { %1339 = vadd.xlane.f32.xlu1 %v1338_v50  ;;  %v1550_v50 = vsel %vm425_vm11, %v1504_v44, 0.0  ;;  %v394_v44 = vmul.f32 %v10504_v33, %v10547_v57 }
 0x11b   : > { %1348 = vadd.xlane.f32.xlu0 %v1347_v54  ;;  %v1307_v54 = vmul.f32 %v10618_v19, %v10680_v36 }
 0x11c   : > { %1539 = vadd.xlane.f32.xlu1 %v1538_v61  ;;  %v1113_v61 = vmul.f32 %v10652_v17, %v10717_v25 }
 0x11d   : > { %v1353_v62 = vsel %vm425_vm11, %v1307_v54, 0.0  ;;  %v1311_v54 = vmul.f32 %v10618_v19, %v10717_v25 }
 0x11e   : > { %v1165_v39 = vsel %vm425_vm11, %v1113_v61, 0.0  ;;  %v817_v61 = vmul.f32 %v10598_v30, %v10547_v57 }
 0x11f   : > { %1154 = vadd.xlane.f32.xlu0 %v1153_v52  ;;  %v1503_v52 = vmul.f32 %v10665_v29, %v10680_v36 }
 0x120   : > { %1148 = vadd.xlane.f32.xlu1 %v1147_v28  ;;  %v1506_v28 = vmul.f32 %v10598_v30, %v10717_v25 }
 0x121   : > { %v1547_v24 = vsel %vm425_vm11, %v1503_v52, 0.0  ;;  %v1507_v52 = vmul.f32 %v10665_v29, %v10717_v25 }
 0x122   : > { %v1556_v37 = vsel %vm425_vm11, %v1506_v28, 0.0  ;;  %v605_v28 = vmul.f32 %v10689_v14, %v10547_v57 }
 0x123   : > { %1545 = vadd.xlane.f32.xlu0 %v1544_v35  ;;  %v1308_v35 = vmul.f32 %v10507_v34, %v10717_v25 }
 0x124   : > { %1151 = vadd.xlane.f32.xlu1 %v1150_v23  ;;  %v1508_v23 = vmul.f32 %v10700_v45, %v10717_v25 }
 0x125   : > { %v1356_v36 = vsel %vm425_vm11, %v1308_v35, 0.0  ;;  %v603_v35 = vmul.f32 %v10507_v34, %v10547_v57 }
 0x127   : > { %1160 = vadd.xlane.f32.xlu0 %v1159_v41  ;;  %v1562_v41 = vsel %vm425_vm11, %v1508_v23, 0.0  ;;  %v606_v23 = vmul.f32 %v10618_v19, %v10547_v57  ;;  %v635_v25 = vsel %vm425_vm11, %v603_v35, 0.0  ;;  %v1989_v35 = vmul.f32 %v10618_v19, %v10621_v48 }
 0x128   : > { %1542 = vadd.xlane.f32.xlu1 %v1541_v18  ;;  %v1553_v18 = vsel %vm425_vm11, %v1505_v40, 0.0 }
 0x129   : > { %v644_v40 = vsel %vm425_vm11, %v606_v23, 0.0  ;;  %v2183_v23 = vmul.f32 %v10606_v38, %v10621_v48 }
 0x12b   : > { %1163 = vadd.xlane.f32.xlu0 %v1162_v43  ;;  %v426_v43 = vsel %vm425_vm11, %v393_v27, 0.0 }
 0x12c   : > { %1157 = vadd.xlane.f32.xlu1 %v1156_v47  ;;  %v1168_v47 = vsel %vm425_vm11, %v1114_v46, 0.0 }
 0x12f   : > { %1551 = vadd.xlane.f32.xlu0 %v1550_v50  ;;  %v429_v50 = vsel %vm425_vm11, %v394_v44, 0.0 }
 0x130   : > { %1351 = vadd.xlane.f32.xlu1 %v1350_v53  ;;  %v1362_v53 = vsel %vm425_vm11, %v1310_v49, 0.0 }
 0x133   : > { %1360 = vadd.xlane.f32.xlu0 %v1359_v59  ;;  %v848_v59 = vsel %vm425_vm11, %v816_v51, 0.0 }
 0x134   : > { %1354 = vadd.xlane.f32.xlu1 %v1353_v62  ;;  %v1365_v62 = vsel %vm425_vm11, %v1311_v54, 0.0 }
 0x137   : > { %1166 = vadd.xlane.f32.xlu0 %v1165_v39  ;;  %v851_v39 = vsel %vm425_vm11, %v817_v61, 0.0 }
 0x138   : > { %1548 = vadd.xlane.f32.xlu1 %v1547_v24  ;;  %v1559_v24 = vsel %vm425_vm11, %v1507_v52, 0.0 }
 0x13b   : > { %1557 = vadd.xlane.f32.xlu0 %v1556_v37  ;;  %v641_v37 = vsel %vm425_vm11, %v605_v28, 0.0  ;;  %v1790_v28 = vmul.f32 %v10504_v33, %v10621_v48 }
 0x13c   : > { %1357 = vadd.xlane.f32.xlu1 %v1356_v36  ;;  %v604_v36 = vmul.f32 %v10522_v42, %v10547_v57 }
 0x13e   : > { %v638_v27 = vsel %vm425_vm11, %v604_v36, 0.0  ;;  %v2185_v36 = vmul.f32 %v10665_v29, %v10621_v48 }
 0x13f   : > { %1563 = vadd.xlane.f32.xlu0 %v1562_v41  ;;  %v818_v41 = vmul.f32 %v10665_v29, %v10547_v57 }
 0x140   : > { %1554 = vadd.xlane.f32.xlu1 %v1553_v18  ;;  %v395_v18 = vmul.f32 %v10652_v17, %v10547_v57 }
 0x141   : > { %v854_v46 = vsel %vm425_vm11, %v818_v41, 0.0  ;;  %v2184_v41 = vmul.f32 %v10598_v30, %v10621_v48 }
 0x142   : > { %v432_v44 = vsel %vm425_vm11, %v395_v18, 0.0  ;;  %v2186_v18 = vmul.f32 %v10700_v45, %v10621_v48 }
 0x143   : > { %427 = vadd.xlane.f32.xlu0 %v426_v43  ;;  %v1986_v43 = vmul.f32 %v10507_v34, %v10621_v48 }
 0x144   : > { %1169 = vadd.xlane.f32.xlu1 %v1168_v47  ;;  %v396_v47 = vmul.f32 %v10671_v31, %v10547_v57 }
 0x145   : > { %v2018_v49 = vsel %vm425_vm11, %v1986_v43, 0.0  ;;  %v1988_v43 = vmul.f32 %v10689_v14, %v10621_v48 }
 0x146   : > { %v435_v51 = vsel %vm425_vm11, %v396_v47, 0.0  ;;  %v1115_v47 = vmul.f32 %v10501_v32, %v10550_v60 }
 0x147   : > { %430 = vadd.xlane.f32.xlu0 %v429_v50  ;;  %v1987_v50 = vmul.f32 %v10522_v42, %v10621_v48 }
 0x148   : > { %1363 = vadd.xlane.f32.xlu1 %v1362_v53  ;;  %v819_v53 = vmul.f32 %v10700_v45, %v10547_v57 }
 0x149   : > { %v2021_v54 = vsel %vm425_vm11, %v1987_v50, 0.0  ;;  %v1312_v50 = vmul.f32 %v10507_v34, %v10550_v60 }
 0x14a   : > { %v857_v61 = vsel %vm425_vm11, %v819_v53, 0.0 }
 0x14b   : > { %849 = vadd.xlane.f32.xlu0 %v848_v59  ;;  %v1791_v59 = vmul.f32 %v10652_v17, %v10621_v48 }
 0x14c   : > { %1366 = vadd.xlane.f32.xlu1 %v1365_v62  ;;  %v1789_v62 = vmul.f32 %v10501_v32, %v10621_v48 }
 0x14d   : > { %v1827_v52 = vsel %vm425_vm11, %v1791_v59, 0.0  ;;  %v1116_v59 = vmul.f32 %v10504_v33, %v10550_v60 }
 0x14e   : > { %v1821_v57 = vsel %vm425_vm11, %v1789_v62, 0.0  ;;  %v397_v62 = vmul.f32 %v10501_v32, %v10554_v0 }
 0x14f   : > { %852 = vadd.xlane.f32.xlu0 %v851_v39  ;;  %v1792_v39 = vmul.f32 %v10671_v31, %v10621_v48  ;;  %v2634_v48 = vld [vmem:[%s14750_s1 + $0x8] sm:$0xff] }
 0x150   : > { %1560 = vadd.xlane.f32.xlu1 %v1559_v24 }
 0x151   : > { %v1830_v24 = vsel %vm425_vm11, %v1792_v39, 0.0  ;;  %v2636_v39 = vld [vmem:[%s14750_s1 + $0x18] sm:$0xff] }
 0x153   : > { %642 = vadd.xlane.f32.xlu0 %v641_v37  ;;  %v1824_v37 = vsel %vm425_vm11, %v1790_v28, 0.0  ;;  %v1174_v28 = vsel %vm425_vm11, %v1116_v59, 0.0 }
 0x154   : > { %636 = vadd.xlane.f32.xlu1 %v635_v25  ;;  %v2027_v25 = vsel %vm425_vm11, %v1989_v35, 0.0  ;;  %v438_v35 = vsel %vm425_vm11, %v397_v62, 0.0  ;;  %v399_v62 = vmul.f32 %v10652_v17, %v10554_v0 }
 0x157   : > { %645 = vadd.xlane.f32.xlu0 %v644_v40  ;;  %v2215_v40 = vsel %vm425_vm11, %v2183_v23, 0.0 }
 0x158   : > { %639 = vadd.xlane.f32.xlu1 %v638_v27  ;;  %v2221_v27 = vsel %vm425_vm11, %v2185_v36, 0.0 }
 0x15b   : > { %855 = vadd.xlane.f32.xlu0 %v854_v46  ;;  %v2218_v46 = vsel %vm425_vm11, %v2184_v41, 0.0 }
 0x15c   : > { %433 = vadd.xlane.f32.xlu1 %v432_v44  ;;  %v2224_v44 = vsel %vm425_vm11, %v2186_v18, 0.0  ;;  %v3078_v18 = vld [vmem:[%s14750_s1 + $0x20] sm:$0xff] }
 0x15f   : > { %2019 = vadd.xlane.f32.xlu0 %v2018_v49  ;;  %v2024_v49 = vsel %vm425_vm11, %v1988_v43, 0.0 }
 0x160   : > { %436 = vadd.xlane.f32.xlu1 %v435_v51  ;;  %v2633_v51 = vld [vmem:[%s14750_s1] sm:$0xff] }
 0x161   : > { %v10056_v53 = vpack.c.bf16 %v2634_v48, %v2633_v51  ;;  %v3080_v51 = vld [vmem:[%s14750_s1 + $0x30] sm:$0xff]  ;;  %v3081_v48 = vld [vmem:[%s14750_s1 + $0x38] sm:$0xff] }
 0x162   : > { %v10068_v59 = vpack.c.bf16 %v3081_v48, %v3080_v51 }
 0x163   : > { %2022 = vadd.xlane.f32.xlu0 %v2021_v54  ;;  %v1171_v54 = vsel %vm425_vm11, %v1115_v47, 0.0  ;;  %10057 = vmatprep.subr.bf16.mxu0 %v10056_v53 }
 0x164   : > { %858 = vadd.xlane.f32.xlu1 %v857_v61  ;;  %v1368_v61 = vsel %vm425_vm11, %v1312_v50, 0.0  ;;  %10059 = vmatpush3.bf16.msra.mxu0 %v10056_v53  ;;  %v821_v50 = vmul.f32 %v10598_v30, %v10554_v0 }
 0x165   : > { %10212 = vmatprep.subr.bf16.mxu1 %v10056_v53 }
 0x166   : > { %10214 = vmatpush3.bf16.msra.mxu1 %v10056_v53 }
 0x167   : > { %1828 = vadd.xlane.f32.xlu0 %v1827_v52  ;;  %v2635_v52 = vld [vmem:[%s14750_s1 + $0x10] sm:$0xff] }
 0x168   : > { %1822 = vadd.xlane.f32.xlu1 %v1821_v57  ;;  %v10060_v57 = vpack.c.bf16 %v2636_v39, %v2635_v52  ;;  %v401_v39 = vmul.f32 %v10501_v32, %v10557_v1 }
 0x16a   : > { %10061 = vmatprep.subr.bf16.mxu0 %v10060_v57  ;;  %10213 = vmatprep.subr.bf16.mxu1 %v10060_v57 }
 0x16b   : > { %1831 = vadd.xlane.f32.xlu0 %v1830_v24  ;;  %v607_v24 = vmul.f32 %v10507_v34, %v10554_v0  ;;  %10063 = vmatpush3.bf16.msra.mxu0 %v10060_v57 }
 0x16c   : > { %1825 = vadd.xlane.f32.xlu1 %v1824_v37  ;;  %v608_v37 = vmul.f32 %v10522_v42, %v10554_v0  ;;  %10215 = vmatpush3.bf16.msra.mxu1 %v10060_v57 }
 0x16d   : > { %v647_v23 = vsel %vm425_vm11, %v607_v24, 0.0  ;;  %v444_v24 = vsel %vm425_vm11, %v399_v62, 0.0 }
 0x16e   : > { %v650_v36 = vsel %vm425_vm11, %v608_v37, 0.0  ;;  %9470 = vmatmul.mubr.f32.vlgmr.msra.gmra.mrb[2].mxu0 %v14756_v4  ;;  %v450_v37 = vsel %vm425_vm11, %v401_v39, 0.0  ;;  %v1794_v39 = vmul.f32 %v10504_v33, %v10628_v55 }
 0x16f   : > { %2028 = vadd.xlane.f32.xlu0 %v2027_v25  ;;  %v398_v25 = vmul.f32 %v10504_v33, %v10554_v0  ;;  %9472 = vmatprep.mubr.f32.mxu0 %v14756_v4 }
 0x170   : > { %2216 = vadd.xlane.f32.xlu1 %v2215_v40  ;;  %v609_v40 = vmul.f32 %v10689_v14, %v10554_v0 }
 0x171   : > { %v441_v41 = vsel %vm425_vm11, %v398_v25, 0.0 }
 0x172   : > { %v653_v43 = vsel %vm425_vm11, %v609_v40, 0.0  ;;  %9473 = vmatmul.mubr.f32.gmra.mrb[4].mxu0 %v14756_v4 }
 0x173   : > { %2222 = vadd.xlane.f32.xlu0 %v2221_v27  ;;  %v820_v27 = vmul.f32 %v10606_v38, %v10554_v0  ;;  %9525 = vmatprep.mubr.f32.mxu0 %v14756_v4 }
 0x174   : > { %2219 = vadd.xlane.f32.xlu1 %v2218_v46  ;;  %v3079_v46 = vld [vmem:[%s14750_s1 + $0x28] sm:$0xff] }
 0x175   : > { %v10064_v47 = vpack.c.bf16 %v3079_v46, %v3078_v18  ;;  %v612_v18 = vmul.f32 %v10522_v42, %v10557_v1 }
 0x177   : > { %2225 = vadd.xlane.f32.xlu0 %v2224_v44  ;;  %v400_v44 = vmul.f32 %v10671_v31, %v10554_v0  ;;  %10065 = vmatprep.subr.bf16.mxu0 %v10064_v47 }
 0x178   : > { %2025 = vadd.xlane.f32.xlu1 %v2024_v49  ;;  %v860_v49 = vsel %vm425_vm11, %v820_v27, 0.0  ;;  %10067 = vmatpush3.bf16.msra.mxu0 %v10064_v47  ;;  %v662_v47 = vsel %vm425_vm11, %v612_v18, 0.0  ;;  %v403_v18 = vmul.f32 %v10652_v17, %v10557_v1 }
 0x179   : > { %v447_v53 = vsel %vm425_vm11, %v400_v44, 0.0  ;;  %10069 = vmatprep.subr.bf16.mxu0 %v10068_v59  ;;  %v402_v44 = vmul.f32 %v10504_v33, %v10557_v1 }
 0x17b   : > { %1172 = vadd.xlane.f32.xlu0 %v1171_v54  ;;  %v822_v54 = vmul.f32 %v10665_v29, %v10554_v0  ;;  %v453_v48 = vsel %vm425_vm11, %v402_v44, 0.0 }
 0x17c   : > { %1369 = vadd.xlane.f32.xlu1 %v1368_v61  ;;  %v863_v61 = vsel %vm425_vm11, %v821_v50, 0.0  ;;  %10071 = vmatpush3.bf16.msra.mxu0 %v10068_v59  ;;  %v825_v59 = vmul.f32 %v10598_v30, %v10557_v1 }
 0x17d   : > { %v866_v52 = vsel %vm425_vm11, %v822_v54, 0.0 }
 0x17f   : > { %1175 = vadd.xlane.f32.xlu0 %v1174_v28  ;;  %9526 = vmatmul.mubr.f32.vlgmr.msra.gmra.mrb[6].mxu0 %v14756_v4 }
 0x180   : > { %439 = vadd.xlane.f32.xlu1 %v438_v35  ;;  %v610_v35 = vmul.f32 %v10618_v19, %v10554_v0  ;;  %9528 = vmatprep.mubr.f32.mxu0 %v14756_v4 }
 0x182   : > { %v656_v40 = vsel %vm425_vm11, %v610_v35, 0.0  ;;  %v1990_v35 = vmul.f32 %v10507_v34, %v10628_v55 }
 0x183   : > { %648 = vadd.xlane.f32.xlu0 %v647_v23  ;;  %v823_v23 = vmul.f32 %v10700_v45, %v10554_v0  ;;  %9529 = vmatmul.mubr.f32.gmra.mrb[8].mxu0 %v14756_v4  ;;  %v1993_v4 = vmul.f32 %v10618_v19, %v10628_v55 }
 0x184   : > { %651 = vadd.xlane.f32.xlu1 %v650_v36 }
 0x185   : > { %v869_v27 = vsel %vm425_vm11, %v823_v23, 0.0 }
 0x187   : > { %442 = vadd.xlane.f32.xlu0 %v441_v41  ;;  %v611_v41 = vmul.f32 %v10507_v34, %v10557_v1 }
 0x188   : > { %654 = vadd.xlane.f32.xlu1 %v653_v43 }
 0x189   : > { %v659_v43 = vsel %vm425_vm11, %v611_v41, 0.0  ;;  %v613_v41 = vmul.f32 %v10689_v14, %v10557_v1 }
 0x18b   : > { %861 = vadd.xlane.f32.xlu0 %v860_v49  ;;  %v1793_v49 = vmul.f32 %v10501_v32, %v10628_v55 }
 0x18c   : > { %448 = vadd.xlane.f32.xlu1 %v447_v53  ;;  %v824_v53 = vmul.f32 %v10606_v38, %v10557_v1 }
 0x18d   : > { %v1833_v54 = vsel %vm425_vm11, %v1793_v49, 0.0  ;;  %v404_v49 = vmul.f32 %v10671_v31, %v10557_v1 }
 0x18f   : > { %864 = vadd.xlane.f32.xlu0 %v863_v61 }
 0x190   : > { %867 = vadd.xlane.f32.xlu1 %v866_v52  ;;  %v10921_v57 = vpop.xlane.xlu0 %1333  ;;  %v872_v52 = vsel %vm425_vm11, %v824_v53, 0.0  ;;  %v614_v53 = vmul.f32 %v10618_v19, %v10557_v1 }
 0x191   : > { %v10923_v28 = vpop.xlane.xlu1 %1136 }
 0x193   : > { %445 = vadd.xlane.f32.xlu0 %v444_v24  ;;  %v875_v24 = vsel %vm425_vm11, %v825_v59, 0.0 }
 0x194   : > { %451 = vadd.xlane.f32.xlu1 %v450_v37  ;;  %v10933_v25 = vpop.xlane.xlu0 %1336 }
 0x195   : > { %v10935_v36 = vpop.xlane.xlu1 %1139 }
 0x197   : > { %657 = vadd.xlane.f32.xlu0 %v656_v40  ;;  %v1836_v40 = vsel %vm425_vm11, %v1794_v39, 0.0  ;;  %v2187_v39 = vmul.f32 %v10606_v38, %v10628_v55 }
 0x198   : > { %870 = vadd.xlane.f32.xlu1 %v869_v27  ;;  %v10944_v0 = vpop.xlane.xlu0 %1533  ;;  %v2030_v27 = vsel %vm425_vm11, %v1990_v35, 0.0  ;;  %v1991_v35 = vmul.f32 %v10522_v42, %v10628_v55 }
 0x199   : > { %v10946_v46 = vpop.xlane.xlu1 %1530 }
 0x19b   : > { %660 = vadd.xlane.f32.xlu0 %v659_v43 }
 0x19c   : > { %663 = vadd.xlane.f32.xlu1 %v662_v47  ;;  %v10954_v50 = vpop.xlane.xlu0 %1342  ;;  %v665_v47 = vsel %vm425_vm11, %v613_v41, 0.0 }
 0x19d   : > { %v10956_v51 = vpop.xlane.xlu1 %1142 }
 0x19f   : > { %454 = vadd.xlane.f32.xlu0 %v453_v48  ;;  %v456_v48 = vsel %vm425_vm11, %v403_v18, 0.0  ;;  %v1795_v18 = vmul.f32 %v10652_v17, %v10628_v55 }
 0x1a0   : > { %1834 = vadd.xlane.f32.xlu1 %v1833_v54  ;;  %v10964_v61 = vpop.xlane.xlu0 %1536 }
 0x1a1   : > { %v10966_v62 = vpop.xlane.xlu1 %1145 }
 0x1a3   : > { %873 = vadd.xlane.f32.xlu0 %v872_v52  ;;  %v459_v52 = vsel %vm425_vm11, %v404_v49, 0.0  ;;  %v826_v49 = vmul.f32 %v10665_v29, %v10557_v1 }
 0x1a4   : > { %876 = vadd.xlane.f32.xlu1 %v875_v24  ;;  %v10974_v37 = vpop.xlane.xlu0 %1345  ;;  %v668_v24 = vsel %vm425_vm11, %v614_v53, 0.0 }
 0x1a5   : > { %v10976_v23 = vpop.xlane.xlu1 %1339 }
 0x1a7   : > { %1837 = vadd.xlane.f32.xlu0 %v1836_v40 }
 0x1a8   : > { %2031 = vadd.xlane.f32.xlu1 %v2030_v27  ;;  %v10984_v43 = vpop.xlane.xlu0 %1348  ;;  %v2227_v27 = vsel %vm425_vm11, %v2187_v39, 0.0  ;;  %v878_v39 = vsel %vm425_vm11, %v826_v49, 0.0 }
 0x1a9   : > { %v10986_v44 = vpop.xlane.xlu1 %1539 }
 0x1ab   : > { %666 = vadd.xlane.f32.xlu0 %v665_v47  ;;  %v2033_v47 = vsel %vm425_vm11, %v1991_v35, 0.0 }
 0x1ac   : > { %457 = vadd.xlane.f32.xlu1 %v456_v48  ;;  %v10994_v54 = vpop.xlane.xlu0 %1154 }
 0x1ad   : > { %14836 = vst [vmem:[#allocation24_spill] sm:$0xff] %v10994_v54  ;;  %v10996_v59 = vpop.xlane.xlu1 %1148 }
 0x1af   : > { %460 = vadd.xlane.f32.xlu0 %v459_v52  ;;  %v1839_v52 = vsel %vm425_vm11, %v1795_v18, 0.0 }
 0x1b0   : > { %669 = vadd.xlane.f32.xlu1 %v668_v24  ;;  %v11004_v40 = vpop.xlane.xlu0 %1545  ;;  %v1796_v24 = vmul.f32 %v10671_v31, %v10628_v55 }
 0x1b1   : > { %14837 = vst [vmem:[#allocation25_spill] sm:$0xff] %v11004_v40  ;;  %v11006_v41 = vpop.xlane.xlu1 %1151 }
 0x1b3   : > { %2228 = vadd.xlane.f32.xlu0 %v2227_v27  ;;  %v827_v27 = vmul.f32 %v10700_v45, %v10557_v1 }
 0x1b4   : > { %2034 = vadd.xlane.f32.xlu1 %v2033_v47  ;;  %v11014_v48 = vpop.xlane.xlu0 %1160  ;;  %v1842_v47 = vsel %vm425_vm11, %v1796_v24, 0.0 }
 0x1b5   : > { %14838 = vst [vmem:[#allocation26_spill] sm:$0xff] %v11014_v48  ;;  %v11016_v53 = vpop.xlane.xlu1 %1542  ;;  %v881_v18 = vsel %vm425_vm11, %v827_v27, 0.0 }
 0x1b7   : > { %1840 = vadd.xlane.f32.xlu0 %v1839_v52  ;;  %v2188_v52 = vmul.f32 %v10598_v30, %v10628_v55 }
 0x1b8   : > { %879 = vadd.xlane.f32.xlu1 %v878_v39  ;;  %v11024_v35 = vpop.xlane.xlu0 %1163  ;;  %v2039_v39 = vsel %vm425_vm11, %v1993_v4, 0.0 }
 0x1b9   : > { %14839 = vst [vmem:[#allocation27_spill] sm:$0xff] %v11024_v35  ;;  %v11026_v2 = vpop.xlane.xlu1 %1157  ;;  %v2230_v24 = vsel %vm425_vm11, %v2188_v52, 0.0  ;;  %v618_v35 = vmul.f32 %v10618_v19, %v10571_v9 }
 0x1ba   : > { %14840 = vst [vmem:[#allocation28_spill] sm:$0xff] %v11026_v2 }
 0x1bb   : > { %1843 = vadd.xlane.f32.xlu0 %v1842_v47  ;;  %v1992_v47 = vmul.f32 %v10689_v14, %v10628_v55  ;;  %v1995_v55 = vmul.f32 %v10522_v42, %v10631_v56 }
 0x1bc   : > { %882 = vadd.xlane.f32.xlu1 %v881_v18  ;;  %v11034_v49 = vpop.xlane.xlu0 %1551  ;;  %v2233_v18 = vsel %vm425_vm11, %v2189_v15, 0.0 }
 0x1bd   : > { %14841 = vst [vmem:[#allocation29_spill] sm:$0xff] %v11034_v49  ;;  %v11036_v1 = vpop.xlane.xlu1 %1351  ;;  %v2036_v4 = vsel %vm425_vm11, %v1992_v47, 0.0 }
 0x1be   : > { %14842 = vst [vmem:[#allocation30_spill] sm:$0xff] %v11036_v1 }
 0x1bf   : > { %2040 = vadd.xlane.f32.xlu0 %v2039_v39  ;;  %v1797_v39 = vmul.f32 %v10501_v32, %v10631_v56 }
 0x1c0   : > { %2231 = vadd.xlane.f32.xlu1 %v2230_v24  ;;  %v11044_v27 = vpop.xlane.xlu0 %1360  ;;  %v1848_v24 = vsel %vm425_vm11, %v1798_v8, 0.0 }
 0x1c1   : > { %14843 = vst [vmem:[#allocation31_spill] sm:$0xff] %v11044_v27  ;;  %v11046_v26 = vpop.xlane.xlu1 %1354  ;;  %v1845_v15 = vsel %vm425_vm11, %v1797_v39, 0.0 }
 0x1c2   : > { %14844 = vst [vmem:[#allocation32_spill] sm:$0xff] %v11046_v26 }
 0x1c3   : > { %2234 = vadd.xlane.f32.xlu0 %v2233_v18  ;;  %v1994_v18 = vmul.f32 %v10507_v34, %v10631_v56 }
 0x1c4   : > { %2037 = vadd.xlane.f32.xlu1 %v2036_v4  ;;  %v11054_v52 = vpop.xlane.xlu0 %1166  ;;  %v2236_v4 = vsel %vm425_vm11, %v2190_v21, 0.0  ;;  %v2045_v21 = vsel %vm425_vm11, %v1995_v55, 0.0 }
 0x1c5   : > { %14845 = vst [vmem:[#allocation33_spill] sm:$0xff] %v11054_v52  ;;  %v11056_v12 = vpop.xlane.xlu1 %1548  ;;  %v2042_v8 = vsel %vm425_vm11, %v1994_v18, 0.0 }
 0x1c6   : > { %14846 = vst [vmem:[#allocation34_spill] sm:$0xff] %v11056_v12  ;;  %v680_v12 = vsel %vm425_vm11, %v618_v35, 0.0 }
 0x1c7   : > { %1849 = vadd.xlane.f32.xlu0 %v1848_v24 }
 0x1c8   : > { %1846 = vadd.xlane.f32.xlu1 %v1845_v15  ;;  %v11064_v47 = vpop.xlane.xlu0 %1557  ;;  %v1228_v15 = vsel %vm425_vm11, %v1134_v11, 0.0 }
 0x1c9   : > { %14847 = vst [vmem:[#allocation35_spill] sm:$0xff] %v11064_v47  ;;  %v11066_v13 = vpop.xlane.xlu1 %1357 }
 0x1ca   : > { %14848 = vst [vmem:[#allocation36_spill] sm:$0xff] %v11066_v13 }
 0x1cb   : > { %2237 = vadd.xlane.f32.xlu0 %v2236_v4  ;;  %v1331_v4 = vmul.f32 %v10618_v19, %v10583_v16  ;;  %v406_v16 = vmul.f32 %v10504_v33, %v10571_v9 }
 0x1cc   : > { %2043 = vadd.xlane.f32.xlu1 %v2042_v8  ;;  %v11074_v39 = vpop.xlane.xlu0 %1563  ;;  %v1622_v8 = vsel %vm425_vm11, %v1528_v6, 0.0 }
 0x1cd   : > { %14849 = vst [vmem:[#allocation37_spill] sm:$0xff] %v11074_v39  ;;  %v11076_v24 = vpop.xlane.xlu1 %1554  ;;  %v615_v39 = vmul.f32 %v10507_v34, %v10571_v9  ;;  %v1425_v11 = vsel %vm425_vm11, %v1331_v4, 0.0 }
 0x1ce   : > { %14850 = vst [vmem:[#allocation38_spill] sm:$0xff] %v11076_v24 }
 0x1cf   : > { %1229 = vadd.xlane.f32.xlu0 %v1228_v15  ;;  %v405_v15 = vmul.f32 %v10501_v32, %v10571_v9 }
 0x1d0   : > { %2046 = vadd.xlane.f32.xlu1 %v2045_v21  ;;  %v428_v18 = vpop.xlane.xlu0 %427  ;;  %v671_v21 = vsel %vm425_vm11, %v615_v39, 0.0 }
 0x1d1   : > { %v11084_v58 = vpop.xlane.xlu1 %1169  ;;  %v462_v6 = vsel %vm425_vm11, %v405_v15, 0.0 }
 0x1d2   : > { %14851 = vst [vmem:[#allocation39_spill] sm:$0xff] %v11084_v58 }
 0x1d3   : > { %1623 = vadd.xlane.f32.xlu0 %v1622_v8  ;;  %v616_v8 = vmul.f32 %v10522_v42, %v10571_v9 }
 0x1d4   : > { %1426 = vadd.xlane.f32.xlu1 %v1425_v11  ;;  %v431_v55 = vpop.xlane.xlu0 %430  ;;  %v465_v11 = vsel %vm425_vm11, %v406_v16, 0.0  ;;  %v11116_v16 = vld [vmem:[%s14752_s3] ss:$0 sm:$0xff] }
 0x1d5   : > { %v11092_v52 = vpop.xlane.xlu1 %1363  ;;  %v674_v39 = vsel %vm425_vm11, %v616_v8, 0.0 }
 0x1d6   : > { %14852 = vst [vmem:[#allocation40_spill] sm:$0xff] %v11092_v52  ;;  %v828_v52 = vmul.f32 %v10606_v38, %v10571_v9 }
 0x1d7   : > { %672 = vadd.xlane.f32.xlu0 %v671_v21  ;;  %v829_v21 = vmul.f32 %v10598_v30, %v10571_v9 }
 0x1d8   : > { %463 = vadd.xlane.f32.xlu1 %v462_v6  ;;  %v850_v4 = vpop.xlane.xlu0 %849  ;;  %v884_v6 = vsel %vm425_vm11, %v828_v52, 0.0 }
 0x1d9   : > { %v11100_v58 = vpop.xlane.xlu1 %1366  ;;  %v887_v8 = vsel %vm425_vm11, %v829_v21, 0.0  ;;  %v527_v21 = vmul.f32 %v11116_v16, %v428_v18 }
 0x1da   : > { %14853 = vst [vmem:[#allocation41_spill] sm:$0xff] %v11100_v58  ;;  %v617_v58 = vmul.f32 %v10689_v14, %v10571_v9 }
 0x1db   : > { %466 = vadd.xlane.f32.xlu0 %v465_v11  ;;  %v11122_v11 = vld [vmem:[%s14752_s3 + $0x1] ss:$0 sm:$0xff] }
 0x1dc   : > { %675 = vadd.xlane.f32.xlu1 %v674_v39  ;;  %v853_v15 = vpop.xlane.xlu0 %852  ;;  %v407_v39 = vmul.f32 %v10652_v17, %v10571_v9  ;;  %v677_v27 = vsel %vm425_vm11, %v617_v58, 0.0  ;;  %v11148_v58 = vld [vmem:[%s14752_s3 + $0x4] ss:$0 sm:$0xff] }
 0x1dd   : > { %v11108_v10 = vpop.xlane.xlu1 %1560  ;;  %v1433_v2 = vmul.f32 %v11148_v58, %v10921_v57 }
 0x1de   : > { %14854 = vst [vmem:[#allocation42_spill] sm:$0xff] %v11108_v10  ;;  %v11129_v10 = vld [vmem:[%s14752_s3 + $0x2] ss:$0 sm:$0xff]  ;;  %v468_v13 = vsel %vm425_vm11, %v407_v39, 0.0 }
 0x1df   : > { %885 = vadd.xlane.f32.xlu0 %v884_v6  ;;  %v408_v6 = vmul.f32 %v10671_v31, %v10571_v9  ;;  %v949_v48 = vmul.f32 %v11129_v10, %v850_v4 }
 0x1e0   : > { %888 = vadd.xlane.f32.xlu1 %v887_v8  ;;  %v643_v52 = vpop.xlane.xlu0 %642  ;;  %v11139_v8 = vld [vmem:[%s14752_s3 + $0x3] ss:$0 sm:$0xff] }
 0x1e1   : > { %v637_v47 = vpop.xlane.xlu1 %636  ;;  %v471_v26 = vsel %vm425_vm11, %v408_v6, 0.0  ;;  %v1236_v39 = vmul.f32 %v11139_v8, %v10923_v28  ;;  %v634_v6 = vmul.f32 %v10618_v19, %v10587_v22  ;;  %v950_v28 = vmul.f32 %v11129_v10, %v853_v15 }
 0x1e2   : > { %v736_v24 = vmul.f32 %v11122_v11, %v637_v47  ;;  %v738_v57 = vmul.f32 %v11122_v11, %v643_v52 }
 0x1e3   : > { %678 = vadd.xlane.f32.xlu0 %v677_v27  ;;  %v424_v27 = vmul.f32 %v10671_v31, %v10587_v22 }
 0x1e4   : > { %v768_v49 = vadd.f32 %v736_v24, %v527_v21  ;;  %469 = vadd.xlane.f32.xlu1 %v468_v13  ;;  %v646_v18 = vpop.xlane.xlu0 %645  ;;  %v11158_v24 = vld [vmem:[%s14752_s3 + $0x5] ss:$0 sm:$0xff]  ;;  %v528_v13 = vmul.f32 %v11116_v16, %v431_v55  ;;  %v1820_v55 = vmul.f32 %v10671_v31, %v10659_v20 }
 0x1e5   : > { %v640_v47 = vpop.xlane.xlu1 %639  ;;  %v519_v35 = vsel %vm425_vm11, %v424_v27, 0.0 }
 0x1e6   : > { %v981_v4 = vadd.f32 %v949_v48, %v768_v49  ;;  %v737_v21 = vmul.f32 %v11122_v11, %v640_v47  ;;  %v1237_v48 = vmul.f32 %v11139_v8, %v10935_v36  ;;  %v728_v36 = vsel %vm425_vm11, %v634_v6, 0.0 }
 0x1e7   : > { %472 = vadd.xlane.f32.xlu0 %v471_v26  ;;  %v1630_v26 = vmul.f32 %v11158_v24, %v10946_v46  ;;  %v847_v46 = vmul.f32 %v10700_v45, %v10587_v22  ;;  %v1238_v6 = vmul.f32 %v11139_v8, %v10956_v51 }
 0x1e8   : > { %v1268_v1 = vadd.f32 %v1236_v39, %v981_v4  ;;  %v769_v54 = vadd.f32 %v737_v21, %v528_v13  ;;  %681 = vadd.xlane.f32.xlu1 %v680_v12  ;;  %v856_v40 = vpop.xlane.xlu0 %855  ;;  %v1434_v12 = vmul.f32 %v11148_v58, %v10933_v25  ;;  %v2214_v25 = vmul.f32 %v10700_v45, %v10659_v20 }
 0x1e9   : > { %v434_v49 = vpop.xlane.xlu1 %433  ;;  %v951_v4 = vmul.f32 %v11129_v10, %v856_v40  ;;  %v941_v40 = vsel %vm425_vm11, %v847_v46, 0.0 }
 0x1ea   : > { %v982_v47 = vadd.f32 %v950_v28, %v769_v54  ;;  %v529_v15 = vmul.f32 %v11116_v16, %v434_v49  ;;  %v1465_v39 = vadd.f32 %v1433_v2, %v1268_v1  ;;  %v1631_v54 = vmul.f32 %v11158_v24, %v10944_v0 }
 0x1eb   : > { %520 = vadd.xlane.f32.xlu0 %v519_v35  ;;  %v1914_v1 = vsel %vm425_vm11, %v1820_v55, 0.0  ;;  %v1435_v0 = vmul.f32 %v11148_v58, %v10976_v23  ;;  %v739_v35 = vmul.f32 %v11122_v11, %v646_v18  ;;  %v11207_v18 = vld [vmem:[%s14752_s3 + $0x6] ss:$0 sm:$0xff] }
 0x1ec   : > { %v1269_v13 = vadd.f32 %v1237_v48, %v982_v47  ;;  %v770_v27 = vadd.f32 %v738_v57, %v529_v15  ;;  %729 = vadd.xlane.f32.xlu1 %v728_v36  ;;  %v2020_v21 = vpop.xlane.xlu0 %2019  ;;  %v1662_v52 = vadd.f32 %v1630_v26, %v1465_v39  ;;  %v2017_v26 = vmul.f32 %v10618_v19, %v10659_v20 }
 0x1ed   : > { %v437_v2 = vpop.xlane.xlu1 %436  ;;  %v2308_v15 = vsel %vm425_vm11, %v2214_v25, 0.0  ;;  %v2191_v39 = vmul.f32 %v10606_v38, %v10631_v56  ;;  %v1799_v25 = vmul.f32 %v10652_v17, %v10631_v56 }
 0x1ee   : > { %v983_v28 = vadd.f32 %v951_v4, %v770_v27  ;;  %v530_v48 = vmul.f32 %v11116_v16, %v437_v2  ;;  %v1466_v49 = vadd.f32 %v1434_v12, %v1269_v13  ;;  %v1632_v12 = vmul.f32 %v11158_v24, %v10964_v61 }
 0x1ef   : > { %1915 = vadd.xlane.f32.xlu0 %v1914_v1  ;;  %v2111_v23 = vsel %vm425_vm11, %v2017_v26, 0.0  ;;  %v830_v27 = vmul.f32 %v10665_v29, %v10571_v9  ;;  %v1239_v4 = vmul.f32 %v11139_v8, %v10966_v62  ;;  %v409_v62 = vmul.f32 %v10501_v32, %v10560_v3 }
 0x1f0   : > { %v1270_v55 = vadd.f32 %v1238_v6, %v983_v28  ;;  %942 = vadd.xlane.f32.xlu1 %v941_v40  ;;  %v2023_v57 = vpop.xlane.xlu0 %2022  ;;  %v1663_v47 = vadd.f32 %v1631_v54, %v1466_v49  ;;  %v771_v36 = vadd.f32 %v739_v35, %v530_v48  ;;  %v1436_v6 = vmul.f32 %v11148_v58, %v10954_v50  ;;  %v11229_v50 = vld [vmem:[%s14752_s3 + $0x7] ss:$0 sm:$0xff] }
 0x1f1   : > { %v859_v51 = vpop.xlane.xlu1 %858  ;;  %v2239_v49 = vsel %vm425_vm11, %v2191_v39, 0.0  ;;  %v890_v40 = vsel %vm425_vm11, %v830_v27, 0.0  ;;  %v1633_v26 = vmul.f32 %v11158_v24, %v10986_v44  ;;  %v474_v44 = vsel %vm425_vm11, %v409_v62, 0.0 }
 0x1f2   : > { %v952_v46 = vmul.f32 %v11129_v10, %v859_v51  ;;  %v1467_v13 = vadd.f32 %v1435_v0, %v1270_v55  ;;  %v1851_v51 = vsel %vm425_vm11, %v1799_v25, 0.0 }
 0x1f3   : > { %2309 = vadd.xlane.f32.xlu0 %v2308_v15 }
 0x1f4   : > { %v984_v54 = vadd.f32 %v952_v46, %v771_v36  ;;  %2112 = vadd.xlane.f32.xlu1 %v2111_v23  ;;  %v11213_v61 = vadd.f32 %v1632_v12, %v1467_v13  ;;  %v1829_v2 = vpop.xlane.xlu0 %1828  ;;  %v619_v36 = vmul.f32 %v10507_v34, %v10560_v3  ;;  %v11239_v46 = vld [vmem:[%s14752_s3 + $0x8] ss:$0 sm:$0xff]  ;;  %v831_v13 = vmul.f32 %v10700_v45, %v10571_v9  ;;  %v11252_v9 = vld [vmem:[%s14752_s3 + $0x9] ss:$0 sm:$0xff] }
 0x1f5   : > { %v1823_v1 = vpop.xlane.xlu1 %1822  ;;  %v2119_v23 = vmul.f32 %v11229_v50, %v2020_v21 }
 0x1f6   : > { %v1271_v28 = vadd.f32 %v1239_v4, %v984_v54  ;;  %v1922_v48 = vmul.f32 %v11207_v18, %v1823_v1  ;;  %v1313_v4 = vmul.f32 %v10522_v42, %v10550_v60  ;;  %v893_v21 = vsel %vm425_vm11, %v831_v13, 0.0 }
 0x1f7   : > { %2240 = vadd.xlane.f32.xlu0 %v2239_v49 }
 0x1f8   : > { %891 = vadd.xlane.f32.xlu1 %v890_v40  ;;  %v1468_v0 = vadd.f32 %v1436_v6, %v1271_v28  ;;  %v1832_v35 = vpop.xlane.xlu0 %1831  ;;  %v1954_v15 = vadd.f32 %v1922_v48, %v1662_v52  ;;  %v683_v6 = vsel %vm425_vm11, %v619_v36, 0.0  ;;  %v1509_v48 = vmul.f32 %v10606_v38, %v10550_v60 }
 0x1f9   : > { %v1826_v55 = vpop.xlane.xlu1 %1825  ;;  %v1925_v28 = vmul.f32 %v11207_v18, %v1832_v35  ;;  %v1800_v35 = vmul.f32 %v10671_v31, %v10631_v56 }
 0x1fa   : > { %v1923_v39 = vmul.f32 %v11207_v18, %v1826_v55  ;;  %v1665_v12 = vadd.f32 %v1633_v26, %v1468_v0  ;;  %v2151_v1 = vadd.f32 %v2119_v23, %v1954_v15  ;;  %v1371_v0 = vsel %vm425_vm11, %v1313_v4, 0.0 }
 0x1fb   : > { %1852 = vadd.xlane.f32.xlu0 %v1851_v51  ;;  %v1924_v55 = vmul.f32 %v11207_v18, %v1829_v2 }
 0x1fc   : > { %475 = vadd.xlane.f32.xlu1 %v474_v44  ;;  %v2029_v52 = vpop.xlane.xlu0 %2028  ;;  %v1955_v54 = vadd.f32 %v1923_v39, %v1663_v47  ;;  %v2120_v47 = vmul.f32 %v11229_v50, %v2023_v57  ;;  %v1957_v36 = vadd.f32 %v1925_v28, %v1665_v12  ;;  %v1565_v57 = vsel %vm425_vm11, %v1509_v48, 0.0 }
 0x1fd   : > { %v2217_v27 = vpop.xlane.xlu1 %2216  ;;  %v2122_v62 = vmul.f32 %v11229_v50, %v2029_v52  ;;  %v2192_v44 = vmul.f32 %v10598_v30, %v10631_v56  ;;  %v1996_v48 = vmul.f32 %v10689_v14, %v10631_v56 }
 0x1fe   : > { %v2316_v25 = vmul.f32 %v11239_v46, %v2217_v27  ;;  %v2152_v15 = vadd.f32 %v2120_v47, %v1955_v54  ;;  %v1117_v54 = vmul.f32 %v10652_v17, %v10550_v60 }
 0x1ff   : > { %684 = vadd.xlane.f32.xlu0 %v683_v6  ;;  %v2154_v27 = vadd.f32 %v2122_v62, %v1957_v36  ;;  %v1854_v6 = vsel %vm425_vm11, %v1800_v35, 0.0 }
 0x200   : > { %v2348_v49 = vadd.f32 %v2316_v25, %v2151_v1  ;;  %894 = vadd.xlane.f32.xlu1 %v893_v21  ;;  %v2223_v40 = vpop.xlane.xlu0 %2222  ;;  %v1956_v1 = vadd.f32 %v1924_v55, %v11213_v61  ;;  %v2242_v21 = vsel %vm425_vm11, %v2192_v44, 0.0  ;;  %v1177_v55 = vsel %vm425_vm11, %v1117_v54, 0.0 }
 0x201   : > { %v2220_v26 = vpop.xlane.xlu1 %2219 }
 0x202   : > { %v2385_v51 = vadd.f32 %v11252_v9, %v2348_v49  ;;  %v2317_v39 = vmul.f32 %v11239_v46, %v2220_v26  ;;  %v2318_v49 = vmul.f32 %v11239_v46, %v2223_v40  ;;  %v620_v40 = vmul.f32 %v10522_v42, %v10560_v3 }
 0x203   : > { %1372 = vadd.xlane.f32.xlu0 %v1371_v0 }
 0x204   : > { %v2417_v13 = vmax.f32 %v2385_v51, 0.0  ;;  %v2349_v23 = vadd.f32 %v2317_v39, %v2152_v15  ;;  %1566 = vadd.xlane.f32.xlu1 %v1565_v57  ;;  %v2226_v52 = vpop.xlane.xlu0 %2225  ;;  %v410_v51 = vmul.f32 %v10504_v33, %v10560_v3  ;;  %v2048_v39 = vsel %vm425_vm11, %v1996_v48, 0.0 }
 0x205   : > { %v2026_v4 = vpop.xlane.xlu1 %2025  ;;  %v2319_v2 = vmul.f32 %v11239_v46, %v2226_v52 }
 0x206   : > { %2449 = vst.msk [vmem:[#allocation2] sm:$0xff] %vm425_vm11, %v2417_v13  ;;  %v2386_v12 = vadd.f32 %v11252_v9, %v2349_v23  ;;  %v2121_v25 = vmul.f32 %v11229_v50, %v2026_v4  ;;  %v477_v52 = vsel %vm425_vm11, %v410_v51, 0.0  ;;  %v686_v4 = vsel %vm425_vm11, %v620_v40, 0.0 }
 0x207   : > { %v2351_v28 = vadd.f32 %v2319_v2, %v2154_v27  ;;  %1855 = vadd.xlane.f32.xlu0 %v1854_v6  ;;  %v832_v27 = vmul.f32 %v10606_v38, %v10560_v3  ;;  %v1118_v2 = vmul.f32 %v10671_v31, %v10550_v60  ;;  %v1510_v6 = vmul.f32 %v10598_v30, %v10550_v60 }
 0x208   : > { %v2418_v47 = vmax.f32 %v2386_v12, 0.0  ;;  %v2153_v62 = vadd.f32 %v2121_v25, %v1956_v1  ;;  %2243 = vadd.xlane.f32.xlu1 %v2242_v21  ;;  %v11280_v61 = vpop.xlane.xlu0 %1172 }
 0x209   : > { %v2388_v26 = vadd.f32 %v11252_v9, %v2351_v28  ;;  %v11283_v0 = vpop.xlane.xlu1 %1369  ;;  %v896_v25 = vsel %vm425_vm11, %v832_v27, 0.0  ;;  %v1180_v48 = vsel %vm425_vm11, %v1118_v2, 0.0  ;;  %v1568_v51 = vsel %vm425_vm11, %v1510_v6, 0.0 }
 0x20a   : > { %2450 = vst.msk [vmem:[#allocation2 + $0x8] sm:$0xff] %vm425_vm11, %v2418_v47  ;;  %v2350_v35 = vadd.f32 %v2318_v49, %v2153_v62  ;;  %v1801_v47 = vmul.f32 %v10501_v32, %v10640_v63 }
 0x20b   : > { %v2420_v15 = vmax.f32 %v2388_v26, 0.0  ;;  %1178 = vadd.xlane.f32.xlu0 %v1177_v55 }
 0x20c   : > { %v2387_v36 = vadd.f32 %v11252_v9, %v2350_v35  ;;  %2049 = vadd.xlane.f32.xlu1 %v2048_v39  ;;  %v11293_v57 = vpop.xlane.xlu0 %1175 }
 0x20d   : > { %2452 = vst.msk [vmem:[#allocation2 + $0x18] sm:$0xff] %vm425_vm11, %v2420_v15  ;;  %v440_v44 = vpop.xlane.xlu1 %439  ;;  %v11296_v13 = vld [vmem:[#allocation2] sm:$0xff]  ;;  %v1997_v15 = vmul.f32 %v10618_v19, %v10631_v56 }
 0x20e   : > { %v2419_v23 = vmax.f32 %v2387_v36, 0.0  ;;  %9531 = vmatprep.mubr.msk.f32.mxu0 %vm425_vm11, %v11296_v13  ;;  %v14773_v28 = vrot.slane %v11296_v13, 7  ;;  %v531_v39 = vmul.f32 %v11116_v16, %v440_v44  ;;  %v1857_v36 = vsel %vm425_vm11, %v1801_v47, 0.0 }
 0x20f   : > { %478 = vadd.xlane.f32.xlu0 %v477_v52  ;;  %v2051_v6 = vsel %vm425_vm11, %v1997_v15, 0.0 }
 0x210   : > { %2451 = vst.msk [vmem:[#allocation2 + $0x10] sm:$0xff] %vm425_vm11, %v2419_v23  ;;  %687 = vadd.xlane.f32.xlu1 %v686_v4  ;;  %v649_v54 = vpop.xlane.xlu0 %648  ;;  %v1314_v23 = vmul.f32 %v10689_v14, %v10550_v60 }
 0x211   : > { %v652_v1 = vpop.xlane.xlu1 %651  ;;  %v2991_v12 = vld [vmem:[#allocation2 + $0x8] sm:$0xff]  ;;  %v740_v26 = vmul.f32 %v11122_v11, %v649_v54 }
 0x212   : > { %9532 = vmatmul.mubr.msk.f32.gmra.mrb[10].mxu0 %vm425_vm11, %v2991_v12  ;;  %v2514_v21 = vrot.slane %v2991_v12, 7  ;;  %v1374_v15 = vsel %vm425_vm11, %v1314_v23, 0.0  ;;  %v1119_v23 = vmul.f32 %v10501_v32, %v10565_v5 }
 0x213   : > { %897 = vadd.xlane.f32.xlu0 %v896_v25  ;;  %v772_v2 = vadd.f32 %v740_v26, %v531_v39  ;;  %v833_v25 = vmul.f32 %v10598_v30, %v10560_v3  ;;  %v1240_v26 = vmul.f32 %v11139_v8, %v10996_v59 }
 0x214   : > { %1181 = vadd.xlane.f32.xlu1 %v1180_v48  ;;  %v443_v49 = vpop.xlane.xlu0 %442  ;;  %v11320_v62 = vsel %vm2545_vm3, %v14773_v28, %v2514_v21  ;;  %v11323_v55 = vld [vmem:[#allocation2 + $0x18] sm:$0xff]  ;;  %v2193_v48 = vmul.f32 %v10665_v29, %v10631_v56 }
 0x215   : > { %v655_v35 = vpop.xlane.xlu1 %654  ;;  %v14774_v4 = vrot.slane %v11323_v55, 7  ;;  %v532_v54 = vmul.f32 %v11116_v16, %v443_v49 }
 0x216   : > { %v2245_v59 = vsel %vm425_vm11, %v2193_v48, 0.0  ;;  %v742_v48 = vmul.f32 %v11122_v11, %v655_v35 }
 0x217   : > { %v2992_v40 = vld [vmem:[#allocation2 + $0x10] sm:$0xff]  ;;  %1569 = vadd.xlane.f32.xlu0 %v1568_v51  ;;  %v741_v51 = vmul.f32 %v11122_v11, %v652_v1  ;;  %v1315_v1 = vmul.f32 %v10618_v19, %v10550_v60 }
 0x218   : > { %9534 = vmatprep.mubr.msk.f32.mxu0 %vm425_vm11, %v2992_v40  ;;  %1858 = vadd.xlane.f32.xlu1 %v1857_v36  ;;  %v862_v52 = vpop.xlane.xlu0 %861  ;;  %v2515_v27 = vrot.slane %v2992_v40, 7 }
 0x219   : > { %9535 = vmatmul.mubr.msk.f32.gmra.mrb[12].mxu0 %vm425_vm11, %v11323_v55  ;;  %v953_v44 = vmul.f32 %v11129_v10, %v862_v52  ;;  %v449_v12 = vpop.xlane.xlu1 %448  ;;  %v773_v36 = vadd.f32 %v741_v51, %v532_v54 }
 0x21a   : > { %v11345_v47 = vsel %vm2545_vm3, %v2514_v21, %v2515_v27  ;;  %v11351_v49 = vsel %vm2545_vm3, %v2515_v27, %v14774_v4  ;;  %v1437_v21 = vmul.f32 %v11148_v58, %v10974_v37  ;;  %v899_v4 = vsel %vm425_vm11, %v833_v25, 0.0 }
 0x21b   : > { %v985_v39 = vadd.f32 %v953_v44, %v772_v2  ;;  %2052 = vadd.xlane.f32.xlu0 %v2051_v6  ;;  %v1241_v2 = vmul.f32 %v11139_v8, %v11006_v41  ;;  %v1634_v37 = vmul.f32 %v11158_v24, %v11016_v53  ;;  %v1438_v25 = vmul.f32 %v11148_v58, %v10984_v43 }
 0x21c   : > { %1375 = vadd.xlane.f32.xlu1 %v1374_v15  ;;  %v865_v40 = vpop.xlane.xlu0 %864  ;;  %v1377_v41 = vsel %vm425_vm11, %v1315_v1, 0.0  ;;  %v1183_v53 = vsel %vm425_vm11, %v1119_v23, 0.0  ;;  %v1802_v43 = vmul.f32 %v10504_v33, %v10640_v63  ;;  %v534_v23 = vmul.f32 %v11116_v16, %v449_v12 }
 0x21d   : > { %v1272_v52 = vadd.f32 %v1240_v26, %v985_v39  ;;  %v954_v28 = vmul.f32 %v11129_v10, %v865_v40  ;;  %v868_v27 = vpop.xlane.xlu1 %867 }
 0x21e   : > { %v955_v35 = vmul.f32 %v11129_v10, %v868_v27  ;;  %v1860_v27 = vsel %vm425_vm11, %v1802_v43, 0.0 }
 0x21f   : > { %v986_v54 = vadd.f32 %v954_v28, %v773_v36  ;;  %2246 = vadd.xlane.f32.xlu0 %v2245_v59  ;;  %v1469_v44 = vadd.f32 %v1437_v21, %v1272_v52  ;;  %v1998_v28 = vmul.f32 %v10507_v34, %v10640_v63  ;;  %v14856_v52 = vld [vmem:[#allocation24_spill] sm:$0xff] }
 0x220   : > { %900 = vadd.xlane.f32.xlu1 %v899_v4  ;;  %v446_v6 = vpop.xlane.xlu0 %445  ;;  %v14855_v4 = vld [vmem:[#allocation25_spill] sm:$0xff]  ;;  %v1242_v59 = vmul.f32 %v11139_v8, %v14856_v52 }
 0x221   : > { %v1273_v26 = vadd.f32 %v1241_v2, %v986_v54  ;;  %v533_v51 = vmul.f32 %v11116_v16, %v446_v6  ;;  %v452_v39 = vpop.xlane.xlu1 %451  ;;  %v11374_v15 = vadd.f32 %v1634_v37, %v1469_v44  ;;  %v1635_v40 = vmul.f32 %v11158_v24, %v14855_v4  ;;  %v14858_v4 = vld [vmem:[#allocation28_spill] sm:$0xff] }
 0x222   : > { %v2054_v6 = vsel %vm425_vm11, %v1998_v28, 0.0  ;;  %v14859_v28 = vld [vmem:[#allocation34_spill] sm:$0xff] }
 0x223   : > { %v774_v21 = vadd.f32 %v742_v48, %v533_v51  ;;  %1184 = vadd.xlane.f32.xlu0 %v1183_v53  ;;  %v1470_v36 = vadd.f32 %v1438_v25, %v1273_v26  ;;  %v411_v25 = vmul.f32 %v10652_v17, %v10560_v3  ;;  %v2194_v48 = vmul.f32 %v10700_v45, %v10631_v56  ;;  %v14857_v26 = vld [vmem:[#allocation30_spill] sm:$0xff] }
 0x224   : > { %1378 = vadd.xlane.f32.xlu1 %v1377_v41  ;;  %v658_v1 = vpop.xlane.xlu0 %657  ;;  %v1439_v51 = vmul.f32 %v11148_v58, %v14857_v26  ;;  %v1636_v43 = vmul.f32 %v11158_v24, %v14859_v28 }
 0x225   : > { %v987_v2 = vadd.f32 %v955_v35, %v774_v21  ;;  %v743_v37 = vmul.f32 %v11122_v11, %v658_v1  ;;  %v871_v54 = vpop.xlane.xlu1 %870  ;;  %v11389_v44 = vadd.f32 %v1635_v40, %v1470_v36  ;;  %v1243_v40 = vmul.f32 %v11139_v8, %v14858_v4 }
 0x226   : > { %v956_v53 = vmul.f32 %v11129_v10, %v871_v54  ;;  %v535_v21 = vmul.f32 %v11116_v16, %v452_v39  ;;  %v14860_v54 = vld [vmem:[#allocation32_spill] sm:$0xff] }
 0x227   : > { %v1274_v12 = vadd.f32 %v1242_v59, %v987_v2  ;;  %v775_v41 = vadd.f32 %v743_v37, %v534_v23  ;;  %1861 = vadd.xlane.f32.xlu0 %v1860_v27  ;;  %v480_v59 = vsel %vm425_vm11, %v411_v25, 0.0  ;;  %v2248_v23 = vsel %vm425_vm11, %v2194_v48, 0.0 }
 0x228   : > { %2055 = vadd.xlane.f32.xlu1 %v2054_v6  ;;  %v661_v35 = vpop.xlane.xlu0 %660  ;;  %v1511_v2 = vmul.f32 %v10665_v29, %v10550_v60  ;;  %v621_v37 = vmul.f32 %v10689_v14, %v10560_v3  ;;  %v1440_v6 = vmul.f32 %v11148_v58, %v14860_v54  ;;  %v14862_v54 = vld [vmem:[#allocation26_spill] sm:$0xff] }
 0x229   : > { %v988_v36 = vadd.f32 %v956_v53, %v775_v41  ;;  %v744_v56 = vmul.f32 %v11122_v11, %v661_v35  ;;  %v664_v52 = vpop.xlane.xlu1 %663  ;;  %v1471_v1 = vadd.f32 %v1439_v51, %v1274_v12  ;;  %v14861_v12 = vld [vmem:[#allocation29_spill] sm:$0xff] }
 0x22a   : > { %v1637_v25 = vmul.f32 %v11158_v24, %v14861_v12  ;;  %v745_v48 = vmul.f32 %v11122_v11, %v664_v52  ;;  %v689_v28 = vsel %vm425_vm11, %v621_v37, 0.0  ;;  %v1120_v37 = vmul.f32 %v10504_v33, %v10565_v5  ;;  %v14863_v12 = vld [vmem:[#allocation27_spill] sm:$0xff] }
 0x22b   : > { %v1275_v27 = vadd.f32 %v1243_v40, %v988_v36  ;;  %v776_v39 = vadd.f32 %v744_v56, %v535_v21  ;;  %2249 = vadd.xlane.f32.xlu0 %v2248_v23  ;;  %v11414_v26 = vadd.f32 %v1636_v43, %v1471_v1  ;;  %v412_v40 = vmul.f32 %v10671_v31, %v10560_v3 }
 0x22c   : > { %481 = vadd.xlane.f32.xlu1 %v480_v59  ;;  %v455_v51 = vpop.xlane.xlu0 %454  ;;  %v1571_v43 = vsel %vm425_vm11, %v1511_v2, 0.0  ;;  %v622_v21 = vmul.f32 %v10618_v19, %v10560_v3  ;;  %v1244_v2 = vmul.f32 %v11139_v8, %v14862_v54 }
 0x22d   : > { %v536_v41 = vmul.f32 %v11116_v16, %v455_v51  ;;  %v1835_v53 = vpop.xlane.xlu1 %1834  ;;  %v1472_v4 = vadd.f32 %v1440_v6, %v1275_v27  ;;  %v483_v23 = vsel %vm425_vm11, %v412_v40, 0.0  ;;  %v1316_v51 = vmul.f32 %v10507_v34, %v10565_v5 }
 0x22e   : > { %v692_v27 = vsel %vm425_vm11, %v622_v21, 0.0  ;;  %v1186_v21 = vsel %vm425_vm11, %v1120_v37, 0.0 }
 0x22f   : > { %v777_v35 = vadd.f32 %v745_v48, %v536_v41  ;;  %690 = vadd.xlane.f32.xlu0 %v689_v28  ;;  %v11426_v36 = vadd.f32 %v1637_v25, %v1472_v4  ;;  %v1245_v25 = vmul.f32 %v11139_v8, %v14863_v12  ;;  %v14864_v4 = vld [vmem:[#allocation36_spill] sm:$0xff] }
 0x230   : > { %1572 = vadd.xlane.f32.xlu1 %v1571_v43  ;;  %v874_v56 = vpop.xlane.xlu0 %873  ;;  %v1441_v28 = vmul.f32 %v11148_v58, %v14864_v4 }
 0x231   : > { %v957_v52 = vmul.f32 %v11129_v10, %v874_v56  ;;  %v877_v1 = vpop.xlane.xlu1 %876  ;;  %v14865_v56 = vld [vmem:[#allocation31_spill] sm:$0xff] }
 0x232   : > { %v958_v59 = vmul.f32 %v11129_v10, %v877_v1  ;;  %v1512_v1 = vmul.f32 %v10700_v45, %v10550_v60 }
 0x233   : > { %v989_v6 = vadd.f32 %v957_v52, %v776_v39  ;;  %484 = vadd.xlane.f32.xlu0 %v483_v23  ;;  %v1442_v39 = vmul.f32 %v11148_v58, %v14865_v56  ;;  %v14866_v23 = vld [vmem:[#allocation38_spill] sm:$0xff]  ;;  %v2195_v56 = vmul.f32 %v10606_v38, %v10640_v63 }
 0x234   : > { %v990_v48 = vadd.f32 %v958_v59, %v777_v35  ;;  %693 = vadd.xlane.f32.xlu1 %v692_v27  ;;  %v1838_v41 = vpop.xlane.xlu0 %1837  ;;  %v1638_v54 = vmul.f32 %v11158_v24, %v14866_v23  ;;  %v1380_v35 = vsel %vm425_vm11, %v1316_v51, 0.0  ;;  %v1999_v59 = vmul.f32 %v10522_v42, %v10640_v63 }
 0x235   : > { %v1276_v40 = vadd.f32 %v1244_v2, %v989_v6  ;;  %v2032_v43 = vpop.xlane.xlu1 %2031  ;;  %v14867_v6 = vld [vmem:[#allocation35_spill] sm:$0xff]  ;;  %v1574_v51 = vsel %vm425_vm11, %v1512_v1, 0.0 }
 0x236   : > { %v1277_v52 = vadd.f32 %v1245_v25, %v990_v48  ;;  %v1639_v27 = vmul.f32 %v11158_v24, %v14867_v6  ;;  %v2251_v6 = vsel %vm425_vm11, %v2195_v56, 0.0 }
 0x237   : > { %1187 = vadd.xlane.f32.xlu0 %v1186_v21  ;;  %v1473_v2 = vadd.f32 %v1441_v28, %v1276_v40  ;;  %v1926_v28 = vmul.f32 %v11207_v18, %v1835_v53  ;;  %v2057_v40 = vsel %vm425_vm11, %v1999_v59, 0.0  ;;  %v1803_v53 = vmul.f32 %v10652_v17, %v10640_v63 }
 0x238   : > { %1381 = vadd.xlane.f32.xlu1 %v1380_v35  ;;  %v667_v12 = vpop.xlane.xlu0 %666  ;;  %v1474_v25 = vadd.f32 %v1442_v39, %v1277_v52  ;;  %v834_v39 = vmul.f32 %v10665_v29, %v10560_v3 }
 0x239   : > { %v746_v37 = vmul.f32 %v11122_v11, %v667_v12  ;;  %v458_v48 = vpop.xlane.xlu1 %457  ;;  %v11455_v60 = vadd.f32 %v1638_v54, %v1473_v2  ;;  %v2123_v54 = vmul.f32 %v11229_v50, %v2032_v43  ;;  %v1958_v59 = vadd.f32 %v1926_v28, %v11374_v15  ;;  %v14868_v12 = vld [vmem:[#allocation12_spill] sm:$0xff] }
 0x23a   : > { %v537_v4 = vmul.f32 %v11116_v16, %v458_v48  ;;  %v11461_v21 = vadd.f32 %v1639_v27, %v1474_v25  ;;  %v902_v27 = vsel %vm425_vm11, %v834_v39, 0.0  ;;  %v413_v25 = vmul.f32 %v10501_v32, %v14868_v12 }
 0x23b   : > { %1575 = vadd.xlane.f32.xlu0 %v1574_v51  ;;  %v1863_v51 = vsel %vm425_vm11, %v1803_v53, 0.0  ;;  %v623_v56 = vmul.f32 %v10507_v34, %v14868_v12  ;;  %v835_v28 = vmul.f32 %v10700_v45, %v10560_v3  ;;  %v1513_v3 = vmul.f32 %v10606_v38, %v10565_v5 }
 0x23c   : > { %v778_v52 = vadd.f32 %v746_v37, %v537_v4  ;;  %2058 = vadd.xlane.f32.xlu1 %v2057_v40  ;;  %v461_v23 = vpop.xlane.xlu0 %460  ;;  %v486_v15 = vsel %vm425_vm11, %v413_v25, 0.0 }
 0x23d   : > { %v538_v1 = vmul.f32 %v11116_v16, %v461_v23  ;;  %v670_v35 = vpop.xlane.xlu1 %669  ;;  %v2155_v16 = vadd.f32 %v2123_v54, %v1958_v59  ;;  %v905_v59 = vsel %vm425_vm11, %v835_v28, 0.0 }
 0x23e   : > { %v747_v2 = vmul.f32 %v11122_v11, %v670_v35  ;;  %v695_v35 = vsel %vm425_vm11, %v623_v56, 0.0  ;;  %v14870_v56 = vld [vmem:[#allocation40_spill] sm:$0xff] }
 0x23f   : > { %2252 = vadd.xlane.f32.xlu0 %v2251_v6  ;;  %v1927_v6 = vmul.f32 %v11207_v18, %v1838_v41  ;;  %v1804_v41 = vmul.f32 %v10671_v31, %v10640_v63 }
 0x240   : > { %v779_v37 = vadd.f32 %v747_v2, %v538_v1  ;;  %903 = vadd.xlane.f32.xlu1 %v902_v27  ;;  %v2229_v43 = vpop.xlane.xlu0 %2228  ;;  %v1317_v2 = vmul.f32 %v10522_v42, %v10565_v5  ;;  %v14869_v27 = vld [vmem:[#allocation33_spill] sm:$0xff] }
 0x241   : > { %v2320_v48 = vmul.f32 %v11239_v46, %v2229_v43  ;;  %v2035_v4 = vpop.xlane.xlu1 %2034  ;;  %v1246_v25 = vmul.f32 %v11139_v8, %v14869_v27 }
 0x243   : > { %v2352_v40 = vadd.f32 %v2320_v48, %v2155_v16  ;;  %1864 = vadd.xlane.f32.xlu0 %v1863_v51  ;;  %v2124_v48 = vmul.f32 %v11229_v50, %v2035_v4  ;;  %v2196_v4 = vmul.f32 %v10598_v30, %v10640_v63 }
 0x244   : > { %487 = vadd.xlane.f32.xlu1 %v486_v15  ;;  %v1841_v39 = vpop.xlane.xlu0 %1840 }
 0x245   : > { %v2389_v23 = vadd.f32 %v11252_v9, %v2352_v40  ;;  %v880_v54 = vpop.xlane.xlu1 %879  ;;  %v1443_v40 = vmul.f32 %v11148_v58, %v14870_v56  ;;  %v1928_v56 = vmul.f32 %v11207_v18, %v1841_v39 }
 0x246   : > { %v959_v1 = vmul.f32 %v11129_v10, %v880_v54  ;;  %v1577_v54 = vsel %vm425_vm11, %v1513_v3, 0.0  ;;  %v1866_v3 = vsel %vm425_vm11, %v1804_v41, 0.0 }
 0x247   : > { %v2421_v53 = vmax.f32 %v2389_v23, 0.0  ;;  %696 = vadd.xlane.f32.xlu0 %v695_v35  ;;  %v1383_v23 = vsel %vm425_vm11, %v1317_v2, 0.0 }
 0x248   : > { %v991_v43 = vadd.f32 %v959_v1, %v778_v52  ;;  %906 = vadd.xlane.f32.xlu1 %v905_v59  ;;  %v1844_v16 = vpop.xlane.xlu0 %1843  ;;  %v1959_v52 = vadd.f32 %v1927_v6, %v11389_v44  ;;  %v14871_v1 = vld [vmem:[#allocation39_spill] sm:$0xff] }
 0x249   : > { %2453 = vst.msk [vmem:[#allocation2 + $0x20] sm:$0xff] %vm425_vm11, %v2421_v53  ;;  %v883_v51 = vpop.xlane.xlu1 %882  ;;  %v1247_v35 = vmul.f32 %v11139_v8, %v14871_v1  ;;  %v14872_v53 = vld [vmem:[#allocation42_spill] sm:$0xff] }
 0x24a   : > { %v1278_v15 = vadd.f32 %v1246_v25, %v991_v43  ;;  %v960_v28 = vmul.f32 %v11129_v10, %v883_v51  ;;  %v1640_v59 = vmul.f32 %v11158_v24, %v14872_v53  ;;  %v14873_v43 = vld [vmem:[#allocation41_spill] sm:$0xff]  ;;  %v2156_v44 = vadd.f32 %v2124_v48, %v1959_v52 }
 0x24b   : > { %1384 = vadd.xlane.f32.xlu0 %v1383_v23  ;;  %v1444_v2 = vmul.f32 %v11148_v58, %v14873_v43  ;;  %v1121_v51 = vmul.f32 %v10652_v17, %v10565_v5  ;;  %v2000_v58 = vmul.f32 %v10689_v14, %v10640_v63  ;;  %v14875_v48 = vld [vmem:[#allocation37_spill] sm:$0xff]  ;;  %v1960_v53 = vadd.f32 %v1928_v56, %v11414_v26 }
 0x24c   : > { %v992_v27 = vadd.f32 %v960_v28, %v779_v37  ;;  %1578 = vadd.xlane.f32.xlu1 %v1577_v54  ;;  %v2041_v25 = vpop.xlane.xlu0 %2040  ;;  %v1475_v10 = vadd.f32 %v1443_v40, %v1278_v15  ;;  %v2254_v37 = vsel %vm425_vm11, %v2196_v4, 0.0  ;;  %v1641_v40 = vmul.f32 %v11158_v24, %v14875_v48 }
 0x24d   : > { %v2232_v6 = vpop.xlane.xlu1 %2231  ;;  %v1189_v54 = vsel %vm425_vm11, %v1121_v51, 0.0  ;;  %v414_v4 = vmul.f32 %v10504_v33, %v14868_v12  ;;  %v2060_v43 = vsel %vm425_vm11, %v2000_v58, 0.0  ;;  %v1122_v48 = vmul.f32 %v10671_v31, %v10565_v5 }
 0x24e   : > { %v1279_v8 = vadd.f32 %v1247_v35, %v992_v27  ;;  %v2321_v23 = vmul.f32 %v11239_v46, %v2232_v6  ;;  %v11518_v1 = vadd.f32 %v1640_v59, %v1475_v10  ;;  %v1929_v10 = vmul.f32 %v11207_v18, %v1844_v16 }
 0x24f   : > { %1867 = vadd.xlane.f32.xlu0 %v1866_v3  ;;  %v2126_v18 = vmul.f32 %v11229_v50, %v2041_v25 }
 0x250   : > { %14874 = vst [vmem:[#allocation25_spill] sm:$0xff] %v11518_v1  ;;  %v2353_v41 = vadd.f32 %v2321_v23, %v2156_v44  ;;  %2255 = vadd.xlane.f32.xlu1 %v2254_v37  ;;  %v2235_v15 = vpop.xlane.xlu0 %2234  ;;  %v2994_v28 = vld [vmem:[#allocation2 + $0x20] sm:$0xff]  ;;  %v1476_v52 = vadd.f32 %v1444_v2, %v1279_v8  ;;  %v624_v2 = vmul.f32 %v10522_v42, %v14868_v12  ;;  %v14877_v44 = vrot.slane %v11323_v55, 7 }
 0x251   : > { %v2038_v39 = vpop.xlane.xlu1 %2037  ;;  %9537 = vmatprep.mubr.msk.f32.mxu0 %vm425_vm11, %v2994_v28  ;;  %v2517_v35 = vrot.slane %v2994_v28, 7  ;;  %v2322_v3 = vmul.f32 %v11239_v46, %v2235_v15  ;;  %v489_v55 = vsel %vm425_vm11, %v414_v4, 0.0  ;;  %v836_v23 = vmul.f32 %v10606_v38, %v14868_v12  ;;  %v14878_v4 = vld [vmem:[#allocation18_spill] sm:$0xff] }
 0x252   : > { %v2390_v59 = vadd.f32 %v11252_v9, %v2353_v41  ;;  %v2125_v24 = vmul.f32 %v11229_v50, %v2038_v39  ;;  %v11532_v27 = vadd.f32 %v1641_v40, %v1476_v52  ;;  %v1961_v37 = vadd.f32 %v1929_v10, %v11426_v36 }
 0x253   : > { %1190 = vadd.xlane.f32.xlu0 %v1189_v54  ;;  %v11542_v6 = vsel %vm2545_vm3, %v14877_v44, %v2517_v35  ;;  %v698_v58 = vsel %vm425_vm11, %v624_v2, 0.0  ;;  %v908_v52 = vsel %vm425_vm11, %v836_v23, 0.0  ;;  %v1514_v36 = vmul.f32 %v10598_v30, %v10565_v5 }
 0x254   : > { %14876 = vst [vmem:[#allocation24_spill] sm:$0xff] %v11532_v27  ;;  %v2422_v26 = vmax.f32 %v2390_v59, 0.0  ;;  %v2157_v51 = vadd.f32 %v2125_v24, %v1960_v53  ;;  %2061 = vadd.xlane.f32.xlu1 %v2060_v43  ;;  %v11545_v56 = vpop.xlane.xlu0 %1849  ;;  %v2158_v40 = vadd.f32 %v2126_v18, %v1961_v37  ;;  %v1192_v54 = vsel %vm425_vm11, %v1122_v48, 0.0 }
 0x255   : > { %v11548_v16 = vpop.xlane.xlu1 %1846  ;;  %v1805_v53 = vmul.f32 %v10501_v32, %v14878_v4  ;;  %v1580_v43 = vsel %vm425_vm11, %v1514_v36, 0.0  ;;  %v2001_v2 = vmul.f32 %v10618_v19, %v10640_v63  ;;  %v2197_v23 = vmul.f32 %v10665_v29, %v10640_v63  ;;  %v14880_v36 = vld [vmem:[#allocation11_spill] sm:$0xff] }
 0x256   : > { %2454 = vst.msk [vmem:[#allocation2 + $0x28] sm:$0xff] %vm425_vm11, %v2422_v26  ;;  %v2354_v8 = vadd.f32 %v2322_v3, %v2157_v51  ;;  %v1318_v51 = vmul.f32 %v10689_v14, %v10565_v5  ;;  %v837_v48 = vmul.f32 %v10598_v30, %v14868_v12  ;;  %v625_v1 = vmul.f32 %v10689_v14, %v14868_v12 }
 0x257   : > { %490 = vadd.xlane.f32.xlu0 %v489_v55  ;;  %v1869_v3 = vsel %vm425_vm11, %v1805_v53, 0.0  ;;  %v2063_v55 = vsel %vm425_vm11, %v2001_v2, 0.0 }
 0x258   : > { %v2391_v50 = vadd.f32 %v11252_v9, %v2354_v8  ;;  %699 = vadd.xlane.f32.xlu1 %v698_v58  ;;  %v2238_v25 = vpop.xlane.xlu0 %2237  ;;  %v1386_v58 = vsel %vm425_vm11, %v1318_v51, 0.0  ;;  %v911_v53 = vsel %vm425_vm11, %v837_v48, 0.0 }
 0x259   : > { %v2323_v41 = vmul.f32 %v11239_v46, %v2238_v25  ;;  %v11560_v15 = vpop.xlane.xlu1 %2043 }
 0x25a   : > { %v2423_v28 = vmax.f32 %v2391_v50, 0.0 }
 0x25b   : > { %v2355_v39 = vadd.f32 %v2323_v41, %v2158_v40  ;;  %909 = vadd.xlane.f32.xlu0 %v908_v52  ;;  %v11605_v41 = vld [vmem:[%s14752_s3] ss:$0 sm:$0xff]  ;;  %v2257_v52 = vsel %vm425_vm11, %v2197_v23, 0.0  ;;  %v11631_v23 = vld [vmem:[%s14752_s3 + $0x1] ss:$0 sm:$0xff] }
 0x25c   : > { %2455 = vst.msk [vmem:[#allocation2 + $0x30] sm:$0xff] %vm425_vm11, %v2423_v28  ;;  %1193 = vadd.xlane.f32.xlu1 %v1192_v54  ;;  %v11569_v59 = vpop.xlane.xlu0 %1229 }
 0x25d   : > { %v2392_v46 = vadd.f32 %v11252_v9, %v2355_v39  ;;  %v11572_v24 = vpop.xlane.xlu1 %2046  ;;  %v2995_v10 = vld [vmem:[#allocation2 + $0x28] sm:$0xff]  ;;  %v1123_v39 = vmul.f32 %v10501_v32, %v14880_v36 }
 0x25e   : > { %9538 = vmatmul.mubr.msk.f32.gmra.mrb[14].mxu0 %vm425_vm11, %v2995_v10  ;;  %v2518_v44 = vrot.slane %v2995_v10, 7 }
 0x25f   : > { %v2424_v26 = vmax.f32 %v2392_v46, 0.0  ;;  %1581 = vadd.xlane.f32.xlu0 %v1580_v43  ;;  %v1319_v46 = vmul.f32 %v10618_v19, %v10565_v5  ;;  %v1195_v48 = vsel %vm425_vm11, %v1123_v39, 0.0  ;;  %v11644_v39 = vld [vmem:[%s14752_s3 + $0x2] ss:$0 sm:$0xff] }
 0x260   : > { %1870 = vadd.xlane.f32.xlu1 %v1869_v3  ;;  %v11581_v9 = vpop.xlane.xlu0 %1623  ;;  %v11585_v18 = vsel %vm2545_vm3, %v2517_v35, %v2518_v44 }
 0x261   : > { %2456 = vst.msk [vmem:[#allocation2 + $0x38] sm:$0xff] %vm425_vm11, %v2424_v26  ;;  %v11588_v8 = vpop.xlane.xlu1 %1426 }
 0x263   : > { %v11593_v37 = vld [vmem:[#allocation2 + $0x30] sm:$0xff]  ;;  %2064 = vadd.xlane.f32.xlu0 %v2063_v55 }
 0x264   : > { %14879 = vst [vmem:[#allocation30_spill] sm:$0xff] %v11593_v37  ;;  %9540 = vmatprep.mubr.msk.f32.mxu0 %vm425_vm11, %v11593_v37  ;;  %1387 = vadd.xlane.f32.xlu1 %v1386_v58  ;;  %v673_v35 = vpop.xlane.xlu0 %672  ;;  %v14775_v50 = vrot.slane %v11593_v37, 7 }
 0x265   : > { %v748_v25 = vmul.f32 %v11122_v11, %v673_v35  ;;  %v464_v40 = vpop.xlane.xlu1 %463  ;;  %v9471_v11 = vpop.f32.mrb[2].mxu0  ;;  %v1806_v35 = vmul.f32 %v10504_v33, %v14878_v4 }
 0x266   : > { %v539_v28 = vmul.f32 %v11605_v41, %v464_v40  ;;  %v11615_v54 = vsel %vm2545_vm3, %v2518_v44, %v14775_v50  ;;  %2959 = vst.msk [vmem:[#allocation3 + $0x8] sm:$0xff] %vm425_vm11, %v9471_v11  ;;  %v2799_v10 = vpop.f32.mrb[3].mxu0  ;;  %v1389_v40 = vsel %vm425_vm11, %v1319_v46, 0.0 }
 0x267   : > { %14881 = vst [vmem:[#allocation28_spill] sm:$0xff] %v11615_v54  ;;  %2258 = vadd.xlane.f32.xlu0 %v2257_v52  ;;  %2958 = vst.msk [vmem:[#allocation3] sm:$0xff] %vm425_vm11, %v2799_v10  ;;  %v9474_v3 = vpop.f32.mrb[4].mxu0 }
 0x268   : > { %v780_v43 = vadd.f32 %v748_v25, %v539_v28  ;;  %912 = vadd.xlane.f32.xlu1 %v911_v53  ;;  %v467_v2 = vpop.xlane.xlu0 %466  ;;  %v11621_v26 = vld [vmem:[#allocation2 + $0x38] sm:$0xff]  ;;  %2961 = vst.msk [vmem:[#allocation3 + $0x18] sm:$0xff] %vm425_vm11, %v9474_v3  ;;  %v2809_v55 = vpop.f32.mrb[5].mxu0  ;;  %v2002_v28 = vmul.f32 %v10507_v34, %v14878_v4 }
 0x269   : > { %v540_v44 = vmul.f32 %v11605_v41, %v467_v2  ;;  %v676_v51 = vpop.xlane.xlu1 %675  ;;  %9541 = vmatmul.mubr.msk.f32.gmra.mrb[16].mxu0 %vm425_vm11, %v11621_v26  ;;  %2960 = vst.msk [vmem:[#allocation3 + $0x10] sm:$0xff] %vm425_vm11, %v2809_v55  ;;  %v9527_v25 = vpop.f32.mrb[6].mxu0  ;;  %v1872_v55 = vsel %vm425_vm11, %v1806_v35, 0.0 }
 0x26a   : > { %v749_v58 = vmul.f32 %v11631_v23, %v676_v51  ;;  %v3244_v52 = vpop.f32.mrb[7].mxu0 }
 0x26b   : > { %1196 = vadd.xlane.f32.xlu0 %v1195_v48  ;;  %v9530_v10 = vpop.f32.mrb[8].mxu0  ;;  %v415_v48 = vmul.f32 %v10652_v17, %v14868_v12 }
 0x26c   : > { %v781_v11 = vadd.f32 %v749_v58, %v540_v44  ;;  %1390 = vadd.xlane.f32.xlu1 %v1389_v40  ;;  %v886_v53 = vpop.xlane.xlu0 %885  ;;  %v3254_v51 = vpop.f32.mrb[9].mxu0  ;;  %v2198_v44 = vmul.f32 %v10700_v45, %v10640_v63  ;;  %v11656_v40 = vld [vmem:[%s14752_s3 + $0x3] ss:$0 sm:$0xff] }
 0x26d   : > { %v961_v2 = vmul.f32 %v11644_v39, %v886_v53  ;;  %v889_v3 = vpop.xlane.xlu1 %888  ;;  %v3404_v58 = vld [vmem:[#allocation3 + $0x8] sm:$0xff]  ;;  %v1248_v53 = vmul.f32 %v11656_v40, %v11280_v61  ;;  %v1249_v22 = vmul.f32 %v11656_v40, %v11293_v57  ;;  %v11668_v61 = vld [vmem:[%s14752_s3 + $0x4] ss:$0 sm:$0xff] }
 0x26e   : > { %v962_v46 = vmul.f32 %v11644_v39, %v889_v3  ;;  %v2066_v3 = vsel %vm425_vm11, %v2002_v28, 0.0  ;;  %v3436_v35 = vadd.f32 %v9527_v25, %v3404_v58  ;;  %v3403_v20 = vld [vmem:[#allocation3] sm:$0xff]  ;;  %v492_v58 = vsel %vm425_vm11, %v415_v48, 0.0 }
 0x26f   : > { %v993_v50 = vadd.f32 %v961_v2, %v780_v43  ;;  %1873 = vadd.xlane.f32.xlu0 %v1872_v55  ;;  %v3435_v37 = vadd.f32 %v3403_v20, %v3244_v52  ;;  %v3406_v54 = vld [vmem:[#allocation3 + $0x18] sm:$0xff]  ;;  %v1445_v43 = vmul.f32 %v11668_v61, %v11283_v0  ;;  %v2260_v20 = vsel %vm425_vm11, %v2198_v44, 0.0 }
 0x270   : > { %v994_v27 = vadd.f32 %v962_v46, %v781_v11  ;;  %2067 = vadd.xlane.f32.xlu1 %v2066_v3  ;;  %v679_v63 = vpop.xlane.xlu0 %678  ;;  %3468 = vst.msk [vmem:[#allocation3 + $0x8] sm:$0xff] %vm425_vm11, %v3436_v35  ;;  %v3438_v11 = vadd.f32 %v9530_v10, %v3406_v54  ;;  %v3405_v2 = vld [vmem:[#allocation3 + $0x10] sm:$0xff]  ;;  %v1515_v0 = vmul.f32 %v10665_v29, %v10565_v5 }
 0x271   : > { %v1280_v25 = vadd.f32 %v1248_v53, %v993_v50  ;;  %v750_v28 = vmul.f32 %v11631_v23, %v679_v63  ;;  %v470_v57 = vpop.xlane.xlu1 %469  ;;  %3467 = vst.msk [vmem:[#allocation3] sm:$0xff] %vm425_vm11, %v3435_v37  ;;  %v3437_v55 = vadd.f32 %v3405_v2, %v3254_v51  ;;  %v701_v51 = vsel %vm425_vm11, %v625_v1, 0.0 }
 0x272   : > { %v541_v46 = vmul.f32 %v11605_v41, %v470_v57  ;;  %v11676_v52 = vadd.f32 %v1249_v22, %v994_v27  ;;  %3470 = vst.msk [vmem:[#allocation3 + $0x18] sm:$0xff] %vm425_vm11, %v3438_v11  ;;  %v416_v48 = vmul.f32 %v10671_v31, %v14868_v12  ;;  %v1583_v44 = vsel %vm425_vm11, %v1515_v0, 0.0 }
 0x273   : > { %2261 = vadd.xlane.f32.xlu0 %v2260_v20  ;;  %v11682_v50 = vadd.f32 %v1445_v43, %v1280_v25  ;;  %3469 = vst.msk [vmem:[#allocation3 + $0x10] sm:$0xff] %vm425_vm11, %v3437_v55  ;;  %v626_v53 = vmul.f32 %v10618_v19, %v14868_v12  ;;  %v1320_v11 = vmul.f32 %v10507_v34, %v14880_v36 }
 0x274   : > { %v11685_v54 = vadd.f32 %v750_v28, %v541_v46  ;;  %493 = vadd.xlane.f32.xlu1 %v492_v58  ;;  %v473_v10 = vpop.xlane.xlu0 %472  ;;  %v495_v1 = vsel %vm425_vm11, %v416_v48, 0.0  ;;  %v1124_v28 = vmul.f32 %v10504_v33, %v14880_v36  ;;  %v1516_v0 = vmul.f32 %v10700_v45, %v10565_v5 }
 0x275   : > { %v542_v22 = vmul.f32 %v11605_v41, %v473_v10  ;;  %v682_v27 = vpop.xlane.xlu1 %681  ;;  %v704_v57 = vsel %vm425_vm11, %v626_v53, 0.0  ;;  %v11713_v10 = vld [vmem:[%s14752_s3 + $0x6] ss:$0 sm:$0xff] }
 0x276   : > { %v751_v37 = vmul.f32 %v11631_v23, %v682_v27  ;;  %v1198_v58 = vsel %vm425_vm11, %v1124_v28, 0.0  ;;  %v1392_v27 = vsel %vm425_vm11, %v1320_v11, 0.0  ;;  %v838_v28 = vmul.f32 %v10665_v29, %v14868_v12 }
 0x277   : > { %702 = vadd.xlane.f32.xlu0 %v701_v51  ;;  %v1267_v51 = vmul.f32 %v11656_v40, %v11569_v59  ;;  %v2199_v59 = vmul.f32 %v10606_v38, %v14878_v4 }
 0x278   : > { %v11696_v3 = vadd.f32 %v751_v37, %v542_v22  ;;  %1584 = vadd.xlane.f32.xlu1 %v1583_v44  ;;  %v521_v35 = vpop.xlane.xlu0 %520  ;;  %v1930_v22 = vmul.f32 %v11713_v10, %v11548_v16  ;;  %v2003_v37 = vmul.f32 %v10522_v42, %v14878_v4  ;;  %v11725_v44 = vld [vmem:[%s14752_s3 + $0x7] ss:$0 sm:$0xff] }
 0x279   : > { %v730_v63 = vpop.xlane.xlu1 %729  ;;  %v558_v25 = vmul.f32 %v11605_v41, %v521_v35  ;;  %v2127_v16 = vmul.f32 %v11725_v44, %v11560_v15  ;;  %v1464_v35 = vmul.f32 %v11668_v61, %v11588_v8  ;;  %v11741_v15 = vld [vmem:[%s14752_s3 + $0x5] ss:$0 sm:$0xff] }
 0x27a   : > { %v767_v43 = vmul.f32 %v11631_v23, %v730_v63  ;;  %v1661_v8 = vmul.f32 %v11741_v15, %v11581_v9 }
 0x27b   : > { %496 = vadd.xlane.f32.xlu0 %v495_v1  ;;  %v2069_v1 = vsel %vm425_vm11, %v2003_v37, 0.0 }
 0x27c   : > { %705 = vadd.xlane.f32.xlu1 %v704_v57  ;;  %v1916_v2 = vpop.xlane.xlu0 %1915  ;;  %v799_v20 = vadd.f32 %v767_v43, %v558_v25  ;;  %v1586_v43 = vsel %vm425_vm11, %v1516_v0, 0.0  ;;  %v1962_v25 = vadd.f32 %v1930_v22, %v11455_v60  ;;  %v11748_v60 = vld [vmem:[%s14752_s3 + $0x8] ss:$0 sm:$0xff] }
 0x27d   : > { %v943_v46 = vpop.xlane.xlu1 %942  ;;  %v1953_v22 = vmul.f32 %v11713_v10, %v1916_v2  ;;  %v11768_v2 = vld [vmem:[%s14752_s3 + $0x9] ss:$0 sm:$0xff] }
 0x27e   : > { %v980_v55 = vmul.f32 %v11644_v39, %v943_v46  ;;  %v2159_v46 = vadd.f32 %v2127_v16, %v1962_v25 }
 0x27f   : > { %1199 = vadd.xlane.f32.xlu0 %v1198_v58  ;;  %v1807_v58 = vmul.f32 %v10652_v17, %v14878_v4 }
 0x280   : > { %v1012_v48 = vadd.f32 %v980_v55, %v799_v20  ;;  %1393 = vadd.xlane.f32.xlu1 %v1392_v27  ;;  %v2310_v5 = vpop.xlane.xlu0 %2309  ;;  %v2263_v27 = vsel %vm425_vm11, %v2199_v59, 0.0 }
 0x281   : > { %v2113_v53 = vpop.xlane.xlu1 %2112 }
 0x282   : > { %v1299_v63 = vadd.f32 %v1267_v51, %v1012_v48  ;;  %v914_v51 = vsel %vm425_vm11, %v838_v28, 0.0  ;;  %v14882_v48 = vld [vmem:[#allocation13_spill] sm:$0xff] }
 0x283   : > { %1587 = vadd.xlane.f32.xlu0 %v1586_v43  ;;  %v417_v16 = vmul.f32 %v10501_v32, %v14882_v48 }
 0x284   : > { %v1496_v57 = vadd.f32 %v1464_v35, %v1299_v63  ;;  %2070 = vadd.xlane.f32.xlu1 %v2069_v1  ;;  %v2241_v11 = vpop.xlane.xlu0 %2240  ;;  %v2150_v63 = vmul.f32 %v11725_v44, %v2113_v53 }
 0x285   : > { %v892_v20 = vpop.xlane.xlu1 %891  ;;  %v2324_v55 = vmul.f32 %v11748_v60, %v2241_v11  ;;  %v498_v11 = vsel %vm425_vm11, %v417_v16, 0.0  ;;  %v1517_v16 = vmul.f32 %v10606_v38, %v14880_v36 }
 0x286   : > { %v1693_v0 = vadd.f32 %v1661_v8, %v1496_v57  ;;  %v963_v9 = vmul.f32 %v11644_v39, %v892_v20  ;;  %v2347_v8 = vmul.f32 %v11748_v60, %v2310_v5  ;;  %v1875_v57 = vsel %vm425_vm11, %v1807_v58, 0.0 }
 0x287   : > { %v2356_v37 = vadd.f32 %v2324_v55, %v2159_v46  ;;  %2264 = vadd.xlane.f32.xlu0 %v2263_v27  ;;  %v839_v46 = vmul.f32 %v10700_v45, %v14868_v12 }
 0x288   : > { %v1985_v35 = vadd.f32 %v1953_v22, %v1693_v0  ;;  %v11761_v43 = vadd.f32 %v963_v9, %v11685_v54  ;;  %915 = vadd.xlane.f32.xlu1 %v914_v51  ;;  %v11763_v25 = vpop.xlane.xlu0 %1852  ;;  %v627_v54 = vmul.f32 %v10507_v34, %v14882_v48 }
 0x289   : > { %v2393_v59 = vadd.f32 %v11768_v2, %v2356_v37  ;;  %v476_v1 = vpop.xlane.xlu1 %475  ;;  %v1321_v37 = vmul.f32 %v10522_v42, %v14880_v36  ;;  %v917_v51 = vsel %vm425_vm11, %v839_v46, 0.0 }
 0x28a   : > { %v2182_v28 = vadd.f32 %v2150_v63, %v1985_v35  ;;  %v543_v0 = vmul.f32 %v11605_v41, %v476_v1  ;;  %v707_v27 = vsel %vm425_vm11, %v627_v54, 0.0  ;;  %v1931_v35 = vmul.f32 %v11713_v10, %v11545_v56 }
 0x28b   : > { %v2425_v53 = vmax.f32 %v2393_v59, 0.0  ;;  %1876 = vadd.xlane.f32.xlu0 %v1875_v57  ;;  %v2128_v57 = vmul.f32 %v11725_v44, %v11572_v24  ;;  %v1395_v54 = vsel %vm425_vm11, %v1321_v37, 0.0  ;;  %v1808_v56 = vmul.f32 %v10671_v31, %v14878_v4 }
 0x28c   : > { %v2379_v20 = vadd.f32 %v2347_v8, %v2182_v28  ;;  %499 = vadd.xlane.f32.xlu1 %v498_v11  ;;  %v685_v55 = vpop.xlane.xlu0 %684  ;;  %v2200_v11 = vmul.f32 %v10598_v30, %v14878_v4  ;;  %v1963_v46 = vadd.f32 %v1931_v35, %v11461_v21  ;;  %v2004_v21 = vmul.f32 %v10689_v14, %v14878_v4 }
 0x28d   : > { %2457 = vst.msk [vmem:[#allocation2 + $0x40] sm:$0xff] %vm425_vm11, %v2425_v53  ;;  %v895_v5 = vpop.xlane.xlu1 %894  ;;  %v752_v58 = vmul.f32 %v11631_v23, %v685_v55 }
 0x28e   : > { %v2416_v22 = vadd.f32 %v11768_v2, %v2379_v20  ;;  %v964_v9 = vmul.f32 %v11644_v39, %v895_v5  ;;  %v1878_v5 = vsel %vm425_vm11, %v1808_v56, 0.0  ;;  %v628_v56 = vmul.f32 %v10522_v42, %v14882_v48 }
 0x28f   : > { %v11786_v12 = vadd.f32 %v752_v58, %v543_v0  ;;  %708 = vadd.xlane.f32.xlu0 %v707_v27  ;;  %v2160_v0 = vadd.f32 %v2128_v57, %v1963_v46  ;;  %v1125_v58 = vmul.f32 %v10652_v17, %v14880_v36  ;;  %v14883_v46 = vrot.slane %v11296_v13, 7 }
 0x290   : > { %v2448_v63 = vmax.f32 %v2416_v22, 0.0  ;;  %v11794_v59 = vadd.f32 %v964_v9, %v11696_v3  ;;  %918 = vadd.xlane.f32.xlu1 %v917_v51  ;;  %v1373_v1 = vpop.xlane.xlu0 %1372  ;;  %v1589_v3 = vsel %vm425_vm11, %v1517_v16, 0.0  ;;  %v2266_v22 = vsel %vm425_vm11, %v2200_v11, 0.0 }
 0x291   : > { %v11796_v28 = vpop.xlane.xlu1 %1566  ;;  %v1446_v8 = vmul.f32 %v11668_v61, %v1373_v1  ;;  %v840_v13 = vmul.f32 %v10606_v38, %v14882_v48 }
 0x292   : > { %2480 = vst.msk [vmem:[#allocation2 + $0xf8] sm:$0xff] %vm425_vm11, %v2448_v63  ;;  %v1201_v63 = vsel %vm425_vm11, %v1125_v58, 0.0 }
 0x293   : > { %v11806_v53 = vadd.f32 %v1446_v8, %v11676_v52  ;;  %1396 = vadd.xlane.f32.xlu0 %v1395_v54  ;;  %v418_v8 = vmul.f32 %v10504_v33, %v14882_v48  ;;  %v2072_v54 = vsel %vm425_vm11, %v2004_v21, 0.0  ;;  %v710_v21 = vsel %vm425_vm11, %v628_v56, 0.0  ;;  %v14885_v56 = vld [vmem:[#allocation19_spill] sm:$0xff] }
 0x294   : > { %1590 = vadd.xlane.f32.xlu1 %v1589_v3  ;;  %v11812_v24 = vpop.xlane.xlu0 %1855  ;;  %v11814_v20 = vld [vmem:[#allocation2 + $0x40] sm:$0xff] }
 0x295   : > { %v2244_v55 = vpop.xlane.xlu1 %2243  ;;  %9543 = vmatprep.mubr.msk.f32.mxu0 %vm425_vm11, %v11814_v20 }
 0x296   : > { %v2325_v52 = vmul.f32 %v11748_v60, %v2244_v55 }
 0x297   : > { %1879 = vadd.xlane.f32.xlu0 %v1878_v5 }
 0x298   : > { %v2357_v9 = vadd.f32 %v2325_v52, %v2160_v0  ;;  %2267 = vadd.xlane.f32.xlu1 %v2266_v22  ;;  %v1179_v27 = vpop.xlane.xlu0 %1178  ;;  %v501_v22 = vsel %vm425_vm11, %v418_v8, 0.0 }
 0x299   : > { %v11825_v37 = vpop.xlane.xlu1 %2049  ;;  %v1250_v51 = vmul.f32 %v11656_v40, %v1179_v27  ;;  %v2512_v16 = vld [vmem:[#allocation2 + $0xf8] sm:$0xff] }
 0x29a   : > { %v2394_v35 = vadd.f32 %v11768_v2, %v2357_v9  ;;  %v2544_v1 = vrot.slane %v2512_v16, 7  ;;  %v1126_v9 = vmul.f32 %v10671_v31, %v14880_v36 }
 0x29b   : > { %v11833_v57 = vadd.f32 %v1250_v51, %v11761_v43  ;;  %1202 = vadd.xlane.f32.xlu0 %v1201_v63 }
 0x29c   : > { %v2426_v3 = vmax.f32 %v2394_v35, 0.0  ;;  %2073 = vadd.xlane.f32.xlu1 %v2072_v54  ;;  %v479_v11 = vpop.xlane.xlu0 %478  ;;  %v2577_v55 = vsel %vm2545_vm3, %v2544_v1, %v14883_v46  ;;  %v1518_v1 = vmul.f32 %v10598_v30, %v14880_v36  ;;  %v1204_v54 = vsel %vm425_vm11, %v1126_v9, 0.0  ;;  %v14887_v9 = vld [vmem:[#allocation30_spill] sm:$0xff] }
 0x29d   : > { %v688_v0 = vpop.xlane.xlu1 %687  ;;  %v544_v52 = vmul.f32 %v11605_v41, %v479_v11  ;;  %v2605_v43 = vsel %vm278_vm2, %v2577_v55, 0.0 }
 0x29e   : > { %2458 = vst.msk [vmem:[#allocation2 + $0x48] sm:$0xff] %vm425_vm11, %v2426_v3  ;;  %v753_v58 = vmul.f32 %v11631_v23, %v688_v0  ;;  %9475 = vmatprep.mubr.msk.f32.mxu1 %vm425_vm11, %v2605_v43  ;;  %v1809_v3 = vmul.f32 %v10501_v32, %v14885_v56  ;;  %v2520_v0 = vrot.slane %v11621_v26, 7  ;;  %v1322_v43 = vmul.f32 %v10689_v14, %v14880_v36 }
 0x29f   : > { %9476 = vmatmul.mubr.msk.f32.vlgmr.msra.gmra.mrb[0].mxu1 %vm425_vm11, %v11320_v62  ;;  %502 = vadd.xlane.f32.xlu0 %v501_v22  ;;  %v920_v62 = vsel %vm425_vm11, %v840_v13, 0.0 }
 0x2a0   : > { %v11856_v27 = vadd.f32 %v753_v58, %v544_v52  ;;  %711 = vadd.xlane.f32.xlu1 %v710_v21  ;;  %9478 = vmatprep.mubr.msk.f32.mxu1 %vm425_vm11, %v11345_v47  ;;  %v898_v51 = vpop.xlane.xlu0 %897  ;;  %v2609_v47 = vsel %vm278_vm2, %v11542_v6, 0.0  ;;  %v2005_v6 = vmul.f32 %v10618_v19, %v14878_v4  ;;  %v1932_v52 = vmul.f32 %v11713_v10, %v11763_v25  ;;  %v14886_v58 = vld [vmem:[#allocation28_spill] sm:$0xff] }
 0x2a1   : > { %v1182_v16 = vpop.xlane.xlu1 %1181  ;;  %v965_v35 = vmul.f32 %v11644_v39, %v898_v51  ;;  %v2129_v25 = vmul.f32 %v11725_v44, %v11825_v37  ;;  %v14888_v51 = vrot.slane %v14887_v9, 7  ;;  %v1398_v37 = vsel %vm425_vm11, %v1322_v43, 0.0 }
 0x2a2   : > { %v1251_v63 = vmul.f32 %v11656_v40, %v1182_v16 }
 0x2a3   : > { %v11866_v8 = vadd.f32 %v965_v35, %v11786_v12  ;;  %9479 = vmatmul.mubr.msk.f32.gmra.mrb[2].mxu1 %vm425_vm11, %v11351_v49  ;;  %921 = vadd.xlane.f32.xlu0 %v920_v62  ;;  %v2521_v49 = vrot.slane %v11814_v20, 7  ;;  %v1881_v20 = vsel %vm425_vm11, %v1809_v3, 0.0  ;;  %v2570_v16 = vsel %vm2545_vm3, %v14888_v51, %v2520_v0  ;;  %v14889_v62 = vld [vmem:[#allocation25_spill] sm:$0xff] }
 0x2a4   : > { %v11877_v11 = vadd.f32 %v1251_v63, %v11794_v59  ;;  %1205 = vadd.xlane.f32.xlu1 %v1204_v54  ;;  %9481 = vmatprep.mubr.msk.f32.mxu1 %vm425_vm11, %v2609_v47  ;;  %v11880_v12 = vpop.xlane.xlu0 %1569  ;;  %v1592_v59 = vsel %vm425_vm11, %v1518_v1, 0.0  ;;  %v2201_v63 = vmul.f32 %v10665_v29, %v14878_v4  ;;  %v1964_v1 = vadd.f32 %v1932_v52, %v14889_v62 }
 0x2a5   : > { %v11883_v46 = vpop.xlane.xlu1 %1858  ;;  %v11885_v55 = vld [vmem:[#allocation2 + $0x48] sm:$0xff]  ;;  %v2569_v26 = vsel %vm2545_vm3, %v2520_v0, %v2521_v49  ;;  %v841_v47 = vmul.f32 %v10598_v30, %v14882_v48 }
 0x2a6   : > { %9544 = vmatmul.mubr.msk.f32.gmra.mrb[18].mxu0 %vm425_vm11, %v11885_v55  ;;  %v2522_v35 = vrot.slane %v11885_v55, 7  ;;  %v2613_v54 = vsel %vm278_vm2, %v2569_v26, 0.0  ;;  %v14890_v26 = vld [vmem:[#allocation14_spill] sm:$0xff] }
 0x2a7   : > { %9482 = vmatmul.mubr.msk.f32.gmra.mrb[4].mxu1 %vm425_vm11, %v11585_v18  ;;  %1593 = vadd.xlane.f32.xlu0 %v1592_v59  ;;  %v2075_v18 = vsel %vm425_vm11, %v2005_v6, 0.0  ;;  %v2161_v59 = vadd.f32 %v2129_v25, %v1964_v1  ;;  %v923_v25 = vsel %vm425_vm11, %v841_v47, 0.0  ;;  %v2006_v1 = vmul.f32 %v10507_v34, %v14885_v56 }
 0x2a8   : > { %1882 = vadd.xlane.f32.xlu1 %v1881_v20  ;;  %9484 = vmatprep.mubr.msk.f32.mxu1 %vm425_vm11, %v14886_v58  ;;  %v2053_v22 = vpop.xlane.xlu0 %2052  ;;  %v2568_v43 = vsel %vm2545_vm3, %v2521_v49, %v2522_v35  ;;  %v2269_v58 = vsel %vm425_vm11, %v2201_v63, 0.0 }
 0x2a9   : > { %v1376_v13 = vpop.xlane.xlu1 %1375 }
 0x2aa   : > { %v1447_v21 = vmul.f32 %v11668_v61, %v1376_v13 }
 0x2ab   : > { %9485 = vmatmul.mubr.msk.f32.gmra.mrb[6].mxu1 %vm425_vm11, %v2570_v16  ;;  %2076 = vadd.xlane.f32.xlu0 %v2075_v18  ;;  %v1323_v18 = vmul.f32 %v10618_v19, %v14880_v36 }
 0x2ac   : > { %v11923_v3 = vadd.f32 %v1447_v21, %v11833_v57  ;;  %1399 = vadd.xlane.f32.xlu1 %v1398_v37  ;;  %9487 = vmatprep.mubr.msk.f32.mxu1 %vm425_vm11, %v2613_v54  ;;  %v2247_v6 = vpop.xlane.xlu0 %2246  ;;  %v1127_v57 = vmul.f32 %v10501_v32, %v14890_v26  ;;  %v1810_v37 = vmul.f32 %v10504_v33, %v14885_v56 }
 0x2ad   : > { %v901_v0 = vpop.xlane.xlu1 %900  ;;  %v2326_v52 = vmul.f32 %v11748_v60, %v2247_v6  ;;  %v1401_v6 = vsel %vm425_vm11, %v1323_v18, 0.0 }
 0x2ae   : > { %v966_v20 = vmul.f32 %v11644_v39, %v901_v0  ;;  %v1207_v62 = vsel %vm425_vm11, %v1127_v57, 0.0  ;;  %v2078_v57 = vsel %vm425_vm11, %v2006_v1, 0.0 }
 0x2af   : > { %v2358_v13 = vadd.f32 %v2326_v52, %v2161_v59  ;;  %9488 = vmatmul.mubr.msk.f32.gmra.mrb[8].mxu1 %vm425_vm11, %v2568_v43  ;;  %2270 = vadd.xlane.f32.xlu0 %v2269_v58  ;;  %v2130_v52 = vmul.f32 %v11725_v44, %v2053_v22  ;;  %v14891_v43 = vld [vmem:[#allocation24_spill] sm:$0xff] }
 0x2b0   : > { %v11940_v21 = vadd.f32 %v966_v20, %v11856_v27  ;;  %924 = vadd.xlane.f32.xlu1 %v923_v25  ;;  %v1185_v9 = vpop.xlane.xlu0 %1184  ;;  %v1933_v27 = vmul.f32 %v11713_v10, %v11812_v24  ;;  %v1884_v24 = vsel %vm425_vm11, %v1810_v37, 0.0 }
 0x2b1   : > { %v2395_v49 = vadd.f32 %v11768_v2, %v2358_v13  ;;  %v1379_v51 = vpop.xlane.xlu1 %1378  ;;  %v1252_v16 = vmul.f32 %v11656_v40, %v1185_v9 }
 0x2b2   : > { %v1448_v63 = vmul.f32 %v11668_v61, %v1379_v51  ;;  %v1965_v58 = vadd.f32 %v1933_v27, %v14891_v43 }
 0x2b3   : > { %v2427_v54 = vmax.f32 %v2395_v49, 0.0  ;;  %v11953_v47 = vadd.f32 %v1252_v16, %v11866_v8  ;;  %1208 = vadd.xlane.f32.xlu0 %v1207_v62  ;;  %v2202_v8 = vmul.f32 %v10700_v45, %v14878_v4  ;;  %v629_v49 = vmul.f32 %v10689_v14, %v14882_v48 }
 0x2b4   : > { %v11957_v59 = vadd.f32 %v1448_v63, %v11877_v11  ;;  %1402 = vadd.xlane.f32.xlu1 %v1401_v6  ;;  %v11959_v0 = vpop.xlane.xlu0 %1861  ;;  %v419_v11 = vmul.f32 %v10652_v17, %v14882_v48  ;;  %v2162_v22 = vadd.f32 %v2130_v52, %v1965_v58  ;;  %v1519_v16 = vmul.f32 %v10665_v29, %v14880_v36 }
 0x2b5   : > { %2459 = vst.msk [vmem:[#allocation2 + $0x50] sm:$0xff] %vm425_vm11, %v2427_v54  ;;  %v11963_v20 = vpop.xlane.xlu1 %2055  ;;  %v2272_v9 = vsel %vm425_vm11, %v2202_v8, 0.0  ;;  %v713_v52 = vsel %vm425_vm11, %v629_v49, 0.0  ;;  %v420_v8 = vmul.f32 %v10671_v31, %v14882_v48  ;;  %v1128_v49 = vmul.f32 %v10504_v33, %v14890_v26 }
 0x2b6   : > { %v504_v51 = vsel %vm425_vm11, %v419_v11, 0.0 }
 0x2b7   : > { %1885 = vadd.xlane.f32.xlu0 %v1884_v24  ;;  %v630_v24 = vmul.f32 %v10618_v19, %v14882_v48 }
 0x2b8   : > { %2079 = vadd.xlane.f32.xlu1 %v2078_v57  ;;  %v2250_v13 = vpop.xlane.xlu0 %2249  ;;  %v1595_v57 = vsel %vm425_vm11, %v1519_v16, 0.0  ;;  %v1642_v16 = vmul.f32 %v11741_v15, %v11796_v28  ;;  %v2007_v28 = vmul.f32 %v10522_v42, %v14885_v56 }
 0x2b9   : > { %v482_v25 = vpop.xlane.xlu1 %481  ;;  %v2327_v18 = vmul.f32 %v11748_v60, %v2250_v13  ;;  %v716_v55 = vsel %vm425_vm11, %v630_v24, 0.0 }
 0x2ba   : > { %v545_v1 = vmul.f32 %v11605_v41, %v482_v25 }
 0x2bb   : > { %v2359_v4 = vadd.f32 %v2327_v18, %v2162_v22  ;;  %2273 = vadd.xlane.f32.xlu0 %v2272_v9  ;;  %v507_v9 = vsel %vm425_vm11, %v420_v8, 0.0 }
 0x2bc   : > { %505 = vadd.xlane.f32.xlu1 %v504_v51  ;;  %v691_v63 = vpop.xlane.xlu0 %690  ;;  %v3000_v62 = vld [vmem:[#allocation2 + $0x50] sm:$0xff] }
 0x2bd   : > { %v2396_v37 = vadd.f32 %v11768_v2, %v2359_v4  ;;  %v11981_v27 = vpop.xlane.xlu1 %1572  ;;  %v754_v54 = vmul.f32 %v11631_v23, %v691_v63  ;;  %9546 = vmatprep.mubr.msk.f32.mxu0 %vm425_vm11, %v3000_v62  ;;  %v2523_v6 = vrot.slane %v3000_v62, 7 }
 0x2bf   : > { %v2428_v43 = vmax.f32 %v2396_v37, 0.0  ;;  %v786_v58 = vadd.f32 %v754_v54, %v545_v1  ;;  %714 = vadd.xlane.f32.xlu0 %v713_v52  ;;  %v2567_v11 = vsel %vm2545_vm3, %v2522_v35, %v2523_v6  ;;  %v1324_v35 = vmul.f32 %v10507_v34, %v14890_v26 }
 0x2c0   : > { %1596 = vadd.xlane.f32.xlu1 %v1595_v57  ;;  %9490 = vmatprep.mubr.msk.f32.mxu1 %vm425_vm11, %v2567_v11  ;;  %v485_v13 = vpop.xlane.xlu0 %484  ;;  %v1210_v37 = vsel %vm425_vm11, %v1128_v49, 0.0  ;;  %v1520_v54 = vmul.f32 %v10700_v45, %v14880_v36  ;;  %v1934_v52 = vmul.f32 %v11713_v10, %v11883_v46  ;;  %v1674_v36 = vadd.f32 %v1642_v16, %v11682_v50 }
 0x2c1   : > { %2460 = vst.msk [vmem:[#allocation2 + $0x58] sm:$0xff] %vm425_vm11, %v2428_v43  ;;  %v694_v22 = vpop.xlane.xlu1 %693  ;;  %v546_v25 = vmul.f32 %v11605_v41, %v485_v13  ;;  %v1404_v8 = vsel %vm425_vm11, %v1324_v35, 0.0  ;;  %v2131_v46 = vmul.f32 %v11725_v44, %v11963_v20  ;;  %v842_v20 = vmul.f32 %v10665_v29, %v14882_v48 }
 0x2c2   : > { %v755_v18 = vmul.f32 %v11631_v23, %v694_v22  ;;  %v1598_v22 = vsel %vm425_vm11, %v1520_v54, 0.0 }
 0x2c3   : > { %508 = vadd.xlane.f32.xlu0 %v507_v9 }
 0x2c4   : > { %v12005_v4 = vadd.f32 %v755_v18, %v546_v25  ;;  %717 = vadd.xlane.f32.xlu1 %v716_v55  ;;  %v1188_v51 = vpop.xlane.xlu0 %1187  ;;  %v1966_v25 = vadd.f32 %v1934_v52, %v1674_v36  ;;  %v2081_v18 = vsel %vm425_vm11, %v2007_v28, 0.0  ;;  %v1325_v36 = vmul.f32 %v10522_v42, %v14890_v26 }
 0x2c5   : > { %v1382_v63 = vpop.xlane.xlu1 %1381  ;;  %v1253_v62 = vmul.f32 %v11656_v40, %v1188_v51 }
 0x2c6   : > { %v1449_v1 = vmul.f32 %v11668_v61, %v1382_v63  ;;  %v2163_v49 = vadd.f32 %v2131_v46, %v1966_v25  ;;  %v1811_v63 = vmul.f32 %v10652_v17, %v14885_v56 }
 0x2c7   : > { %v12017_v24 = vadd.f32 %v1253_v62, %v11940_v21  ;;  %1211 = vadd.xlane.f32.xlu0 %v1210_v37 }
 0x2c8   : > { %v12023_v43 = vadd.f32 %v1449_v1, %v11953_v47  ;;  %1405 = vadd.xlane.f32.xlu1 %v1404_v8  ;;  %v12025_v57 = vpop.xlane.xlu0 %1575  ;;  %v12027_v11 = vld [vmem:[#allocation2 + $0x58] sm:$0xff]  ;;  %v2203_v47 = vmul.f32 %v10606_v38, %v14885_v56  ;;  %v843_v1 = vmul.f32 %v10700_v45, %v14882_v48  ;;  %v1887_v28 = vsel %vm425_vm11, %v1811_v63, 0.0 }
 0x2c9   : > { %v2059_v21 = vpop.xlane.xlu1 %2058  ;;  %9547 = vmatmul.mubr.msk.f32.gmra.mrb[20].mxu0 %vm425_vm11, %v12027_v11  ;;  %v2524_v13 = vrot.slane %v12027_v11, 7  ;;  %v1521_v48 = vmul.f32 %v10606_v38, %v14890_v26 }
 0x2ca   : > { %v2275_v16 = vsel %vm425_vm11, %v2203_v47, 0.0 }
 0x2cb   : > { %1599 = vadd.xlane.f32.xlu0 %v1598_v22  ;;  %v2566_v50 = vsel %vm2545_vm3, %v2523_v6, %v2524_v13  ;;  %v926_v6 = vsel %vm425_vm11, %v842_v20, 0.0  ;;  %v929_v22 = vsel %vm425_vm11, %v843_v1, 0.0 }
 0x2cc   : > { %2082 = vadd.xlane.f32.xlu1 %v2081_v18  ;;  %9491 = vmatmul.mubr.msk.f32.gmra.mrb[10].mxu1 %vm425_vm11, %v2566_v50  ;;  %v2253_v9 = vpop.xlane.xlu0 %2252  ;;  %v1643_v50 = vmul.f32 %v11741_v15, %v11880_v12 }
 0x2cd   : > { %v904_v55 = vpop.xlane.xlu1 %903  ;;  %v2328_v35 = vmul.f32 %v11748_v60, %v2253_v9  ;;  %v1407_v9 = vsel %vm425_vm11, %v1325_v36, 0.0  ;;  %v2008_v36 = vmul.f32 %v10689_v14, %v14885_v56 }
 0x2ce   : > { %v967_v51 = vmul.f32 %v11644_v39, %v904_v55  ;;  %v1675_v1 = vadd.f32 %v1643_v50, %v11806_v53 }
 0x2cf   : > { %v2360_v62 = vadd.f32 %v2328_v35, %v2163_v49  ;;  %2276 = vadd.xlane.f32.xlu0 %v2275_v16  ;;  %v1812_v49 = vmul.f32 %v10671_v31, %v14885_v56  ;;  %v1601_v35 = vsel %vm425_vm11, %v1521_v48, 0.0  ;;  %v1935_v16 = vmul.f32 %v11713_v10, %v11959_v0 }
 0x2d0   : > { %v12054_v37 = vadd.f32 %v967_v51, %v786_v58  ;;  %927 = vadd.xlane.f32.xlu1 %v926_v6  ;;  %v12056_v54 = vpop.xlane.xlu0 %1864  ;;  %v2204_v51 = vmul.f32 %v10598_v30, %v14885_v56 }
 0x2d1   : > { %v2397_v52 = vadd.f32 %v11768_v2, %v2360_v62  ;;  %v488_v8 = vpop.xlane.xlu1 %487 }
 0x2d2   : > { %v547_v47 = vmul.f32 %v11605_v41, %v488_v8  ;;  %v1890_v8 = vsel %vm425_vm11, %v1812_v49, 0.0 }
 0x2d3   : > { %v2429_v46 = vmax.f32 %v2397_v52, 0.0  ;;  %1888 = vadd.xlane.f32.xlu0 %v1887_v28  ;;  %v2132_v52 = vmul.f32 %v11725_v44, %v2059_v21  ;;  %v1129_v28 = vmul.f32 %v10652_v17, %v14890_v26 }
 0x2d4   : > { %930 = vadd.xlane.f32.xlu1 %v929_v22  ;;  %v697_v58 = vpop.xlane.xlu0 %696 }
 0x2d5   : > { %2461 = vst.msk [vmem:[#allocation2 + $0x60] sm:$0xff] %vm425_vm11, %v2429_v46  ;;  %v907_v25 = vpop.xlane.xlu1 %906  ;;  %v756_v18 = vmul.f32 %v11631_v23, %v697_v58  ;;  %v1967_v46 = vadd.f32 %v1935_v16, %v1675_v1 }
 0x2d6   : > { %v968_v20 = vmul.f32 %v11644_v39, %v907_v25  ;;  %v1130_v25 = vmul.f32 %v10671_v31, %v14890_v26 }
 0x2d7   : > { %v12074_v55 = vadd.f32 %v756_v18, %v547_v47  ;;  %1408 = vadd.xlane.f32.xlu0 %v1407_v9  ;;  %v1213_v47 = vsel %vm425_vm11, %v1129_v28, 0.0  ;;  %v2084_v18 = vsel %vm425_vm11, %v2008_v36, 0.0 }
 0x2d8   : > { %v12082_v12 = vadd.f32 %v968_v20, %v12005_v4  ;;  %1602 = vadd.xlane.f32.xlu1 %v1601_v35  ;;  %v1385_v63 = vpop.xlane.xlu0 %1384  ;;  %v2278_v4 = vsel %vm425_vm11, %v2204_v51, 0.0  ;;  %v1522_v20 = vmul.f32 %v10598_v30, %v14890_v26  ;;  %v1216_v11 = vsel %vm425_vm11, %v1130_v25, 0.0 }
 0x2d9   : > { %v12084_v62 = vpop.xlane.xlu1 %1578  ;;  %v1450_v6 = vmul.f32 %v11668_v61, %v1385_v63 }
 0x2db   : > { %v12093_v0 = vadd.f32 %v1450_v6, %v12017_v24  ;;  %1891 = vadd.xlane.f32.xlu0 %v1890_v8  ;;  %v2164_v24 = vadd.f32 %v2132_v52, %v1967_v46  ;;  %v14892_v6 = vld [vmem:[#allocation20_spill] sm:$0xff]  ;;  %v1604_v52 = vsel %vm425_vm11, %v1522_v20, 0.0  ;;  %v2009_v8 = vmul.f32 %v10618_v19, %v14885_v56 }
 0x2dc   : > { %2279 = vadd.xlane.f32.xlu1 %v2278_v4  ;;  %v12098_v22 = vpop.xlane.xlu0 %1867  ;;  %v12100_v53 = vld [vmem:[#allocation2 + $0x60] sm:$0xff] }
 0x2dd   : > { %v2256_v21 = vpop.xlane.xlu1 %2255  ;;  %9549 = vmatprep.mubr.msk.f32.mxu0 %vm425_vm11, %v12100_v53  ;;  %v2525_v48 = vrot.slane %v12100_v53, 7  ;;  %v2087_v25 = vsel %vm425_vm11, %v2009_v8, 0.0 }
 0x2de   : > { %v2329_v58 = vmul.f32 %v11748_v60, %v2256_v21 }
 0x2df   : > { %1214 = vadd.xlane.f32.xlu0 %v1213_v47  ;;  %v2565_v50 = vsel %vm2545_vm3, %v2524_v13, %v2525_v48  ;;  %v1813_v13 = vmul.f32 %v10501_v32, %v14892_v6  ;;  %v1326_v47 = vmul.f32 %v10689_v14, %v14890_v26 }
 0x2e0   : > { %v2361_v9 = vadd.f32 %v2329_v58, %v2164_v24  ;;  %2085 = vadd.xlane.f32.xlu1 %v2084_v18  ;;  %v1191_v49 = vpop.xlane.xlu0 %1190  ;;  %v2617_v35 = vsel %vm278_vm2, %v2565_v50, 0.0  ;;  %v2205_v18 = vmul.f32 %v10665_v29, %v14885_v56 }
 0x2e1   : > { %v2062_v51 = vpop.xlane.xlu1 %2061  ;;  %v1254_v16 = vmul.f32 %v11656_v40, %v1191_v49  ;;  %9493 = vmatprep.mubr.msk.f32.mxu1 %vm425_vm11, %v2617_v35  ;;  %v1410_v49 = vsel %vm425_vm11, %v1326_v47, 0.0  ;;  %v1327_v35 = vmul.f32 %v10618_v19, %v14890_v26  ;;  %v2206_v47 = vmul.f32 %v10700_v45, %v14885_v56 }
 0x2e2   : > { %v2398_v63 = vadd.f32 %v11768_v2, %v2361_v9 }
 0x2e3   : > { %v1286_v1 = vadd.f32 %v1254_v16, %v12054_v37  ;;  %1217 = vadd.xlane.f32.xlu0 %v1216_v11  ;;  %v1893_v37 = vsel %vm425_vm11, %v1813_v13, 0.0  ;;  %v1814_v11 = vmul.f32 %v10504_v33, %v14892_v6  ;;  %v2284_v53 = vsel %vm425_vm11, %v2206_v47, 0.0 }
 0x2e4   : > { %v2430_v28 = vmax.f32 %v2398_v63, 0.0  ;;  %1605 = vadd.xlane.f32.xlu1 %v1604_v52  ;;  %v491_v4 = vpop.xlane.xlu0 %490  ;;  %v2281_v63 = vsel %vm425_vm11, %v2205_v18, 0.0 }
 0x2e5   : > { %v700_v36 = vpop.xlane.xlu1 %699  ;;  %v548_v46 = vmul.f32 %v11605_v41, %v491_v4  ;;  %v12131_v21 = vpop.f32.mrb[10].mxu0 }
 0x2e6   : > { %2462 = vst.msk [vmem:[#allocation2 + $0x68] sm:$0xff] %vm425_vm11, %v2430_v28  ;;  %v757_v24 = vmul.f32 %v11631_v23, %v700_v36  ;;  %v12135_v58 = vpop.f32.mrb[11].mxu0  ;;  %v1644_v28 = vmul.f32 %v11741_v15, %v11981_v27  ;;  %v1896_v27 = vsel %vm425_vm11, %v1814_v11, 0.0 }
 0x2e7   : > { %1894 = vadd.xlane.f32.xlu0 %v1893_v37  ;;  %v1936_v37 = vmul.f32 %v11713_v10, %v12056_v54 }
 0x2e8   : > { %v789_v41 = vadd.f32 %v757_v24, %v548_v46  ;;  %2088 = vadd.xlane.f32.xlu1 %v2087_v25  ;;  %v910_v50 = vpop.xlane.xlu0 %909  ;;  %v1413_v46 = vsel %vm425_vm11, %v1327_v35, 0.0  ;;  %v2010_v24 = vmul.f32 %v10507_v34, %v14892_v6 }
 0x2e9   : > { %v1194_v20 = vpop.xlane.xlu1 %1193  ;;  %v969_v9 = vmul.f32 %v11644_v39, %v910_v50  ;;  %v1676_v50 = vadd.f32 %v1644_v28, %v11923_v3 }
 0x2ea   : > { %v1255_v23 = vmul.f32 %v11656_v40, %v1194_v20  ;;  %v2133_v20 = vmul.f32 %v11725_v44, %v2062_v51  ;;  %v2090_v56 = vsel %vm425_vm11, %v2010_v24, 0.0  ;;  %v2011_v24 = vmul.f32 %v10522_v42, %v14892_v6 }
 0x2eb   : > { %v1001_v16 = vadd.f32 %v969_v9, %v12074_v55  ;;  %1411 = vadd.xlane.f32.xlu0 %v1410_v49  ;;  %v1968_v49 = vadd.f32 %v1936_v37, %v1676_v50 }
 0x2ec   : > { %v1287_v13 = vadd.f32 %v1255_v23, %v12082_v12  ;;  %2282 = vadd.xlane.f32.xlu1 %v2281_v63  ;;  %v12153_v52 = vpop.f32.mrb[12].mxu0  ;;  %v12155_v8 = vpop.xlane.xlu0 %1581  ;;  %v1523_v23 = vmul.f32 %v10665_v29, %v14890_v26 }
 0x2ed   : > { %v12159_v4 = vpop.xlane.xlu1 %1870  ;;  %v12161_v36 = vpop.f32.mrb[13].mxu0  ;;  %v12163_v55 = vld [vmem:[#allocation2 + $0x68] sm:$0xff]  ;;  %v2165_v35 = vadd.f32 %v2133_v20, %v1968_v49 }
 0x2ee   : > { %9550 = vmatmul.mubr.msk.f32.gmra.mrb[22].mxu0 %vm425_vm11, %v12163_v55  ;;  %v2526_v12 = vrot.slane %v12163_v55, 7 }
 0x2ef   : > { %1414 = vadd.xlane.f32.xlu0 %v1413_v46  ;;  %v1607_v46 = vsel %vm425_vm11, %v1523_v23, 0.0  ;;  %v1937_v23 = vmul.f32 %v11713_v10, %v12098_v22 }
 0x2f0   : > { %1897 = vadd.xlane.f32.xlu1 %v1896_v27  ;;  %v2564_v25 = vsel %vm2545_vm3, %v2525_v48, %v2526_v12  ;;  %v2065_v18 = vpop.xlane.xlu0 %2064  ;;  %v1524_v48 = vmul.f32 %v10700_v45, %v14890_v26  ;;  %v2207_v26 = vmul.f32 %v10606_v38, %v14892_v6 }
 0x2f1   : > { %v1388_v54 = vpop.xlane.xlu1 %1387  ;;  %9494 = vmatmul.mubr.msk.f32.gmra.mrb[12].mxu1 %vm425_vm11, %v2564_v25  ;;  %v1645_v25 = vmul.f32 %v11741_v15, %v12025_v57 }
 0x2f2   : > { %v1451_v9 = vmul.f32 %v11668_v61, %v1388_v54  ;;  %v1610_v27 = vsel %vm425_vm11, %v1524_v48, 0.0 }
 0x2f3   : > { %2091 = vadd.xlane.f32.xlu0 %v2090_v56  ;;  %v1816_v56 = vmul.f32 %v10671_v31, %v14892_v6  ;;  %v1677_v48 = vadd.f32 %v1645_v25, %v11957_v59  ;;  %v2134_v31 = vmul.f32 %v11725_v44, %v2065_v18 }
 0x2f4   : > { %v12192_v3 = vadd.f32 %v1451_v9, %v1286_v1  ;;  %2285 = vadd.xlane.f32.xlu1 %v2284_v53  ;;  %v2259_v51 = vpop.xlane.xlu0 %2258  ;;  %v2093_v9 = vsel %vm425_vm11, %v2011_v24, 0.0  ;;  %v2287_v53 = vsel %vm425_vm11, %v2207_v26, 0.0  ;;  %v2209_v24 = vmul.f32 %v10665_v29, %v14892_v6 }
 0x2f5   : > { %v913_v63 = vpop.xlane.xlu1 %912  ;;  %v2330_v11 = vmul.f32 %v11748_v60, %v2259_v51 }
 0x2f6   : > { %v970_v28 = vmul.f32 %v11644_v39, %v913_v63  ;;  %v2012_v63 = vmul.f32 %v10689_v14, %v14892_v6 }
 0x2f7   : > { %v2362_v37 = vadd.f32 %v2330_v11, %v2165_v35  ;;  %1608 = vadd.xlane.f32.xlu0 %v1607_v46  ;;  %v1969_v35 = vadd.f32 %v1937_v23, %v1677_v48  ;;  %v2293_v23 = vsel %vm425_vm11, %v2209_v24, 0.0 }
 0x2f8   : > { %v12202_v1 = vadd.f32 %v970_v28, %v789_v41  ;;  %1611 = vadd.xlane.f32.xlu1 %v1610_v27  ;;  %v1197_v47 = vpop.xlane.xlu0 %1196  ;;  %v1815_v41 = vmul.f32 %v10652_v17, %v14892_v6  ;;  %v2096_v26 = vsel %vm425_vm11, %v2012_v63, 0.0 }
 0x2f9   : > { %v2399_v39 = vadd.f32 %v11768_v2, %v2362_v37  ;;  %v1391_v50 = vpop.xlane.xlu1 %1390  ;;  %v1256_v20 = vmul.f32 %v11656_v40, %v1197_v47  ;;  %v2166_v11 = vadd.f32 %v2134_v31, %v1969_v35  ;;  %v2013_v37 = vmul.f32 %v10618_v19, %v14892_v6 }
 0x2fa   : > { %v1452_v54 = vmul.f32 %v11668_v61, %v1391_v50  ;;  %v1899_v22 = vsel %vm425_vm11, %v1815_v41, 0.0 }
 0x2fb   : > { %v2431_v49 = vmax.f32 %v2399_v39, 0.0  ;;  %v12216_v57 = vadd.f32 %v1256_v20, %v1001_v16  ;;  %2094 = vadd.xlane.f32.xlu0 %v2093_v9  ;;  %v2208_v16 = vmul.f32 %v10598_v30, %v14892_v6  ;;  %v12244_v39 = vld [vmem:[%s14752_s3] ss:$0 sm:$0xff]  ;;  %v12253_v9 = vld [vmem:[%s14752_s3 + $0x1] ss:$0 sm:$0xff] }
 0x2fc   : > { %v12219_v40 = vadd.f32 %v1452_v54, %v1287_v13  ;;  %2288 = vadd.xlane.f32.xlu1 %v2287_v53  ;;  %v12221_v61 = vpop.xlane.xlu0 %1873  ;;  %v1902_v13 = vsel %vm425_vm11, %v1816_v56, 0.0  ;;  %v2210_v53 = vmul.f32 %v10700_v45, %v14892_v6 }
 0x2fd   : > { %2463 = vst.msk [vmem:[#allocation2 + $0x70] sm:$0xff] %vm425_vm11, %v2431_v49  ;;  %v12226_v51 = vpop.xlane.xlu1 %2067  ;;  %v2290_v46 = vsel %vm425_vm11, %v2208_v16, 0.0  ;;  %v2099_v49 = vsel %vm425_vm11, %v2013_v37, 0.0  ;;  %v14893_v16 = vld [vmem:[#allocation16_spill] sm:$0xff] }
 0x2fe   : > { %v421_v35 = vmul.f32 %v10501_v32, %v14893_v16  ;;  %v631_v55 = vmul.f32 %v10507_v34, %v14893_v16 }
 0x2ff   : > { %1900 = vadd.xlane.f32.xlu0 %v1899_v22 }
 0x300   : > { %1903 = vadd.xlane.f32.xlu1 %v1902_v13  ;;  %v2262_v59 = vpop.xlane.xlu0 %2261  ;;  %v719_v37 = vsel %vm425_vm11, %v631_v55, 0.0 }
 0x301   : > { %v494_v18 = vpop.xlane.xlu1 %493  ;;  %v2331_v28 = vmul.f32 %v11748_v60, %v2262_v59  ;;  %v2296_v59 = vsel %vm425_vm11, %v2210_v53, 0.0 }
 0x302   : > { %v549_v50 = vmul.f32 %v12244_v39, %v494_v18 }
 0x303   : > { %v2363_v27 = vadd.f32 %v2331_v28, %v2166_v11  ;;  %2291 = vadd.xlane.f32.xlu0 %v2290_v46  ;;  %v844_v11 = vmul.f32 %v10606_v38, %v14893_v16  ;;  %v1646_v46 = vmul.f32 %v11741_v15, %v12084_v62 }
 0x304   : > { %2097 = vadd.xlane.f32.xlu1 %v2096_v26  ;;  %v703_v47 = vpop.xlane.xlu0 %702  ;;  %v3004_v25 = vld [vmem:[#allocation2 + $0x70] sm:$0xff] }
 0x305   : > { %v2400_v20 = vadd.f32 %v11768_v2, %v2363_v27  ;;  %v12248_v54 = vpop.xlane.xlu1 %1584  ;;  %v758_v56 = vmul.f32 %v12253_v9, %v703_v47  ;;  %9552 = vmatprep.mubr.msk.f32.mxu0 %vm425_vm11, %v3004_v25  ;;  %v2527_v41 = vrot.slane %v3004_v25, 7  ;;  %v14894_v27 = vld [vmem:[#allocation15_spill] sm:$0xff]  ;;  %v1938_v47 = vmul.f32 %v11713_v10, %v12159_v4 }
 0x306   : > { %v1131_v26 = vmul.f32 %v10501_v32, %v14894_v27  ;;  %v932_v25 = vsel %vm425_vm11, %v844_v11, 0.0  ;;  %v1678_v62 = vadd.f32 %v1646_v46, %v12023_v43  ;;  %v14895_v43 = vld [vmem:[#allocation21_spill] sm:$0xff]  ;;  %v3652_v46 = vld [vmem:[%s14750_s1 + $0x48] sm:$0xff] }
 0x307   : > { %v2432_v48 = vmax.f32 %v2400_v20, 0.0  ;;  %v12261_v31 = vadd.f32 %v758_v56, %v549_v50  ;;  %2100 = vadd.xlane.f32.xlu0 %v2099_v49  ;;  %v2563_v22 = vsel %vm2545_vm3, %v2526_v12, %v2527_v41  ;;  %v510_v12 = vsel %vm425_vm11, %v421_v35, 0.0 }
 0x308   : > { %2294 = vadd.xlane.f32.xlu1 %v2293_v23  ;;  %9496 = vmatprep.mubr.msk.f32.mxu1 %vm425_vm11, %v2563_v22  ;;  %v497_v13 = vpop.xlane.xlu0 %496  ;;  %v1328_v50 = vmul.f32 %v10507_v34, %v14894_v27  ;;  %v2135_v56 = vmul.f32 %v11725_v44, %v12226_v51  ;;  %v1219_v4 = vsel %vm425_vm11, %v1131_v26, 0.0  ;;  %v1525_v49 = vmul.f32 %v10606_v38, %v14894_v27 }
 0x309   : > { %2464 = vst.msk [vmem:[#allocation2 + $0x78] sm:$0xff] %vm425_vm11, %v2432_v48  ;;  %v706_v63 = vpop.xlane.xlu1 %705  ;;  %v550_v45 = vmul.f32 %v12244_v39, %v497_v13  ;;  %v1970_v53 = vadd.f32 %v1938_v47, %v1678_v62  ;;  %v1817_v51 = vmul.f32 %v10501_v32, %v14895_v43  ;;  %v2211_v32 = vmul.f32 %v10606_v38, %v14895_v43 }
 0x30a   : > { %v759_v6 = vmul.f32 %v12253_v9, %v706_v63  ;;  %v1416_v48 = vsel %vm425_vm11, %v1328_v50, 0.0  ;;  %v422_v38 = vmul.f32 %v10504_v33, %v14893_v16 }
 0x30b   : > { %2297 = vadd.xlane.f32.xlu0 %v2296_v59  ;;  %v2167_v35 = vadd.f32 %v2135_v56, %v1970_v53  ;;  %v12350_v56 = vld [vmem:[%s14752_s3 + $0x5] ss:$0 sm:$0xff]  ;;  %v845_v53 = vmul.f32 %v10598_v30, %v14893_v16 }
 0x30c   : > { %v12279_v18 = vadd.f32 %v759_v6, %v550_v45  ;;  %511 = vadd.xlane.f32.xlu1 %v510_v12  ;;  %v12281_v28 = vpop.xlane.xlu0 %1199  ;;  %v1613_v45 = vsel %vm425_vm11, %v1525_v49, 0.0  ;;  %v2014_v6 = vmul.f32 %v10507_v34, %v14895_v43  ;;  %v513_v49 = vsel %vm425_vm11, %v422_v38, 0.0  ;;  %v12394_v38 = vld [vmem:[%s14752_s3 + $0x8] ss:$0 sm:$0xff] }
 0x30d   : > { %v12285_v24 = vpop.xlane.xlu1 %1393 }
 0x30f   : > { %720 = vadd.xlane.f32.xlu0 %v719_v37  ;;  %v2102_v37 = vsel %vm425_vm11, %v2014_v6, 0.0 }
 0x310   : > { %933 = vadd.xlane.f32.xlu1 %v932_v25  ;;  %v12295_v20 = vpop.xlane.xlu0 %1587  ;;  %v12297_v15 = vld [vmem:[#allocation2 + $0x78] sm:$0xff]  ;;  %v632_v25 = vmul.f32 %v10522_v42, %v14893_v16 }
 0x311   : > { %v2071_v23 = vpop.xlane.xlu1 %2070  ;;  %9553 = vmatmul.mubr.msk.f32.gmra.mrb[24].mxu0 %vm425_vm11, %v12297_v15  ;;  %v2528_v10 = vrot.slane %v12297_v15, 7  ;;  %v12417_v15 = vld [vmem:[%s14752_s3 + $0x9] ss:$0 sm:$0xff] }
 0x313   : > { %1220 = vadd.xlane.f32.xlu0 %v1219_v4  ;;  %v2562_v44 = vsel %vm2545_vm3, %v2527_v41, %v2528_v10  ;;  %v1905_v41 = vsel %vm425_vm11, %v1817_v51, 0.0  ;;  %v1647_v4 = vmul.f32 %v12350_v56, %v12155_v8  ;;  %v12363_v51 = vld [vmem:[%s14752_s3 + $0x6] ss:$0 sm:$0xff] }
 0x314   : > { %1417 = vadd.xlane.f32.xlu1 %v1416_v48  ;;  %9497 = vmatmul.mubr.msk.f32.gmra.mrb[14].mxu1 %vm425_vm11, %v2562_v44  ;;  %v2265_v22 = vpop.xlane.xlu0 %2264  ;;  %v722_v48 = vsel %vm425_vm11, %v632_v25, 0.0  ;;  %v423_v44 = vmul.f32 %v10652_v17, %v14893_v16 }
 0x315   : > { %v12316_v13 = vpop.xlane.xlu1 %915  ;;  %v2332_v63 = vmul.f32 %v11748_v60, %v2265_v22  ;;  %v3651_v60 = vld [vmem:[%s14750_s1 + $0x40] sm:$0xff]  ;;  %v1939_v22 = vmul.f32 %v12363_v51, %v12221_v61 }
 0x316   : > { %v10072_v26 = vpack.c.bf16 %v3652_v46, %v3651_v60  ;;  %v516_v61 = vsel %vm425_vm11, %v423_v44, 0.0 }
 0x317   : > { %v2364_v59 = vadd.f32 %v2332_v63, %v2167_v35  ;;  %1614 = vadd.xlane.f32.xlu0 %v1613_v45  ;;  %v1679_v63 = vadd.f32 %v1647_v4, %v12093_v0  ;;  %v12375_v45 = vld [vmem:[%s14752_s3 + $0x7] ss:$0 sm:$0xff] }
 0x318   : > { %1906 = vadd.xlane.f32.xlu1 %v1905_v41  ;;  %v12325_v55 = vpop.xlane.xlu0 %1876  ;;  %10073 = vmatprep.subr.bf16.mxu1 %v10072_v26  ;;  %v2136_v6 = vmul.f32 %v12375_v45, %v2071_v23  ;;  %v633_v41 = vmul.f32 %v10689_v14, %v14893_v16 }
 0x319   : > { %v2401_v12 = vadd.f32 %v11768_v2, %v2364_v59  ;;  %v12328_v11 = vpop.xlane.xlu1 %499  ;;  %v2299_v2 = vsel %vm425_vm11, %v2211_v32, 0.0  ;;  %10075 = vmatpush3.bf16.msra.mxu1 %v10072_v26  ;;  %v935_v59 = vsel %vm425_vm11, %v845_v53, 0.0  ;;  %v1132_v32 = vmul.f32 %v10504_v33, %v14894_v27 }
 0x31b   : > { %v2433_v47 = vmax.f32 %v2401_v12, 0.0  ;;  %2103 = vadd.xlane.f32.xlu0 %v2102_v37  ;;  %v1971_v12 = vadd.f32 %v1939_v22, %v1679_v63  ;;  %v1222_v25 = vsel %vm425_vm11, %v1132_v32, 0.0  ;;  %v1133_v63 = vmul.f32 %v10652_v17, %v14894_v27 }
 0x31c   : > { %2300 = vadd.xlane.f32.xlu1 %v2299_v2  ;;  %v12342_v50 = vpop.xlane.xlu0 %708  ;;  %v846_v2 = vmul.f32 %v10665_v29, %v14893_v16 }
 0x31d   : > { %2465 = vst.msk [vmem:[#allocation2 + $0x80] sm:$0xff] %vm425_vm11, %v2433_v47  ;;  %v12345_v62 = vpop.xlane.xlu1 %918  ;;  %v2168_v37 = vadd.f32 %v2136_v6, %v1971_v12  ;;  %v725_v47 = vsel %vm425_vm11, %v633_v41, 0.0  ;;  %v4200_v41 = vld [vmem:[%s14750_s1 + $0x60] sm:$0xff] }
 0x31e   : > { %v938_v22 = vsel %vm425_vm11, %v846_v2, 0.0 }
 0x31f   : > { %514 = vadd.xlane.f32.xlu0 %v513_v49  ;;  %v1329_v49 = vmul.f32 %v10522_v42, %v14894_v27 }
 0x320   : > { %723 = vadd.xlane.f32.xlu1 %v722_v48  ;;  %v12367_v8 = vpop.xlane.xlu0 %1396 }
 0x321   : > { %v12369_v35 = vpop.xlane.xlu1 %1590  ;;  %v1419_v6 = vsel %vm425_vm11, %v1329_v49, 0.0 }
 0x323   : > { %936 = vadd.xlane.f32.xlu0 %v935_v59  ;;  %v1526_v59 = vmul.f32 %v10598_v30, %v14894_v27 }
 0x324   : > { %517 = vadd.xlane.f32.xlu1 %v516_v61  ;;  %v12384_v0 = vpop.xlane.xlu0 %1879  ;;  %v12386_v60 = vld [vmem:[#allocation2 + $0x80] sm:$0xff]  ;;  %v4201_v61 = vld [vmem:[%s14750_s1 + $0x68] sm:$0xff] }
 0x325   : > { %v2268_v46 = vpop.xlane.xlu1 %2267  ;;  %9555 = vmatprep.mubr.msk.f32.mxu0 %vm425_vm11, %v12386_v60  ;;  %v2529_v23 = vrot.slane %v12386_v60, 7  ;;  %v1616_v2 = vsel %vm425_vm11, %v1526_v59, 0.0  ;;  %v4203_v59 = vld [vmem:[%s14750_s1 + $0x78] sm:$0xff] }
 0x326   : > { %v2333_v26 = vmul.f32 %v12394_v38, %v2268_v46  ;;  %v10080_v46 = vpack.c.bf16 %v4201_v61, %v4200_v41  ;;  %v3653_v41 = vld [vmem:[%s14750_s1 + $0x50] sm:$0xff] }
 0x327   : > { %726 = vadd.xlane.f32.xlu0 %v725_v47  ;;  %v2561_v4 = vsel %vm2545_vm3, %v2528_v10, %v2529_v23  ;;  %v1330_v47 = vmul.f32 %v10689_v14, %v14894_v27 }
 0x328   : > { %v2365_v53 = vadd.f32 %v2333_v26, %v2168_v37  ;;  %1223 = vadd.xlane.f32.xlu1 %v1222_v25  ;;  %v12409_v48 = vpop.xlane.xlu0 %1202  ;;  %v2621_v16 = vsel %vm278_vm2, %v2561_v4, 0.0  ;;  %v1225_v26 = vsel %vm425_vm11, %v1133_v63, 0.0  ;;  %10081 = vmatprep.subr.bf16.mxu0 %v10080_v46  ;;  %v1818_v25 = vmul.f32 %v10504_v33, %v14895_v43 }
 0x329   : > { %v2074_v44 = vpop.xlane.xlu1 %2073  ;;  %9499 = vmatprep.mubr.msk.f32.mxu1 %vm425_vm11, %v2621_v16  ;;  %10083 = vmatpush3.bf16.msra.mxu0 %v10080_v46  ;;  %v2015_v33 = vmul.f32 %v10522_v42, %v14895_v43  ;;  %v1648_v46 = vmul.f32 %v12350_v56, %v12248_v54 }
 0x32a   : > { %v2402_v10 = vadd.f32 %v12417_v15, %v2365_v53  ;;  %v1908_v63 = vsel %vm425_vm11, %v1818_v25, 0.0 }
 0x32b   : > { %939 = vadd.xlane.f32.xlu0 %v938_v22  ;;  %v1527_v22 = vmul.f32 %v10665_v29, %v14894_v27  ;;  %v2105_v54 = vsel %vm425_vm11, %v2015_v33, 0.0 }
 0x32c   : > { %v2434_v32 = vmax.f32 %v2402_v10, 0.0  ;;  %1420 = vadd.xlane.f32.xlu1 %v1419_v6  ;;  %v12432_v12 = vpop.xlane.xlu0 %502  ;;  %v1422_v10 = vsel %vm425_vm11, %v1330_v47, 0.0  ;;  %v4202_v6 = vld [vmem:[%s14750_s1 + $0x70] sm:$0xff] }
 0x32d   : > { %v12434_v37 = vpop.xlane.xlu1 %711  ;;  %v10084_v61 = vpack.c.bf16 %v4203_v59, %v4202_v6  ;;  %v1619_v25 = vsel %vm425_vm11, %v1527_v22, 0.0  ;;  %v1940_v6 = vmul.f32 %v12363_v51, %v12325_v55  ;;  %v2212_v59 = vmul.f32 %v10598_v30, %v14895_v43 }
 0x32e   : > { %2466 = vst.msk [vmem:[#allocation2 + $0x88] sm:$0xff] %vm425_vm11, %v2434_v32  ;;  %v3654_v32 = vld [vmem:[%s14750_s1 + $0x58] sm:$0xff]  ;;  %v2016_v30 = vmul.f32 %v10689_v14, %v14895_v43 }
 0x32f   : > { %1226 = vadd.xlane.f32.xlu0 %v1225_v26  ;;  %10085 = vmatprep.subr.bf16.mxu0 %v10084_v61 }
 0x330   : > { %1617 = vadd.xlane.f32.xlu1 %v1616_v2  ;;  %v12443_v4 = vpop.xlane.xlu0 %921  ;;  %v10076_v2 = vpack.c.bf16 %v3654_v32, %v3653_v41  ;;  %10087 = vmatpush3.bf16.msra.mxu0 %v10084_v61  ;;  %v2137_v32 = vmul.f32 %v12375_v45, %v2074_v44  ;;  %v2213_v61 = vmul.f32 %v10665_v29, %v14895_v43 }
 0x331   : > { %v12445_v49 = vpop.xlane.xlu1 %1205  ;;  %v12447_v53 = vpop.f32.mrb[14].mxu0  ;;  %v1649_v29 = vmul.f32 %v12350_v56, %v12295_v20 }
 0x332   : > { %v12449_v16 = vpop.f32.mrb[15].mxu0  ;;  %10077 = vmatprep.subr.bf16.mxu1 %v10076_v2 }
 0x333   : > { %1423 = vadd.xlane.f32.xlu0 %v1422_v10  ;;  %10079 = vmatpush3.bf16.msra.mxu1 %v10076_v2  ;;  %v2108_v2 = vsel %vm425_vm11, %v2016_v30, 0.0  ;;  %v1681_v30 = vadd.f32 %v1649_v29, %v12219_v40 }
 0x334   : > { %1909 = vadd.xlane.f32.xlu1 %v1908_v63  ;;  %v12466_v27 = vpop.xlane.xlu0 %1593  ;;  %v1819_v63 = vmul.f32 %v10652_v17, %v14895_v43  ;;  %v1680_v17 = vadd.f32 %v1648_v46, %v12192_v3 }
 0x335   : > { %v12473_v26 = vpop.xlane.xlu1 %1882  ;;  %v12475_v47 = vld [vmem:[#allocation2 + $0x88] sm:$0xff] }
 0x336   : > { %9556 = vmatmul.mubr.msk.f32.gmra.mrb[26].mxu0 %vm425_vm11, %v12475_v47  ;;  %v2530_v10 = vrot.slane %v12475_v47, 7  ;;  %v1911_v33 = vsel %vm425_vm11, %v1819_v63, 0.0  ;;  %v1972_v60 = vadd.f32 %v1940_v6, %v1680_v17  ;;  %v1941_v17 = vmul.f32 %v12363_v51, %v12384_v0 }
 0x337   : > { %1620 = vadd.xlane.f32.xlu0 %v1619_v25 }
 0x338   : > { %2106 = vadd.xlane.f32.xlu1 %v2105_v54  ;;  %v2560_v22 = vsel %vm2545_vm3, %v2529_v23, %v2530_v10  ;;  %v2077_v41 = vpop.xlane.xlu0 %2076  ;;  %v2302_v23 = vsel %vm425_vm11, %v2212_v59, 0.0  ;;  %v2169_v46 = vadd.f32 %v2137_v32, %v1972_v60  ;;  %v2305_v54 = vsel %vm425_vm11, %v2213_v61, 0.0 }
 0x339   : > { %v12494_v55 = vpop.xlane.xlu1 %1399  ;;  %9500 = vmatmul.mubr.msk.f32.gmra.mrb[16].mxu1 %vm425_vm11, %v2560_v22  ;;  %v2138_v60 = vmul.f32 %v12375_v45, %v2077_v41  ;;  %v1973_v61 = vadd.f32 %v1941_v17, %v1681_v30  ;;  %v4653_v30 = vld [vmem:[%s14750_s1 + $0x80] sm:$0xff] }
 0x33b   : > { %1912 = vadd.xlane.f32.xlu0 %v1911_v33 }
 0x33c   : > { %2303 = vadd.xlane.f32.xlu1 %v2302_v23  ;;  %v2271_v3 = vpop.xlane.xlu0 %2270  ;;  %v12503_v44 = vpop.f32.mrb[16].mxu0 }
 0x33d   : > { %v12505_v47 = vpop.xlane.xlu1 %924  ;;  %v2334_v25 = vmul.f32 %v12394_v38, %v2271_v3  ;;  %v12508_v63 = vpop.f32.mrb[17].mxu0 }
 0x33f   : > { %v2366_v6 = vadd.f32 %v2334_v25, %v2169_v46  ;;  %2109 = vadd.xlane.f32.xlu0 %v2108_v2  ;;  %v2170_v46 = vadd.f32 %v2138_v60, %v1973_v61  ;;  %v4654_v60 = vld [vmem:[%s14750_s1 + $0x88] sm:$0xff] }
 0x340   : > { %2306 = vadd.xlane.f32.xlu1 %v2305_v54  ;;  %v12512_v59 = vpop.xlane.xlu0 %1208 }
 0x341   : > { %v2403_v43 = vadd.f32 %v12417_v15, %v2366_v6  ;;  %v12517_v22 = vpop.xlane.xlu1 %1402 }
 0x343   : > { %v2435_v32 = vmax.f32 %v2403_v43, 0.0 }
 0x344   : > { %v1886_v33 = vpop.xlane.xlu0 %1885 }
 0x345   : > { %2467 = vst.msk [vmem:[#allocation2 + $0x90] sm:$0xff] %vm425_vm11, %v2435_v32  ;;  %v2080_v23 = vpop.xlane.xlu1 %2079  ;;  %v1943_v34 = vmul.f32 %v12363_v51, %v1886_v33 }
 0x348   : > { %v2274_v3 = vpop.xlane.xlu0 %2273 }
 0x349   : > { %v12524_v20 = vpop.xlane.xlu1 %505  ;;  %v2335_v25 = vmul.f32 %v12394_v38, %v2274_v3  ;;  %v12554_v3 = vpack.c.bf16 %v4654_v60, %v4653_v30  ;;  %v2139_v30 = vmul.f32 %v12375_v45, %v2080_v23  ;;  %v12579_v23 = vld [vmem:[%s14752_s3 + $0x3] ss:$0 sm:$0xff] }
 0x34b   : > { %v2367_v2 = vadd.f32 %v2335_v25, %v2170_v46  ;;  %14896 = vst [vmem:[#allocation34_spill] sm:$0xff] %v12554_v3  ;;  %v1650_v25 = vmul.f32 %v12350_v56, %v12369_v35  ;;  %10089 = vmatprep.subr.bf16.mxu1 %v12554_v3 }
 0x34c   : > { %v12527_v6 = vpop.xlane.xlu0 %714  ;;  %v3008_v0 = vld [vmem:[#allocation2 + $0x90] sm:$0xff] }
 0x34d   : > { %v2404_v54 = vadd.f32 %v12417_v15, %v2367_v2  ;;  %v12530_v43 = vpop.xlane.xlu1 %1596  ;;  %9558 = vmatprep.mubr.msk.f32.mxu0 %vm425_vm11, %v3008_v0  ;;  %v2531_v40 = vrot.slane %v3008_v0, 7 }
 0x34f   : > { %v2436_v41 = vmax.f32 %v2404_v54, 0.0  ;;  %v2559_v29 = vsel %vm2545_vm3, %v2530_v10, %v2531_v40  ;;  %v12550_v10 = vld [vmem:[%s14752_s3 + $0x4] ss:$0 sm:$0xff]  ;;  %v1942_v54 = vmul.f32 %v12363_v51, %v12473_v26 }
 0x350   : > { %9502 = vmatprep.mubr.msk.f32.mxu1 %vm425_vm11, %v2559_v29  ;;  %v12536_v17 = vpop.xlane.xlu0 %508  ;;  %v1453_v61 = vmul.f32 %v12550_v10, %v12285_v24 }
 0x351   : > { %2468 = vst.msk [vmem:[#allocation2 + $0x98] sm:$0xff] %vm425_vm11, %v2436_v41  ;;  %v12539_v32 = vpop.xlane.xlu1 %717 }
 0x352   : > { %v1485_v0 = vadd.f32 %v1453_v61, %v12216_v57 }
 0x354   : > { %v12556_v46 = vpop.xlane.xlu0 %1211  ;;  %v1682_v24 = vadd.f32 %v1650_v25, %v1485_v0  ;;  %v1257_v25 = vmul.f32 %v12579_v23, %v12281_v28 }
 0x355   : > { %v12560_v2 = vpop.xlane.xlu1 %1405 }
 0x356   : > { %v1974_v35 = vadd.f32 %v1942_v54, %v1682_v24  ;;  %v1289_v24 = vadd.f32 %v1257_v25, %v12202_v1  ;;  %v5203_v1 = vld [vmem:[%s14750_s1 + $0xa8] sm:$0xff] }
 0x358   : > { %v12566_v41 = vpop.xlane.xlu0 %1599  ;;  %v3009_v29 = vld [vmem:[#allocation2 + $0x98] sm:$0xff]  ;;  %v2171_v61 = vadd.f32 %v2139_v30, %v1974_v35  ;;  %v1651_v30 = vmul.f32 %v12350_v56, %v12466_v27 }
 0x359   : > { %v2083_v60 = vpop.xlane.xlu1 %2082  ;;  %9559 = vmatmul.mubr.msk.f32.gmra.mrb[28].mxu0 %vm425_vm11, %v3009_v29  ;;  %v2532_v19 = vrot.slane %v3009_v29, 7 }
 0x35a   : > { %v2140_v27 = vmul.f32 %v12375_v45, %v2083_v60 }
 0x35b   : > { %v2558_v14 = vsel %vm2545_vm3, %v2531_v40, %v2532_v19  ;;  %v1454_v40 = vmul.f32 %v12550_v10, %v12367_v8  ;;  %v5202_v8 = vld [vmem:[%s14750_s1 + $0xa0] sm:$0xff] }
 0x35c   : > { %9503 = vmatmul.mubr.msk.f32.gmra.mrb[18].mxu1 %vm425_vm11, %v2558_v14  ;;  %v2277_v57 = vpop.xlane.xlu0 %2276 }
 0x35d   : > { %v12573_v42 = vpop.xlane.xlu1 %927  ;;  %v2336_v26 = vmul.f32 %v12394_v38, %v2277_v57  ;;  %v1486_v57 = vadd.f32 %v1454_v40, %v1289_v24  ;;  %v12613_v24 = vld [vmem:[%s14752_s3 + $0x2] ss:$0 sm:$0xff] }
 0x35f   : > { %v2368_v0 = vadd.f32 %v2336_v26, %v2171_v61  ;;  %v1683_v61 = vadd.f32 %v1651_v30, %v1486_v57  ;;  %v12604_v26 = vpack.c.bf16 %v5203_v1, %v5202_v8  ;;  %v971_v30 = vmul.f32 %v12613_v24, %v12316_v13 }
 0x360   : > { %v1889_v54 = vpop.xlane.xlu0 %1888  ;;  %v1258_v1 = vmul.f32 %v12579_v23, %v12409_v48 }
 0x361   : > { %v2405_v14 = vadd.f32 %v12417_v15, %v2368_v0  ;;  %v12586_v29 = vpop.xlane.xlu1 %930  ;;  %14897 = vst [vmem:[#allocation32_spill] sm:$0xff] %v12604_v26  ;;  %v1975_v33 = vadd.f32 %v1943_v34, %v1683_v61  ;;  %10097 = vmatprep.subr.bf16.mxu0 %v12604_v26  ;;  %v1003_v13 = vadd.f32 %v971_v30, %v12261_v31 }
 0x362   : > { %v972_v31 = vmul.f32 %v12613_v24, %v12345_v62 }
 0x363   : > { %v2437_v35 = vmax.f32 %v2405_v14, 0.0  ;;  %v2172_v40 = vadd.f32 %v2140_v27, %v1975_v33  ;;  %v1455_v33 = vmul.f32 %v12550_v10, %v12494_v55  ;;  %v1290_v48 = vadd.f32 %v1258_v1, %v1003_v13 }
 0x364   : > { %v12592_v3 = vpop.xlane.xlu0 %1408  ;;  %v1259_v1 = vmul.f32 %v12579_v23, %v12445_v49  ;;  %v1004_v62 = vadd.f32 %v972_v31, %v12279_v18  ;;  %v760_v49 = vmul.f32 %v12253_v9, %v12342_v50  ;;  %v1653_v18 = vmul.f32 %v12350_v56, %v12566_v41 }
 0x365   : > { %2469 = vst.msk [vmem:[#allocation2 + $0xa0] sm:$0xff] %vm425_vm11, %v2437_v35  ;;  %v12595_v28 = vpop.xlane.xlu1 %1602  ;;  %v1487_v30 = vadd.f32 %v1455_v33, %v1290_v48 }
 0x368   : > { %v12606_v25 = vpop.xlane.xlu0 %1891 }
 0x369   : > { %v2280_v0 = vpop.xlane.xlu1 %2279 }
 0x36a   : > { %v2337_v14 = vmul.f32 %v12394_v38, %v2280_v0 }
 0x36c   : > { %v2369_v60 = vadd.f32 %v2337_v14, %v2172_v40  ;;  %v12617_v35 = vpop.xlane.xlu0 %1214  ;;  %v3010_v34 = vld [vmem:[#allocation2 + $0xa0] sm:$0xff] }
 0x36d   : > { %v2086_v57 = vpop.xlane.xlu1 %2085  ;;  %9561 = vmatprep.mubr.msk.f32.mxu0 %vm425_vm11, %v3010_v34  ;;  %v12620_v8 = vrot.slane %v3010_v34, 7 }
 0x36e   : > { %v2406_v61 = vadd.f32 %v12417_v15, %v2369_v60  ;;  %v1652_v60 = vmul.f32 %v12350_v56, %v12530_v43 }
 0x36f   : > { %v2557_v27 = vsel %vm2545_vm3, %v2532_v19, %v12620_v8 }
 0x370   : > { %v2438_v0 = vmax.f32 %v2406_v61, 0.0  ;;  %v12631_v40 = vpop.xlane.xlu0 %1217  ;;  %v2625_v14 = vsel %vm278_vm2, %v2557_v27, 0.0  ;;  %v1944_v61 = vmul.f32 %v12363_v51, %v1889_v54  ;;  %v1684_v13 = vadd.f32 %v1652_v60, %v1487_v30 }
 0x371   : > { %v12635_v34 = vpop.xlane.xlu1 %1605  ;;  %9505 = vmatprep.mubr.msk.f32.mxu1 %vm425_vm11, %v2625_v14  ;;  %v1291_v60 = vadd.f32 %v1259_v1, %v1004_v62  ;;  %v551_v1 = vmul.f32 %v12244_v39, %v12328_v11  ;;  %v973_v62 = vmul.f32 %v12613_v24, %v12443_v4 }
 0x372   : > { %2470 = vst.msk [vmem:[#allocation2 + $0xa8] sm:$0xff] %vm425_vm11, %v2438_v0  ;;  %v9477_v19 = vpop.f32.mrb[0].mxu1  ;;  %v2141_v0 = vmul.f32 %v12375_v45, %v2086_v57  ;;  %v1976_v33 = vadd.f32 %v1944_v61, %v1684_v13 }
 0x373   : > { %2963 = vst.msk [vmem:[#allocation3 + $0x28] sm:$0xff] %vm425_vm11, %v9477_v19  ;;  %v2819_v55 = vpop.f32.mrb[1].mxu1  ;;  %v1456_v19 = vmul.f32 %v12550_v10, %v12517_v22  ;;  %v792_v4 = vadd.f32 %v760_v49, %v551_v1 }
 0x374   : > { %2962 = vst.msk [vmem:[#allocation3 + $0x20] sm:$0xff] %vm425_vm11, %v2819_v55  ;;  %v12646_v27 = vpop.xlane.xlu0 %1894  ;;  %v2173_v22 = vadd.f32 %v2141_v0, %v1976_v33 }
 0x375   : > { %v2089_v43 = vpop.xlane.xlu1 %2088 }
 0x376   : > { %v9480_v14 = vpop.f32.mrb[2].mxu1  ;;  %v2142_v49 = vmul.f32 %v12375_v45, %v2089_v43 }
 0x377   : > { %2965 = vst.msk [vmem:[#allocation3 + $0x38] sm:$0xff] %vm425_vm11, %v9480_v14  ;;  %v2829_v54 = vpop.f32.mrb[3].mxu1 }
 0x378   : > { %2964 = vst.msk [vmem:[#allocation3 + $0x30] sm:$0xff] %vm425_vm11, %v2829_v54  ;;  %v12656_v48 = vpop.xlane.xlu0 %1411  ;;  %v1488_v54 = vadd.f32 %v1456_v19, %v1291_v60  ;;  %v552_v19 = vmul.f32 %v12244_v39, %v12432_v12  ;;  %v761_v60 = vmul.f32 %v12253_v9, %v12434_v37 }
 0x379   : > { %v2283_v55 = vpop.xlane.xlu1 %2282  ;;  %v12660_v57 = vpop.f32.mrb[18].mxu0  ;;  %v12662_v30 = vld [vmem:[#allocation2 + $0xa8] sm:$0xff] }
 0x37a   : > { %v3408_v31 = vld [vmem:[#allocation3 + $0x28] sm:$0xff]  ;;  %v2338_v61 = vmul.f32 %v12394_v38, %v2283_v55  ;;  %v9483_v13 = vpop.f32.mrb[4].mxu1  ;;  %v12667_v14 = vpop.f32.mrb[19].mxu0  ;;  %9562 = vmatmul.mubr.msk.f32.gmra.mrb[30].mxu0 %vm425_vm11, %v12662_v30  ;;  %v2534_v50 = vrot.slane %v12662_v30, 7  ;;  %v1945_v55 = vmul.f32 %v12363_v51, %v12606_v25  ;;  %v1260_v25 = vmul.f32 %v12579_v23, %v12512_v59 }
 0x37b   : > { %v3440_v41 = vadd.f32 %v12131_v21, %v3408_v31  ;;  %v3407_v0 = vld [vmem:[#allocation3 + $0x20] sm:$0xff]  ;;  %2967 = vst.msk [vmem:[#allocation3 + $0x48] sm:$0xff] %vm425_vm11, %v9483_v13  ;;  %v2839_v33 = vpop.f32.mrb[5].mxu1  ;;  %v1005_v59 = vadd.f32 %v973_v62, %v792_v4  ;;  %v1457_v13 = vmul.f32 %v12550_v10, %v12560_v2  ;;  %v762_v2 = vmul.f32 %v12253_v9, %v12527_v6 }
 0x37c   : > { %v3439_v26 = vadd.f32 %v3407_v0, %v12135_v58  ;;  %v2370_v5 = vadd.f32 %v2338_v61, %v2173_v22  ;;  %2966 = vst.msk [vmem:[#allocation3 + $0x40] sm:$0xff] %vm425_vm11, %v2839_v33  ;;  %v12687_v11 = vsel %vm2545_vm3, %v12620_v8, %v2534_v50  ;;  %v12689_v21 = vpop.xlane.xlu0 %1414  ;;  %v1685_v22 = vadd.f32 %v1653_v18, %v1488_v54 }
 0x37d   : > { %3472 = vst.msk [vmem:[#allocation3 + $0x28] sm:$0xff] %vm425_vm11, %v3440_v41  ;;  %v12696_v58 = vpop.xlane.xlu1 %1897  ;;  %9506 = vmatmul.mubr.msk.f32.gmra.mrb[20].mxu1 %vm425_vm11, %v12687_v11  ;;  %v1292_v62 = vadd.f32 %v1260_v25, %v1005_v59  ;;  %v793_v54 = vadd.f32 %v761_v60, %v552_v19  ;;  %v1654_v33 = vmul.f32 %v12350_v56, %v12595_v28 }
 0x37e   : > { %3471 = vst.msk [vmem:[#allocation3 + $0x20] sm:$0xff] %vm425_vm11, %v3439_v26  ;;  %v3410_v31 = vld [vmem:[#allocation3 + $0x38] sm:$0xff]  ;;  %v2407_v12 = vadd.f32 %v12417_v15, %v2370_v5  ;;  %v9486_v61 = vpop.f32.mrb[6].mxu1  ;;  %v1977_v37 = vadd.f32 %v1945_v55, %v1685_v22  ;;  %v974_v5 = vmul.f32 %v12613_v24, %v12505_v47  ;;  %v553_v25 = vmul.f32 %v12244_v39, %v12524_v20 }
 0x37f   : > { %v3442_v1 = vadd.f32 %v12153_v52, %v3410_v31  ;;  %v3409_v41 = vld [vmem:[#allocation3 + $0x30] sm:$0xff]  ;;  %2969 = vst.msk [vmem:[#allocation3 + $0x58] sm:$0xff] %vm425_vm11, %v9486_v61  ;;  %v2849_v0 = vpop.f32.mrb[7].mxu1  ;;  %v1489_v6 = vadd.f32 %v1457_v13, %v1292_v62  ;;  %v1261_v22 = vmul.f32 %v12579_v23, %v12556_v46  ;;  %v1946_v31 = vmul.f32 %v12363_v51, %v12646_v27 }
 0x380   : > { %v3441_v18 = vadd.f32 %v3409_v41, %v12161_v36  ;;  %v2439_v26 = vmax.f32 %v2407_v12, 0.0  ;;  %2968 = vst.msk [vmem:[#allocation3 + $0x50] sm:$0xff] %vm425_vm11, %v2849_v0  ;;  %v2092_v43 = vpop.xlane.xlu0 %2091  ;;  %v2174_v55 = vadd.f32 %v2142_v49, %v1977_v37  ;;  %v975_v49 = vmul.f32 %v12613_v24, %v12573_v42 }
 0x381   : > { %3474 = vst.msk [vmem:[#allocation3 + $0x38] sm:$0xff] %vm425_vm11, %v3442_v1  ;;  %v2286_v52 = vpop.xlane.xlu1 %2285  ;;  %v1006_v46 = vadd.f32 %v974_v5, %v793_v54  ;;  %v554_v13 = vmul.f32 %v12244_v39, %v12536_v17  ;;  %v1686_v42 = vadd.f32 %v1654_v33, %v1489_v6  ;;  %v2143_v1 = vmul.f32 %v12375_v45, %v2092_v43 }
 0x382   : > { %3473 = vst.msk [vmem:[#allocation3 + $0x30] sm:$0xff] %vm425_vm11, %v3441_v18  ;;  %2471 = vst.msk [vmem:[#allocation2 + $0xb0] sm:$0xff] %vm425_vm11, %v2439_v26  ;;  %v3412_v36 = vld [vmem:[#allocation3 + $0x48] sm:$0xff]  ;;  %v2339_v4 = vmul.f32 %v12394_v38, %v2286_v52  ;;  %v9489_v47 = vpop.f32.mrb[8].mxu1  ;;  %v763_v41 = vmul.f32 %v12253_v9, %v12539_v32  ;;  %v1458_v37 = vmul.f32 %v12550_v10, %v12592_v3  ;;  %v14796_v33 = vrot.slane %v12662_v30, 1 }
 0x383   : > { %v3444_v19 = vadd.f32 %v12447_v53, %v3412_v36  ;;  %v3411_v60 = vld [vmem:[#allocation3 + $0x40] sm:$0xff]  ;;  %2971 = vst.msk [vmem:[#allocation3 + $0x68] sm:$0xff] %vm425_vm11, %v9489_v47  ;;  %v2859_v28 = vpop.f32.mrb[9].mxu1  ;;  %v794_v53 = vadd.f32 %v762_v2, %v553_v25  ;;  %v1293_v0 = vadd.f32 %v1261_v22, %v1006_v46  ;;  %v1978_v17 = vadd.f32 %v1946_v31, %v1686_v42 }
 0x384   : > { %v3443_v12 = vadd.f32 %v3411_v60, %v12449_v16  ;;  %v2371_v61 = vadd.f32 %v2339_v4, %v2174_v55  ;;  %2970 = vst.msk [vmem:[#allocation3 + $0x60] sm:$0xff] %vm425_vm11, %v2859_v28  ;;  %v1609_v20 = vpop.xlane.xlu0 %1608  ;;  %v976_v54 = vmul.f32 %v12613_v24, %v12586_v29  ;;  %v1262_v43 = vmul.f32 %v12579_v23, %v12617_v35 }
 0x385   : > { %3476 = vst.msk [vmem:[#allocation3 + $0x48] sm:$0xff] %vm425_vm11, %v3444_v19  ;;  %v1612_v59 = vpop.xlane.xlu1 %1611  ;;  %v1007_v5 = vadd.f32 %v975_v49, %v794_v53  ;;  %v1655_v32 = vmul.f32 %v12350_v56, %v12635_v34  ;;  %v1490_v4 = vadd.f32 %v1458_v37, %v1293_v0  ;;  %v1459_v34 = vmul.f32 %v12550_v10, %v12656_v48 }
 0x386   : > { %3475 = vst.msk [vmem:[#allocation3 + $0x40] sm:$0xff] %vm425_vm11, %v3443_v12  ;;  %v3414_v27 = vld [vmem:[#allocation3 + $0x58] sm:$0xff]  ;;  %v2408_v16 = vadd.f32 %v12417_v15, %v2371_v61  ;;  %v1947_v47 = vmul.f32 %v12363_v51, %v12696_v58  ;;  %v795_v58 = vadd.f32 %v763_v41, %v554_v13  ;;  %v1656_v12 = vmul.f32 %v12350_v56, %v1609_v20 }
 0x387   : > { %v3446_v18 = vadd.f32 %v12503_v44, %v3414_v27  ;;  %v3413_v26 = vld [vmem:[#allocation3 + $0x50] sm:$0xff]  ;;  %v1687_v49 = vadd.f32 %v1655_v32, %v1490_v4  ;;  %v1657_v41 = vmul.f32 %v12350_v56, %v1612_v59 }
 0x388   : > { %v3445_v62 = vadd.f32 %v3413_v26, %v12508_v63  ;;  %v2440_v2 = vmax.f32 %v2408_v16, 0.0  ;;  %v2095_v52 = vpop.xlane.xlu0 %2094  ;;  %v2175_v63 = vadd.f32 %v2143_v1, %v1978_v17  ;;  %v1008_v46 = vadd.f32 %v976_v54, %v795_v58 }
 0x389   : > { %3478 = vst.msk [vmem:[#allocation3 + $0x58] sm:$0xff] %vm425_vm11, %v3446_v18  ;;  %v2289_v3 = vpop.xlane.xlu1 %2288  ;;  %v3012_v44 = vld [vmem:[#allocation2 + $0xb0] sm:$0xff]  ;;  %v1979_v53 = vadd.f32 %v1947_v47, %v1687_v49 }
 0x38a   : > { %3477 = vst.msk [vmem:[#allocation3 + $0x50] sm:$0xff] %vm425_vm11, %v3445_v62  ;;  %2472 = vst.msk [vmem:[#allocation2 + $0xb8] sm:$0xff] %vm425_vm11, %v2440_v2  ;;  %v3416_v55 = vld [vmem:[#allocation3 + $0x68] sm:$0xff]  ;;  %v2340_v29 = vmul.f32 %v12394_v38, %v2289_v3  ;;  %9564 = vmatprep.mubr.msk.f32.mxu0 %vm425_vm11, %v3012_v44  ;;  %v2535_v35 = vrot.slane %v3012_v44, 7  ;;  %v3553_v36 = vrot.slane %v3012_v44, 1 }
 0x38b   : > { %v3448_v25 = vadd.f32 %v12660_v57, %v3416_v55  ;;  %v3415_v6 = vld [vmem:[#allocation3 + $0x60] sm:$0xff]  ;;  %v1263_v57 = vmul.f32 %v12579_v23, %v12631_v40  ;;  %v1460_v40 = vmul.f32 %v12550_v10, %v12689_v21 }
 0x38c   : > { %v3447_v22 = vadd.f32 %v3415_v6, %v12667_v14  ;;  %v2372_v19 = vadd.f32 %v2340_v29, %v2175_v63  ;;  %v12768_v60 = vsel %vm2545_vm3, %v2534_v50, %v2535_v35  ;;  %v1901_v28 = vpop.xlane.xlu0 %1900  ;;  %v12774_v48 = vsel %vm3563_vm4, %v14796_v33, %v3553_v36  ;;  %v10291_v33 = vld [vmem:[%s14752_s3 + $0x1] ss:$0 sm:$0xff] }
 0x38d   : > { %3480 = vst.msk [vmem:[#allocation3 + $0x68] sm:$0xff] %vm425_vm11, %v3448_v25  ;;  %v2144_v14 = vmul.f32 %v12375_v45, %v2095_v52  ;;  %v1904_v31 = vpop.xlane.xlu1 %1903  ;;  %9508 = vmatprep.mubr.msk.f32.mxu1 %vm425_vm11, %v12768_v60  ;;  %v1294_v50 = vadd.f32 %v1262_v43, %v1007_v5  ;;  %v1948_v27 = vmul.f32 %v12363_v51, %v1901_v28 }
 0x38e   : > { %3479 = vst.msk [vmem:[#allocation3 + $0x60] sm:$0xff] %vm425_vm11, %v3447_v22  ;;  %v2409_v61 = vadd.f32 %v12417_v15, %v2372_v19  ;;  %v1295_v1 = vadd.f32 %v1263_v57, %v1008_v46  ;;  %v1949_v2 = vmul.f32 %v12363_v51, %v1904_v31 }
 0x38f   : > { %v1491_v13 = vadd.f32 %v1459_v34, %v1294_v50  ;;  %v2176_v0 = vadd.f32 %v2144_v14, %v1979_v53 }
 0x390   : > { %v2441_v42 = vmax.f32 %v2409_v61, 0.0  ;;  %v2292_v16 = vpop.xlane.xlu0 %2291  ;;  %v1492_v62 = vadd.f32 %v1460_v40, %v1295_v1  ;;  %v12824_v1 = vld [vmem:[#allocation2 + $0xf8] sm:$0xff] }
 0x391   : > { %v2098_v37 = vpop.xlane.xlu1 %2097  ;;  %v2341_v18 = vmul.f32 %v12394_v38, %v2292_v16  ;;  %v3013_v20 = vld [vmem:[#allocation2 + $0xb8] sm:$0xff]  ;;  %v1688_v26 = vadd.f32 %v1656_v12, %v1491_v13 }
 0x392   : > { %2473 = vst.msk [vmem:[#allocation2 + $0xc0] sm:$0xff] %vm425_vm11, %v2441_v42  ;;  %v2145_v5 = vmul.f32 %v12375_v45, %v2098_v37  ;;  %9565 = vmatmul.mubr.msk.f32.gmra.mrb[32].mxu0 %vm425_vm11, %v3013_v20  ;;  %v2536_v21 = vrot.slane %v3013_v20, 7  ;;  %v3554_v17 = vrot.slane %v3013_v20, 1  ;;  %v1689_v3 = vadd.f32 %v1657_v41, %v1492_v62 }
 0x393   : > { %v2373_v52 = vadd.f32 %v2341_v18, %v2176_v0  ;;  %v1980_v54 = vadd.f32 %v1948_v27, %v1688_v26  ;;  %v12830_v18 = vld [vmem:[#allocation2] sm:$0xff] }
 0x394   : > { %v12796_v59 = vsel %vm2545_vm3, %v2535_v35, %v2536_v21  ;;  %v2101_v43 = vpop.xlane.xlu0 %2100  ;;  %v12800_v32 = vsel %vm3563_vm4, %v3553_v36, %v3554_v17  ;;  %v1981_v34 = vadd.f32 %v1949_v2, %v1689_v3 }
 0x395   : > { %v2410_v44 = vadd.f32 %v12417_v15, %v2373_v52  ;;  %v2295_v63 = vpop.xlane.xlu1 %2294  ;;  %9509 = vmatmul.mubr.msk.f32.gmra.mrb[22].mxu1 %vm425_vm11, %v12796_v59  ;;  %v2146_v55 = vmul.f32 %v12375_v45, %v2101_v43  ;;  %v2177_v29 = vadd.f32 %v2145_v5, %v1980_v54  ;;  %v14793_v5 = vrot.slane %v12824_v1, 7 }
 0x396   : > { %v2342_v4 = vmul.f32 %v12394_v38, %v2295_v63  ;;  %v4104_v54 = vrot.slane %v12830_v18, 7 }
 0x397   : > { %v2442_v35 = vmax.f32 %v2410_v44, 0.0  ;;  %v2178_v36 = vadd.f32 %v2146_v55, %v1981_v34 }
 0x398   : > { %v2374_v47 = vadd.f32 %v2342_v4, %v2177_v29  ;;  %v2298_v25 = vpop.xlane.xlu0 %2297  ;;  %v12857_v29 = vld [vmem:[#allocation2 + $0x8] sm:$0xff] }
 0x399   : > { %2474 = vst.msk [vmem:[#allocation2 + $0xc8] sm:$0xff] %vm425_vm11, %v2442_v35  ;;  %v2343_v6 = vmul.f32 %v12394_v38, %v2298_v25  ;;  %v512_v22 = vpop.xlane.xlu1 %511  ;;  %v3014_v19 = vld [vmem:[#allocation2 + $0xc0] sm:$0xff]  ;;  %v4167_v25 = vsel %vm2545_vm3, %v14793_v5, %v4104_v54 }
 0x39a   : > { %v2411_v28 = vadd.f32 %v12417_v15, %v2374_v47  ;;  %9567 = vmatprep.mubr.msk.f32.mxu0 %vm425_vm11, %v3014_v19  ;;  %v2537_v58 = vrot.slane %v3014_v19, 7  ;;  %v3555_v49 = vrot.slane %v3014_v19, 1  ;;  %v555_v53 = vmul.f32 %v12244_v39, %v512_v22 }
 0x39b   : > { %v2375_v57 = vadd.f32 %v2343_v6, %v2178_v36  ;;  %v12866_v36 = vld [vmem:[#allocation2 + $0x10] sm:$0xff] }
 0x39c   : > { %v2443_v14 = vmax.f32 %v2411_v28, 0.0  ;;  %v721_v31 = vpop.xlane.xlu0 %720  ;;  %v9548_v50 = vpop.f32.mrb[20].mxu0  ;;  %v2553_v12 = vsel %vm2545_vm3, %v2536_v21, %v2537_v58  ;;  %v12815_v61 = vsel %vm3563_vm4, %v3554_v17, %v3555_v49 }
 0x39d   : > { %v2412_v46 = vadd.f32 %v12417_v15, %v2375_v57  ;;  %v764_v40 = vmul.f32 %v12253_v9, %v721_v31  ;;  %v934_v13 = vpop.xlane.xlu1 %933  ;;  %v12822_v27 = vsel %vm278_vm2, %v2553_v12, 0.0  ;;  %v3314_v16 = vpop.f32.mrb[21].mxu0 }
 0x39e   : > { %2475 = vst.msk [vmem:[#allocation2 + $0xd0] sm:$0xff] %vm425_vm11, %v2443_v14  ;;  %9511 = vmatprep.mubr.msk.f32.mxu1 %vm425_vm11, %v12822_v27  ;;  %v977_v37 = vmul.f32 %v12613_v24, %v934_v13 }
 0x39f   : > { %v2444_v41 = vmax.f32 %v2412_v46, 0.0  ;;  %v796_v0 = vadd.f32 %v764_v40, %v555_v53  ;;  %v9492_v39 = vpop.f32.mrb[10].mxu1  ;;  %v4106_v53 = vrot.slane %v12866_v36, 7  ;;  %v5205_v40 = vld [vmem:[%s14750_s1 + $0xb8] sm:$0xff] }
 0x3a0   : > { %2973 = vst.msk [vmem:[#allocation3 + $0x78] sm:$0xff] %vm425_vm11, %v9492_v39  ;;  %v2869_v9 = vpop.f32.mrb[11].mxu1  ;;  %v1221_v20 = vpop.xlane.xlu0 %1220  ;;  %v12833_v26 = vld [vmem:[#allocation2 + $0xc8] sm:$0xff]  ;;  %v12896_v39 = vld [vmem:[#allocation2 + $0x18] sm:$0xff] }
 0x3a1   : > { %2476 = vst.msk [vmem:[#allocation2 + $0xd8] sm:$0xff] %vm425_vm11, %v2444_v41  ;;  %v1009_v21 = vadd.f32 %v977_v37, %v796_v0  ;;  %2972 = vst.msk [vmem:[#allocation3 + $0x70] sm:$0xff] %vm425_vm11, %v2869_v9  ;;  %v1264_v17 = vmul.f32 %v12579_v23, %v1221_v20  ;;  %v1418_v62 = vpop.xlane.xlu1 %1417  ;;  %9568 = vmatmul.mubr.msk.f32.gmra.mrb[34].mxu0 %vm425_vm11, %v12833_v26  ;;  %v2538_v2 = vrot.slane %v12833_v26, 7  ;;  %v14794_v52 = vrot.slane %v12833_v26, 1 }
 0x3a2   : > { %v1461_v3 = vmul.f32 %v12550_v10, %v1418_v62  ;;  %14900 = vst [vmem:[#allocation26_spill] sm:$0xff] %v12896_v39 }
 0x3a3   : > { %v1296_v43 = vadd.f32 %v1264_v17, %v1009_v21  ;;  %v12847_v44 = vsel %vm2545_vm3, %v2537_v58, %v2538_v2  ;;  %v12853_v63 = vsel %vm3563_vm4, %v3555_v49, %v14794_v52  ;;  %v12873_v58 = vld [vmem:[#allocation2 + $0x20] sm:$0xff]  ;;  %v5204_v49 = vld [vmem:[%s14750_s1 + $0xb0] sm:$0xff] }
 0x3a4   : > { %9512 = vmatmul.mubr.msk.f32.gmra.mrb[24].mxu1 %vm425_vm11, %v12847_v44  ;;  %v1615_v55 = vpop.xlane.xlu0 %1614  ;;  %14899 = vst [vmem:[#allocation29_spill] sm:$0xff] %v12873_v58  ;;  %v10100_v21 = vpack.c.bf16 %v5205_v40, %v5204_v49  ;;  %v5751_v40 = vld [vmem:[%s14750_s1 + $0xc0] sm:$0xff] }
 0x3a5   : > { %v1493_v4 = vadd.f32 %v1461_v3, %v1296_v43  ;;  %v1658_v34 = vmul.f32 %v12350_v56, %v1615_v55  ;;  %v1907_v35 = vpop.xlane.xlu1 %1906  ;;  %v12860_v47 = vld [vmem:[#allocation2 + $0xd0] sm:$0xff]  ;;  %v4105_v56 = vrot.slane %v12857_v29, 7  ;;  %v4656_v43 = vld [vmem:[%s14750_s1 + $0x98] sm:$0xff] }
 0x3a6   : > { %9570 = vmatprep.mubr.msk.f32.mxu0 %vm425_vm11, %v12860_v47  ;;  %v2539_v6 = vrot.slane %v12860_v47, 7  ;;  %v1950_v28 = vmul.f32 %v12363_v51, %v1907_v35  ;;  %v4168_v51 = vsel %vm278_vm2, %v4167_v25, 0.0  ;;  %v6236_v35 = vld [vmem:[%s14750_s1 + $0xe0] sm:$0xff]  ;;  %v6237_v25 = vld [vmem:[%s14750_s1 + $0xe8] sm:$0xff] }
 0x3a7   : > { %v3418_v22 = vld [vmem:[#allocation3 + $0x78] sm:$0xff]  ;;  %v1690_v19 = vadd.f32 %v1658_v34, %v1493_v4  ;;  %v4166_v62 = vsel %vm2545_vm3, %v4104_v54, %v4105_v56  ;;  %v4165_v4 = vsel %vm2545_vm3, %v4105_v56, %v4106_v53  ;;  %v14901_v34 = vmov 0.0   ;;  %v12928_v54 = vld [vmem:[#allocation2 + $0x28] sm:$0xff]  ;;  %v12943_v56 = vld [vmem:[#allocation2 + $0x40] sm:$0xff] }
 0x3a8   : > { %v3450_v57 = vadd.f32 %v9548_v50, %v3418_v22  ;;  %v3417_v14 = vld [vmem:[#allocation3 + $0x70] sm:$0xff]  ;;  %v12880_v31 = vsel %vm2545_vm3, %v2538_v2, %v2539_v6  ;;  %v2104_v12 = vpop.xlane.xlu0 %2103  ;;  %v12882_v46 = vld [vmem:[#allocation2 + $0xd8] sm:$0xff]  ;;  %v4107_v2 = vrot.slane %v12896_v39, 7  ;;  %14902 = vst [vmem:[#allocation27_spill] sm:$0xff] %v12928_v54  ;;  %14905 = vst [vmem:[#allocation31_spill] sm:$0xff] %v12943_v56 }
 0x3a9   : > { %v3449_v13 = vadd.f32 %v3417_v14, %v3314_v16  ;;  %v1982_v41 = vadd.f32 %v1950_v28, %v1690_v19  ;;  %9514 = vmatprep.mubr.msk.f32.mxu1 %vm425_vm11, %v12880_v31  ;;  %v2147_v50 = vmul.f32 %v12375_v45, %v2104_v12  ;;  %v2301_v0 = vpop.xlane.xlu1 %2300  ;;  %9571 = vmatmul.mubr.msk.f32.gmra.mrb[36].mxu0 %vm425_vm11, %v12882_v46  ;;  %v14795_v37 = vrot.slane %v12882_v46, 7  ;;  %v12939_v22 = vld [vmem:[#allocation2 + $0x30] sm:$0xff] }
 0x3aa   : > { %3482 = vst.msk [vmem:[#allocation3 + $0x78] sm:$0xff] %vm425_vm11, %v3450_v57  ;;  %9637 = vmatprep.mubr.msk.f32.mxu0 %vm425_vm11, %v4168_v51  ;;  %v4108_v16 = vrot.slane %v12873_v58, 7  ;;  %v2344_v20 = vmul.f32 %v12394_v38, %v2301_v0  ;;  %v4655_v38 = vld [vmem:[%s14750_s1 + $0x90] sm:$0xff]  ;;  %14903 = vst [vmem:[#allocation36_spill] sm:$0xff] %v12939_v22  ;;  %v4164_v14 = vsel %vm2545_vm3, %v4106_v53, %v4107_v2  ;;  %v3532_v12 = vrot.slane %v12857_v29, 1 }
 0x3ab   : > { %3481 = vst.msk [vmem:[#allocation3 + $0x70] sm:$0xff] %vm425_vm11, %v3449_v13  ;;  %v2179_v9 = vadd.f32 %v2147_v50, %v1982_v41  ;;  %v12907_v45 = vsel %vm2545_vm3, %v2539_v6, %v14795_v37  ;;  %v14904_v19 = vld [vmem:[#allocation32_spill] sm:$0xff]  ;;  %v10092_v49 = vpack.c.bf16 %v4656_v43, %v4655_v38  ;;  %v4109_v51 = vrot.slane %v12928_v54, 7 }
 0x3ac   : > { %9515 = vmatmul.mubr.msk.f32.gmra.mrb[26].mxu1 %vm425_vm11, %v12907_v45  ;;  %v12911_v17 = vpop.xlane.xlu0 %514  ;;  %v4163_v6 = vsel %vm2545_vm3, %v4107_v2, %v4108_v16  ;;  %v12958_v13 = vpack.c.bf16 %v6237_v25, %v6236_v35  ;;  %v4110_v0 = vrot.slane %v12939_v22, 7  ;;  %v14907_v2 = vld [vmem:[#allocation34_spill] sm:$0xff]  ;;  %v3533_v38 = vrot.slane %v12866_v36, 1 }
 0x3ad   : > { %v2376_v3 = vadd.f32 %v2344_v20, %v2179_v9  ;;  %v12922_v55 = vpop.xlane.xlu1 %723  ;;  %9638 = vmatmul.mubr.msk.f32.vlgmr.msra.gmra.mrb[38].mxu0 %vm425_vm11, %v4166_v62  ;;  %9581 = vmatprep.mubr.f32.mxu1 %v14901_v34  ;;  %v4172_v53 = vsel %vm278_vm2, %v4163_v6, 0.0  ;;  %v12967_v9 = vld [vmem:[#allocation2 + $0x38] sm:$0xff]  ;;  %v14792_v20 = vrot.slane %v12830_v18, 1  ;;  %v4112_v62 = vrot.slane %v12943_v56, 7 }
 0x3ae   : > { %9640 = vmatprep.mubr.msk.f32.mxu0 %vm425_vm11, %v4165_v4  ;;  %10099 = vmatpush3.bf16.msra.mxu0 %v14904_v19  ;;  %14906 = vst [vmem:[#allocation38_spill] sm:$0xff] %v12967_v9  ;;  %v3535_v43 = vrot.slane %v12873_v58, 1  ;;  %v4162_v25 = vsel %vm2545_vm3, %v4108_v16, %v4109_v51  ;;  %v4111_v6 = vrot.slane %v12967_v9, 7  ;;  %v3537_v52 = vrot.slane %v12939_v22, 1 }
 0x3af   : > { %v2413_v28 = vadd.f32 %v12417_v15, %v2376_v3  ;;  %10101 = vmatprep.subr.bf16.mxu0 %v10100_v21  ;;  %v5752_v15 = vld [vmem:[%s14750_s1 + $0xc8] sm:$0xff]  ;;  %v12983_v35 = vsel %vm3563_vm4, %v14792_v20, %v3532_v12 }
 0x3b0   : > { %9582 = vmatmul.mubr.f32.vlgmr.msra.gmra.mrb[28].mxu1 %v14901_v34  ;;  %v12946_v57 = vpop.xlane.xlu0 %936  ;;  %v12976_v3 = vpack.c.bf16 %v5752_v15, %v5751_v40  ;;  %v4159_v16 = vsel %vm2545_vm3, %v4111_v6, %v4112_v62  ;;  %v13000_v40 = vld [vmem:[#allocation2 + $0x50] sm:$0xff]  ;;  %v13004_v15 = vsel %vm3563_vm4, %v3532_v12, %v3533_v38  ;;  %v4160_v12 = vsel %vm2545_vm3, %v4110_v0, %v4111_v6  ;;  %v10290_v6 = vld [vmem:[%s14752_s3] ss:$0 sm:$0xff] }
 0x3b1   : > { %v2445_v41 = vmax.f32 %v2413_v28, 0.0  ;;  %v12960_v50 = vpop.xlane.xlu1 %517  ;;  %9641 = vmatmul.mubr.msk.f32.gmra.mrb[40].mxu0 %vm425_vm11, %v4164_v14  ;;  %9584 = vmatprep.mubr.f32.mxu1 %v14901_v34  ;;  %v3534_v28 = vrot.slane %v12896_v39, 1  ;;  %v12995_v14 = vld [vmem:[#allocation2 + $0x48] sm:$0xff]  ;;  %14910 = vst [vmem:[#allocation33_spill] sm:$0xff] %v13000_v40  ;;  %v4176_v20 = vsel %vm278_vm2, %v4159_v16, 0.0  ;;  %v4114_v5 = vrot.slane %v13000_v40, 7 }
 0x3b2   : > { %9643 = vmatprep.mubr.msk.f32.mxu0 %vm425_vm11, %v4172_v53  ;;  %10091 = vmatpush3.bf16.msra.mxu1 %v14907_v2  ;;  %14908 = vst [vmem:[#allocation35_spill] sm:$0xff] %v12976_v3  ;;  %14909 = vst [vmem:[#allocation12_spill] sm:$0xff] %v12995_v14  ;;  %v3536_v53 = vrot.slane %v12928_v54, 1  ;;  %v13013_v2 = vld [vmem:[#allocation2 + $0x60] sm:$0xff]  ;;  %v556_v37 = vmul.f32 %v10290_v6, %v12911_v17  ;;  %v3538_v16 = vrot.slane %v12967_v9, 1  ;;  %v3540_v17 = vrot.slane %v12995_v14, 1 }
 0x3b3   : > { %2477 = vst.msk [vmem:[#allocation2 + $0xe0] sm:$0xff] %vm425_vm11, %v2445_v41  ;;  %10093 = vmatprep.subr.bf16.mxu1 %v10092_v49  ;;  %10103 = vmatpush3.bf16.msra.mxu0 %v10100_v21  ;;  %v4161_v21 = vsel %vm2545_vm3, %v4109_v51, %v4110_v0  ;;  %v13008_v41 = vsel %vm3563_vm4, %v3533_v38, %v3534_v28  ;;  %14911 = vst [vmem:[#allocation40_spill] sm:$0xff] %v13013_v2  ;;  %v4113_v38 = vrot.slane %v12995_v14, 7  ;;  %v13030_v0 = vld [vmem:[#allocation2 + $0x58] sm:$0xff]  ;;  %v13070_v14 = vld [vmem:[#allocation2 + $0x68] sm:$0xff] }
 0x3b4   : > { %9585 = vmatmul.mubr.f32.gmra.mrb[30].mxu1 %v14901_v34  ;;  %v727_v4 = vpop.xlane.xlu0 %726  ;;  %10113 = vmatprep.subr.bf16.mxu0 %v12958_v13  ;;  %v3591_v51 = vsel %vm3563_vm4, %v3534_v28, %v3535_v43  ;;  %14913 = vst [vmem:[#allocation39_spill] sm:$0xff] %v13030_v0  ;;  %v4116_v34 = vrot.slane %v13013_v2, 7  ;;  %v13049_v22 = vsel %vm3563_vm4, %v3535_v43, %v3536_v53  ;;  %v4115_v9 = vrot.slane %v13030_v0, 7 }
 0x3b5   : > { %v1224_v19 = vpop.xlane.xlu1 %1223  ;;  %9587 = vmatprep.mubr.msk.f32.mxu1 %vm425_vm11, %v12983_v35  ;;  %9644 = vmatmul.mubr.msk.f32.gmra.mrb[42].mxu0 %vm425_vm11, %v4162_v25  ;;  %v14912_v25 = vld [vmem:[#allocation22_spill] sm:$0xff]  ;;  %14915 = vst [vmem:[#allocation41_spill] sm:$0xff] %v13049_v22  ;;  %v978_v54 = vmul.f32 %v12613_v24, %v12946_v57  ;;  %v4157_v57 = vsel %vm2545_vm3, %v4113_v38, %v4114_v5 }
 0x3b6   : > { %9646 = vmatprep.mubr.msk.f32.mxu0 %vm425_vm11, %v4161_v21  ;;  %10095 = vmatpush3.bf16.msra.mxu1 %v10092_v49  ;;  %vm3610_vm5 = vcmp.lt.s32.totalorder %v14912_v25, 32  ;;  %v3539_v21 = vrot.slane %v12943_v56, 1  ;;  %v13068_v43 = vsel %vm3563_vm4, %v3536_v53, %v3537_v52  ;;  %v1265_v39 = vmul.f32 %v12579_v23, %v1224_v19  ;;  %v13091_v19 = vld [vmem:[#allocation2 + $0x80] sm:$0xff] }
 0x3b7   : > { %10105 = vmatprep.subr.bf16.mxu1 %v12976_v3  ;;  %v13045_v56 = vsel %vm3610_vm5, %v3591_v51, 0.0  ;;  %14916 = vst [vmem:[#allocation37_spill] sm:$0xff] %v13068_v43  ;;  %v4155_v3 = vsel %vm2545_vm3, %v4115_v9, %v4116_v34  ;;  %14918 = vst [vmem:[#allocation11_spill] sm:$0xff] %v13091_v19 }
 0x3b8   : > { %9588 = vmatmul.mubr.msk.f32.gmra.mrb[32].mxu1 %vm425_vm11, %v13004_v15  ;;  %v940_v49 = vpop.xlane.xlu0 %939  ;;  %14914 = vst [vmem:[#allocation42_spill] sm:$0xff] %v13045_v56  ;;  %v3587_v51 = vsel %vm3563_vm4, %v3538_v16, %v3539_v21 }
 0x3b9   : > { %v1421_v28 = vpop.xlane.xlu1 %1420  ;;  %9590 = vmatprep.mubr.msk.f32.mxu1 %vm425_vm11, %v13008_v41  ;;  %9647 = vmatmul.mubr.msk.f32.gmra.mrb[44].mxu0 %vm425_vm11, %v4160_v12  ;;  %v765_v12 = vmul.f32 %v10291_v33, %v12922_v55  ;;  %v13085_v53 = vsel %vm3610_vm5, %v3587_v51, 0.0  ;;  %v979_v51 = vmul.f32 %v12613_v24, %v940_v49  ;;  %v10292_v24 = vld [vmem:[%s14752_s3 + $0x5] ss:$0 sm:$0xff] }
 0x3ba   : > { %9649 = vmatprep.mubr.msk.f32.mxu0 %vm425_vm11, %v4176_v20  ;;  %v4158_v20 = vsel %vm2545_vm3, %v4112_v62, %v4113_v38  ;;  %v13081_v38 = vsel %vm3563_vm4, %v3537_v52, %v3538_v16  ;;  %v4156_v52 = vsel %vm2545_vm3, %v4114_v5, %v4115_v9  ;;  %v557_v16 = vmul.f32 %v10290_v6, %v12960_v50  ;;  %v13109_v5 = vld [vmem:[#allocation2 + $0x78] sm:$0xff] }
 0x3bb   : > { %v797_v62 = vadd.f32 %v765_v12, %v556_v37  ;;  %14917 = vst [vmem:[#allocation18_spill] sm:$0xff] %v13081_v38  ;;  %v13089_v37 = vsel %vm3563_vm4, %v3539_v21, %v3540_v17 }
 0x3bc   : > { %9591 = vmatmul.mubr.msk.f32.gmra.mrb[34].mxu1 %vm425_vm11, %v13045_v56  ;;  %v1227_v55 = vpop.xlane.xlu0 %1226  ;;  %v766_v56 = vmul.f32 %v10291_v33, %v727_v4  ;;  %v4117_v4 = vrot.slane %v13070_v14, 7 }
 0x3bd   : > { %v1618_v58 = vpop.xlane.xlu1 %1617  ;;  %9593 = vmatprep.mubr.msk.f32.mxu1 %vm425_vm11, %v13049_v22  ;;  %9650 = vmatmul.mubr.msk.f32.gmra.mrb[46].mxu0 %vm425_vm11, %v4158_v20  ;;  %v13076_v22 = vld [vmem:[#allocation2 + $0x70] sm:$0xff]  ;;  %v3541_v20 = vrot.slane %v13000_v40, 1  ;;  %v1010_v12 = vadd.f32 %v978_v54, %v797_v62  ;;  %v4180_v54 = vsel %vm278_vm2, %v4155_v3, 0.0  ;;  %v4120_v3 = vrot.slane %v13091_v19, 7 }
 0x3be   : > { %9652 = vmatprep.mubr.msk.f32.mxu0 %vm425_vm11, %v4157_v57  ;;  %v1462_v57 = vmul.f32 %v12550_v10, %v1421_v28  ;;  %v4118_v28 = vrot.slane %v13076_v22, 7  ;;  %v1659_v50 = vmul.f32 %v10292_v24, %v1618_v58  ;;  %v798_v62 = vadd.f32 %v766_v56, %v557_v16  ;;  %v10293_v58 = vld [vmem:[%s14752_s3 + $0x6] ss:$0 sm:$0xff] }
 0x3bf   : > { %v1297_v9 = vadd.f32 %v1265_v39, %v1010_v12  ;;  %v13119_v6 = vsel %vm3563_vm4, %v3540_v17, %v3541_v20  ;;  %v3542_v39 = vrot.slane %v13030_v0, 1  ;;  %v3543_v12 = vrot.slane %v13013_v2, 1  ;;  %v13142_v2 = vld [vmem:[#allocation2 + $0x88] sm:$0xff] }
 0x3c0   : > { %9594 = vmatmul.mubr.msk.f32.gmra.mrb[36].mxu1 %vm425_vm11, %v13068_v43  ;;  %v1424_v33 = vpop.xlane.xlu0 %1423  ;;  %v4154_v56 = vsel %vm2545_vm3, %v4116_v34, %v4117_v4  ;;  %v13144_v34 = vld [vmem:[#allocation2 + $0x90] sm:$0xff] }
 0x3c1   : > { %v1910_v21 = vpop.xlane.xlu1 %1909  ;;  %v13101_v40 = vpop.f32.mrb[22].mxu0  ;;  %9596 = vmatprep.mubr.msk.f32.mxu1 %vm425_vm11, %v13081_v38  ;;  %9653 = vmatmul.mubr.msk.f32.gmra.mrb[48].mxu0 %vm425_vm11, %v4156_v52  ;;  %v1266_v52 = vmul.f32 %v12579_v23, %v1227_v55  ;;  %v1494_v38 = vadd.f32 %v1462_v57, %v1297_v9  ;;  %v13133_v23 = vrot.slane %v13109_v5, 7  ;;  %v1011_v55 = vadd.f32 %v979_v51, %v798_v62 }
 0x3c2   : > { %v13114_v49 = vpop.f32.mrb[23].mxu0  ;;  %9655 = vmatprep.mubr.msk.f32.mxu0 %vm425_vm11, %v4180_v54  ;;  %v1951_v43 = vmul.f32 %v10293_v58, %v1910_v21  ;;  %v1463_v16 = vmul.f32 %v12550_v10, %v1424_v33  ;;  %v4153_v21 = vsel %vm2545_vm3, %v4117_v4, %v4118_v28  ;;  %v10294_v10 = vld [vmem:[%s14752_s3 + $0x7] ss:$0 sm:$0xff]  ;;  %v3544_v4 = vrot.slane %v13070_v14, 1 }
 0x3c3   : > { %14919 = vst [vmem:[#allocation13_spill] sm:$0xff] %v13133_v23  ;;  %v1691_v0 = vadd.f32 %v1659_v50, %v1494_v38  ;;  %v4151_v51 = vsel %vm2545_vm3, %v13133_v23, %v4120_v3  ;;  %v1298_v62 = vadd.f32 %v1266_v52, %v1011_v55  ;;  %v13157_v38 = vsel %vm3563_vm4, %v3541_v20, %v3542_v39 }
 0x3c4   : > { %v9495_v54 = vpop.f32.mrb[12].mxu1  ;;  %9597 = vmatmul.mubr.msk.f32.gmra.mrb[38].mxu1 %vm425_vm11, %v13085_v53  ;;  %v1621_v17 = vpop.xlane.xlu0 %1620  ;;  %v3583_v50 = vsel %vm3563_vm4, %v3542_v39, %v3543_v12 }
 0x3c5   : > { %2975 = vst.msk [vmem:[#allocation3 + $0x88] sm:$0xff] %vm425_vm11, %v9495_v54  ;;  %v2879_v57 = vpop.f32.mrb[13].mxu1  ;;  %v2107_v9 = vpop.xlane.xlu1 %2106  ;;  %9599 = vmatprep.mubr.msk.f32.mxu1 %vm425_vm11, %v13089_v37  ;;  %9656 = vmatmul.mubr.msk.f32.gmra.mrb[50].mxu0 %vm425_vm11, %v4154_v56  ;;  %v1660_v54 = vmul.f32 %v10292_v24, %v1621_v17  ;;  %v1983_v56 = vadd.f32 %v1951_v43, %v1691_v0  ;;  %v4122_v24 = vrot.slane %v13144_v34, 7  ;;  %v13173_v0 = vsel %vm278_vm2, %v4151_v51, 0.0  ;;  %v13175_v43 = vld [vmem:[#allocation2 + $0x98] sm:$0xff] }
 0x3c6   : > { %2974 = vst.msk [vmem:[#allocation3 + $0x80] sm:$0xff] %vm425_vm11, %v2879_v57  ;;  %v2148_v33 = vmul.f32 %v10294_v10, %v2107_v9  ;;  %9658 = vmatprep.mubr.msk.f32.mxu0 %vm425_vm11, %v4153_v21  ;;  %v4152_v9 = vsel %vm2545_vm3, %v4118_v28, %v13133_v23  ;;  %v4121_v21 = vrot.slane %v13142_v2, 7  ;;  %v1495_v52 = vadd.f32 %v1463_v16, %v1298_v62  ;;  %v10295_v28 = vld [vmem:[%s14752_s3 + $0x8] ss:$0 sm:$0xff] }
 0x3c7   : > { %14920 = vst [vmem:[#allocation19_spill] sm:$0xff] %v13173_v0  ;;  %v13188_v16 = vsel %vm3563_vm4, %v3543_v12, %v3544_v4  ;;  %v3545_v62 = vrot.slane %v13076_v22, 1 }
 0x3c8   : > { %9600 = vmatmul.mubr.msk.f32.gmra.mrb[40].mxu1 %vm425_vm11, %v13119_v6  ;;  %v1913_v57 = vpop.xlane.xlu0 %1912  ;;  %v2180_v39 = vadd.f32 %v2148_v33, %v1983_v56  ;;  %v1692_v51 = vadd.f32 %v1660_v54, %v1495_v52  ;;  %v3546_v33 = vrot.slane %v13109_v5, 1  ;;  %v3547_v56 = vrot.slane %v13091_v19, 1 }
 0x3c9   : > { %v1952_v17 = vmul.f32 %v10293_v58, %v1913_v57  ;;  %v2304_v20 = vpop.xlane.xlu1 %2303  ;;  %9602 = vmatprep.mubr.msk.f32.mxu1 %vm425_vm11, %v13157_v38  ;;  %9659 = vmatmul.mubr.msk.f32.gmra.mrb[52].mxu0 %vm425_vm11, %v4152_v9  ;;  %v13184_v58 = vsel %vm3610_vm5, %v3583_v50, 0.0  ;;  %v13197_v50 = vsel %vm2545_vm3, %v4120_v3, %v4121_v21  ;;  %v13201_v12 = vsel %vm2545_vm3, %v4121_v21, %v4122_v24  ;;  %v10296_v21 = vld [vmem:[%s14752_s3 + $0x9] ss:$0 sm:$0xff] }
 0x3ca   : > { %v2345_v55 = vmul.f32 %v10295_v28, %v2304_v20  ;;  %9661 = vmatprep.mubr.msk.f32.mxu0 %vm425_vm11, %v13173_v0  ;;  %v13204_v54 = vrot.slane %v13175_v43, 7 }
 0x3cb   : > { %v1984_v23 = vadd.f32 %v1952_v17, %v1692_v51 }
 0x3cc   : > { %v3420_v57 = vld [vmem:[#allocation3 + $0x88] sm:$0xff]  ;;  %v2377_v9 = vadd.f32 %v2345_v55, %v2180_v39  ;;  %9603 = vmatmul.mubr.msk.f32.gmra.mrb[42].mxu1 %vm425_vm11, %v13184_v58  ;;  %v2110_v20 = vpop.xlane.xlu0 %2109 }
 0x3cd   : > { %v3452_v52 = vadd.f32 %v13101_v40, %v3420_v57  ;;  %v3419_v0 = vld [vmem:[#allocation3 + $0x80] sm:$0xff]  ;;  %v2149_v39 = vmul.f32 %v10294_v10, %v2110_v20  ;;  %v2307_v55 = vpop.xlane.xlu1 %2306  ;;  %9605 = vmatprep.mubr.msk.f32.mxu1 %vm425_vm11, %v13188_v16  ;;  %9662 = vmatmul.mubr.msk.f32.gmra.mrb[54].mxu0 %vm425_vm11, %v13197_v50  ;;  %v4147_v40 = vsel %vm2545_vm3, %v13204_v54, %v12620_v8  ;;  %v3549_v57 = vrot.slane %v13144_v34, 1 }
 0x3ce   : > { %v3451_v3 = vadd.f32 %v3419_v0, %v13114_v49  ;;  %v2414_v19 = vadd.f32 %v10296_v21, %v2377_v9  ;;  %9664 = vmatprep.mubr.msk.f32.mxu0 %vm425_vm11, %v13201_v12  ;;  %v2346_v17 = vmul.f32 %v10295_v28, %v2307_v55  ;;  %v13224_v49 = vsel %vm3563_vm4, %v3544_v4, %v3545_v62  ;;  %v13277_v55 = vld [vmem:[#allocation2 + $0xe0] sm:$0xff] }
 0x3cf   : > { %3484 = vst.msk [vmem:[#allocation3 + $0x88] sm:$0xff] %vm425_vm11, %v3452_v52  ;;  %v2181_v10 = vadd.f32 %v2149_v39, %v1984_v23  ;;  %v13228_v0 = vsel %vm3563_vm4, %v3545_v62, %v3546_v33  ;;  %v13236_v8 = vsel %vm2545_vm3, %v4122_v24, %v13204_v54  ;;  %v3579_v23 = vsel %vm3563_vm4, %v3546_v33, %v3547_v56  ;;  %v13247_v62 = vld [vmem:[#allocation2 + $0xa0] sm:$0xff] }
 0x3d0   : > { %3483 = vst.msk [vmem:[#allocation3 + $0x80] sm:$0xff] %vm425_vm11, %v3451_v3  ;;  %v2446_v51 = vmax.f32 %v2414_v19, 0.0  ;;  %9606 = vmatmul.mubr.msk.f32.gmra.mrb[44].mxu1 %vm425_vm11, %v13224_v49  ;;  %v3548_v4 = vrot.slane %v13142_v2, 1  ;;  %v4188_v19 = vsel %vm278_vm2, %v4147_v40, 0.0  ;;  %v13253_v33 = vsel %vm3610_vm5, %v3579_v23, 0.0 }
 0x3d1   : > { %v2378_v28 = vadd.f32 %v2346_v17, %v2181_v10  ;;  %9608 = vmatprep.mubr.msk.f32.mxu1 %vm425_vm11, %v13228_v0  ;;  %9665 = vmatmul.mubr.msk.f32.gmra.mrb[56].mxu0 %vm425_vm11, %v13236_v8  ;;  %v3550_v20 = vrot.slane %v13175_v43, 1  ;;  %v13264_v52 = vrot.slane %v13247_v62, 1  ;;  %v14921_v40 = vrot.slane %v12662_v30, 1 }
 0x3d2   : > { %2478 = vst.msk [vmem:[#allocation2 + $0xe8] sm:$0xff] %vm425_vm11, %v2446_v51  ;;  %9667 = vmatprep.mubr.msk.f32.mxu0 %vm425_vm11, %v4188_v19  ;;  %v13260_v9 = vsel %vm3563_vm4, %v3547_v56, %v3548_v4  ;;  %v13275_v56 = vsel %vm3563_vm4, %v3548_v4, %v3549_v57  ;;  %v3557_v23 = vrot.slane %v12860_v47, 1 }
 0x3d3   : > { %v2415_v24 = vadd.f32 %v10296_v21, %v2378_v28  ;;  %v13283_v3 = vsel %vm3563_vm4, %v3549_v57, %v3550_v20  ;;  %v3574_v10 = vsel %vm3563_vm4, %v13264_v52, %v14921_v40  ;;  %v13347_v28 = vrot.slane %v13277_v55, 1  ;;  %v6239_v40 = vld [vmem:[%s14750_s1 + $0xf8] sm:$0xff] }
 0x3d4   : > { %9609 = vmatmul.mubr.msk.f32.gmra.mrb[46].mxu1 %vm425_vm11, %v13253_v33 }
 0x3d5   : > { %v2447_v39 = vmax.f32 %v2415_v24, 0.0  ;;  %9611 = vmatprep.mubr.msk.f32.mxu1 %vm425_vm11, %v13260_v9  ;;  %9668 = vmatmul.mubr.msk.f32.gmra.mrb[58].mxu0 %vm425_vm11, %v12687_v11  ;;  %v3575_v11 = vsel %vm3563_vm4, %v3550_v20, %v13264_v52  ;;  %v14924_v20 = vrot.slane %v12824_v1, 7 }
 0x3d6   : > { %9670 = vmatprep.mubr.msk.f32.mxu0 %vm425_vm11, %v12768_v60  ;;  %v13295_v60 = vrot.slane %v13277_v55, 7  ;;  %v13299_v21 = vsel %vm3610_vm5, %v3575_v11, 0.0  ;;  %v6238_v11 = vld [vmem:[%s14750_s1 + $0xf0] sm:$0xff] }
 0x3d7   : > { %2479 = vst.msk [vmem:[#allocation2 + $0xf0] sm:$0xff] %vm425_vm11, %v2447_v39 }
 0x3d8   : > { %9612 = vmatmul.mubr.msk.f32.gmra.mrb[48].mxu1 %vm425_vm11, %v13275_v56 }
 0x3d9   : > { %9614 = vmatprep.mubr.msk.f32.mxu1 %vm425_vm11, %v13283_v3  ;;  %9671 = vmatmul.mubr.msk.f32.gmra.mrb[60].mxu0 %vm425_vm11, %v12796_v59  ;;  %v13311_v59 = vld [vmem:[#allocation2 + $0xe8] sm:$0xff] }
 0x3da   : > { %9673 = vmatprep.mubr.msk.f32.mxu0 %vm425_vm11, %v12822_v27  ;;  %v14922_v27 = vrot.slane %v12882_v46, 7  ;;  %v4133_v51 = vrot.slane %v13311_v59, 7 }
 0x3dc   : > { %9615 = vmatmul.mubr.msk.f32.gmra.mrb[50].mxu1 %vm425_vm11, %v13299_v21  ;;  %v4139_v30 = vsel %vm2545_vm3, %v14922_v27, %v13295_v60  ;;  %v5753_v27 = vld [vmem:[%s14750_s1 + $0xd0] sm:$0xff] }
 0x3dd   : > { %9617 = vmatprep.mubr.msk.f32.mxu1 %vm425_vm11, %v3574_v10  ;;  %9674 = vmatmul.mubr.msk.f32.gmra.mrb[62].mxu0 %vm425_vm11, %v12847_v44  ;;  %v4196_v44 = vsel %vm278_vm2, %v4139_v30, 0.0  ;;  %v10116_v10 = vpack.c.bf16 %v6239_v40, %v6238_v11  ;;  %v5754_v30 = vld [vmem:[%s14750_s1 + $0xd8] sm:$0xff]  ;;  %v13483_v11 = vld [vmem:[#allocation2 + $0xb0] sm:$0xff]  ;;  %v13490_v40 = vld [vmem:[#allocation2 + $0xc0] sm:$0xff] }
 0x3de   : > { %9676 = vmatprep.mubr.msk.f32.mxu0 %vm425_vm11, %v12880_v31  ;;  %v13320_v17 = vld [vmem:[#allocation2 + $0xf0] sm:$0xff] }
 0x3df   : > { %v13332_v31 = vrot.slane %v13320_v17, 7 }
 0x3e0   : > { %9618 = vmatmul.mubr.msk.f32.gmra.mrb[52].mxu1 %vm425_vm11, %v12774_v48  ;;  %v3646_v48 = vsel %vm3610_vm5, %v12815_v61, 0.0 }
 0x3e1   : > { %9620 = vmatprep.mubr.msk.f32.mxu1 %vm425_vm11, %v12800_v32  ;;  %9677 = vmatmul.mubr.msk.f32.gmra.mrb[64].mxu0 %vm425_vm11, %v12907_v45  ;;  %v13343_v32 = vsel %vm2545_vm3, %v13295_v60, %v4133_v51  ;;  %v3558_v45 = vrot.slane %v12882_v46, 1  ;;  %v13356_v61 = vsel %vm2545_vm3, %v4133_v51, %v13332_v31  ;;  %v14923_v46 = vrot.slane %v12833_v26, 1 }
 0x3e2   : > { %9679 = vmatprep.mubr.msk.f32.mxu0 %vm425_vm11, %v4196_v44  ;;  %v4136_v39 = vsel %vm2545_vm3, %v13332_v31, %v14924_v20  ;;  %v10108_v51 = vpack.c.bf16 %v5754_v30, %v5753_v27  ;;  %v14935_v20 = vld [vmem:[#allocation31_spill] sm:$0xff] }
 0x3e3   : > { %v3569_v24 = vsel %vm3563_vm4, %v14923_v46, %v3557_v23  ;;  %v3568_v57 = vsel %vm3563_vm4, %v3557_v23, %v3558_v45  ;;  %v3567_v26 = vsel %vm3563_vm4, %v3558_v45, %v13347_v28  ;;  %v6785_v23 = vld [vmem:[%s14750_s1 + $0x100] sm:$0xff]  ;;  %v13506_v27 = vld [vmem:[#allocation2 + $0xc8] sm:$0xff] }
 0x3e4   : > { %v9554_v4 = vpop.f32.mrb[24].mxu0  ;;  %9621 = vmatmul.mubr.msk.f32.gmra.mrb[54].mxu1 %vm425_vm11, %v3646_v48  ;;  %v3650_v1 = vsel %vm3610_vm5, %v3567_v26, 0.0  ;;  %v14931_v46 = vld [vmem:[#allocation18_spill] sm:$0xff]  ;;  %v14937_v26 = vld [vmem:[#allocation33_spill] sm:$0xff] }
 0x3e5   : > { %v3334_v19 = vpop.f32.mrb[25].mxu0  ;;  %9623 = vmatprep.mubr.msk.f32.mxu1 %vm425_vm11, %v12853_v63  ;;  %9680 = vmatmul.mubr.msk.f32.gmra.mrb[66].mxu0 %vm425_vm11, %v13343_v32 }
 0x3e6   : > { %9682 = vmatprep.mubr.msk.f32.mxu0 %vm425_vm11, %v13356_v61 }
 0x3e7   : > { %v9498_v47 = vpop.f32.mrb[14].mxu1 }
 0x3e8   : > { %2977 = vst.msk [vmem:[#allocation3 + $0x98] sm:$0xff] %vm425_vm11, %v9498_v47  ;;  %v2889_v63 = vpop.f32.mrb[15].mxu1  ;;  %9624 = vmatmul.mubr.msk.f32.gmra.mrb[56].mxu1 %vm425_vm11, %v3569_v24  ;;  %v14930_v47 = vld [vmem:[#allocation37_spill] sm:$0xff]  ;;  %v14932_v24 = vld [vmem:[#allocation27_spill] sm:$0xff] }
 0x3e9   : > { %2976 = vst.msk [vmem:[#allocation3 + $0x90] sm:$0xff] %vm425_vm11, %v2889_v63  ;;  %9626 = vmatprep.mubr.msk.f32.mxu1 %vm425_vm11, %v3568_v57  ;;  %9683 = vmatmul.mubr.msk.f32.gmra.mrb[68].mxu0 %vm425_vm11, %v4136_v39  ;;  %v14933_v63 = vld [vmem:[#allocation36_spill] sm:$0xff]  ;;  %v14934_v57 = vld [vmem:[#allocation38_spill] sm:$0xff] }
 0x3ea   : > { %9749 = vmatprep.mubr.msk.f32.mxu0 %vm425_vm11, %v12983_v35  ;;  %v14936_v39 = vld [vmem:[#allocation12_spill] sm:$0xff] }
 0x3ec   : > { %9627 = vmatmul.mubr.msk.f32.gmra.mrb[58].mxu1 %vm425_vm11, %v3650_v1  ;;  %v5128_v1 = vrot.slane %v13483_v11, 1 }
 0x3ed   : > { %9693 = vmatprep.mubr.msk.f32.mxu1 %vm425_vm11, %v12830_v18  ;;  %9750 = vmatmul.mubr.msk.f32.vlgmr.msra.gmra.mrb[70].mxu0 %vm425_vm11, %v13004_v15  ;;  %v6786_v15 = vld [vmem:[%s14750_s1 + $0x108] sm:$0xff] }
 0x3ee   : > { %9752 = vmatprep.mubr.msk.f32.mxu0 %vm425_vm11, %v13008_v41  ;;  %10115 = vmatpush3.bf16.msra.mxu0 %v12958_v13  ;;  %v14925_v13 = vld [vmem:[#allocation42_spill] sm:$0xff]  ;;  %v14926_v41 = vld [vmem:[#allocation41_spill] sm:$0xff] }
 0x3ef   : > { %v3422_v35 = vld [vmem:[#allocation3 + $0x98] sm:$0xff]  ;;  %10117 = vmatprep.subr.bf16.mxu0 %v10116_v10 }
 0x3f0   : > { %v3454_v44 = vadd.f32 %v9554_v4, %v3422_v35  ;;  %v3421_v48 = vld [vmem:[#allocation3 + $0x90] sm:$0xff]  ;;  %9694 = vmatmul.mubr.msk.f32.vlgmr.msra.gmra.mrb[60].mxu1 %vm425_vm11, %v12857_v29  ;;  %v14927_v29 = vld [vmem:[#allocation35_spill] sm:$0xff]  ;;  %v13420_v4 = vpack.c.bf16 %v6786_v15, %v6785_v23 }
 0x3f1   : > { %v3453_v45 = vadd.f32 %v3421_v48, %v3334_v19  ;;  %9696 = vmatprep.mubr.msk.f32.mxu1 %vm425_vm11, %v12866_v36  ;;  %9753 = vmatmul.mubr.msk.f32.gmra.mrb[72].mxu0 %vm425_vm11, %v14925_v13  ;;  %v14928_v19 = vld [vmem:[#allocation26_spill] sm:$0xff]  ;;  %v14929_v36 = vld [vmem:[#allocation29_spill] sm:$0xff]  ;;  %v5131_v48 = vrot.slane %v13506_v27, 1 }
 0x3f2   : > { %3486 = vst.msk [vmem:[#allocation3 + $0x98] sm:$0xff] %vm425_vm11, %v3454_v44  ;;  %9755 = vmatprep.mubr.msk.f32.mxu0 %vm425_vm11, %v14926_v41  ;;  %10107 = vmatpush3.bf16.msra.mxu1 %v14927_v29  ;;  %v13526_v23 = vld [vmem:[#allocation2 + $0xd0] sm:$0xff] }
 0x3f3   : > { %3485 = vst.msk [vmem:[#allocation3 + $0x90] sm:$0xff] %vm425_vm11, %v3453_v45  ;;  %10109 = vmatprep.subr.bf16.mxu1 %v10108_v51  ;;  %10119 = vmatpush3.bf16.msra.mxu0 %v10116_v10  ;;  %v5130_v10 = vrot.slane %v13490_v40, 1  ;;  %v13530_v45 = vld [vmem:[#allocation2 + $0xd8] sm:$0xff]  ;;  %v5132_v41 = vrot.slane %v13526_v23, 1 }
 0x3f4   : > { %9697 = vmatmul.mubr.msk.f32.gmra.mrb[62].mxu1 %vm425_vm11, %v14928_v19  ;;  %v13550_v19 = vrot.slane %v13530_v45, 1 }
 0x3f5   : > { %9699 = vmatprep.mubr.msk.f32.mxu1 %vm425_vm11, %v14929_v36  ;;  %9756 = vmatmul.mubr.msk.f32.gmra.mrb[74].mxu0 %vm425_vm11, %v14930_v47  ;;  %v13547_v29 = vsel %vm3563_vm4, %v5130_v10, %v5131_v48  ;;  %v13558_v36 = vsel %vm3563_vm4, %v5131_v48, %v5132_v41 }
 0x3f6   : > { %9758 = vmatprep.mubr.msk.f32.mxu0 %vm425_vm11, %v14931_v46  ;;  %10111 = vmatpush3.bf16.msra.mxu1 %v10108_v51  ;;  %v13567_v47 = vsel %vm3563_vm4, %v5132_v41, %v13550_v19  ;;  %v5141_v46 = vsel %vm3563_vm4, %v13550_v19, %v13347_v28  ;;  %v6787_v41 = vld [vmem:[%s14750_s1 + $0x110] sm:$0xff] }
 0x3f7   : > { %10121 = vmatprep.subr.bf16.mxu1 %v13420_v4 }
 0x3f8   : > { %9700 = vmatmul.mubr.msk.f32.gmra.mrb[64].mxu1 %vm425_vm11, %v14932_v24  ;;  %v5135_v24 = vrot.slane %v13311_v59, 1 }
 0x3f9   : > { %9702 = vmatprep.mubr.msk.f32.mxu1 %vm425_vm11, %v14933_v63  ;;  %9759 = vmatmul.mubr.msk.f32.gmra.mrb[76].mxu0 %vm425_vm11, %v13085_v53  ;;  %v14938_v53 = vld [vmem:[#allocation39_spill] sm:$0xff]  ;;  %v13576_v63 = vld [vmem:[#allocation2 + $0xf8] sm:$0xff] }
 0x3fa   : > { %9761 = vmatprep.mubr.msk.f32.mxu0 %vm425_vm11, %v13089_v37  ;;  %v14939_v37 = vld [vmem:[#allocation40_spill] sm:$0xff]  ;;  %v5686_v42 = vrot.slane %v13576_v63, 7 }
 0x3fc   : > { %9703 = vmatmul.mubr.msk.f32.gmra.mrb[66].mxu1 %vm425_vm11, %v14934_v57  ;;  %v5197_v57 = vsel %vm3610_vm5, %v5141_v46, 0.0  ;;  %v6788_v46 = vld [vmem:[%s14750_s1 + $0x118] sm:$0xff] }
 0x3fd   : > { %9705 = vmatprep.mubr.msk.f32.mxu1 %vm425_vm11, %v14935_v20  ;;  %9762 = vmatmul.mubr.msk.f32.gmra.mrb[78].mxu0 %vm425_vm11, %v13119_v6  ;;  %v5136_v20 = vrot.slane %v13320_v17, 1 }
 0x3fe   : > { %9764 = vmatprep.mubr.msk.f32.mxu0 %vm425_vm11, %v13157_v38 }
 0x400   : > { %9706 = vmatmul.mubr.msk.f32.gmra.mrb[68].mxu1 %vm425_vm11, %v14936_v39  ;;  %v5140_v39 = vsel %vm3563_vm4, %v13347_v28, %v5135_v24 }
 0x401   : > { %9708 = vmatprep.mubr.msk.f32.mxu1 %vm425_vm11, %v14937_v26  ;;  %9765 = vmatmul.mubr.msk.f32.gmra.mrb[80].mxu0 %vm425_vm11, %v13184_v58  ;;  %v13471_v58 = vld [vmem:[#allocation2 + $0xa8] sm:$0xff]  ;;  %v13590_v26 = vrot.slane %v13576_v63, 1 }
 0x402   : > { %9767 = vmatprep.mubr.msk.f32.mxu0 %vm425_vm11, %v13188_v16 }
 0x403   : > { %v5138_v28 = vsel %vm3563_vm4, %v5136_v20, %v13590_v26 }
 0x404   : > { %9709 = vmatmul.mubr.msk.f32.gmra.mrb[70].mxu1 %vm425_vm11, %v14938_v53  ;;  %v13593_v53 = vld [vmem:[#allocation2 + $0x20] sm:$0xff] }
 0x405   : > { %9711 = vmatprep.mubr.msk.f32.mxu1 %vm425_vm11, %v14939_v37  ;;  %9768 = vmatmul.mubr.msk.f32.gmra.mrb[82].mxu0 %vm425_vm11, %v13224_v49  ;;  %v5139_v37 = vsel %vm3563_vm4, %v5135_v24, %v5136_v20 }
 0x406   : > { %9770 = vmatprep.mubr.msk.f32.mxu0 %vm425_vm11, %v13228_v0  ;;  %v14940_v0 = vld [vmem:[#allocation11_spill] sm:$0xff] }
 0x408   : > { %9712 = vmatmul.mubr.msk.f32.gmra.mrb[72].mxu1 %vm425_vm11, %v13070_v14 }
 0x409   : > { %v9557_v6 = vpop.f32.mrb[26].mxu0  ;;  %9714 = vmatprep.mubr.msk.f32.mxu1 %vm425_vm11, %v13076_v22  ;;  %9771 = vmatmul.mubr.msk.f32.gmra.mrb[84].mxu0 %vm425_vm11, %v13253_v33  ;;  %v13481_v33 = vrot.slane %v13471_v58, 1 }
 0x40a   : > { %v3344_v38 = vpop.f32.mrb[27].mxu0  ;;  %9773 = vmatprep.mubr.msk.f32.mxu0 %vm425_vm11, %v13260_v9  ;;  %v13488_v9 = vld [vmem:[#allocation2 + $0xb8] sm:$0xff] }
 0x40c   : > { %v9501_v16 = vpop.f32.mrb[16].mxu1  ;;  %9715 = vmatmul.mubr.msk.f32.gmra.mrb[74].mxu1 %vm425_vm11, %v13109_v5 }
 0x40d   : > { %2979 = vst.msk [vmem:[#allocation3 + $0xa8] sm:$0xff] %vm425_vm11, %v9501_v16  ;;  %v2899_v49 = vpop.f32.mrb[17].mxu1  ;;  %9717 = vmatprep.mubr.msk.f32.mxu1 %vm425_vm11, %v14940_v0  ;;  %9774 = vmatmul.mubr.msk.f32.gmra.mrb[86].mxu0 %vm425_vm11, %v13275_v56  ;;  %v5148_v56 = vsel %vm3563_vm4, %v13264_v52, %v13481_v33 }
 0x40e   : > { %2978 = vst.msk [vmem:[#allocation3 + $0xa0] sm:$0xff] %vm425_vm11, %v2899_v49  ;;  %9776 = vmatprep.mubr.msk.f32.mxu0 %vm425_vm11, %v13283_v3  ;;  %v5129_v3 = vrot.slane %v13488_v9, 1  ;;  %v5659_v49 = vrot.slane %v13593_v53, 7 }
 0x410   : > { %9718 = vmatmul.mubr.msk.f32.gmra.mrb[76].mxu1 %vm425_vm11, %v13142_v2  ;;  %v13521_v52 = vsel %vm3563_vm4, %v5128_v1, %v5129_v3  ;;  %v5145_v44 = vsel %vm3563_vm4, %v5129_v3, %v5130_v10  ;;  %v13616_v3 = vld [vmem:[#allocation2 + $0x28] sm:$0xff]  ;;  %v13623_v10 = vld [vmem:[#allocation2 + $0x30] sm:$0xff] }
 0x411   : > { %9720 = vmatprep.mubr.msk.f32.mxu1 %vm425_vm11, %v13144_v34  ;;  %9777 = vmatmul.mubr.msk.f32.gmra.mrb[88].mxu0 %vm425_vm11, %v13299_v21  ;;  %v13513_v21 = vsel %vm3563_vm4, %v13481_v33, %v5128_v1  ;;  %v13538_v13 = vsel %vm3610_vm5, %v5145_v44, 0.0  ;;  %v5661_v48 = vrot.slane %v13623_v10, 7 }
 0x412   : > { %9779 = vmatprep.mubr.msk.f32.mxu0 %vm425_vm11, %v5148_v56 }
 0x414   : > { %v3424_v30 = vld [vmem:[#allocation3 + $0xa8] sm:$0xff]  ;;  %9721 = vmatmul.mubr.msk.f32.gmra.mrb[78].mxu1 %vm425_vm11, %v13175_v43 }
 0x415   : > { %v3456_v35 = vadd.f32 %v9557_v6, %v3424_v30  ;;  %v3423_v51 = vld [vmem:[#allocation3 + $0xa0] sm:$0xff]  ;;  %9723 = vmatprep.mubr.msk.f32.mxu1 %vm425_vm11, %v13247_v62  ;;  %9780 = vmatmul.mubr.msk.f32.gmra.mrb[90].mxu0 %vm425_vm11, %v13513_v21  ;;  %v5626_v6 = vld [vmem:[#allocation2 + $0x18] sm:$0xff] }
 0x416   : > { %v3455_v15 = vadd.f32 %v3423_v51, %v3344_v38  ;;  %9782 = vmatprep.mubr.msk.f32.mxu0 %vm425_vm11, %v13521_v52  ;;  %v14941_v38 = vrot.slane %v12830_v18, 1  ;;  %v5658_v1 = vrot.slane %v5626_v6, 7  ;;  %v13627_v30 = vld [vmem:[#allocation2 + $0x40] sm:$0xff]  ;;  %v10124_v6 = vpack.c.bf16 %v6788_v46, %v6787_v41  ;;  %v13678_v46 = vld [vmem:[#allocation2 + $0x58] sm:$0xff] }
 0x417   : > { %3488 = vst.msk [vmem:[#allocation3 + $0xa8] sm:$0xff] %vm425_vm11, %v3456_v35  ;;  %v5660_v35 = vrot.slane %v13616_v3, 7 }
 0x418   : > { %3487 = vst.msk [vmem:[#allocation3 + $0xa0] sm:$0xff] %vm425_vm11, %v3455_v15  ;;  %9724 = vmatmul.mubr.msk.f32.gmra.mrb[80].mxu1 %vm425_vm11, %v13471_v58  ;;  %v5169_v16 = vsel %vm3563_vm4, %v13590_v26, %v14941_v38  ;;  %v5714_v18 = vsel %vm2545_vm3, %v5658_v1, %v5659_v49  ;;  %v13635_v15 = vld [vmem:[#allocation2 + $0x38] sm:$0xff]  ;;  %v13664_v1 = vld [vmem:[#allocation2 + $0x50] sm:$0xff] }
 0x419   : > { %9726 = vmatprep.mubr.msk.f32.mxu1 %vm425_vm11, %v13483_v11  ;;  %9783 = vmatmul.mubr.msk.f32.gmra.mrb[92].mxu0 %vm425_vm11, %v13538_v13  ;;  %v5201_v56 = vsel %vm3610_vm5, %v5169_v16, 0.0  ;;  %v5719_v44 = vsel %vm278_vm2, %v5714_v18, 0.0  ;;  %v5712_v38 = vsel %vm2545_vm3, %v5660_v35, %v5661_v48  ;;  %v13656_v16 = vld [vmem:[#allocation2 + $0x48] sm:$0xff]  ;;  %v5665_v41 = vrot.slane %v13664_v1, 7 }
 0x41a   : > { %9785 = vmatprep.mubr.msk.f32.mxu0 %vm425_vm11, %v13547_v29 }
 0x41c   : > { %9727 = vmatmul.mubr.msk.f32.gmra.mrb[82].mxu1 %vm425_vm11, %v13488_v9 }
 0x41d   : > { %9729 = vmatprep.mubr.msk.f32.mxu1 %vm425_vm11, %v13490_v40  ;;  %9786 = vmatmul.mubr.msk.f32.gmra.mrb[94].mxu0 %vm425_vm11, %v13558_v36 }
 0x41e   : > { %9788 = vmatprep.mubr.msk.f32.mxu0 %vm425_vm11, %v13567_v47 }
 0x420   : > { %9730 = vmatmul.mubr.msk.f32.gmra.mrb[84].mxu1 %vm425_vm11, %v13506_v27 }
 0x421   : > { %9732 = vmatprep.mubr.msk.f32.mxu1 %vm425_vm11, %v13526_v23  ;;  %9789 = vmatmul.mubr.msk.f32.gmra.mrb[96].mxu0 %vm425_vm11, %v5197_v57  ;;  %v5663_v57 = vrot.slane %v13627_v30, 7 }
 0x422   : > { %9791 = vmatprep.mubr.msk.f32.mxu0 %vm425_vm11, %v5140_v39  ;;  %v5713_v39 = vsel %vm2545_vm3, %v5659_v49, %v5660_v35  ;;  %v5664_v35 = vrot.slane %v13656_v16, 7 }
 0x424   : > { %9733 = vmatmul.mubr.msk.f32.gmra.mrb[86].mxu1 %vm425_vm11, %v13530_v45 }
 0x425   : > { %9735 = vmatprep.mubr.msk.f32.mxu1 %vm425_vm11, %v13277_v55  ;;  %9792 = vmatmul.mubr.msk.f32.gmra.mrb[98].mxu0 %vm425_vm11, %v5139_v37  ;;  %v5662_v37 = vrot.slane %v13635_v15, 7 }
 0x426   : > { %9794 = vmatprep.mubr.msk.f32.mxu0 %vm425_vm11, %v5138_v28 }
 0x427   : > { %v5710_v49 = vsel %vm2545_vm3, %v5662_v37, %v5663_v57  ;;  %v5711_v18 = vsel %vm2545_vm3, %v5661_v48, %v5662_v37 }
 0x428   : > { %9736 = vmatmul.mubr.msk.f32.gmra.mrb[88].mxu1 %vm425_vm11, %v13311_v59 }
 0x429   : > { %9738 = vmatprep.mubr.msk.f32.mxu1 %vm425_vm11, %v13320_v17  ;;  %9795 = vmatmul.mubr.msk.f32.gmra.mrb[100].mxu0 %vm425_vm11, %v5201_v56  ;;  %v13668_v56 = vld [vmem:[#allocation2 + $0x60] sm:$0xff] }
 0x42a   : > { %9861 = vmatprep.mubr.msk.f32.mxu0 %vm425_vm11, %v13593_v53 }
 0x42c   : > { %v9560_v51 = vpop.f32.mrb[28].mxu0  ;;  %9739 = vmatmul.mubr.msk.f32.gmra.mrb[90].mxu1 %vm425_vm11, %v13576_v63 }
 0x42d   : > { %v3354_v24 = vpop.f32.mrb[29].mxu0  ;;  %9805 = vmatprep.mubr.msk.f32.mxu1 %vm425_vm11, %v5719_v44  ;;  %9862 = vmatmul.mubr.msk.f32.vlgmr.msra.gmra.mrb[102].mxu0 %vm425_vm11, %v13616_v3  ;;  %v5723_v44 = vsel %vm278_vm2, %v5710_v49, 0.0  ;;  %v13692_v49 = vld [vmem:[#allocation2 + $0x68] sm:$0xff] }
 0x42e   : > { %9864 = vmatprep.mubr.msk.f32.mxu0 %vm425_vm11, %v13623_v10 }
 0x42f   : > { %v9504_v20 = vpop.f32.mrb[18].mxu1 }
 0x430   : > { %2981 = vst.msk [vmem:[#allocation3 + $0xb8] sm:$0xff] %vm425_vm11, %v9504_v20  ;;  %v2909_v28 = vpop.f32.mrb[19].mxu1  ;;  %9806 = vmatmul.mubr.msk.f32.vlgmr.msra.gmra.mrb[92].mxu1 %vm425_vm11, %v5713_v39  ;;  %v5709_v20 = vsel %vm2545_vm3, %v5663_v57, %v5664_v35  ;;  %v5666_v39 = vrot.slane %v13678_v46, 7 }
 0x431   : > { %2980 = vst.msk [vmem:[#allocation3 + $0xb0] sm:$0xff] %vm425_vm11, %v2909_v28  ;;  %9808 = vmatprep.mubr.msk.f32.mxu1 %vm425_vm11, %v5712_v38  ;;  %9865 = vmatmul.mubr.msk.f32.gmra.mrb[104].mxu0 %vm425_vm11, %v13635_v15  ;;  %v5708_v38 = vsel %vm2545_vm3, %v5664_v35, %v5665_v41 }
 0x432   : > { %9867 = vmatprep.mubr.msk.f32.mxu0 %vm425_vm11, %v13627_v30  ;;  %10123 = vmatpush3.bf16.msra.mxu1 %v13420_v4  ;;  %v5667_v4 = vrot.slane %v13668_v56, 7 }
 0x433   : > { %10125 = vmatprep.subr.bf16.mxu1 %v10124_v6 }
 0x434   : > { %9809 = vmatmul.mubr.msk.f32.gmra.mrb[94].mxu1 %vm425_vm11, %v5711_v18  ;;  %v5706_v57 = vsel %vm2545_vm3, %v5666_v39, %v5667_v4 }
 0x435   : > { %9811 = vmatprep.mubr.msk.f32.mxu1 %vm425_vm11, %v5723_v44  ;;  %9868 = vmatmul.mubr.msk.f32.gmra.mrb[106].mxu0 %vm425_vm11, %v13656_v16  ;;  %v5727_v35 = vsel %vm278_vm2, %v5706_v57, 0.0 }
 0x436   : > { %9870 = vmatprep.mubr.msk.f32.mxu0 %vm425_vm11, %v13664_v1  ;;  %10127 = vmatpush3.bf16.msra.mxu1 %v10124_v6  ;;  %v13699_v6 = vld [vmem:[#allocation2 + $0x70] sm:$0xff] }
 0x437   : > { %v3426_v48 = vld [vmem:[#allocation3 + $0xb8] sm:$0xff]  ;;  %v5669_v44 = vrot.slane %v13699_v6, 7 }
 0x438   : > { %v3458_v37 = vadd.f32 %v9560_v51, %v3426_v48  ;;  %v3425_v28 = vld [vmem:[#allocation3 + $0xb0] sm:$0xff]  ;;  %9812 = vmatmul.mubr.msk.f32.gmra.mrb[96].mxu1 %vm425_vm11, %v5709_v20  ;;  %v5707_v51 = vsel %vm2545_vm3, %v5665_v41, %v5666_v39  ;;  %v5675_v20 = vrot.slane %v13247_v62, 7 }
 0x439   : > { %v3457_v18 = vadd.f32 %v3425_v28, %v3354_v24  ;;  %9814 = vmatprep.mubr.msk.f32.mxu1 %vm425_vm11, %v5708_v38  ;;  %9871 = vmatmul.mubr.msk.f32.gmra.mrb[108].mxu0 %vm425_vm11, %v13678_v46  ;;  %v5668_v24 = vrot.slane %v13692_v49, 7  ;;  %v5680_v28 = vrot.slane %v13506_v27, 7 }
 0x43a   : > { %3490 = vst.msk [vmem:[#allocation3 + $0xb8] sm:$0xff] %vm425_vm11, %v3458_v37  ;;  %9873 = vmatprep.mubr.msk.f32.mxu0 %vm425_vm11, %v13668_v56 }
 0x43b   : > { %3489 = vst.msk [vmem:[#allocation3 + $0xb0] sm:$0xff] %vm425_vm11, %v3457_v18  ;;  %v5705_v41 = vsel %vm2545_vm3, %v5667_v4, %v5668_v24  ;;  %v5704_v48 = vsel %vm2545_vm3, %v5668_v24, %v5669_v44  ;;  %v14943_v4 = vld [vmem:[#allocation19_spill] sm:$0xff]  ;;  %v5682_v18 = vrot.slane %v13530_v45, 7 }
 0x43c   : > { %9815 = vmatmul.mubr.msk.f32.gmra.mrb[98].mxu1 %vm425_vm11, %v5707_v51 }
 0x43d   : > { %9817 = vmatprep.mubr.msk.f32.mxu1 %vm425_vm11, %v5727_v35  ;;  %9874 = vmatmul.mubr.msk.f32.gmra.mrb[110].mxu0 %vm425_vm11, %v13070_v14  ;;  %v14942_v14 = vld [vmem:[#allocation13_spill] sm:$0xff] }
 0x43e   : > { %9876 = vmatprep.mubr.msk.f32.mxu0 %vm425_vm11, %v13076_v22  ;;  %v5703_v22 = vsel %vm2545_vm3, %v5669_v44, %v14942_v14  ;;  %v6697_v14 = vrot.slane %v13627_v30, 1 }
 0x440   : > { %9818 = vmatmul.mubr.msk.f32.gmra.mrb[100].mxu1 %vm425_vm11, %v5705_v41  ;;  %v6695_v41 = vrot.slane %v13623_v10, 1 }
 0x441   : > { %9820 = vmatprep.mubr.msk.f32.mxu1 %vm425_vm11, %v5704_v48  ;;  %9877 = vmatmul.mubr.msk.f32.gmra.mrb[112].mxu0 %vm425_vm11, %v13109_v5  ;;  %v5698_v5 = vsel %vm2545_vm3, %v13204_v54, %v5675_v20 }
 0x442   : > { %9879 = vmatprep.mubr.msk.f32.mxu0 %vm425_vm11, %v14940_v0 }
 0x444   : > { %9821 = vmatmul.mubr.msk.f32.gmra.mrb[102].mxu1 %vm425_vm11, %v5703_v22 }
 0x445   : > { %9823 = vmatprep.mubr.msk.f32.mxu1 %vm425_vm11, %v14943_v4  ;;  %9880 = vmatmul.mubr.msk.f32.gmra.mrb[114].mxu0 %vm425_vm11, %v13142_v2  ;;  %v5676_v2 = vrot.slane %v13471_v58, 7 }
 0x446   : > { %9882 = vmatprep.mubr.msk.f32.mxu0 %vm425_vm11, %v13144_v34  ;;  %v5735_v34 = vsel %vm278_vm2, %v5698_v5, 0.0 }
 0x448   : > { %9824 = vmatmul.mubr.msk.f32.gmra.mrb[104].mxu1 %vm425_vm11, %v13197_v50  ;;  %v5677_v50 = vrot.slane %v13483_v11, 7 }
 0x449   : > { %9826 = vmatprep.mubr.msk.f32.mxu1 %vm425_vm11, %v13201_v12  ;;  %9883 = vmatmul.mubr.msk.f32.gmra.mrb[116].mxu0 %vm425_vm11, %v13175_v43  ;;  %v5679_v43 = vrot.slane %v13490_v40, 7 }
 0x44a   : > { %9885 = vmatprep.mubr.msk.f32.mxu0 %vm425_vm11, %v13247_v62  ;;  %v5678_v62 = vrot.slane %v13488_v9, 7  ;;  %v5696_v39 = vsel %vm2545_vm3, %v5676_v2, %v5677_v50 }
 0x44c   : > { %9827 = vmatmul.mubr.msk.f32.gmra.mrb[106].mxu1 %vm425_vm11, %v13236_v8  ;;  %v5697_v8 = vsel %vm2545_vm3, %v5675_v20, %v5676_v2  ;;  %v5695_v37 = vsel %vm2545_vm3, %v5677_v50, %v5678_v62  ;;  %v6698_v20 = vrot.slane %v13656_v16, 1 }
 0x44d   : > { %v9563_v12 = vpop.f32.mrb[30].mxu0  ;;  %9829 = vmatprep.mubr.msk.f32.mxu1 %vm425_vm11, %v5735_v34  ;;  %9886 = vmatmul.mubr.msk.f32.gmra.mrb[118].mxu0 %vm425_vm11, %v13471_v58  ;;  %v6699_v34 = vrot.slane %v13664_v1, 1 }
 0x44e   : > { %v3364_v54 = vpop.f32.mrb[31].mxu0  ;;  %9888 = vmatprep.mubr.msk.f32.mxu0 %vm425_vm11, %v13483_v11  ;;  %v5694_v11 = vsel %vm2545_vm3, %v5678_v62, %v5679_v43  ;;  %v6743_v16 = vsel %vm3563_vm4, %v6697_v14, %v6698_v20 }
 0x44f   : > { %v5739_v38 = vsel %vm278_vm2, %v5694_v11, 0.0  ;;  %v6742_v62 = vsel %vm3563_vm4, %v6698_v20, %v6699_v34 }
 0x450   : > { %v9507_v0 = vpop.f32.mrb[20].mxu1  ;;  %9830 = vmatmul.mubr.msk.f32.gmra.mrb[108].mxu1 %vm425_vm11, %v5697_v8 }
 0x451   : > { %2983 = vst.msk [vmem:[#allocation3 + $0xc8] sm:$0xff] %vm425_vm11, %v9507_v0  ;;  %v2919_v58 = vpop.f32.mrb[21].mxu1  ;;  %9832 = vmatprep.mubr.msk.f32.mxu1 %vm425_vm11, %v5696_v39  ;;  %9889 = vmatmul.mubr.msk.f32.gmra.mrb[120].mxu0 %vm425_vm11, %v13488_v9  ;;  %v5681_v9 = vrot.slane %v13526_v23, 7  ;;  %v6672_v39 = vld [vmem:[#allocation2 + $0x78] sm:$0xff] }
 0x452   : > { %2982 = vst.msk [vmem:[#allocation3 + $0xc0] sm:$0xff] %vm425_vm11, %v2919_v58  ;;  %9891 = vmatprep.mubr.msk.f32.mxu0 %vm425_vm11, %v13490_v40  ;;  %v5693_v40 = vsel %vm2545_vm3, %v5679_v43, %v5680_v28  ;;  %v6701_v43 = vrot.slane %v13668_v56, 1  ;;  %v6702_v56 = vrot.slane %v13692_v49, 1  ;;  %v6673_v58 = vld [vmem:[#allocation2 + $0x80] sm:$0xff] }
 0x453   : > { %v5692_v51 = vsel %vm2545_vm3, %v5680_v28, %v5681_v9  ;;  %v5691_v44 = vsel %vm2545_vm3, %v5681_v9, %v5682_v18  ;;  %v6704_v9 = vrot.slane %v6672_v39, 1 }
 0x454   : > { %9833 = vmatmul.mubr.msk.f32.gmra.mrb[110].mxu1 %vm425_vm11, %v5695_v37  ;;  %v6703_v37 = vrot.slane %v13699_v6, 1 }
 0x455   : > { %9835 = vmatprep.mubr.msk.f32.mxu1 %vm425_vm11, %v5739_v38  ;;  %9892 = vmatmul.mubr.msk.f32.gmra.mrb[122].mxu0 %vm425_vm11, %v13506_v27  ;;  %v5690_v27 = vsel %vm2545_vm3, %v5682_v18, %v13295_v60  ;;  %v5687_v60 = vsel %vm2545_vm3, %v13332_v31, %v5686_v42  ;;  %v6693_v31 = vrot.slane %v13593_v53, 1  ;;  %v6739_v38 = vsel %vm3563_vm4, %v6701_v43, %v6702_v56  ;;  %v6674_v18 = vld [vmem:[#allocation2 + $0x88] sm:$0xff] }
 0x456   : > { %9894 = vmatprep.mubr.msk.f32.mxu0 %vm425_vm11, %v13526_v23  ;;  %v6706_v42 = vrot.slane %v6674_v18, 1 }
 0x458   : > { %v3428_v57 = vld [vmem:[#allocation3 + $0xc8] sm:$0xff]  ;;  %9836 = vmatmul.mubr.msk.f32.gmra.mrb[112].mxu1 %vm425_vm11, %v5693_v40  ;;  %v6705_v40 = vrot.slane %v6673_v58, 1 }
 0x459   : > { %v3460_v24 = vadd.f32 %v9563_v12, %v3428_v57  ;;  %v3427_v35 = vld [vmem:[#allocation3 + $0xc0] sm:$0xff]  ;;  %9838 = vmatprep.mubr.msk.f32.mxu1 %vm425_vm11, %v5692_v51  ;;  %9895 = vmatmul.mubr.msk.f32.gmra.mrb[124].mxu0 %vm425_vm11, %v13530_v45  ;;  %v5743_v45 = vsel %vm278_vm2, %v5690_v27, 0.0  ;;  %v6700_v12 = vrot.slane %v13678_v46, 1 }
 0x45a   : > { %v3459_v23 = vadd.f32 %v3427_v35, %v3364_v54  ;;  %9897 = vmatprep.mubr.msk.f32.mxu0 %vm425_vm11, %v13277_v55  ;;  %v14944_v55 = vmov 0.0  }
 0x45b   : > { %3492 = vst.msk [vmem:[#allocation3 + $0xc8] sm:$0xff] %vm425_vm11, %v3460_v24  ;;  %v6741_v0 = vsel %vm3563_vm4, %v6699_v34, %v6700_v12  ;;  %v6740_v46 = vsel %vm3563_vm4, %v6700_v12, %v6701_v43  ;;  %v6738_v24 = vsel %vm3563_vm4, %v6702_v56, %v6703_v37 }
 0x45c   : > { %3491 = vst.msk [vmem:[#allocation3 + $0xc0] sm:$0xff] %vm425_vm11, %v3459_v23  ;;  %9839 = vmatmul.mubr.msk.f32.gmra.mrb[114].mxu1 %vm425_vm11, %v5691_v44  ;;  %v6760_v11 = vsel %vm3610_vm5, %v6740_v46, 0.0  ;;  %v6737_v44 = vsel %vm3563_vm4, %v6703_v37, %v6704_v9 }
 0x45d   : > { %9841 = vmatprep.mubr.msk.f32.mxu1 %vm425_vm11, %v5743_v45  ;;  %9898 = vmatmul.mubr.msk.f32.gmra.mrb[126].mxu0 %vm425_vm11, %v13311_v59  ;;  %v6736_v45 = vsel %vm3563_vm4, %v6704_v9, %v6705_v40  ;;  %v3980_v9 = vld [vmem:[#allocation3 + $0x20] sm:$0xff] }
 0x45e   : > { %9900 = vmatprep.mubr.msk.f32.mxu0 %vm425_vm11, %v13320_v17 }
 0x460   : > { %9842 = vmatmul.mubr.msk.f32.gmra.mrb[116].mxu1 %vm425_vm11, %v13343_v32 }
 0x461   : > { %9844 = vmatprep.mubr.msk.f32.mxu1 %vm425_vm11, %v13356_v61  ;;  %9901 = vmatmul.mubr.msk.f32.gmra.mrb[128].mxu0 %vm425_vm11, %v13576_v63  ;;  %v6694_v61 = vrot.slane %v13616_v3, 1  ;;  %v6696_v3 = vrot.slane %v13635_v15, 1 }
 0x462   : > { %9903 = vmatprep.mubr.f32.mxu0 %v14944_v55 }
 0x463   : > { %v6747_v48 = vsel %vm3563_vm4, %v6693_v31, %v6694_v61  ;;  %v6746_v22 = vsel %vm3563_vm4, %v6694_v61, %v6695_v41  ;;  %v6745_v53 = vsel %vm3563_vm4, %v6695_v41, %v6696_v3  ;;  %v6744_v10 = vsel %vm3563_vm4, %v6696_v3, %v6697_v14  ;;  %v6676_v61 = vld [vmem:[#allocation2 + $0x98] sm:$0xff]  ;;  %v3976_v31 = vld [vmem:[#allocation3] sm:$0xff] }
 0x464   : > { %9845 = vmatmul.mubr.msk.f32.gmra.mrb[118].mxu1 %vm425_vm11, %v5687_v60  ;;  %v6756_v2 = vsel %vm3610_vm5, %v6744_v10, 0.0  ;;  %v6675_v60 = vld [vmem:[#allocation2 + $0x90] sm:$0xff]  ;;  %v6708_v10 = vrot.slane %v6676_v61, 1 }
 0x465   : > { %v9566_v59 = vpop.f32.mrb[32].mxu0  ;;  %9847 = vmatprep.mubr.f32.mxu1 %v14944_v55  ;;  %9904 = vmatmul.mubr.f32.gmra.mrb[130].mxu0 %v14944_v55  ;;  %v6707_v3 = vrot.slane %v6675_v60, 1 }
 0x466   : > { %v3374_v17 = vpop.f32.mrb[33].mxu0  ;;  %9906 = vmatprep.mubr.f32.mxu0 %v14944_v55 }
 0x468   : > { %v9510_v32 = vpop.f32.mrb[22].mxu1  ;;  %9848 = vmatmul.mubr.f32.gmra.mrb[120].mxu1 %v14944_v55 }
 0x469   : > { %2985 = vst.msk [vmem:[#allocation3 + $0xd8] sm:$0xff] %vm425_vm11, %v9510_v32  ;;  %v2929_v63 = vpop.f32.mrb[23].mxu1  ;;  %9850 = vmatprep.mubr.f32.mxu1 %v14944_v55  ;;  %9907 = vmatmul.mubr.f32.gmra.mrb[132].mxu0 %v14944_v55  ;;  %v3977_v32 = vld [vmem:[#allocation3 + $0x8] sm:$0xff] }
 0x46a   : > { %2984 = vst.msk [vmem:[#allocation3 + $0xd0] sm:$0xff] %vm425_vm11, %v2929_v63  ;;  %v6677_v63 = vld [vmem:[#allocation2 + $0xa0] sm:$0xff] }
 0x46b   : > { %v6709_v20 = vrot.slane %v6677_v63, 1 }
 0x46c   : > { %9851 = vmatmul.mubr.f32.gmra.mrb[122].mxu1 %v14944_v55 }
 0x46d   : > { %9917 = vmatprep.mubr.msk.f32.mxu1 %vm425_vm11, %v6747_v48  ;;  %v6764_v48 = vsel %vm3610_vm5, %v6736_v45, 0.0 }
 0x470   : > { %v3430_v4 = vld [vmem:[#allocation3 + $0xd8] sm:$0xff]  ;;  %9918 = vmatmul.mubr.msk.f32.vlgmr.msra.gmra.mrb[124].mxu1 %vm425_vm11, %v6746_v22 }
 0x471   : > { %v3462_v5 = vadd.f32 %v9566_v59, %v3430_v4  ;;  %v3429_v15 = vld [vmem:[#allocation3 + $0xd0] sm:$0xff]  ;;  %9920 = vmatprep.mubr.msk.f32.mxu1 %vm425_vm11, %v6745_v53  ;;  %v6735_v53 = vsel %vm3563_vm4, %v6705_v40, %v6706_v42 }
 0x472   : > { %v3461_v30 = vadd.f32 %v3429_v15, %v3374_v17 }
 0x473   : > { %3494 = vst.msk [vmem:[#allocation3 + $0xd8] sm:$0xff] %vm425_vm11, %v3462_v5 }
 0x474   : > { %3493 = vst.msk [vmem:[#allocation3 + $0xd0] sm:$0xff] %vm425_vm11, %v3461_v30  ;;  %v9569_v50 = vpop.f32.mrb[34].mxu0  ;;  %9921 = vmatmul.mubr.msk.f32.gmra.mrb[126].mxu1 %vm425_vm11, %v6756_v2  ;;  %v3979_v30 = vld [vmem:[#allocation3 + $0x18] sm:$0xff]  ;;  %v3978_v2 = vld [vmem:[#allocation3 + $0x10] sm:$0xff] }
 0x475   : > { %v3384_v54 = vpop.f32.mrb[35].mxu0  ;;  %9923 = vmatprep.mubr.msk.f32.mxu1 %vm425_vm11, %v6743_v16  ;;  %v6734_v16 = vsel %vm3563_vm4, %v6706_v42, %v6707_v3 }
 0x477   : > { %v9513_v8 = vpop.f32.mrb[24].mxu1 }
 0x478   : > { %2987 = vst.msk [vmem:[#allocation3 + $0xe8] sm:$0xff] %vm425_vm11, %v9513_v8  ;;  %v2939_v1 = vpop.f32.mrb[25].mxu1  ;;  %9924 = vmatmul.mubr.msk.f32.gmra.mrb[128].mxu1 %vm425_vm11, %v6742_v62 }
 0x479   : > { %2986 = vst.msk [vmem:[#allocation3 + $0xe0] sm:$0xff] %vm425_vm11, %v2939_v1  ;;  %9926 = vmatprep.mubr.msk.f32.mxu1 %vm425_vm11, %v6741_v0  ;;  %v6733_v1 = vsel %vm3563_vm4, %v6707_v3, %v6708_v10  ;;  %v6732_v0 = vsel %vm3563_vm4, %v6708_v10, %v6709_v20  ;;  %v6686_v10 = vld [vmem:[#allocation2 + $0xe8] sm:$0xff] }
 0x47a   : > { %v6768_v37 = vsel %vm3610_vm5, %v6732_v0, 0.0 }
 0x47c   : > { %v9572_v28 = vpop.f32.mrb[36].mxu0  ;;  %9927 = vmatmul.mubr.msk.f32.gmra.mrb[130].mxu1 %vm425_vm11, %v6760_v11  ;;  %v3981_v11 = vld [vmem:[#allocation3 + $0x28] sm:$0xff] }
 0x47d   : > { %v3394_v49 = vpop.f32.mrb[37].mxu0  ;;  %9929 = vmatprep.mubr.msk.f32.mxu1 %vm425_vm11, %v6739_v38 }
 0x47f   : > { %v3432_v57 = vld [vmem:[#allocation3 + $0xe8] sm:$0xff]  ;;  %v9516_v51 = vpop.f32.mrb[26].mxu1 }
 0x480   : > { %v3464_v35 = vadd.f32 %v9569_v50, %v3432_v57  ;;  %v3431_v27 = vld [vmem:[#allocation3 + $0xe0] sm:$0xff]  ;;  %2989 = vst.msk [vmem:[#allocation3 + $0xf8] sm:$0xff] %vm425_vm11, %v9516_v51  ;;  %v2949_v6 = vpop.f32.mrb[27].mxu1  ;;  %v13884_v23 = vpop.f32.mrb[38].mxu0  ;;  %9930 = vmatmul.mubr.msk.f32.gmra.mrb[132].mxu1 %vm425_vm11, %v6738_v24 }
 0x481   : > { %v3463_v59 = vadd.f32 %v3431_v27, %v3384_v54  ;;  %2988 = vst.msk [vmem:[#allocation3 + $0xf0] sm:$0xff] %vm425_vm11, %v2949_v6  ;;  %v13892_v17 = vpop.f32.mrb[39].mxu0  ;;  %9932 = vmatprep.mubr.msk.f32.mxu1 %vm425_vm11, %v6737_v44  ;;  %v3983_v6 = vld [vmem:[#allocation3 + $0x38] sm:$0xff] }
 0x482   : > { %3496 = vst.msk [vmem:[#allocation3 + $0xe8] sm:$0xff] %vm425_vm11, %v3464_v35 }
 0x483   : > { %3495 = vst.msk [vmem:[#allocation3 + $0xe0] sm:$0xff] %vm425_vm11, %v3463_v59  ;;  %v9583_v41 = vpop.f32.mrb[28].mxu1 }
 0x484   : > { %v4009_v14 = vadd.f32 %v9583_v41, %v3977_v32  ;;  %v3817_v22 = vpop.f32.mrb[29].mxu1  ;;  %v13899_v4 = vpop.f32.mrb[40].mxu0  ;;  %9933 = vmatmul.mubr.msk.f32.gmra.mrb[134].mxu1 %vm425_vm11, %v6764_v48 }
 0x485   : > { %v4008_v5 = vadd.f32 %v3976_v31, %v3817_v22  ;;  %v13904_v15 = vpop.f32.mrb[41].mxu0  ;;  %9935 = vmatprep.mubr.msk.f32.mxu1 %vm425_vm11, %v6735_v53  ;;  %v3985_v31 = vld [vmem:[#allocation3 + $0x48] sm:$0xff] }
 0x486   : > { %4041 = vst.msk [vmem:[#allocation3 + $0x8] sm:$0xff] %vm425_vm11, %v4009_v14  ;;  %v3984_v14 = vld [vmem:[#allocation3 + $0x40] sm:$0xff] }
 0x487   : > { %v3434_v34 = vld [vmem:[#allocation3 + $0xf8] sm:$0xff]  ;;  %4040 = vst.msk [vmem:[#allocation3] sm:$0xff] %vm425_vm11, %v4008_v5  ;;  %v9586_v50 = vpop.f32.mrb[30].mxu1 }
 0x488   : > { %v3466_v12 = vadd.f32 %v9572_v28, %v3434_v34  ;;  %v3433_v43 = vld [vmem:[#allocation3 + $0xf0] sm:$0xff]  ;;  %v4011_v54 = vadd.f32 %v9586_v50, %v3979_v30  ;;  %v3827_v8 = vpop.f32.mrb[31].mxu1  ;;  %v13911_v62 = vpop.f32.mrb[42].mxu0  ;;  %9936 = vmatmul.mubr.msk.f32.gmra.mrb[136].mxu1 %vm425_vm11, %v6734_v16  ;;  %v3987_v30 = vld [vmem:[#allocation3 + $0x58] sm:$0xff] }
 0x489   : > { %v3465_v46 = vadd.f32 %v3433_v43, %v3394_v49  ;;  %v4010_v56 = vadd.f32 %v3978_v2, %v3827_v8  ;;  %v13918_v39 = vpop.f32.mrb[43].mxu0  ;;  %9938 = vmatprep.mubr.msk.f32.mxu1 %vm425_vm11, %v6733_v1  ;;  %v6731_v49 = vsel %vm3563_vm4, %v6709_v20, %v13481_v33  ;;  %v3982_v33 = vld [vmem:[#allocation3 + $0x30] sm:$0xff]  ;;  %v6718_v43 = vrot.slane %v6686_v10, 1 }
 0x48a   : > { %3498 = vst.msk [vmem:[#allocation3 + $0xf8] sm:$0xff] %vm425_vm11, %v3466_v12  ;;  %4043 = vst.msk [vmem:[#allocation3 + $0x18] sm:$0xff] %vm425_vm11, %v4011_v54  ;;  %v3986_v16 = vld [vmem:[#allocation3 + $0x50] sm:$0xff] }
 0x48b   : > { %3497 = vst.msk [vmem:[#allocation3 + $0xf0] sm:$0xff] %vm425_vm11, %v3465_v46  ;;  %4042 = vst.msk [vmem:[#allocation3 + $0x10] sm:$0xff] %vm425_vm11, %v4010_v56  ;;  %v9589_v58 = vpop.f32.mrb[32].mxu1  ;;  %v6687_v54 = vld [vmem:[#allocation2 + $0xf0] sm:$0xff]  ;;  %v3989_v46 = vld [vmem:[#allocation3 + $0x68] sm:$0xff] }
 0x48c   : > { %v4013_v28 = vadd.f32 %v9589_v58, %v3981_v11  ;;  %v3837_v38 = vpop.f32.mrb[33].mxu1  ;;  %v13927_v40 = vpop.f32.mrb[44].mxu0  ;;  %9939 = vmatmul.mubr.msk.f32.gmra.mrb[138].mxu1 %vm425_vm11, %v6768_v37  ;;  %v6657_v58 = vld [vmem:[#allocation2] sm:$0xff] }
 0x48d   : > { %v4012_v18 = vadd.f32 %v3980_v9, %v3837_v38  ;;  %v13933_v57 = vpop.f32.mrb[45].mxu0  ;;  %9941 = vmatprep.mubr.msk.f32.mxu1 %vm425_vm11, %v6731_v49  ;;  %v4526_v51 = vld [vmem:[#allocation3 + $0x8] sm:$0xff] }
 0x48e   : > { %4045 = vst.msk [vmem:[#allocation3 + $0x28] sm:$0xff] %vm425_vm11, %v4013_v28  ;;  %v4558_v24 = vadd.f32 %v13884_v23, %v4526_v51  ;;  %v4525_v35 = vld [vmem:[#allocation3] sm:$0xff] }
 0x48f   : > { %4044 = vst.msk [vmem:[#allocation3 + $0x20] sm:$0xff] %vm425_vm11, %v4012_v18  ;;  %v9592_v27 = vpop.f32.mrb[34].mxu1  ;;  %v4557_v44 = vadd.f32 %v4525_v35, %v13892_v17  ;;  %v6685_v23 = vld [vmem:[#allocation2 + $0xe0] sm:$0xff] }
 0x490   : > { %v4015_v45 = vadd.f32 %v9592_v27, %v3983_v6  ;;  %v3847_v42 = vpop.f32.mrb[35].mxu1  ;;  %v13940_v60 = vpop.f32.mrb[46].mxu0  ;;  %9942 = vmatmul.mubr.msk.f32.gmra.mrb[140].mxu1 %vm425_vm11, %v13513_v21  ;;  %4590 = vst.msk [vmem:[#allocation3 + $0x8] sm:$0xff] %vm425_vm11, %v4558_v24  ;;  %v3988_v28 = vld [vmem:[#allocation3 + $0x60] sm:$0xff]  ;;  %v3991_v27 = vld [vmem:[#allocation3 + $0x78] sm:$0xff] }
 0x491   : > { %v4014_v59 = vadd.f32 %v3982_v33, %v3847_v42  ;;  %v13945_v32 = vpop.f32.mrb[47].mxu0  ;;  %9944 = vmatprep.mubr.msk.f32.mxu1 %vm425_vm11, %v13521_v52  ;;  %4589 = vst.msk [vmem:[#allocation3] sm:$0xff] %vm425_vm11, %v4557_v44  ;;  %v4528_v17 = vld [vmem:[#allocation3 + $0x18] sm:$0xff]  ;;  %v6717_v52 = vrot.slane %v6685_v23, 1  ;;  %v3990_v33 = vld [vmem:[#allocation3 + $0x70] sm:$0xff] }
 0x492   : > { %4047 = vst.msk [vmem:[#allocation3 + $0x38] sm:$0xff] %vm425_vm11, %v4015_v45  ;;  %v4560_v61 = vadd.f32 %v13899_v4, %v4528_v17  ;;  %v4527_v63 = vld [vmem:[#allocation3 + $0x10] sm:$0xff] }
 0x493   : > { %4046 = vst.msk [vmem:[#allocation3 + $0x30] sm:$0xff] %vm425_vm11, %v4014_v59  ;;  %v9595_v21 = vpop.f32.mrb[36].mxu1  ;;  %v4559_v41 = vadd.f32 %v4527_v63, %v13904_v15  ;;  %v6723_v9 = vsel %vm3563_vm4, %v6717_v52, %v6718_v43 }
 0x494   : > { %v4017_v48 = vadd.f32 %v9595_v21, %v3985_v31  ;;  %v3857_v3 = vpop.f32.mrb[37].mxu1  ;;  %v13954_v22 = vpop.f32.mrb[48].mxu0  ;;  %9945 = vmatmul.mubr.msk.f32.gmra.mrb[142].mxu1 %vm425_vm11, %v13538_v13  ;;  %4592 = vst.msk [vmem:[#allocation3 + $0x18] sm:$0xff] %vm425_vm11, %v4560_v61 }
 0x495   : > { %v4016_v53 = vadd.f32 %v3984_v14, %v3857_v3  ;;  %v13959_v4 = vpop.f32.mrb[49].mxu0  ;;  %9947 = vmatprep.mubr.msk.f32.mxu1 %vm425_vm11, %v13547_v29  ;;  %4591 = vst.msk [vmem:[#allocation3 + $0x10] sm:$0xff] %vm425_vm11, %v4559_v41  ;;  %v4530_v20 = vld [vmem:[#allocation3 + $0x28] sm:$0xff]  ;;  %v6724_v29 = vsel %vm3563_vm4, %v13550_v19, %v6717_v52  ;;  %v3992_v52 = vld [vmem:[#allocation3 + $0x80] sm:$0xff] }
 0x496   : > { %4049 = vst.msk [vmem:[#allocation3 + $0x48] sm:$0xff] %vm425_vm11, %v4017_v48  ;;  %v4562_v5 = vadd.f32 %v13911_v62, %v4530_v20  ;;  %v4529_v15 = vld [vmem:[#allocation3 + $0x20] sm:$0xff]  ;;  %v6776_v56 = vsel %vm3610_vm5, %v6724_v29, 0.0  ;;  %v3993_v41 = vld [vmem:[#allocation3 + $0x88] sm:$0xff] }
 0x497   : > { %4048 = vst.msk [vmem:[#allocation3 + $0x40] sm:$0xff] %vm425_vm11, %v4016_v53  ;;  %v9598_v13 = vpop.f32.mrb[38].mxu1  ;;  %v4561_v2 = vadd.f32 %v4529_v15, %v13918_v39  ;;  %v6719_v39 = vrot.slane %v6687_v54, 1  ;;  %v3995_v15 = vld [vmem:[#allocation3 + $0x98] sm:$0xff] }
 0x498   : > { %v4019_v34 = vadd.f32 %v9598_v13, %v3987_v30  ;;  %v3867_v50 = vpop.f32.mrb[39].mxu1  ;;  %v13968_v12 = vpop.f32.mrb[50].mxu0  ;;  %9948 = vmatmul.mubr.msk.f32.gmra.mrb[144].mxu1 %vm425_vm11, %v13558_v36  ;;  %4594 = vst.msk [vmem:[#allocation3 + $0x28] sm:$0xff] %vm425_vm11, %v4562_v5 }
 0x499   : > { %v4018_v8 = vadd.f32 %v3986_v16, %v3867_v50  ;;  %v13976_v62 = vpop.f32.mrb[51].mxu0  ;;  %9950 = vmatprep.mubr.msk.f32.mxu1 %vm425_vm11, %v13567_v47  ;;  %4593 = vst.msk [vmem:[#allocation3 + $0x20] sm:$0xff] %vm425_vm11, %v4561_v2  ;;  %v4532_v1 = vld [vmem:[#allocation3 + $0x38] sm:$0xff]  ;;  %v6722_v6 = vsel %vm3563_vm4, %v6718_v43, %v6719_v39 }
 0x49a   : > { %4051 = vst.msk [vmem:[#allocation3 + $0x58] sm:$0xff] %vm425_vm11, %v4019_v34  ;;  %v4564_v36 = vadd.f32 %v13927_v40, %v4532_v1  ;;  %v4531_v0 = vld [vmem:[#allocation3 + $0x30] sm:$0xff] }
 0x49b   : > { %4050 = vst.msk [vmem:[#allocation3 + $0x50] sm:$0xff] %vm425_vm11, %v4018_v8  ;;  %v9601_v19 = vpop.f32.mrb[40].mxu1  ;;  %v4563_v11 = vadd.f32 %v4531_v0, %v13933_v57  ;;  %v6689_v57 = vrot.slane %v6657_v58, 1  ;;  %v3994_v34 = vld [vmem:[#allocation3 + $0x90] sm:$0xff] }
 0x49c   : > { %v4021_v47 = vadd.f32 %v9601_v19, %v3989_v46  ;;  %v3877_v37 = vpop.f32.mrb[41].mxu1  ;;  %v13987_v38 = vpop.f32.mrb[52].mxu0  ;;  %9951 = vmatmul.mubr.msk.f32.gmra.mrb[146].mxu1 %vm425_vm11, %v6776_v56  ;;  %4596 = vst.msk [vmem:[#allocation3 + $0x38] sm:$0xff] %vm425_vm11, %v4564_v36  ;;  %v3996_v19 = vld [vmem:[#allocation3 + $0xa0] sm:$0xff] }
 0x49d   : > { %v4020_v40 = vadd.f32 %v3988_v28, %v3877_v37  ;;  %v13993_v49 = vpop.f32.mrb[53].mxu0  ;;  %9953 = vmatprep.mubr.msk.f32.mxu1 %vm425_vm11, %v6723_v9  ;;  %4595 = vst.msk [vmem:[#allocation3 + $0x30] sm:$0xff] %vm425_vm11, %v4563_v11  ;;  %v4534_v18 = vld [vmem:[#allocation3 + $0x48] sm:$0xff]  ;;  %v6752_v23 = vsel %vm3563_vm4, %v13590_v26, %v6689_v57  ;;  %v3999_v28 = vld [vmem:[#allocation3 + $0xb8] sm:$0xff]  ;;  %v7307_v9 = vld [vmem:[%s14750_s1 + $0x120] sm:$0xff] }
 0x49e   : > { %4053 = vst.msk [vmem:[#allocation3 + $0x68] sm:$0xff] %vm425_vm11, %v4021_v47  ;;  %v4566_v51 = vadd.f32 %v13940_v60, %v4534_v18  ;;  %v4533_v24 = vld [vmem:[#allocation3 + $0x40] sm:$0xff]  ;;  %v6721_v60 = vsel %vm3563_vm4, %v6719_v39, %v13590_v26  ;;  %v6780_v26 = vsel %vm3610_vm5, %v6752_v23, 0.0  ;;  %v3998_v57 = vld [vmem:[#allocation3 + $0xb0] sm:$0xff] }
 0x49f   : > { %4052 = vst.msk [vmem:[#allocation3 + $0x60] sm:$0xff] %vm425_vm11, %v4020_v40  ;;  %v9604_v35 = vpop.f32.mrb[42].mxu1  ;;  %v4565_v44 = vadd.f32 %v4533_v24, %v13945_v32  ;;  %v7308_v40 = vld [vmem:[%s14750_s1 + $0x128] sm:$0xff] }
 0x4a0   : > { %v4023_v45 = vadd.f32 %v9604_v35, %v3991_v27  ;;  %v3887_v42 = vpop.f32.mrb[43].mxu1  ;;  %v14003_v59 = vpop.f32.mrb[54].mxu0  ;;  %9954 = vmatmul.mubr.msk.f32.gmra.mrb[148].mxu1 %vm425_vm11, %v6722_v6  ;;  %4598 = vst.msk [vmem:[#allocation3 + $0x48] sm:$0xff] %vm425_vm11, %v4566_v51  ;;  %v10128_v24 = vpack.c.bf16 %v7308_v40, %v7307_v9 }
 0x4a1   : > { %v4022_v17 = vadd.f32 %v3990_v33, %v3887_v42  ;;  %v14013_v61 = vpop.f32.mrb[55].mxu0  ;;  %9956 = vmatprep.mubr.msk.f32.mxu1 %vm425_vm11, %v6721_v60  ;;  %4597 = vst.msk [vmem:[#allocation3 + $0x40] sm:$0xff] %vm425_vm11, %v4565_v44  ;;  %v4536_v32 = vld [vmem:[#allocation3 + $0x58] sm:$0xff]  ;;  %v4001_v33 = vld [vmem:[#allocation3 + $0xc8] sm:$0xff] }
 0x4a2   : > { %4055 = vst.msk [vmem:[#allocation3 + $0x78] sm:$0xff] %vm425_vm11, %v4023_v45  ;;  %v4568_v63 = vadd.f32 %v13954_v22, %v4536_v32  ;;  %v4535_v21 = vld [vmem:[#allocation3 + $0x50] sm:$0xff]  ;;  %10129 = vmatprep.subr.bf16.mxu0 %v10128_v24 }
 0x4a3   : > { %4054 = vst.msk [vmem:[#allocation3 + $0x70] sm:$0xff] %vm425_vm11, %v4022_v17  ;;  %v9607_v31 = vpop.f32.mrb[44].mxu1  ;;  %v4567_v48 = vadd.f32 %v4535_v21, %v13959_v4  ;;  %10131 = vmatpush3.bf16.msra.mxu0 %v10128_v24  ;;  %v4000_v17 = vld [vmem:[#allocation3 + $0xc0] sm:$0xff] }
 0x4a4   : > { %v4025_v3 = vadd.f32 %v9607_v31, %v3993_v41  ;;  %v3897_v14 = vpop.f32.mrb[45].mxu1  ;;  %v14023_v53 = vpop.f32.mrb[56].mxu0  ;;  %9957 = vmatmul.mubr.msk.f32.gmra.mrb[150].mxu1 %vm425_vm11, %v6780_v26  ;;  %4600 = vst.msk [vmem:[#allocation3 + $0x58] sm:$0xff] %vm425_vm11, %v4568_v63 }
 0x4a5   : > { %v4024_v22 = vadd.f32 %v3992_v52, %v3897_v14  ;;  %v14027_v10 = vpop.f32.mrb[57].mxu0  ;;  %9959 = vmatprep.mubr.f32.mxu1 %v14944_v55  ;;  %4599 = vst.msk [vmem:[#allocation3 + $0x50] sm:$0xff] %vm425_vm11, %v4567_v48  ;;  %v4538_v25 = vld [vmem:[#allocation3 + $0x68] sm:$0xff]  ;;  %v4003_v48 = vld [vmem:[#allocation3 + $0xd8] sm:$0xff] }
 0x4a6   : > { %4057 = vst.msk [vmem:[#allocation3 + $0x88] sm:$0xff] %vm425_vm11, %v4025_v3  ;;  %v4570_v4 = vadd.f32 %v13968_v12, %v4538_v25  ;;  %v4537_v20 = vld [vmem:[#allocation3 + $0x60] sm:$0xff] }
 0x4a7   : > { %4056 = vst.msk [vmem:[#allocation3 + $0x80] sm:$0xff] %vm425_vm11, %v4024_v22  ;;  %v9610_v5 = vpop.f32.mrb[46].mxu1  ;;  %v4569_v13 = vadd.f32 %v4537_v20, %v13976_v62  ;;  %v3997_v62 = vld [vmem:[#allocation3 + $0xa8] sm:$0xff] }
 0x4a8   : > { %v4027_v30 = vadd.f32 %v9610_v5, %v3995_v15  ;;  %v3907_v2 = vpop.f32.mrb[47].mxu1  ;;  %v14035_v50 = vpop.f32.mrb[58].mxu0  ;;  %9960 = vmatmul.mubr.f32.gmra.mrb[152].mxu1 %v14944_v55  ;;  %4602 = vst.msk [vmem:[#allocation3 + $0x68] sm:$0xff] %vm425_vm11, %v4570_v4 }
 0x4a9   : > { %v4026_v16 = vadd.f32 %v3994_v34, %v3907_v2  ;;  %v14039_v29 = vpop.f32.mrb[59].mxu0  ;;  %9962 = vmatprep.mubr.f32.mxu1 %v14944_v55  ;;  %4601 = vst.msk [vmem:[#allocation3 + $0x60] sm:$0xff] %vm425_vm11, %v4569_v13  ;;  %v4540_v12 = vld [vmem:[#allocation3 + $0x78] sm:$0xff]  ;;  %v4005_v13 = vld [vmem:[#allocation3 + $0xe8] sm:$0xff] }
 0x4aa   : > { %4059 = vst.msk [vmem:[#allocation3 + $0x98] sm:$0xff] %vm425_vm11, %v4027_v30  ;;  %v4572_v43 = vadd.f32 %v13987_v38, %v4540_v12  ;;  %v4539_v54 = vld [vmem:[#allocation3 + $0x70] sm:$0xff] }
 0x4ab   : > { %4058 = vst.msk [vmem:[#allocation3 + $0x90] sm:$0xff] %vm425_vm11, %v4026_v16  ;;  %v9613_v8 = vpop.f32.mrb[48].mxu1  ;;  %v4571_v1 = vadd.f32 %v4539_v54, %v13993_v49 }
 0x4ac   : > { %v4029_v36 = vadd.f32 %v9613_v8, %v3997_v62  ;;  %v3917_v0 = vpop.f32.mrb[49].mxu1  ;;  %v9672_v46 = vpop.f32.mrb[60].mxu0  ;;  %9963 = vmatmul.mubr.f32.gmra.mrb[154].mxu1 %v14944_v55  ;;  %4604 = vst.msk [vmem:[#allocation3 + $0x78] sm:$0xff] %vm425_vm11, %v4572_v43 }
 0x4ad   : > { %v4028_v56 = vadd.f32 %v3996_v19, %v3917_v0  ;;  %v4476_v39 = vpop.f32.mrb[61].mxu0  ;;  %4603 = vst.msk [vmem:[#allocation3 + $0x70] sm:$0xff] %vm425_vm11, %v4571_v1  ;;  %v4542_v58 = vld [vmem:[#allocation3 + $0x88] sm:$0xff]  ;;  %v4007_v1 = vld [vmem:[#allocation3 + $0xf8] sm:$0xff] }
 0x4ae   : > { %4061 = vst.msk [vmem:[#allocation3 + $0xa8] sm:$0xff] %vm425_vm11, %v4029_v36  ;;  %v4574_v11 = vadd.f32 %v14003_v59, %v4542_v58  ;;  %v4541_v47 = vld [vmem:[#allocation3 + $0x80] sm:$0xff] }
 0x4af   : > { %4060 = vst.msk [vmem:[#allocation3 + $0xa0] sm:$0xff] %vm425_vm11, %v4028_v56  ;;  %v9616_v37 = vpop.f32.mrb[50].mxu1  ;;  %v4573_v38 = vadd.f32 %v4541_v47, %v14013_v61 }
 0x4b0   : > { %v4031_v49 = vadd.f32 %v9616_v37, %v3999_v28  ;;  %v3927_v18 = vpop.f32.mrb[51].mxu1  ;;  %v9675_v51 = vpop.f32.mrb[62].mxu0  ;;  %4606 = vst.msk [vmem:[#allocation3 + $0x88] sm:$0xff] %vm425_vm11, %v4574_v11 }
 0x4b1   : > { %v4030_v35 = vadd.f32 %v3998_v57, %v3927_v18  ;;  %v4486_v27 = vpop.f32.mrb[63].mxu0  ;;  %4605 = vst.msk [vmem:[#allocation3 + $0x80] sm:$0xff] %vm425_vm11, %v4573_v38  ;;  %v4544_v6 = vld [vmem:[#allocation3 + $0x98] sm:$0xff]  ;;  %v4979_v38 = vld [vmem:[#allocation3 + $0x8] sm:$0xff]  ;;  %v4978_v18 = vld [vmem:[#allocation3] sm:$0xff] }
 0x4b2   : > { %4063 = vst.msk [vmem:[#allocation3 + $0xb8] sm:$0xff] %vm425_vm11, %v4031_v49  ;;  %v4576_v44 = vadd.f32 %v14023_v53, %v4544_v6  ;;  %v4543_v45 = vld [vmem:[#allocation3 + $0x90] sm:$0xff] }
 0x4b3   : > { %4062 = vst.msk [vmem:[#allocation3 + $0xb0] sm:$0xff] %vm425_vm11, %v4030_v35  ;;  %v9619_v42 = vpop.f32.mrb[52].mxu1  ;;  %v4575_v59 = vadd.f32 %v4543_v45, %v14027_v10  ;;  %v4002_v53 = vld [vmem:[#allocation3 + $0xd0] sm:$0xff]  ;;  %v4981_v45 = vld [vmem:[#allocation3 + $0x18] sm:$0xff] }
 0x4b4   : > { %v4033_v60 = vadd.f32 %v9619_v42, %v4001_v33  ;;  %v3937_v23 = vpop.f32.mrb[53].mxu1  ;;  %v9678_v61 = vpop.f32.mrb[64].mxu0  ;;  %4608 = vst.msk [vmem:[#allocation3 + $0x98] sm:$0xff] %vm425_vm11, %v4576_v44 }
 0x4b5   : > { %v4032_v32 = vadd.f32 %v4000_v17, %v3937_v23  ;;  %v4496_v63 = vpop.f32.mrb[65].mxu0  ;;  %4607 = vst.msk [vmem:[#allocation3 + $0x90] sm:$0xff] %vm425_vm11, %v4575_v59  ;;  %v4546_v21 = vld [vmem:[#allocation3 + $0xa8] sm:$0xff] }
 0x4b6   : > { %4065 = vst.msk [vmem:[#allocation3 + $0xc8] sm:$0xff] %vm425_vm11, %v4033_v60  ;;  %v4578_v31 = vadd.f32 %v14035_v50, %v4546_v21  ;;  %v4545_v41 = vld [vmem:[#allocation3 + $0xa0] sm:$0xff]  ;;  %v4980_v60 = vld [vmem:[#allocation3 + $0x10] sm:$0xff] }
 0x4b7   : > { %4064 = vst.msk [vmem:[#allocation3 + $0xc0] sm:$0xff] %vm425_vm11, %v4032_v32  ;;  %v9622_v26 = vpop.f32.mrb[54].mxu1  ;;  %v4577_v3 = vadd.f32 %v4545_v41, %v14039_v29  ;;  %v4004_v50 = vld [vmem:[#allocation3 + $0xe0] sm:$0xff]  ;;  %v4983_v41 = vld [vmem:[#allocation3 + $0x28] sm:$0xff] }
 0x4b8   : > { %v4035_v14 = vadd.f32 %v9622_v26, %v4003_v48  ;;  %v3947_v52 = vpop.f32.mrb[55].mxu1  ;;  %v9681_v22 = vpop.f32.mrb[66].mxu0  ;;  %4610 = vst.msk [vmem:[#allocation3 + $0xa8] sm:$0xff] %vm425_vm11, %v4578_v31 }
 0x4b9   : > { %v4034_v10 = vadd.f32 %v4002_v53, %v3947_v52  ;;  %v4506_v25 = vpop.f32.mrb[67].mxu0  ;;  %4609 = vst.msk [vmem:[#allocation3 + $0xa0] sm:$0xff] %vm425_vm11, %v4577_v3  ;;  %v4548_v4 = vld [vmem:[#allocation3 + $0xb8] sm:$0xff] }
 0x4ba   : > { %4067 = vst.msk [vmem:[#allocation3 + $0xd8] sm:$0xff] %vm425_vm11, %v4035_v14  ;;  %v4580_v20 = vadd.f32 %v9672_v46, %v4548_v4  ;;  %v4547_v5 = vld [vmem:[#allocation3 + $0xb0] sm:$0xff]  ;;  %v4982_v14 = vld [vmem:[#allocation3 + $0x20] sm:$0xff] }
 0x4bb   : > { %4066 = vst.msk [vmem:[#allocation3 + $0xd0] sm:$0xff] %vm425_vm11, %v4034_v10  ;;  %v9625_v15 = vpop.f32.mrb[56].mxu1  ;;  %v4579_v30 = vadd.f32 %v4547_v5, %v4476_v39  ;;  %v4006_v46 = vld [vmem:[#allocation3 + $0xf0] sm:$0xff]  ;;  %v4985_v5 = vld [vmem:[#allocation3 + $0x38] sm:$0xff] }
 0x4bc   : > { %v4037_v2 = vadd.f32 %v9625_v15, %v4005_v13  ;;  %v3957_v34 = vpop.f32.mrb[57].mxu1  ;;  %v9684_v16 = vpop.f32.mrb[68].mxu0  ;;  %4612 = vst.msk [vmem:[#allocation3 + $0xb8] sm:$0xff] %vm425_vm11, %v4580_v20  ;;  %v7309_v13 = vld [vmem:[%s14750_s1 + $0x130] sm:$0xff] }
 0x4bd   : > { %v4036_v29 = vadd.f32 %v4004_v50, %v3957_v34  ;;  %v4516_v12 = vpop.f32.mrb[69].mxu0  ;;  %4611 = vst.msk [vmem:[#allocation3 + $0xb0] sm:$0xff] %vm425_vm11, %v4579_v30  ;;  %v4550_v43 = vld [vmem:[#allocation3 + $0xc8] sm:$0xff]  ;;  %v7310_v30 = vld [vmem:[%s14750_s1 + $0x138] sm:$0xff]  ;;  %v4984_v50 = vld [vmem:[#allocation3 + $0x30] sm:$0xff] }
 0x4be   : > { %4069 = vst.msk [vmem:[#allocation3 + $0xe8] sm:$0xff] %vm425_vm11, %v4037_v2  ;;  %v4582_v54 = vadd.f32 %v9675_v51, %v4550_v43  ;;  %v4549_v8 = vld [vmem:[#allocation3 + $0xc0] sm:$0xff] }
 0x4bf   : > { %4068 = vst.msk [vmem:[#allocation3 + $0xe0] sm:$0xff] %vm425_vm11, %v4036_v29  ;;  %v9628_v62 = vpop.f32.mrb[58].mxu1  ;;  %v4581_v36 = vadd.f32 %v4549_v8, %v4486_v27  ;;  %v10132_v29 = vpack.c.bf16 %v7310_v30, %v7309_v13  ;;  %v4995_v13 = vld [vmem:[#allocation3 + $0x88] sm:$0xff] }
 0x4c0   : > { %v4039_v0 = vadd.f32 %v9628_v62, %v4007_v1  ;;  %v3967_v19 = vpop.f32.mrb[59].mxu1  ;;  %v9751_v56 = vpop.f32.mrb[70].mxu0  ;;  %4614 = vst.msk [vmem:[#allocation3 + $0xc8] sm:$0xff] %vm425_vm11, %v4582_v54 }
 0x4c1   : > { %v4038_v39 = vadd.f32 %v4006_v46, %v3967_v19  ;;  %v5368_v58 = vpop.f32.mrb[71].mxu0  ;;  %4613 = vst.msk [vmem:[#allocation3 + $0xc0] sm:$0xff] %vm425_vm11, %v4581_v36  ;;  %v4552_v11 = vld [vmem:[#allocation3 + $0xd8] sm:$0xff]  ;;  %10133 = vmatprep.subr.bf16.mxu0 %v10132_v29  ;;  %v4987_v36 = vld [vmem:[#allocation3 + $0x48] sm:$0xff] }
 0x4c2   : > { %4071 = vst.msk [vmem:[#allocation3 + $0xf8] sm:$0xff] %vm425_vm11, %v4039_v0  ;;  %v4584_v47 = vadd.f32 %v9678_v61, %v4552_v11  ;;  %v4551_v37 = vld [vmem:[#allocation3 + $0xd0] sm:$0xff]  ;;  %10135 = vmatpush3.bf16.msra.mxu0 %v10132_v29 }
 0x4c3   : > { %4070 = vst.msk [vmem:[#allocation3 + $0xf0] sm:$0xff] %vm425_vm11, %v4038_v39  ;;  %v9695_v28 = vpop.f32.mrb[60].mxu1  ;;  %v4583_v9 = vadd.f32 %v4551_v37, %v4496_v63 }
 0x4c4   : > { %v5011_v40 = vadd.f32 %v9695_v28, %v4979_v38  ;;  %v4819_v49 = vpop.f32.mrb[61].mxu1  ;;  %v9754_v57 = vpop.f32.mrb[72].mxu0  ;;  %4616 = vst.msk [vmem:[#allocation3 + $0xd8] sm:$0xff] %vm425_vm11, %v4584_v47 }
 0x4c5   : > { %v5010_v51 = vadd.f32 %v4978_v18, %v4819_v49  ;;  %v5378_v24 = vpop.f32.mrb[73].mxu0  ;;  %4615 = vst.msk [vmem:[#allocation3 + $0xd0] sm:$0xff] %vm425_vm11, %v4583_v9  ;;  %v4554_v35 = vld [vmem:[#allocation3 + $0xe8] sm:$0xff] }
 0x4c6   : > { %5043 = vst.msk [vmem:[#allocation3 + $0x8] sm:$0xff] %vm425_vm11, %v5011_v40  ;;  %v4586_v27 = vadd.f32 %v9681_v22, %v4554_v35  ;;  %v4553_v6 = vld [vmem:[#allocation3 + $0xe0] sm:$0xff]  ;;  %v4989_v40 = vld [vmem:[#allocation3 + $0x58] sm:$0xff] }
 0x4c7   : > { %5042 = vst.msk [vmem:[#allocation3] sm:$0xff] %vm425_vm11, %v5010_v51  ;;  %v9698_v44 = vpop.f32.mrb[62].mxu1  ;;  %v4585_v42 = vadd.f32 %v4553_v6, %v4506_v25  ;;  %v4988_v51 = vld [vmem:[#allocation3 + $0x50] sm:$0xff] }
 0x4c8   : > { %v5013_v33 = vadd.f32 %v9698_v44, %v4981_v45  ;;  %v4829_v59 = vpop.f32.mrb[63].mxu1  ;;  %v9757_v23 = vpop.f32.mrb[74].mxu0  ;;  %4618 = vst.msk [vmem:[#allocation3 + $0xe8] sm:$0xff] %vm425_vm11, %v4586_v27 }
 0x4c9   : > { %v5012_v17 = vadd.f32 %v4980_v60, %v4829_v59  ;;  %v14089_v61 = vpop.f32.mrb[75].mxu0  ;;  %4617 = vst.msk [vmem:[#allocation3 + $0xe0] sm:$0xff] %vm425_vm11, %v4585_v42  ;;  %v4556_v32 = vld [vmem:[#allocation3 + $0xf8] sm:$0xff] }
 0x4ca   : > { %5045 = vst.msk [vmem:[#allocation3 + $0x18] sm:$0xff] %vm425_vm11, %v5013_v33  ;;  %v4588_v63 = vadd.f32 %v9684_v16, %v4556_v32  ;;  %v4555_v21 = vld [vmem:[#allocation3 + $0xf0] sm:$0xff]  ;;  %v4991_v33 = vld [vmem:[#allocation3 + $0x68] sm:$0xff] }
 0x4cb   : > { %5044 = vst.msk [vmem:[#allocation3 + $0x10] sm:$0xff] %vm425_vm11, %v5012_v17  ;;  %v9701_v31 = vpop.f32.mrb[64].mxu1  ;;  %v4587_v26 = vadd.f32 %v4555_v21, %v4516_v12  ;;  %v4990_v17 = vld [vmem:[#allocation3 + $0x60] sm:$0xff] }
 0x4cc   : > { %v5015_v48 = vadd.f32 %v9701_v31, %v4983_v41  ;;  %v4839_v3 = vpop.f32.mrb[65].mxu1  ;;  %v9760_v52 = vpop.f32.mrb[76].mxu0  ;;  %4620 = vst.msk [vmem:[#allocation3 + $0xf8] sm:$0xff] %vm425_vm11, %v4588_v63 }
 0x4cd   : > { %v5014_v53 = vadd.f32 %v4982_v14, %v4839_v3  ;;  %v14095_v22 = vpop.f32.mrb[77].mxu0  ;;  %4619 = vst.msk [vmem:[#allocation3 + $0xf0] sm:$0xff] %vm425_vm11, %v4587_v26  ;;  %v5528_v10 = vld [vmem:[#allocation3 + $0x8] sm:$0xff] }
 0x4ce   : > { %5047 = vst.msk [vmem:[#allocation3 + $0x28] sm:$0xff] %vm425_vm11, %v5015_v48  ;;  %v5560_v25 = vadd.f32 %v9751_v56, %v5528_v10  ;;  %v5527_v4 = vld [vmem:[#allocation3] sm:$0xff]  ;;  %v4993_v48 = vld [vmem:[#allocation3 + $0x78] sm:$0xff] }
 0x4cf   : > { %5046 = vst.msk [vmem:[#allocation3 + $0x20] sm:$0xff] %vm425_vm11, %v5014_v53  ;;  %v9704_v20 = vpop.f32.mrb[66].mxu1  ;;  %v5559_v15 = vadd.f32 %v5527_v4, %v5368_v58  ;;  %v4986_v56 = vld [vmem:[#allocation3 + $0x40] sm:$0xff]  ;;  %v14945_v58 = vmov 0.0|0.0   ;;  %v4992_v53 = vld [vmem:[#allocation3 + $0x70] sm:$0xff] }
 0x4d0   : > { %v5017_v2 = vadd.f32 %v9704_v20, %v4985_v5  ;;  %v4849_v34 = vpop.f32.mrb[67].mxu1  ;;  %v9763_v16 = vpop.f32.mrb[78].mxu0  ;;  %5592 = vst.msk [vmem:[#allocation3 + $0x8] sm:$0xff] %vm425_vm11, %v5560_v25  ;;  %10168 = vmatprep.subr.bf16.mxu0 %v14945_v58 }
 0x4d1   : > { %v5016_v12 = vadd.f32 %v4984_v50, %v4849_v34  ;;  %v5408_v43 = vpop.f32.mrb[79].mxu0  ;;  %5591 = vst.msk [vmem:[#allocation3] sm:$0xff] %vm425_vm11, %v5559_v15  ;;  %v5530_v54 = vld [vmem:[#allocation3 + $0x18] sm:$0xff]  ;;  %v4994_v50 = vld [vmem:[#allocation3 + $0x80] sm:$0xff] }
 0x4d2   : > { %5049 = vst.msk [vmem:[#allocation3 + $0x38] sm:$0xff] %vm425_vm11, %v5017_v2  ;;  %v5562_v8 = vadd.f32 %v9754_v57, %v5530_v54  ;;  %v5529_v62 = vld [vmem:[#allocation3 + $0x10] sm:$0xff] }
 0x4d3   : > { %5048 = vst.msk [vmem:[#allocation3 + $0x30] sm:$0xff] %vm425_vm11, %v5016_v12  ;;  %v9707_v1 = vpop.f32.mrb[68].mxu1  ;;  %v5561_v0 = vadd.f32 %v5529_v62, %v5378_v24 }
 0x4d4   : > { %v5019_v19 = vadd.f32 %v9707_v1, %v4987_v36  ;;  %v4859_v46 = vpop.f32.mrb[69].mxu1  ;;  %v9766_v39 = vpop.f32.mrb[80].mxu0  ;;  %5594 = vst.msk [vmem:[#allocation3 + $0x18] sm:$0xff] %vm425_vm11, %v5562_v8  ;;  %v4997_v1 = vld [vmem:[#allocation3 + $0x98] sm:$0xff] }
 0x4d5   : > { %v5018_v11 = vadd.f32 %v4986_v56, %v4859_v46  ;;  %v5418_v47 = vpop.f32.mrb[81].mxu0  ;;  %5593 = vst.msk [vmem:[#allocation3 + $0x10] sm:$0xff] %vm425_vm11, %v5561_v0  ;;  %v5532_v37 = vld [vmem:[#allocation3 + $0x28] sm:$0xff]  ;;  %v4996_v46 = vld [vmem:[#allocation3 + $0x90] sm:$0xff] }
 0x4d6   : > { %5051 = vst.msk [vmem:[#allocation3 + $0x48] sm:$0xff] %vm425_vm11, %v5019_v19  ;;  %v5564_v28 = vadd.f32 %v9757_v23, %v5532_v37  ;;  %v5531_v38 = vld [vmem:[#allocation3 + $0x20] sm:$0xff] }
 0x4d7   : > { %5050 = vst.msk [vmem:[#allocation3 + $0x40] sm:$0xff] %vm425_vm11, %v5018_v11  ;;  %v9710_v9 = vpop.f32.mrb[70].mxu1  ;;  %v5563_v49 = vadd.f32 %v5531_v38, %v14089_v61 }
 0x4d8   : > { %v5021_v18 = vadd.f32 %v9710_v9, %v4989_v40  ;;  %v4869_v57 = vpop.f32.mrb[71].mxu1  ;;  %v9769_v24 = vpop.f32.mrb[82].mxu0  ;;  %5596 = vst.msk [vmem:[#allocation3 + $0x28] sm:$0xff] %vm425_vm11, %v5564_v28  ;;  %v4999_v9 = vld [vmem:[#allocation3 + $0xa8] sm:$0xff] }
 0x4d9   : > { %v5020_v35 = vadd.f32 %v4988_v51, %v4869_v57  ;;  %v5428_v27 = vpop.f32.mrb[83].mxu0  ;;  %5595 = vst.msk [vmem:[#allocation3 + $0x20] sm:$0xff] %vm425_vm11, %v5563_v49  ;;  %v5534_v6 = vld [vmem:[#allocation3 + $0x38] sm:$0xff]  ;;  %v4998_v57 = vld [vmem:[#allocation3 + $0xa0] sm:$0xff] }
 0x4da   : > { %5053 = vst.msk [vmem:[#allocation3 + $0x58] sm:$0xff] %vm425_vm11, %v5021_v18  ;;  %v5566_v44 = vadd.f32 %v9760_v52, %v5534_v6  ;;  %v5533_v45 = vld [vmem:[#allocation3 + $0x30] sm:$0xff] }
 0x4db   : > { %5052 = vst.msk [vmem:[#allocation3 + $0x50] sm:$0xff] %vm425_vm11, %v5020_v35  ;;  %v9713_v42 = vpop.f32.mrb[72].mxu1  ;;  %v5565_v59 = vadd.f32 %v5533_v45, %v14095_v22 }
 0x4dc   : > { %v5023_v60 = vadd.f32 %v9713_v42, %v4991_v33  ;;  %v4879_v23 = vpop.f32.mrb[73].mxu1  ;;  %v9772_v61 = vpop.f32.mrb[84].mxu0  ;;  %5598 = vst.msk [vmem:[#allocation3 + $0x38] sm:$0xff] %vm425_vm11, %v5566_v44  ;;  %v5001_v42 = vld [vmem:[#allocation3 + $0xb8] sm:$0xff] }
 0x4dd   : > { %v5022_v32 = vadd.f32 %v4990_v17, %v4879_v23  ;;  %v5438_v63 = vpop.f32.mrb[85].mxu0  ;;  %5597 = vst.msk [vmem:[#allocation3 + $0x30] sm:$0xff] %vm425_vm11, %v5565_v59  ;;  %v5536_v21 = vld [vmem:[#allocation3 + $0x48] sm:$0xff]  ;;  %v5000_v23 = vld [vmem:[#allocation3 + $0xb0] sm:$0xff] }
 0x4de   : > { %5055 = vst.msk [vmem:[#allocation3 + $0x68] sm:$0xff] %vm425_vm11, %v5023_v60  ;;  %v5568_v31 = vadd.f32 %v9763_v16, %v5536_v21  ;;  %v5535_v41 = vld [vmem:[#allocation3 + $0x40] sm:$0xff] }
 0x4df   : > { %5054 = vst.msk [vmem:[#allocation3 + $0x60] sm:$0xff] %vm425_vm11, %v5022_v32  ;;  %v9716_v26 = vpop.f32.mrb[74].mxu1  ;;  %v5567_v3 = vadd.f32 %v5535_v41, %v5408_v43 }
 0x4e0   : > { %v5025_v14 = vadd.f32 %v9716_v26, %v4993_v48  ;;  %v4889_v52 = vpop.f32.mrb[75].mxu1  ;;  %v9775_v22 = vpop.f32.mrb[86].mxu0  ;;  %5600 = vst.msk [vmem:[#allocation3 + $0x48] sm:$0xff] %vm425_vm11, %v5568_v31  ;;  %v5003_v26 = vld [vmem:[#allocation3 + $0xc8] sm:$0xff] }
 0x4e1   : > { %v5024_v10 = vadd.f32 %v4992_v53, %v4889_v52  ;;  %v5448_v25 = vpop.f32.mrb[87].mxu0  ;;  %5599 = vst.msk [vmem:[#allocation3 + $0x40] sm:$0xff] %vm425_vm11, %v5567_v3  ;;  %v5538_v4 = vld [vmem:[#allocation3 + $0x58] sm:$0xff]  ;;  %v5002_v52 = vld [vmem:[#allocation3 + $0xc0] sm:$0xff] }
 0x4e2   : > { %5057 = vst.msk [vmem:[#allocation3 + $0x78] sm:$0xff] %vm425_vm11, %v5025_v14  ;;  %v5570_v20 = vadd.f32 %v9766_v39, %v5538_v4  ;;  %v5537_v5 = vld [vmem:[#allocation3 + $0x50] sm:$0xff] }
 0x4e3   : > { %5056 = vst.msk [vmem:[#allocation3 + $0x70] sm:$0xff] %vm425_vm11, %v5024_v10  ;;  %v9719_v15 = vpop.f32.mrb[76].mxu1  ;;  %v5569_v30 = vadd.f32 %v5537_v5, %v5418_v47 }
 0x4e4   : > { %v5027_v2 = vadd.f32 %v9719_v15, %v4995_v13  ;;  %v4899_v34 = vpop.f32.mrb[77].mxu1  ;;  %v9778_v16 = vpop.f32.mrb[88].mxu0  ;;  %5602 = vst.msk [vmem:[#allocation3 + $0x58] sm:$0xff] %vm425_vm11, %v5570_v20  ;;  %v5005_v15 = vld [vmem:[#allocation3 + $0xd8] sm:$0xff] }
 0x4e5   : > { %v5026_v29 = vadd.f32 %v4994_v50, %v4899_v34  ;;  %v5458_v12 = vpop.f32.mrb[89].mxu0  ;;  %5601 = vst.msk [vmem:[#allocation3 + $0x50] sm:$0xff] %vm425_vm11, %v5569_v30  ;;  %v5540_v43 = vld [vmem:[#allocation3 + $0x68] sm:$0xff]  ;;  %v5004_v34 = vld [vmem:[#allocation3 + $0xd0] sm:$0xff] }
 0x4e6   : > { %5059 = vst.msk [vmem:[#allocation3 + $0x88] sm:$0xff] %vm425_vm11, %v5027_v2  ;;  %v5572_v54 = vadd.f32 %v9769_v24, %v5540_v43  ;;  %v5539_v8 = vld [vmem:[#allocation3 + $0x60] sm:$0xff] }
 0x4e7   : > { %5058 = vst.msk [vmem:[#allocation3 + $0x80] sm:$0xff] %vm425_vm11, %v5026_v29  ;;  %v9722_v62 = vpop.f32.mrb[78].mxu1  ;;  %v5571_v36 = vadd.f32 %v5539_v8, %v5428_v27 }
 0x4e8   : > { %v5029_v0 = vadd.f32 %v9722_v62, %v4997_v1  ;;  %v4909_v19 = vpop.f32.mrb[79].mxu1  ;;  %v9781_v56 = vpop.f32.mrb[90].mxu0  ;;  %5604 = vst.msk [vmem:[#allocation3 + $0x68] sm:$0xff] %vm425_vm11, %v5572_v54  ;;  %v5007_v62 = vld [vmem:[#allocation3 + $0xe8] sm:$0xff] }
 0x4e9   : > { %v5028_v39 = vadd.f32 %v4996_v46, %v4909_v19  ;;  %v5468_v11 = vpop.f32.mrb[91].mxu0  ;;  %5603 = vst.msk [vmem:[#allocation3 + $0x60] sm:$0xff] %vm425_vm11, %v5571_v36  ;;  %v5542_v47 = vld [vmem:[#allocation3 + $0x78] sm:$0xff]  ;;  %v5006_v19 = vld [vmem:[#allocation3 + $0xe0] sm:$0xff] }
 0x4ea   : > { %5061 = vst.msk [vmem:[#allocation3 + $0x98] sm:$0xff] %vm425_vm11, %v5029_v0  ;;  %v5574_v37 = vadd.f32 %v9772_v61, %v5542_v47  ;;  %v5541_v28 = vld [vmem:[#allocation3 + $0x70] sm:$0xff] }
 0x4eb   : > { %5060 = vst.msk [vmem:[#allocation3 + $0x90] sm:$0xff] %vm425_vm11, %v5028_v39  ;;  %v9725_v38 = vpop.f32.mrb[80].mxu1  ;;  %v5573_v40 = vadd.f32 %v5541_v28, %v5438_v63 }
 0x4ec   : > { %v5031_v49 = vadd.f32 %v9725_v38, %v4999_v9  ;;  %v4919_v18 = vpop.f32.mrb[81].mxu1  ;;  %v9784_v51 = vpop.f32.mrb[92].mxu0  ;;  %5606 = vst.msk [vmem:[#allocation3 + $0x78] sm:$0xff] %vm425_vm11, %v5574_v37  ;;  %v5009_v38 = vld [vmem:[#allocation3 + $0xf8] sm:$0xff] }
 0x4ed   : > { %v5030_v24 = vadd.f32 %v4998_v57, %v4919_v18  ;;  %v5478_v35 = vpop.f32.mrb[93].mxu0  ;;  %5605 = vst.msk [vmem:[#allocation3 + $0x70] sm:$0xff] %vm425_vm11, %v5573_v40  ;;  %v5544_v27 = vld [vmem:[#allocation3 + $0x88] sm:$0xff]  ;;  %v5008_v18 = vld [vmem:[#allocation3 + $0xf0] sm:$0xff] }
 0x4ee   : > { %5063 = vst.msk [vmem:[#allocation3 + $0xa8] sm:$0xff] %vm425_vm11, %v5031_v49  ;;  %v5576_v6 = vadd.f32 %v9775_v22, %v5544_v27  ;;  %v5543_v44 = vld [vmem:[#allocation3 + $0x80] sm:$0xff] }
 0x4ef   : > { %5062 = vst.msk [vmem:[#allocation3 + $0xa0] sm:$0xff] %vm425_vm11, %v5030_v24  ;;  %v9728_v45 = vpop.f32.mrb[82].mxu1  ;;  %v5575_v33 = vadd.f32 %v5543_v44, %v5448_v25 }
 0x4f0   : > { %v5033_v59 = vadd.f32 %v9728_v45, %v5001_v42  ;;  %v4929_v60 = vpop.f32.mrb[83].mxu1  ;;  %v9787_v17 = vpop.f32.mrb[94].mxu0  ;;  %5608 = vst.msk [vmem:[#allocation3 + $0x88] sm:$0xff] %vm425_vm11, %v5576_v6  ;;  %v6077_v45 = vld [vmem:[#allocation3 + $0x8] sm:$0xff] }
 0x4f1   : > { %v5032_v61 = vadd.f32 %v5000_v23, %v4929_v60  ;;  %v5488_v32 = vpop.f32.mrb[95].mxu0  ;;  %5607 = vst.msk [vmem:[#allocation3 + $0x80] sm:$0xff] %vm425_vm11, %v5575_v33  ;;  %v5546_v63 = vld [vmem:[#allocation3 + $0x98] sm:$0xff]  ;;  %v6076_v60 = vld [vmem:[#allocation3] sm:$0xff] }
 0x4f2   : > { %5065 = vst.msk [vmem:[#allocation3 + $0xb8] sm:$0xff] %vm425_vm11, %v5033_v59  ;;  %v5578_v21 = vadd.f32 %v9778_v16, %v5546_v63  ;;  %v5545_v31 = vld [vmem:[#allocation3 + $0x90] sm:$0xff] }
 0x4f3   : > { %5064 = vst.msk [vmem:[#allocation3 + $0xb0] sm:$0xff] %vm425_vm11, %v5032_v61  ;;  %v9731_v41 = vpop.f32.mrb[84].mxu1  ;;  %v5577_v48 = vadd.f32 %v5545_v31, %v5458_v12 }
 0x4f4   : > { %v5035_v3 = vadd.f32 %v9731_v41, %v5003_v26  ;;  %v4939_v14 = vpop.f32.mrb[85].mxu1  ;;  %v9790_v53 = vpop.f32.mrb[96].mxu0  ;;  %5610 = vst.msk [vmem:[#allocation3 + $0x98] sm:$0xff] %vm425_vm11, %v5578_v21  ;;  %v6079_v41 = vld [vmem:[#allocation3 + $0x18] sm:$0xff] }
 0x4f5   : > { %v5034_v22 = vadd.f32 %v5002_v52, %v4939_v14  ;;  %v5498_v10 = vpop.f32.mrb[97].mxu0  ;;  %5609 = vst.msk [vmem:[#allocation3 + $0x90] sm:$0xff] %vm425_vm11, %v5577_v48  ;;  %v5548_v25 = vld [vmem:[#allocation3 + $0xa8] sm:$0xff]  ;;  %v6078_v14 = vld [vmem:[#allocation3 + $0x10] sm:$0xff] }
 0x4f6   : > { %5067 = vst.msk [vmem:[#allocation3 + $0xc8] sm:$0xff] %vm425_vm11, %v5035_v3  ;;  %v5580_v4 = vadd.f32 %v9781_v56, %v5548_v25  ;;  %v5547_v20 = vld [vmem:[#allocation3 + $0xa0] sm:$0xff] }
 0x4f7   : > { %5066 = vst.msk [vmem:[#allocation3 + $0xc0] sm:$0xff] %vm425_vm11, %v5034_v22  ;;  %v9734_v5 = vpop.f32.mrb[86].mxu1  ;;  %v5579_v13 = vadd.f32 %v5547_v20, %v5468_v11 }
 0x4f8   : > { %v5037_v30 = vadd.f32 %v9734_v5, %v5005_v15  ;;  %v4949_v2 = vpop.f32.mrb[87].mxu1  ;;  %v9793_v50 = vpop.f32.mrb[98].mxu0  ;;  %5612 = vst.msk [vmem:[#allocation3 + $0xa8] sm:$0xff] %vm425_vm11, %v5580_v4  ;;  %v6081_v5 = vld [vmem:[#allocation3 + $0x28] sm:$0xff] }
 0x4f9   : > { %v5036_v16 = vadd.f32 %v5004_v34, %v4949_v2  ;;  %v5508_v29 = vpop.f32.mrb[99].mxu0  ;;  %5611 = vst.msk [vmem:[#allocation3 + $0xa0] sm:$0xff] %vm425_vm11, %v5579_v13  ;;  %v5550_v12 = vld [vmem:[#allocation3 + $0xb8] sm:$0xff]  ;;  %v6080_v2 = vld [vmem:[#allocation3 + $0x20] sm:$0xff] }
 0x4fa   : > { %5069 = vst.msk [vmem:[#allocation3 + $0xd8] sm:$0xff] %vm425_vm11, %v5037_v30  ;;  %v5582_v43 = vadd.f32 %v9784_v51, %v5550_v12  ;;  %v5549_v54 = vld [vmem:[#allocation3 + $0xb0] sm:$0xff] }
 0x4fb   : > { %5068 = vst.msk [vmem:[#allocation3 + $0xd0] sm:$0xff] %vm425_vm11, %v5036_v16  ;;  %v9737_v8 = vpop.f32.mrb[88].mxu1  ;;  %v5581_v1 = vadd.f32 %v5549_v54, %v5478_v35 }
 0x4fc   : > { %v5039_v36 = vadd.f32 %v9737_v8, %v5007_v62  ;;  %v4959_v0 = vpop.f32.mrb[89].mxu1  ;;  %v9796_v46 = vpop.f32.mrb[100].mxu0  ;;  %5614 = vst.msk [vmem:[#allocation3 + $0xb8] sm:$0xff] %vm425_vm11, %v5582_v43  ;;  %v6083_v8 = vld [vmem:[#allocation3 + $0x38] sm:$0xff] }
 0x4fd   : > { %v5038_v56 = vadd.f32 %v5006_v19, %v4959_v0  ;;  %v5518_v39 = vpop.f32.mrb[101].mxu0  ;;  %5613 = vst.msk [vmem:[#allocation3 + $0xb0] sm:$0xff] %vm425_vm11, %v5581_v1  ;;  %v5552_v11 = vld [vmem:[#allocation3 + $0xc8] sm:$0xff]  ;;  %v6082_v0 = vld [vmem:[#allocation3 + $0x30] sm:$0xff] }
 0x4fe   : > { %5071 = vst.msk [vmem:[#allocation3 + $0xe8] sm:$0xff] %vm425_vm11, %v5039_v36  ;;  %v5584_v47 = vadd.f32 %v9787_v17, %v5552_v11  ;;  %v5551_v37 = vld [vmem:[#allocation3 + $0xc0] sm:$0xff] }
 0x4ff   : > { %5070 = vst.msk [vmem:[#allocation3 + $0xe0] sm:$0xff] %vm425_vm11, %v5038_v56  ;;  %v9740_v28 = vpop.f32.mrb[90].mxu1  ;;  %v5583_v9 = vadd.f32 %v5551_v37, %v5488_v32 }
 0x500   : > { %v5041_v40 = vadd.f32 %v9740_v28, %v5009_v38  ;;  %v4969_v49 = vpop.f32.mrb[91].mxu1  ;;  %v9863_v57 = vpop.f32.mrb[102].mxu0  ;;  %5616 = vst.msk [vmem:[#allocation3 + $0xc8] sm:$0xff] %vm425_vm11, %v5584_v47  ;;  %v6085_v28 = vld [vmem:[#allocation3 + $0x48] sm:$0xff] }
 0x501   : > { %v5040_v51 = vadd.f32 %v5008_v18, %v4969_v49  ;;  %v6402_v24 = vpop.f32.mrb[103].mxu0  ;;  %5615 = vst.msk [vmem:[#allocation3 + $0xc0] sm:$0xff] %vm425_vm11, %v5583_v9  ;;  %v5554_v35 = vld [vmem:[#allocation3 + $0xd8] sm:$0xff]  ;;  %v6084_v49 = vld [vmem:[#allocation3 + $0x40] sm:$0xff] }
 0x502   : > { %5073 = vst.msk [vmem:[#allocation3 + $0xf8] sm:$0xff] %vm425_vm11, %v5041_v40  ;;  %v5586_v27 = vadd.f32 %v9790_v53, %v5554_v35  ;;  %v5553_v6 = vld [vmem:[#allocation3 + $0xd0] sm:$0xff] }
 0x503   : > { %5072 = vst.msk [vmem:[#allocation3 + $0xf0] sm:$0xff] %vm425_vm11, %v5040_v51  ;;  %v9807_v44 = vpop.f32.mrb[92].mxu1  ;;  %v5585_v42 = vadd.f32 %v5553_v6, %v5498_v10 }
 0x504   : > { %v6109_v33 = vadd.f32 %v9807_v44, %v6077_v45  ;;  %v5917_v59 = vpop.f32.mrb[93].mxu1  ;;  %v9866_v23 = vpop.f32.mrb[104].mxu0  ;;  %5618 = vst.msk [vmem:[#allocation3 + $0xd8] sm:$0xff] %vm425_vm11, %v5586_v27  ;;  %v6087_v44 = vld [vmem:[#allocation3 + $0x58] sm:$0xff] }
 0x505   : > { %v6108_v17 = vadd.f32 %v6076_v60, %v5917_v59  ;;  %v6412_v61 = vpop.f32.mrb[105].mxu0  ;;  %5617 = vst.msk [vmem:[#allocation3 + $0xd0] sm:$0xff] %vm425_vm11, %v5585_v42  ;;  %v5556_v32 = vld [vmem:[#allocation3 + $0xe8] sm:$0xff]  ;;  %v6086_v59 = vld [vmem:[#allocation3 + $0x50] sm:$0xff] }
 0x506   : > { %6141 = vst.msk [vmem:[#allocation3 + $0x8] sm:$0xff] %vm425_vm11, %v6109_v33  ;;  %v5588_v63 = vadd.f32 %v9793_v50, %v5556_v32  ;;  %v5555_v21 = vld [vmem:[#allocation3 + $0xe0] sm:$0xff] }
 0x507   : > { %6140 = vst.msk [vmem:[#allocation3] sm:$0xff] %vm425_vm11, %v6108_v17  ;;  %v9810_v31 = vpop.f32.mrb[94].mxu1  ;;  %v5587_v26 = vadd.f32 %v5555_v21, %v5508_v29 }
 0x508   : > { %v6111_v48 = vadd.f32 %v9810_v31, %v6079_v41  ;;  %v5927_v3 = vpop.f32.mrb[95].mxu1  ;;  %v9869_v52 = vpop.f32.mrb[106].mxu0  ;;  %5620 = vst.msk [vmem:[#allocation3 + $0xe8] sm:$0xff] %vm425_vm11, %v5588_v63  ;;  %v6089_v31 = vld [vmem:[#allocation3 + $0x68] sm:$0xff] }
 0x509   : > { %v6110_v53 = vadd.f32 %v6078_v14, %v5927_v3  ;;  %v6422_v22 = vpop.f32.mrb[107].mxu0  ;;  %5619 = vst.msk [vmem:[#allocation3 + $0xe0] sm:$0xff] %vm425_vm11, %v5587_v26  ;;  %v5558_v10 = vld [vmem:[#allocation3 + $0xf8] sm:$0xff]  ;;  %v6088_v3 = vld [vmem:[#allocation3 + $0x60] sm:$0xff] }
 0x50a   : > { %6143 = vst.msk [vmem:[#allocation3 + $0x18] sm:$0xff] %vm425_vm11, %v6111_v48  ;;  %v5590_v25 = vadd.f32 %v9796_v46, %v5558_v10  ;;  %v5557_v4 = vld [vmem:[#allocation3 + $0xf0] sm:$0xff] }
 0x50b   : > { %6142 = vst.msk [vmem:[#allocation3 + $0x10] sm:$0xff] %vm425_vm11, %v6110_v53  ;;  %v9813_v20 = vpop.f32.mrb[96].mxu1  ;;  %v5589_v15 = vadd.f32 %v5557_v4, %v5518_v39 }
 0x50c   : > { %v6113_v13 = vadd.f32 %v9813_v20, %v6081_v5  ;;  %v5937_v30 = vpop.f32.mrb[97].mxu1  ;;  %v9872_v34 = vpop.f32.mrb[108].mxu0  ;;  %5622 = vst.msk [vmem:[#allocation3 + $0xf8] sm:$0xff] %vm425_vm11, %v5590_v25  ;;  %v6091_v20 = vld [vmem:[#allocation3 + $0x78] sm:$0xff] }
 0x50d   : > { %v6112_v50 = vadd.f32 %v6080_v2, %v5937_v30  ;;  %v6432_v16 = vpop.f32.mrb[109].mxu0  ;;  %5621 = vst.msk [vmem:[#allocation3 + $0xf0] sm:$0xff] %vm425_vm11, %v5589_v15  ;;  %v6562_v29 = vld [vmem:[#allocation3 + $0x8] sm:$0xff]  ;;  %v6090_v30 = vld [vmem:[#allocation3 + $0x70] sm:$0xff] }
 0x50e   : > { %6145 = vst.msk [vmem:[#allocation3 + $0x28] sm:$0xff] %vm425_vm11, %v6113_v13  ;;  %v6594_v12 = vadd.f32 %v9863_v57, %v6562_v29  ;;  %v6561_v43 = vld [vmem:[#allocation3] sm:$0xff] }
 0x50f   : > { %6144 = vst.msk [vmem:[#allocation3 + $0x20] sm:$0xff] %vm425_vm11, %v6112_v50  ;;  %v9816_v54 = vpop.f32.mrb[98].mxu1  ;;  %v6593_v62 = vadd.f32 %v6561_v43, %v6402_v24 }
 0x510   : > { %v6115_v1 = vadd.f32 %v9816_v54, %v6083_v8  ;;  %v5947_v36 = vpop.f32.mrb[99].mxu1  ;;  %v9875_v19 = vpop.f32.mrb[110].mxu0  ;;  %6626 = vst.msk [vmem:[#allocation3 + $0x8] sm:$0xff] %vm425_vm11, %v6594_v12  ;;  %v6093_v54 = vld [vmem:[#allocation3 + $0x88] sm:$0xff] }
 0x511   : > { %v6114_v46 = vadd.f32 %v6082_v0, %v5947_v36  ;;  %v6442_v56 = vpop.f32.mrb[111].mxu0  ;;  %6625 = vst.msk [vmem:[#allocation3] sm:$0xff] %vm425_vm11, %v6593_v62  ;;  %v6564_v39 = vld [vmem:[#allocation3 + $0x18] sm:$0xff]  ;;  %v6092_v36 = vld [vmem:[#allocation3 + $0x80] sm:$0xff] }
 0x512   : > { %6147 = vst.msk [vmem:[#allocation3 + $0x38] sm:$0xff] %vm425_vm11, %v6115_v1  ;;  %v6596_v11 = vadd.f32 %v9866_v23, %v6564_v39  ;;  %v6563_v47 = vld [vmem:[#allocation3 + $0x10] sm:$0xff] }
 0x513   : > { %6146 = vst.msk [vmem:[#allocation3 + $0x30] sm:$0xff] %vm425_vm11, %v6114_v46  ;;  %v9819_v37 = vpop.f32.mrb[100].mxu1  ;;  %v6595_v38 = vadd.f32 %v6563_v47, %v6412_v61 }
 0x514   : > { %v6117_v9 = vadd.f32 %v9819_v37, %v6085_v28  ;;  %v5957_v40 = vpop.f32.mrb[101].mxu1  ;;  %v9878_v18 = vpop.f32.mrb[112].mxu0  ;;  %6628 = vst.msk [vmem:[#allocation3 + $0x18] sm:$0xff] %vm425_vm11, %v6596_v11  ;;  %v6095_v37 = vld [vmem:[#allocation3 + $0x98] sm:$0xff] }
 0x515   : > { %v6116_v57 = vadd.f32 %v6084_v49, %v5957_v40  ;;  %v6452_v51 = vpop.f32.mrb[113].mxu0  ;;  %6627 = vst.msk [vmem:[#allocation3 + $0x10] sm:$0xff] %vm425_vm11, %v6595_v38  ;;  %v6566_v24 = vld [vmem:[#allocation3 + $0x28] sm:$0xff]  ;;  %v6094_v40 = vld [vmem:[#allocation3 + $0x90] sm:$0xff] }
 0x516   : > { %6149 = vst.msk [vmem:[#allocation3 + $0x48] sm:$0xff] %vm425_vm11, %v6117_v9  ;;  %v6598_v35 = vadd.f32 %v9869_v52, %v6566_v24  ;;  %v6565_v27 = vld [vmem:[#allocation3 + $0x20] sm:$0xff] }
 0x517   : > { %6148 = vst.msk [vmem:[#allocation3 + $0x40] sm:$0xff] %vm425_vm11, %v6116_v57  ;;  %v9822_v6 = vpop.f32.mrb[102].mxu1  ;;  %v6597_v45 = vadd.f32 %v6565_v27, %v6422_v22 }
 0x518   : > { %v6119_v42 = vadd.f32 %v9822_v6, %v6087_v44  ;;  %v5967_v33 = vpop.f32.mrb[103].mxu1  ;;  %v9881_v60 = vpop.f32.mrb[114].mxu0  ;;  %6630 = vst.msk [vmem:[#allocation3 + $0x28] sm:$0xff] %vm425_vm11, %v6598_v35  ;;  %v6097_v6 = vld [vmem:[#allocation3 + $0xa8] sm:$0xff] }
 0x519   : > { %v6118_v23 = vadd.f32 %v6086_v59, %v5967_v33  ;;  %v6462_v17 = vpop.f32.mrb[115].mxu0  ;;  %6629 = vst.msk [vmem:[#allocation3 + $0x20] sm:$0xff] %vm425_vm11, %v6597_v45  ;;  %v6568_v61 = vld [vmem:[#allocation3 + $0x38] sm:$0xff]  ;;  %v6096_v33 = vld [vmem:[#allocation3 + $0xa0] sm:$0xff] }
 0x51a   : > { %6151 = vst.msk [vmem:[#allocation3 + $0x58] sm:$0xff] %vm425_vm11, %v6119_v42  ;;  %v6600_v32 = vadd.f32 %v9872_v34, %v6568_v61  ;;  %v6567_v63 = vld [vmem:[#allocation3 + $0x30] sm:$0xff] }
 0x51b   : > { %6150 = vst.msk [vmem:[#allocation3 + $0x50] sm:$0xff] %vm425_vm11, %v6118_v23  ;;  %v9825_v21 = vpop.f32.mrb[104].mxu1  ;;  %v6599_v41 = vadd.f32 %v6567_v63, %v6432_v16 }
 0x51c   : > { %v6121_v26 = vadd.f32 %v9825_v21, %v6089_v31  ;;  %v5977_v48 = vpop.f32.mrb[105].mxu1  ;;  %v9884_v14 = vpop.f32.mrb[116].mxu0  ;;  %6632 = vst.msk [vmem:[#allocation3 + $0x38] sm:$0xff] %vm425_vm11, %v6600_v32  ;;  %v6099_v21 = vld [vmem:[#allocation3 + $0xb8] sm:$0xff] }
 0x51d   : > { %v6120_v52 = vadd.f32 %v6088_v3, %v5977_v48  ;;  %v6472_v53 = vpop.f32.mrb[117].mxu0  ;;  %6631 = vst.msk [vmem:[#allocation3 + $0x30] sm:$0xff] %vm425_vm11, %v6599_v41  ;;  %v6570_v22 = vld [vmem:[#allocation3 + $0x48] sm:$0xff]  ;;  %v6098_v48 = vld [vmem:[#allocation3 + $0xb0] sm:$0xff] }
 0x51e   : > { %6153 = vst.msk [vmem:[#allocation3 + $0x68] sm:$0xff] %vm425_vm11, %v6121_v26  ;;  %v6602_v10 = vadd.f32 %v9875_v19, %v6570_v22  ;;  %v6569_v25 = vld [vmem:[#allocation3 + $0x40] sm:$0xff] }
 0x51f   : > { %6152 = vst.msk [vmem:[#allocation3 + $0x60] sm:$0xff] %vm425_vm11, %v6120_v52  ;;  %v9828_v4 = vpop.f32.mrb[106].mxu1  ;;  %v6601_v5 = vadd.f32 %v6569_v25, %v6442_v56 }
 0x520   : > { %v6123_v15 = vadd.f32 %v9828_v4, %v6091_v20  ;;  %v5987_v13 = vpop.f32.mrb[107].mxu1  ;;  %v9887_v2 = vpop.f32.mrb[118].mxu0  ;;  %6634 = vst.msk [vmem:[#allocation3 + $0x48] sm:$0xff] %vm425_vm11, %v6602_v10  ;;  %v6101_v4 = vld [vmem:[#allocation3 + $0xc8] sm:$0xff] }
 0x521   : > { %v6122_v34 = vadd.f32 %v6090_v30, %v5987_v13  ;;  %v6482_v50 = vpop.f32.mrb[119].mxu0  ;;  %6633 = vst.msk [vmem:[#allocation3 + $0x40] sm:$0xff] %vm425_vm11, %v6601_v5  ;;  %v6572_v16 = vld [vmem:[#allocation3 + $0x58] sm:$0xff]  ;;  %v6100_v13 = vld [vmem:[#allocation3 + $0xc0] sm:$0xff] }
 0x522   : > { %6155 = vst.msk [vmem:[#allocation3 + $0x78] sm:$0xff] %vm425_vm11, %v6123_v15  ;;  %v6604_v29 = vadd.f32 %v9878_v18, %v6572_v16  ;;  %v6571_v12 = vld [vmem:[#allocation3 + $0x50] sm:$0xff] }
 0x523   : > { %6154 = vst.msk [vmem:[#allocation3 + $0x70] sm:$0xff] %vm425_vm11, %v6122_v34  ;;  %v9831_v43 = vpop.f32.mrb[108].mxu1  ;;  %v6603_v8 = vadd.f32 %v6571_v12, %v6452_v51 }
 0x524   : > { %v6125_v62 = vadd.f32 %v9831_v43, %v6093_v54  ;;  %v5997_v1 = vpop.f32.mrb[109].mxu1  ;;  %v9890_v0 = vpop.f32.mrb[120].mxu0  ;;  %6636 = vst.msk [vmem:[#allocation3 + $0x58] sm:$0xff] %vm425_vm11, %v6604_v29  ;;  %v6103_v43 = vld [vmem:[#allocation3 + $0xd8] sm:$0xff] }
 0x525   : > { %v6124_v19 = vadd.f32 %v6092_v36, %v5997_v1  ;;  %v6492_v46 = vpop.f32.mrb[121].mxu0  ;;  %6635 = vst.msk [vmem:[#allocation3 + $0x50] sm:$0xff] %vm425_vm11, %v6603_v8  ;;  %v6574_v56 = vld [vmem:[#allocation3 + $0x68] sm:$0xff]  ;;  %v6102_v1 = vld [vmem:[#allocation3 + $0xd0] sm:$0xff] }
 0x526   : > { %6157 = vst.msk [vmem:[#allocation3 + $0x88] sm:$0xff] %vm425_vm11, %v6125_v62  ;;  %v6606_v39 = vadd.f32 %v9881_v60, %v6574_v56  ;;  %v6573_v11 = vld [vmem:[#allocation3 + $0x60] sm:$0xff] }
 0x527   : > { %6156 = vst.msk [vmem:[#allocation3 + $0x80] sm:$0xff] %vm425_vm11, %v6124_v19  ;;  %v9834_v47 = vpop.f32.mrb[110].mxu1  ;;  %v6605_v28 = vadd.f32 %v6573_v11, %v6462_v17 }
 0x528   : > { %v6127_v38 = vadd.f32 %v9834_v47, %v6095_v37  ;;  %v6007_v9 = vpop.f32.mrb[111].mxu1  ;;  %v9893_v49 = vpop.f32.mrb[122].mxu0  ;;  %6638 = vst.msk [vmem:[#allocation3 + $0x68] sm:$0xff] %vm425_vm11, %v6606_v39  ;;  %v6105_v47 = vld [vmem:[#allocation3 + $0xe8] sm:$0xff] }
 0x529   : > { %v6126_v18 = vadd.f32 %v6094_v40, %v6007_v9  ;;  %v6502_v57 = vpop.f32.mrb[123].mxu0  ;;  %6637 = vst.msk [vmem:[#allocation3 + $0x60] sm:$0xff] %vm425_vm11, %v6605_v28  ;;  %v6576_v51 = vld [vmem:[#allocation3 + $0x78] sm:$0xff]  ;;  %v6104_v9 = vld [vmem:[#allocation3 + $0xe0] sm:$0xff] }
 0x52a   : > { %6159 = vst.msk [vmem:[#allocation3 + $0x98] sm:$0xff] %vm425_vm11, %v6127_v38  ;;  %v6608_v24 = vadd.f32 %v9884_v14, %v6576_v51  ;;  %v6575_v35 = vld [vmem:[#allocation3 + $0x70] sm:$0xff] }
 0x52b   : > { %6158 = vst.msk [vmem:[#allocation3 + $0x90] sm:$0xff] %vm425_vm11, %v6126_v18  ;;  %v9837_v27 = vpop.f32.mrb[112].mxu1  ;;  %v6607_v44 = vadd.f32 %v6575_v35, %v6472_v53 }
 0x52c   : > { %v6129_v45 = vadd.f32 %v9837_v27, %v6097_v6  ;;  %v6017_v42 = vpop.f32.mrb[113].mxu1  ;;  %v9896_v59 = vpop.f32.mrb[124].mxu0  ;;  %6640 = vst.msk [vmem:[#allocation3 + $0x78] sm:$0xff] %vm425_vm11, %v6608_v24  ;;  %v6107_v27 = vld [vmem:[#allocation3 + $0xf8] sm:$0xff] }
 0x52d   : > { %v6128_v60 = vadd.f32 %v6096_v33, %v6017_v42  ;;  %v6512_v23 = vpop.f32.mrb[125].mxu0  ;;  %6639 = vst.msk [vmem:[#allocation3 + $0x70] sm:$0xff] %vm425_vm11, %v6607_v44  ;;  %v6578_v17 = vld [vmem:[#allocation3 + $0x88] sm:$0xff]  ;;  %v6106_v42 = vld [vmem:[#allocation3 + $0xf0] sm:$0xff] }
 0x52e   : > { %6161 = vst.msk [vmem:[#allocation3 + $0xa8] sm:$0xff] %vm425_vm11, %v6129_v45  ;;  %v6610_v61 = vadd.f32 %v9887_v2, %v6578_v17  ;;  %v6577_v32 = vld [vmem:[#allocation3 + $0x80] sm:$0xff] }
 0x52f   : > { %6160 = vst.msk [vmem:[#allocation3 + $0xa0] sm:$0xff] %vm425_vm11, %v6128_v60  ;;  %v9840_v63 = vpop.f32.mrb[114].mxu1  ;;  %v6609_v31 = vadd.f32 %v6577_v32, %v6482_v50 }
 0x530   : > { %v6131_v41 = vadd.f32 %v9840_v63, %v6099_v21  ;;  %v6027_v26 = vpop.f32.mrb[115].mxu1  ;;  %v9899_v3 = vpop.f32.mrb[126].mxu0  ;;  %6642 = vst.msk [vmem:[#allocation3 + $0x88] sm:$0xff] %vm425_vm11, %v6610_v61  ;;  %v7111_v61 = vld [vmem:[#allocation3 + $0x8] sm:$0xff] }
 0x531   : > { %v6130_v14 = vadd.f32 %v6098_v48, %v6027_v26  ;;  %v6522_v52 = vpop.f32.mrb[127].mxu0  ;;  %6641 = vst.msk [vmem:[#allocation3 + $0x80] sm:$0xff] %vm425_vm11, %v6609_v31  ;;  %v6580_v53 = vld [vmem:[#allocation3 + $0x98] sm:$0xff]  ;;  %v7110_v31 = vld [vmem:[#allocation3] sm:$0xff] }
 0x532   : > { %6163 = vst.msk [vmem:[#allocation3 + $0xb8] sm:$0xff] %vm425_vm11, %v6131_v41  ;;  %v6612_v22 = vadd.f32 %v9890_v0, %v6580_v53  ;;  %v6579_v10 = vld [vmem:[#allocation3 + $0x90] sm:$0xff]  ;;  %v7113_v53 = vld [vmem:[#allocation3 + $0x18] sm:$0xff] }
 0x533   : > { %6162 = vst.msk [vmem:[#allocation3 + $0xb0] sm:$0xff] %vm425_vm11, %v6130_v14  ;;  %v9843_v25 = vpop.f32.mrb[116].mxu1  ;;  %v6611_v20 = vadd.f32 %v6579_v10, %v6492_v46 }
 0x534   : > { %v6133_v5 = vadd.f32 %v9843_v25, %v6101_v4  ;;  %v6037_v15 = vpop.f32.mrb[117].mxu1  ;;  %v9902_v30 = vpop.f32.mrb[128].mxu0  ;;  %6644 = vst.msk [vmem:[#allocation3 + $0x98] sm:$0xff] %vm425_vm11, %v6612_v22  ;;  %v7112_v25 = vld [vmem:[#allocation3 + $0x10] sm:$0xff] }
 0x535   : > { %v6132_v2 = vadd.f32 %v6100_v13, %v6037_v15  ;;  %v6532_v34 = vpop.f32.mrb[129].mxu0  ;;  %6643 = vst.msk [vmem:[#allocation3 + $0x90] sm:$0xff] %vm425_vm11, %v6611_v20  ;;  %v6582_v50 = vld [vmem:[#allocation3 + $0xa8] sm:$0xff] }
 0x536   : > { %6165 = vst.msk [vmem:[#allocation3 + $0xc8] sm:$0xff] %vm425_vm11, %v6133_v5  ;;  %v6614_v16 = vadd.f32 %v9893_v49, %v6582_v50  ;;  %v6581_v29 = vld [vmem:[#allocation3 + $0xa0] sm:$0xff] }
 0x537   : > { %6164 = vst.msk [vmem:[#allocation3 + $0xc0] sm:$0xff] %vm425_vm11, %v6132_v2  ;;  %v9846_v12 = vpop.f32.mrb[118].mxu1  ;;  %v6613_v54 = vadd.f32 %v6581_v29, %v6502_v57  ;;  %v7115_v2 = vld [vmem:[#allocation3 + $0x28] sm:$0xff]  ;;  %v7114_v29 = vld [vmem:[#allocation3 + $0x20] sm:$0xff] }
 0x538   : > { %v6135_v8 = vadd.f32 %v9846_v12, %v6103_v43  ;;  %v6047_v62 = vpop.f32.mrb[119].mxu1  ;;  %v9905_v36 = vpop.f32.mrb[130].mxu0  ;;  %6646 = vst.msk [vmem:[#allocation3 + $0xa8] sm:$0xff] %vm425_vm11, %v6614_v16 }
 0x539   : > { %v6134_v0 = vadd.f32 %v6102_v1, %v6047_v62  ;;  %v6542_v19 = vpop.f32.mrb[131].mxu0  ;;  %6645 = vst.msk [vmem:[#allocation3 + $0xa0] sm:$0xff] %vm425_vm11, %v6613_v54  ;;  %v6584_v46 = vld [vmem:[#allocation3 + $0xb8] sm:$0xff] }
 0x53a   : > { %6167 = vst.msk [vmem:[#allocation3 + $0xd8] sm:$0xff] %vm425_vm11, %v6135_v8  ;;  %v6616_v56 = vadd.f32 %v9896_v59, %v6584_v46  ;;  %v6583_v39 = vld [vmem:[#allocation3 + $0xb0] sm:$0xff]  ;;  %v7117_v1 = vld [vmem:[#allocation3 + $0x38] sm:$0xff] }
 0x53b   : > { %6166 = vst.msk [vmem:[#allocation3 + $0xd0] sm:$0xff] %vm425_vm11, %v6134_v0  ;;  %v9849_v11 = vpop.f32.mrb[120].mxu1  ;;  %v6615_v37 = vadd.f32 %v6583_v39, %v6512_v23  ;;  %v7116_v46 = vld [vmem:[#allocation3 + $0x30] sm:$0xff] }
 0x53c   : > { %v6137_v28 = vadd.f32 %v9849_v11, %v6105_v47  ;;  %v6057_v38 = vpop.f32.mrb[121].mxu1  ;;  %v9908_v40 = vpop.f32.mrb[132].mxu0  ;;  %6648 = vst.msk [vmem:[#allocation3 + $0xb8] sm:$0xff] %vm425_vm11, %v6616_v56 }
 0x53d   : > { %v6136_v49 = vadd.f32 %v6104_v9, %v6057_v38  ;;  %v6552_v18 = vpop.f32.mrb[133].mxu0  ;;  %6647 = vst.msk [vmem:[#allocation3 + $0xb0] sm:$0xff] %vm425_vm11, %v6615_v37  ;;  %v6586_v57 = vld [vmem:[#allocation3 + $0xc8] sm:$0xff] }
 0x53e   : > { %6169 = vst.msk [vmem:[#allocation3 + $0xe8] sm:$0xff] %vm425_vm11, %v6137_v28  ;;  %v6618_v51 = vadd.f32 %v9899_v3, %v6586_v57  ;;  %v6585_v24 = vld [vmem:[#allocation3 + $0xc0] sm:$0xff]  ;;  %v7119_v9 = vld [vmem:[#allocation3 + $0x48] sm:$0xff] }
 0x53f   : > { %6168 = vst.msk [vmem:[#allocation3 + $0xe0] sm:$0xff] %vm425_vm11, %v6136_v49  ;;  %v9852_v35 = vpop.f32.mrb[122].mxu1  ;;  %v6617_v6 = vadd.f32 %v6585_v24, %v6522_v52  ;;  %v7118_v57 = vld [vmem:[#allocation3 + $0x40] sm:$0xff] }
 0x540   : > { %v6139_v44 = vadd.f32 %v9852_v35, %v6107_v27  ;;  %v6067_v45 = vpop.f32.mrb[123].mxu1  ;;  %6650 = vst.msk [vmem:[#allocation3 + $0xc8] sm:$0xff] %vm425_vm11, %v6618_v51 }
 0x541   : > { %v6138_v33 = vadd.f32 %v6106_v42, %v6067_v45  ;;  %6649 = vst.msk [vmem:[#allocation3 + $0xc0] sm:$0xff] %vm425_vm11, %v6617_v6  ;;  %v6588_v59 = vld [vmem:[#allocation3 + $0xd8] sm:$0xff] }
 0x542   : > { %6171 = vst.msk [vmem:[#allocation3 + $0xf8] sm:$0xff] %vm425_vm11, %v6139_v44  ;;  %v6620_v60 = vadd.f32 %v9902_v30, %v6588_v59  ;;  %v6587_v23 = vld [vmem:[#allocation3 + $0xd0] sm:$0xff]  ;;  %v7121_v42 = vld [vmem:[#allocation3 + $0x58] sm:$0xff] }
 0x543   : > { %6170 = vst.msk [vmem:[#allocation3 + $0xf0] sm:$0xff] %vm425_vm11, %v6138_v33  ;;  %v9919_v17 = vpop.f32.mrb[124].mxu1  ;;  %v6619_v32 = vadd.f32 %v6587_v23, %v6532_v34  ;;  %v14236_v34 = vld [vmem:[%s14752_s3 + $0xb] ss:$0 sm:$0xff]  ;;  %v7120_v23 = vld [vmem:[#allocation3 + $0x50] sm:$0xff] }
 0x544   : > { %v7143_v63 = vadd.f32 %v9919_v17, %v7111_v61  ;;  %v6951_v21 = vpop.f32.mrb[125].mxu1  ;;  %6652 = vst.msk [vmem:[#allocation3 + $0xd8] sm:$0xff] %vm425_vm11, %v6620_v60 }
 0x545   : > { %v7142_v41 = vadd.f32 %v7110_v31, %v6951_v21  ;;  %v6590_v26 = vld [vmem:[#allocation3 + $0xe8] sm:$0xff]  ;;  %6651 = vst.msk [vmem:[#allocation3 + $0xd0] sm:$0xff] %vm425_vm11, %v6619_v32 }
 0x546   : > { %7175 = vst.msk [vmem:[#allocation3 + $0x8] sm:$0xff] %vm425_vm11, %v7143_v63  ;;  %v6622_v48 = vadd.f32 %v9905_v36, %v6590_v26  ;;  %v6589_v3 = vld [vmem:[#allocation3 + $0xe0] sm:$0xff]  ;;  %v7123_v26 = vld [vmem:[#allocation3 + $0x68] sm:$0xff] }
 0x547   : > { %7174 = vst.msk [vmem:[#allocation3] sm:$0xff] %vm425_vm11, %v7142_v41  ;;  %v6621_v14 = vadd.f32 %v6589_v3, %v6542_v19  ;;  %v9922_v52 = vpop.f32.mrb[126].mxu1 }
 0x548   : > { %6654 = vst.msk [vmem:[#allocation3 + $0xe8] sm:$0xff] %vm425_vm11, %v6622_v48  ;;  %v7145_v22 = vadd.f32 %v9922_v52, %v7113_v53  ;;  %v6961_v10 = vpop.f32.mrb[127].mxu1  ;;  %v7122_v52 = vld [vmem:[#allocation3 + $0x60] sm:$0xff] }
 0x549   : > { %6653 = vst.msk [vmem:[#allocation3 + $0xe0] sm:$0xff] %vm425_vm11, %v6621_v14  ;;  %v7144_v4 = vadd.f32 %v7112_v25, %v6961_v10  ;;  %v6592_v20 = vld [vmem:[#allocation3 + $0xf8] sm:$0xff] }
 0x54a   : > { %7177 = vst.msk [vmem:[#allocation3 + $0x18] sm:$0xff] %vm425_vm11, %v7145_v22  ;;  %v6624_v5 = vadd.f32 %v9908_v40, %v6592_v20  ;;  %v6591_v15 = vld [vmem:[#allocation3 + $0xf0] sm:$0xff] }
 0x54b   : > { %7176 = vst.msk [vmem:[#allocation3 + $0x10] sm:$0xff] %vm425_vm11, %v7144_v4  ;;  %v6623_v13 = vadd.f32 %v6591_v15, %v6552_v18  ;;  %v9925_v30 = vpop.f32.mrb[128].mxu1  ;;  %v7125_v15 = vld [vmem:[#allocation3 + $0x78] sm:$0xff] }
 0x54c   : > { %6656 = vst.msk [vmem:[#allocation3 + $0xf8] sm:$0xff] %vm425_vm11, %v6624_v5  ;;  %v7147_v50 = vadd.f32 %v9925_v30, %v7115_v2  ;;  %v6971_v16 = vpop.f32.mrb[129].mxu1 }
 0x54d   : > { %6655 = vst.msk [vmem:[#allocation3 + $0xf0] sm:$0xff] %vm425_vm11, %v6623_v13  ;;  %v7146_v12 = vadd.f32 %v7114_v29, %v6971_v16  ;;  %v7207_v43 = vld [vmem:[#allocation3 + $0x8] sm:$0xff] }
 0x54e   : > { %7179 = vst.msk [vmem:[#allocation3 + $0x28] sm:$0xff] %vm425_vm11, %v7147_v50  ;;  %v7206_v54 = vld [vmem:[#allocation3] sm:$0xff]  ;;  %v7244_v8 = vadd.f32 %v14236_v34, %v7207_v43  ;;  %v7124_v50 = vld [vmem:[#allocation3 + $0x70] sm:$0xff] }
 0x54f   : > { %7178 = vst.msk [vmem:[#allocation3 + $0x20] sm:$0xff] %vm425_vm11, %v7146_v12  ;;  %v9928_v62 = vpop.f32.mrb[130].mxu1  ;;  %v7243_v36 = vadd.f32 %v14236_v34, %v7206_v54 }
 0x550   : > { %v7149_v0 = vadd.f32 %v9928_v62, %v7117_v1  ;;  %v6981_v19 = vpop.f32.mrb[131].mxu1  ;;  %v7276_v47 = vmax.f32 %v7244_v8, 0.0  ;;  %v7127_v1 = vld [vmem:[#allocation3 + $0x88] sm:$0xff] }
 0x551   : > { %v7148_v56 = vadd.f32 %v7116_v46, %v6981_v19  ;;  %v7275_v39 = vmax.f32 %v7243_v36, 0.0  ;;  %v7209_v11 = vld [vmem:[#allocation3 + $0x18] sm:$0xff]  ;;  %v7126_v46 = vld [vmem:[#allocation3 + $0x80] sm:$0xff] }
 0x552   : > { %7181 = vst.msk [vmem:[#allocation3 + $0x38] sm:$0xff] %vm425_vm11, %v7149_v0  ;;  %v7208_v37 = vld [vmem:[#allocation3 + $0x10] sm:$0xff]  ;;  %v7246_v28 = vadd.f32 %v14236_v34, %v7209_v11 }
 0x553   : > { %7180 = vst.msk [vmem:[#allocation3 + $0x30] sm:$0xff] %vm425_vm11, %v7148_v56  ;;  %v9931_v38 = vpop.f32.mrb[132].mxu1  ;;  %9973 = vmatprep.mubr.msk.f32.mxu0 %vm425_vm11, %v7275_v39  ;;  %v7245_v40 = vadd.f32 %v14236_v34, %v7208_v37 }
 0x554   : > { %v7151_v49 = vadd.f32 %v9931_v38, %v7119_v9  ;;  %v6991_v18 = vpop.f32.mrb[133].mxu1  ;;  %9974 = vmatmul.mubr.msk.f32.vlgmr.msra.gmra.mrb[134].mxu0 %vm425_vm11, %v7276_v47  ;;  %v7278_v27 = vmax.f32 %v7246_v28, 0.0  ;;  %v7129_v9 = vld [vmem:[#allocation3 + $0x98] sm:$0xff] }
 0x555   : > { %v7150_v51 = vadd.f32 %v7118_v57, %v6991_v18  ;;  %v7277_v24 = vmax.f32 %v7245_v40, 0.0  ;;  %v7211_v35 = vld [vmem:[#allocation3 + $0x28] sm:$0xff]  ;;  %v7128_v57 = vld [vmem:[#allocation3 + $0x90] sm:$0xff] }
 0x556   : > { %7183 = vst.msk [vmem:[#allocation3 + $0x48] sm:$0xff] %vm425_vm11, %v7151_v49  ;;  %v7210_v6 = vld [vmem:[#allocation3 + $0x20] sm:$0xff]  ;;  %v7248_v44 = vadd.f32 %v14236_v34, %v7211_v35 }
 0x557   : > { %7182 = vst.msk [vmem:[#allocation3 + $0x40] sm:$0xff] %vm425_vm11, %v7150_v51  ;;  %v9934_v45 = vpop.f32.mrb[134].mxu1  ;;  %9976 = vmatprep.mubr.msk.f32.mxu0 %vm425_vm11, %v7277_v24  ;;  %v7247_v33 = vadd.f32 %v14236_v34, %v7210_v6 }
 0x558   : > { %v7153_v59 = vadd.f32 %v9934_v45, %v7121_v42  ;;  %v7001_v60 = vpop.f32.mrb[135].mxu1  ;;  %9977 = vmatmul.mubr.msk.f32.gmra.mrb[136].mxu0 %vm425_vm11, %v7278_v27  ;;  %v7280_v63 = vmax.f32 %v7248_v44, 0.0  ;;  %v7131_v42 = vld [vmem:[#allocation3 + $0xa8] sm:$0xff] }
 0x559   : > { %v7152_v17 = vadd.f32 %v7120_v23, %v7001_v60  ;;  %v7279_v61 = vmax.f32 %v7247_v33, 0.0  ;;  %v7213_v32 = vld [vmem:[#allocation3 + $0x38] sm:$0xff]  ;;  %v7130_v23 = vld [vmem:[#allocation3 + $0xa0] sm:$0xff] }
 0x55a   : > { %7185 = vst.msk [vmem:[#allocation3 + $0x58] sm:$0xff] %vm425_vm11, %v7153_v59  ;;  %v7212_v21 = vld [vmem:[#allocation3 + $0x30] sm:$0xff]  ;;  %v7250_v31 = vadd.f32 %v14236_v34, %v7213_v32 }
 0x55b   : > { %7184 = vst.msk [vmem:[#allocation3 + $0x50] sm:$0xff] %vm425_vm11, %v7152_v17  ;;  %v9937_v41 = vpop.f32.mrb[136].mxu1  ;;  %9979 = vmatprep.mubr.msk.f32.mxu0 %vm425_vm11, %v7279_v61  ;;  %v7249_v48 = vadd.f32 %v14236_v34, %v7212_v21 }
 0x55c   : > { %v7155_v3 = vadd.f32 %v9937_v41, %v7123_v26  ;;  %v7011_v14 = vpop.f32.mrb[137].mxu1  ;;  %9980 = vmatmul.mubr.msk.f32.gmra.mrb[138].mxu0 %vm425_vm11, %v7280_v63  ;;  %v7282_v25 = vmax.f32 %v7250_v31, 0.0  ;;  %v7133_v26 = vld [vmem:[#allocation3 + $0xb8] sm:$0xff] }
 0x55d   : > { %v7154_v53 = vadd.f32 %v7122_v52, %v7011_v14  ;;  %v7281_v22 = vmax.f32 %v7249_v48, 0.0  ;;  %v7215_v10 = vld [vmem:[#allocation3 + $0x48] sm:$0xff]  ;;  %v7132_v52 = vld [vmem:[#allocation3 + $0xb0] sm:$0xff] }
 0x55e   : > { %7187 = vst.msk [vmem:[#allocation3 + $0x68] sm:$0xff] %vm425_vm11, %v7155_v3  ;;  %v7214_v4 = vld [vmem:[#allocation3 + $0x40] sm:$0xff]  ;;  %v7252_v20 = vadd.f32 %v14236_v34, %v7215_v10 }
 0x55f   : > { %7186 = vst.msk [vmem:[#allocation3 + $0x60] sm:$0xff] %vm425_vm11, %v7154_v53  ;;  %v9940_v5 = vpop.f32.mrb[138].mxu1  ;;  %9982 = vmatprep.mubr.msk.f32.mxu0 %vm425_vm11, %v7281_v22  ;;  %v7251_v13 = vadd.f32 %v14236_v34, %v7214_v4 }
 0x560   : > { %v7157_v30 = vadd.f32 %v9940_v5, %v7125_v15  ;;  %v7021_v2 = vpop.f32.mrb[139].mxu1  ;;  %9983 = vmatmul.mubr.msk.f32.gmra.mrb[140].mxu0 %vm425_vm11, %v7282_v25  ;;  %v7284_v43 = vmax.f32 %v7252_v20, 0.0  ;;  %v7135_v15 = vld [vmem:[#allocation3 + $0xc8] sm:$0xff] }
 0x561   : > { %v7156_v16 = vadd.f32 %v7124_v50, %v7021_v2  ;;  %v7283_v29 = vmax.f32 %v7251_v13, 0.0  ;;  %v7217_v12 = vld [vmem:[#allocation3 + $0x58] sm:$0xff]  ;;  %v7134_v50 = vld [vmem:[#allocation3 + $0xc0] sm:$0xff] }
 0x562   : > { %7189 = vst.msk [vmem:[#allocation3 + $0x78] sm:$0xff] %vm425_vm11, %v7157_v30  ;;  %v7216_v54 = vld [vmem:[#allocation3 + $0x50] sm:$0xff]  ;;  %v7254_v8 = vadd.f32 %v14236_v34, %v7217_v12 }
 0x563   : > { %7188 = vst.msk [vmem:[#allocation3 + $0x70] sm:$0xff] %vm425_vm11, %v7156_v16  ;;  %v9943_v62 = vpop.f32.mrb[140].mxu1  ;;  %9985 = vmatprep.mubr.msk.f32.mxu0 %vm425_vm11, %v7283_v29  ;;  %v7253_v36 = vadd.f32 %v14236_v34, %v7216_v54 }
 0x564   : > { %v7159_v0 = vadd.f32 %v9943_v62, %v7127_v1  ;;  %v7031_v19 = vpop.f32.mrb[141].mxu1  ;;  %9986 = vmatmul.mubr.msk.f32.gmra.mrb[142].mxu0 %vm425_vm11, %v7284_v43  ;;  %v7286_v47 = vmax.f32 %v7254_v8, 0.0  ;;  %v7137_v1 = vld [vmem:[#allocation3 + $0xd8] sm:$0xff] }
 0x565   : > { %v7158_v56 = vadd.f32 %v7126_v46, %v7031_v19  ;;  %v7285_v39 = vmax.f32 %v7253_v36, 0.0  ;;  %v7219_v11 = vld [vmem:[#allocation3 + $0x68] sm:$0xff]  ;;  %v7136_v46 = vld [vmem:[#allocation3 + $0xd0] sm:$0xff] }
 0x566   : > { %7191 = vst.msk [vmem:[#allocation3 + $0x88] sm:$0xff] %vm425_vm11, %v7159_v0  ;;  %v7218_v37 = vld [vmem:[#allocation3 + $0x60] sm:$0xff]  ;;  %v7256_v28 = vadd.f32 %v14236_v34, %v7219_v11 }
 0x567   : > { %7190 = vst.msk [vmem:[#allocation3 + $0x80] sm:$0xff] %vm425_vm11, %v7158_v56  ;;  %v9946_v38 = vpop.f32.mrb[142].mxu1  ;;  %9988 = vmatprep.mubr.msk.f32.mxu0 %vm425_vm11, %v7285_v39  ;;  %v7255_v40 = vadd.f32 %v14236_v34, %v7218_v37 }
 0x568   : > { %v7161_v49 = vadd.f32 %v9946_v38, %v7129_v9  ;;  %v7041_v18 = vpop.f32.mrb[143].mxu1  ;;  %9989 = vmatmul.mubr.msk.f32.gmra.mrb[144].mxu0 %vm425_vm11, %v7286_v47  ;;  %v7288_v27 = vmax.f32 %v7256_v28, 0.0  ;;  %v7139_v9 = vld [vmem:[#allocation3 + $0xe8] sm:$0xff] }
 0x569   : > { %v7160_v51 = vadd.f32 %v7128_v57, %v7041_v18  ;;  %v7287_v24 = vmax.f32 %v7255_v40, 0.0  ;;  %v7221_v35 = vld [vmem:[#allocation3 + $0x78] sm:$0xff]  ;;  %v7138_v57 = vld [vmem:[#allocation3 + $0xe0] sm:$0xff] }
 0x56a   : > { %7193 = vst.msk [vmem:[#allocation3 + $0x98] sm:$0xff] %vm425_vm11, %v7161_v49  ;;  %v7220_v6 = vld [vmem:[#allocation3 + $0x70] sm:$0xff]  ;;  %v7258_v44 = vadd.f32 %v14236_v34, %v7221_v35 }
 0x56b   : > { %7192 = vst.msk [vmem:[#allocation3 + $0x90] sm:$0xff] %vm425_vm11, %v7160_v51  ;;  %v9949_v45 = vpop.f32.mrb[144].mxu1  ;;  %9991 = vmatprep.mubr.msk.f32.mxu0 %vm425_vm11, %v7287_v24  ;;  %v7257_v33 = vadd.f32 %v14236_v34, %v7220_v6 }
 0x56c   : > { %v7163_v59 = vadd.f32 %v9949_v45, %v7131_v42  ;;  %v7051_v60 = vpop.f32.mrb[145].mxu1  ;;  %9992 = vmatmul.mubr.msk.f32.gmra.mrb[146].mxu0 %vm425_vm11, %v7288_v27  ;;  %v7290_v63 = vmax.f32 %v7258_v44, 0.0  ;;  %v7141_v42 = vld [vmem:[#allocation3 + $0xf8] sm:$0xff] }
 0x56d   : > { %v7162_v17 = vadd.f32 %v7130_v23, %v7051_v60  ;;  %v7289_v61 = vmax.f32 %v7257_v33, 0.0  ;;  %v7223_v32 = vld [vmem:[#allocation3 + $0x88] sm:$0xff]  ;;  %v7140_v23 = vld [vmem:[#allocation3 + $0xf0] sm:$0xff] }
 0x56e   : > { %7195 = vst.msk [vmem:[#allocation3 + $0xa8] sm:$0xff] %vm425_vm11, %v7163_v59  ;;  %v7222_v21 = vld [vmem:[#allocation3 + $0x80] sm:$0xff]  ;;  %v7260_v31 = vadd.f32 %v14236_v34, %v7223_v32 }
 0x56f   : > { %7194 = vst.msk [vmem:[#allocation3 + $0xa0] sm:$0xff] %vm425_vm11, %v7162_v17  ;;  %v9952_v41 = vpop.f32.mrb[146].mxu1  ;;  %9994 = vmatprep.mubr.msk.f32.mxu0 %vm425_vm11, %v7289_v61  ;;  %v7259_v48 = vadd.f32 %v14236_v34, %v7222_v21 }
 0x570   : > { %v7165_v3 = vadd.f32 %v9952_v41, %v7133_v26  ;;  %v7061_v14 = vpop.f32.mrb[147].mxu1  ;;  %9995 = vmatmul.mubr.msk.f32.gmra.mrb[148].mxu0 %vm425_vm11, %v7290_v63  ;;  %v7292_v25 = vmax.f32 %v7260_v31, 0.0 }
 0x571   : > { %v7164_v53 = vadd.f32 %v7132_v52, %v7061_v14  ;;  %v7291_v22 = vmax.f32 %v7259_v48, 0.0  ;;  %v7225_v10 = vld [vmem:[#allocation3 + $0x98] sm:$0xff] }
 0x572   : > { %7197 = vst.msk [vmem:[#allocation3 + $0xb8] sm:$0xff] %vm425_vm11, %v7165_v3  ;;  %v7224_v4 = vld [vmem:[#allocation3 + $0x90] sm:$0xff]  ;;  %v7262_v20 = vadd.f32 %v14236_v34, %v7225_v10 }
 0x573   : > { %7196 = vst.msk [vmem:[#allocation3 + $0xb0] sm:$0xff] %vm425_vm11, %v7164_v53  ;;  %v9955_v5 = vpop.f32.mrb[148].mxu1  ;;  %9997 = vmatprep.mubr.msk.f32.mxu0 %vm425_vm11, %v7291_v22  ;;  %v7261_v13 = vadd.f32 %v14236_v34, %v7224_v4 }
 0x574   : > { %v7167_v30 = vadd.f32 %v9955_v5, %v7135_v15  ;;  %v7071_v2 = vpop.f32.mrb[149].mxu1  ;;  %9998 = vmatmul.mubr.msk.f32.gmra.mrb[150].mxu0 %vm425_vm11, %v7292_v25  ;;  %v7294_v43 = vmax.f32 %v7262_v20, 0.0 }
 0x575   : > { %v7166_v16 = vadd.f32 %v7134_v50, %v7071_v2  ;;  %v7293_v29 = vmax.f32 %v7261_v13, 0.0  ;;  %v7227_v12 = vld [vmem:[#allocation3 + $0xa8] sm:$0xff] }
 0x576   : > { %7199 = vst.msk [vmem:[#allocation3 + $0xc8] sm:$0xff] %vm425_vm11, %v7167_v30  ;;  %v7226_v54 = vld [vmem:[#allocation3 + $0xa0] sm:$0xff]  ;;  %v7264_v8 = vadd.f32 %v14236_v34, %v7227_v12  ;;  %v14337_v30 = vld [vmem:[%s14752_s3 + $0xc] ss:$0 sm:$0xff] }
 0x577   : > { %7198 = vst.msk [vmem:[#allocation3 + $0xc0] sm:$0xff] %vm425_vm11, %v7166_v16  ;;  %v9958_v62 = vpop.f32.mrb[150].mxu1  ;;  %10000 = vmatprep.mubr.msk.f32.mxu0 %vm425_vm11, %v7293_v29  ;;  %v7263_v36 = vadd.f32 %v14236_v34, %v7226_v54  ;;  %v14343_v16 = vld [vmem:[%s14752_s3 + $0xd] ss:$0 sm:$0xff] }
 0x578   : > { %v7169_v0 = vadd.f32 %v9958_v62, %v7137_v1  ;;  %v7081_v19 = vpop.f32.mrb[151].mxu1  ;;  %10001 = vmatmul.mubr.msk.f32.gmra.mrb[152].mxu0 %vm425_vm11, %v7294_v43  ;;  %v7296_v47 = vmax.f32 %v7264_v8, 0.0 }
 0x579   : > { %v7168_v56 = vadd.f32 %v7136_v46, %v7081_v19  ;;  %v7295_v39 = vmax.f32 %v7263_v36, 0.0  ;;  %v7229_v11 = vld [vmem:[#allocation3 + $0xb8] sm:$0xff] }
 0x57a   : > { %7201 = vst.msk [vmem:[#allocation3 + $0xd8] sm:$0xff] %vm425_vm11, %v7169_v0  ;;  %v7228_v37 = vld [vmem:[#allocation3 + $0xb0] sm:$0xff]  ;;  %v7266_v28 = vadd.f32 %v14236_v34, %v7229_v11 }
 0x57b   : > { %7200 = vst.msk [vmem:[#allocation3 + $0xd0] sm:$0xff] %vm425_vm11, %v7168_v56  ;;  %v9961_v38 = vpop.f32.mrb[152].mxu1  ;;  %10003 = vmatprep.mubr.msk.f32.mxu0 %vm425_vm11, %v7295_v39  ;;  %v7265_v40 = vadd.f32 %v14236_v34, %v7228_v37 }
 0x57c   : > { %v7171_v49 = vadd.f32 %v9961_v38, %v7139_v9  ;;  %v7091_v18 = vpop.f32.mrb[153].mxu1  ;;  %10004 = vmatmul.mubr.msk.f32.gmra.mrb[154].mxu0 %vm425_vm11, %v7296_v47  ;;  %v7298_v27 = vmax.f32 %v7266_v28, 0.0 }
 0x57d   : > { %v7170_v51 = vadd.f32 %v7138_v57, %v7091_v18  ;;  %v7297_v24 = vmax.f32 %v7265_v40, 0.0  ;;  %v7231_v35 = vld [vmem:[#allocation3 + $0xc8] sm:$0xff] }
 0x57e   : > { %7203 = vst.msk [vmem:[#allocation3 + $0xe8] sm:$0xff] %vm425_vm11, %v7171_v49  ;;  %v7230_v6 = vld [vmem:[#allocation3 + $0xc0] sm:$0xff]  ;;  %v7268_v44 = vadd.f32 %v14236_v34, %v7231_v35 }
 0x57f   : > { %7202 = vst.msk [vmem:[#allocation3 + $0xe0] sm:$0xff] %vm425_vm11, %v7170_v51  ;;  %v9964_v45 = vpop.f32.mrb[154].mxu1  ;;  %10006 = vmatprep.mubr.msk.f32.mxu0 %vm425_vm11, %v7297_v24  ;;  %v7267_v33 = vadd.f32 %v14236_v34, %v7230_v6 }
 0x580   : > { %v7173_v59 = vadd.f32 %v9964_v45, %v7141_v42  ;;  %v7101_v60 = vpop.f32.mrb[155].mxu1  ;;  %10007 = vmatmul.mubr.msk.f32.gmra.mrb[156].mxu0 %vm425_vm11, %v7298_v27  ;;  %v7300_v63 = vmax.f32 %v7268_v44, 0.0 }
 0x581   : > { %v7172_v17 = vadd.f32 %v7140_v23, %v7101_v60  ;;  %v7299_v61 = vmax.f32 %v7267_v33, 0.0  ;;  %v7233_v32 = vld [vmem:[#allocation3 + $0xd8] sm:$0xff] }
 0x582   : > { %7205 = vst.msk [vmem:[#allocation3 + $0xf8] sm:$0xff] %vm425_vm11, %v7173_v59  ;;  %v7232_v21 = vld [vmem:[#allocation3 + $0xd0] sm:$0xff]  ;;  %v7270_v31 = vadd.f32 %v14236_v34, %v7233_v32 }
 0x583   : > { %7204 = vst.msk [vmem:[#allocation3 + $0xf0] sm:$0xff] %vm425_vm11, %v7172_v17  ;;  %10009 = vmatprep.mubr.msk.f32.mxu0 %vm425_vm11, %v7299_v61  ;;  %v7269_v41 = vadd.f32 %v14236_v34, %v7232_v21 }
 0x584   : > { %10010 = vmatmul.mubr.msk.f32.gmra.mrb[158].mxu0 %vm425_vm11, %v7300_v63  ;;  %v7302_v3 = vmax.f32 %v7270_v31, 0.0 }
 0x585   : > { %v7301_v26 = vmax.f32 %v7269_v41, 0.0  ;;  %v7235_v48 = vld [vmem:[#allocation3 + $0xe8] sm:$0xff] }
 0x586   : > { %v7234_v14 = vld [vmem:[#allocation3 + $0xe0] sm:$0xff]  ;;  %v7272_v52 = vadd.f32 %v14236_v34, %v7235_v48 }
 0x587   : > { %10012 = vmatprep.mubr.msk.f32.mxu0 %vm425_vm11, %v7301_v26  ;;  %v7271_v53 = vadd.f32 %v14236_v34, %v7234_v14 }
 0x588   : > { %10013 = vmatmul.mubr.msk.f32.gmra.mrb[160].mxu0 %vm425_vm11, %v7302_v3  ;;  %v7304_v25 = vmax.f32 %v7272_v52, 0.0 }
 0x589   : > { %v7303_v22 = vmax.f32 %v7271_v53, 0.0  ;;  %v7237_v10 = vld [vmem:[#allocation3 + $0xf8] sm:$0xff] }
 0x58a   : > { %v7236_v4 = vld [vmem:[#allocation3 + $0xf0] sm:$0xff]  ;;  %v7274_v20 = vadd.f32 %v14236_v34, %v7237_v10 }
 0x58b   : > { %10015 = vmatprep.mubr.msk.f32.mxu0 %vm425_vm11, %v7303_v22  ;;  %v7273_v5 = vadd.f32 %v14236_v34, %v7236_v4 }
 0x58c   : > { %10016 = vmatmul.mubr.msk.f32.gmra.mrb[162].mxu0 %vm425_vm11, %v7304_v25  ;;  %v7306_v13 = vmax.f32 %v7274_v20, 0.0 }
 0x58d   : > { %v7305_v15 = vmax.f32 %v7273_v5, 0.0 }
 0x58f   : > { %10018 = vmatprep.mubr.msk.f32.mxu0 %vm425_vm11, %v7305_v15  ;;  %v10365_v15 = vmov 0  }
 0x590   : > { %10019 = vmatmul.mubr.msk.f32.gmra.mrb[164].mxu0 %vm425_vm11, %v7306_v13  ;;  %10265 = vset.pattern.permute.xlu0 %v10365_v15 }
 0x591   : > { %10029 = vmatprep.mubr.msk.f32.mxu0 %vm10362_vm0, %v14944_v55  ;;  %10264 = vset.pattern.permute.xlu1 %v10365_v15 }
 0x627   : > { %v9975_v2 = vpop.f32.mrb[134].mxu0 }
 0x628   : > { %v7484_v50 = vadd.f32 %v9975_v2, %v14337_v30  ;;  %v7478_v34 = vpop.f32.mrb[135].mxu0 }
 0x629   : > { %v7479_v29 = vadd.f32 %v14337_v30, %v7478_v34 }
 0x62a   : > { %v7638_v12 = vmax.f32 %v7484_v50, 0.0 }
 0x62b   : > { %v7637_v43 = vmax.f32 %v7479_v29, 0.0  ;;  %v9978_v54 = vpop.f32.mrb[136].mxu0 }
 0x62c   : > { %v7675_v8 = vmul.f32 %v14343_v16, %v7638_v12  ;;  %v7494_v62 = vadd.f32 %v9978_v54, %v14337_v30  ;;  %v7488_v1 = vpop.f32.mrb[137].mxu0 }
 0x62d   : > { %v7674_v36 = vmul.f32 %v14343_v16, %v7637_v43  ;;  %v7489_v0 = vadd.f32 %v14337_v30, %v7488_v1 }
 0x62e   : > { %v7640_v19 = vmax.f32 %v7494_v62, 0.0  ;;  %v7709_v46 = vsel %vm425_vm11, %v7675_v8, 0.0 }
 0x62f   : > { %v7639_v56 = vmax.f32 %v7489_v0, 0.0  ;;  %7710 = vadd.xlane.f32.xlu1 %v7709_v46  ;;  %v9981_v39 = vpop.f32.mrb[138].mxu0  ;;  %v7706_v11 = vsel %vm425_vm11, %v7674_v36, 0.0 }
 0x630   : > { %v7677_v47 = vmul.f32 %v14343_v16, %v7640_v19  ;;  %v7504_v37 = vadd.f32 %v9981_v39, %v14337_v30  ;;  %7707 = vadd.xlane.f32.xlu0 %v7706_v11  ;;  %v7498_v28 = vpop.f32.mrb[139].mxu0 }
 0x631   : > { %v7676_v38 = vmul.f32 %v14343_v16, %v7639_v56  ;;  %v7499_v9 = vadd.f32 %v14337_v30, %v7498_v28 }
 0x632   : > { %v7642_v40 = vmax.f32 %v7504_v37, 0.0  ;;  %v7715_v49 = vsel %vm425_vm11, %v7677_v47, 0.0 }
 0x633   : > { %v7641_v18 = vmax.f32 %v7499_v9, 0.0  ;;  %7716 = vadd.xlane.f32.xlu1 %v7715_v49  ;;  %v9984_v57 = vpop.f32.mrb[140].mxu0  ;;  %v7712_v51 = vsel %vm425_vm11, %v7676_v38, 0.0 }
 0x634   : > { %v7679_v24 = vmul.f32 %v14343_v16, %v7642_v40  ;;  %v7514_v35 = vadd.f32 %v9984_v57, %v14337_v30  ;;  %v7508_v27 = vpop.f32.mrb[141].mxu0  ;;  %7713 = vadd.xlane.f32.xlu0 %v7712_v51 }
 0x635   : > { %v7678_v6 = vmul.f32 %v14343_v16, %v7641_v18  ;;  %v7509_v44 = vadd.f32 %v14337_v30, %v7508_v27 }
 0x636   : > { %v7644_v45 = vmax.f32 %v7514_v35, 0.0  ;;  %v7721_v42 = vsel %vm425_vm11, %v7679_v24, 0.0 }
 0x637   : > { %v7643_v33 = vmax.f32 %v7509_v44, 0.0  ;;  %7722 = vadd.xlane.f32.xlu1 %v7721_v42  ;;  %v9987_v59 = vpop.f32.mrb[142].mxu0  ;;  %v7718_v60 = vsel %vm425_vm11, %v7678_v6, 0.0 }
 0x638   : > { %v7681_v23 = vmul.f32 %v14343_v16, %v7644_v45  ;;  %v7524_v17 = vadd.f32 %v9987_v59, %v14337_v30  ;;  %v7518_v61 = vpop.f32.mrb[143].mxu0  ;;  %7719 = vadd.xlane.f32.xlu0 %v7718_v60 }
 0x639   : > { %v7680_v32 = vmul.f32 %v14343_v16, %v7643_v33  ;;  %v7519_v63 = vadd.f32 %v14337_v30, %v7518_v61 }
 0x63a   : > { %v7646_v21 = vmax.f32 %v7524_v17, 0.0  ;;  %v7727_v31 = vsel %vm425_vm11, %v7681_v23, 0.0 }
 0x63b   : > { %v7645_v41 = vmax.f32 %v7519_v63, 0.0  ;;  %7728 = vadd.xlane.f32.xlu1 %v7727_v31  ;;  %v9990_v26 = vpop.f32.mrb[144].mxu0  ;;  %v7724_v48 = vsel %vm425_vm11, %v7680_v32, 0.0 }
 0x63c   : > { %v7683_v3 = vmul.f32 %v14343_v16, %v7646_v21  ;;  %v7534_v14 = vadd.f32 %v9990_v26, %v14337_v30  ;;  %v7528_v52 = vpop.f32.mrb[145].mxu0  ;;  %7725 = vadd.xlane.f32.xlu0 %v7724_v48 }
 0x63d   : > { %v7682_v53 = vmul.f32 %v14343_v16, %v7645_v41  ;;  %v7529_v22 = vadd.f32 %v14337_v30, %v7528_v52 }
 0x63e   : > { %v7648_v10 = vmax.f32 %v7534_v14, 0.0  ;;  %v7733_v25 = vsel %vm425_vm11, %v7683_v3, 0.0 }
 0x63f   : > { %v7647_v4 = vmax.f32 %v7529_v22, 0.0  ;;  %7734 = vadd.xlane.f32.xlu1 %v7733_v25  ;;  %v9993_v20 = vpop.f32.mrb[146].mxu0  ;;  %v7730_v5 = vsel %vm425_vm11, %v7682_v53, 0.0 }
 0x640   : > { %v7685_v13 = vmul.f32 %v14343_v16, %v7648_v10  ;;  %v7544_v2 = vadd.f32 %v9993_v20, %v14337_v30  ;;  %v7538_v50 = vpop.f32.mrb[147].mxu0  ;;  %7731 = vadd.xlane.f32.xlu0 %v7730_v5 }
 0x641   : > { %v7684_v34 = vmul.f32 %v14343_v16, %v7647_v4  ;;  %v7539_v29 = vadd.f32 %v14337_v30, %v7538_v50 }
 0x642   : > { %v7650_v12 = vmax.f32 %v7544_v2, 0.0  ;;  %v7739_v43 = vsel %vm425_vm11, %v7685_v13, 0.0 }
 0x643   : > { %v7649_v54 = vmax.f32 %v7539_v29, 0.0  ;;  %7740 = vadd.xlane.f32.xlu1 %v7739_v43  ;;  %v9996_v8 = vpop.f32.mrb[148].mxu0  ;;  %v7736_v62 = vsel %vm425_vm11, %v7684_v34, 0.0 }
 0x644   : > { %v7687_v1 = vmul.f32 %v14343_v16, %v7650_v12  ;;  %v7554_v36 = vadd.f32 %v9996_v8, %v14337_v30  ;;  %v7548_v0 = vpop.f32.mrb[149].mxu0  ;;  %7737 = vadd.xlane.f32.xlu0 %v7736_v62 }
 0x645   : > { %v7686_v19 = vmul.f32 %v14343_v16, %v7649_v54  ;;  %v7549_v46 = vadd.f32 %v14337_v30, %v7548_v0 }
 0x646   : > { %v7652_v56 = vmax.f32 %v7554_v36, 0.0  ;;  %v7745_v39 = vsel %vm425_vm11, %v7687_v1, 0.0 }
 0x647   : > { %v7651_v11 = vmax.f32 %v7549_v46, 0.0  ;;  %7746 = vadd.xlane.f32.xlu1 %v7745_v39  ;;  %v9999_v47 = vpop.f32.mrb[150].mxu0  ;;  %v7742_v37 = vsel %vm425_vm11, %v7686_v19, 0.0 }
 0x648   : > { %v7689_v28 = vmul.f32 %v14343_v16, %v7652_v56  ;;  %v7564_v38 = vadd.f32 %v9999_v47, %v14337_v30  ;;  %v7558_v9 = vpop.f32.mrb[151].mxu0  ;;  %7743 = vadd.xlane.f32.xlu0 %v7742_v37 }
 0x649   : > { %v7688_v40 = vmul.f32 %v14343_v16, %v7651_v11  ;;  %v7559_v49 = vadd.f32 %v14337_v30, %v7558_v9 }
 0x64a   : > { %v7654_v18 = vmax.f32 %v7564_v38, 0.0  ;;  %v7751_v57 = vsel %vm425_vm11, %v7689_v28, 0.0 }
 0x64b   : > { %v7653_v51 = vmax.f32 %v7559_v49, 0.0  ;;  %7752 = vadd.xlane.f32.xlu1 %v7751_v57  ;;  %v10002_v24 = vpop.f32.mrb[152].mxu0  ;;  %v7748_v35 = vsel %vm425_vm11, %v7688_v40, 0.0 }
 0x64c   : > { %v7691_v27 = vmul.f32 %v14343_v16, %v7654_v18  ;;  %v7574_v6 = vadd.f32 %v10002_v24, %v14337_v30  ;;  %v7568_v44 = vpop.f32.mrb[153].mxu0  ;;  %7749 = vadd.xlane.f32.xlu0 %v7748_v35 }
 0x64d   : > { %v7690_v45 = vmul.f32 %v14343_v16, %v7653_v51  ;;  %v7569_v42 = vadd.f32 %v14337_v30, %v7568_v44 }
 0x64e   : > { %v7656_v33 = vmax.f32 %v7574_v6, 0.0  ;;  %v7757_v59 = vsel %vm425_vm11, %v7691_v27, 0.0 }
 0x64f   : > { %v7655_v60 = vmax.f32 %v7569_v42, 0.0  ;;  %7758 = vadd.xlane.f32.xlu1 %v7757_v59  ;;  %v10005_v23 = vpop.f32.mrb[154].mxu0  ;;  %v7754_v17 = vsel %vm425_vm11, %v7690_v45, 0.0 }
 0x650   : > { %v7693_v61 = vmul.f32 %v14343_v16, %v7656_v33  ;;  %v7584_v32 = vadd.f32 %v10005_v23, %v14337_v30  ;;  %v7578_v63 = vpop.f32.mrb[155].mxu0  ;;  %7755 = vadd.xlane.f32.xlu0 %v7754_v17 }
 0x651   : > { %v7692_v21 = vmul.f32 %v14343_v16, %v7655_v60  ;;  %v7579_v31 = vadd.f32 %v14337_v30, %v7578_v63 }
 0x652   : > { %v7658_v41 = vmax.f32 %v7584_v32, 0.0  ;;  %v7763_v26 = vsel %vm425_vm11, %v7693_v61, 0.0 }
 0x653   : > { %v7657_v48 = vmax.f32 %v7579_v31, 0.0  ;;  %7764 = vadd.xlane.f32.xlu1 %v7763_v26  ;;  %v10008_v3 = vpop.f32.mrb[156].mxu0  ;;  %v7760_v14 = vsel %vm425_vm11, %v7692_v21, 0.0 }
 0x654   : > { %v7695_v52 = vmul.f32 %v14343_v16, %v7658_v41  ;;  %v7594_v53 = vadd.f32 %v10008_v3, %v14337_v30  ;;  %v7588_v22 = vpop.f32.mrb[157].mxu0  ;;  %7761 = vadd.xlane.f32.xlu0 %v7760_v14 }
 0x655   : > { %v7694_v10 = vmul.f32 %v14343_v16, %v7657_v48  ;;  %v7589_v25 = vadd.f32 %v14337_v30, %v7588_v22 }
 0x656   : > { %v7660_v4 = vmax.f32 %v7594_v53, 0.0  ;;  %v7769_v20 = vsel %vm425_vm11, %v7695_v52, 0.0 }
 0x657   : > { %v7659_v5 = vmax.f32 %v7589_v25, 0.0  ;;  %7770 = vadd.xlane.f32.xlu1 %v7769_v20  ;;  %v10011_v15 = vpop.f32.mrb[158].mxu0  ;;  %v7766_v13 = vsel %vm425_vm11, %v7694_v10, 0.0 }
 0x658   : > { %v7697_v2 = vmul.f32 %v14343_v16, %v7660_v4  ;;  %v7604_v50 = vadd.f32 %v10011_v15, %v14337_v30  ;;  %v7598_v34 = vpop.f32.mrb[159].mxu0  ;;  %7767 = vadd.xlane.f32.xlu0 %v7766_v13 }
 0x659   : > { %v7696_v29 = vmul.f32 %v14343_v16, %v7659_v5  ;;  %v7599_v12 = vadd.f32 %v14337_v30, %v7598_v34 }
 0x65a   : > { %v7662_v43 = vmax.f32 %v7604_v50, 0.0  ;;  %v7775_v54 = vsel %vm425_vm11, %v7697_v2, 0.0 }
 0x65b   : > { %v7661_v8 = vmax.f32 %v7599_v12, 0.0  ;;  %7776 = vadd.xlane.f32.xlu1 %v7775_v54  ;;  %v10014_v62 = vpop.f32.mrb[160].mxu0  ;;  %v7772_v1 = vsel %vm425_vm11, %v7696_v29, 0.0 }
 0x65c   : > { %v7699_v36 = vmul.f32 %v14343_v16, %v7662_v43  ;;  %v7614_v0 = vadd.f32 %v10014_v62, %v14337_v30  ;;  %v7608_v19 = vpop.f32.mrb[161].mxu0  ;;  %7773 = vadd.xlane.f32.xlu0 %v7772_v1 }
 0x65d   : > { %v7698_v46 = vmul.f32 %v14343_v16, %v7661_v8  ;;  %v7609_v56 = vadd.f32 %v14337_v30, %v7608_v19 }
 0x65e   : > { %v7664_v39 = vmax.f32 %v7614_v0, 0.0  ;;  %v7781_v11 = vsel %vm425_vm11, %v7699_v36, 0.0 }
 0x65f   : > { %v7663_v47 = vmax.f32 %v7609_v56, 0.0  ;;  %7782 = vadd.xlane.f32.xlu1 %v7781_v11  ;;  %v10017_v37 = vpop.f32.mrb[162].mxu0  ;;  %v7778_v28 = vsel %vm425_vm11, %v7698_v46, 0.0 }
 0x660   : > { %v7701_v38 = vmul.f32 %v14343_v16, %v7664_v39  ;;  %v7624_v9 = vadd.f32 %v10017_v37, %v14337_v30  ;;  %v7618_v40 = vpop.f32.mrb[163].mxu0  ;;  %7779 = vadd.xlane.f32.xlu0 %v7778_v28 }
 0x661   : > { %v7700_v49 = vmul.f32 %v14343_v16, %v7663_v47  ;;  %v7619_v18 = vadd.f32 %v14337_v30, %v7618_v40 }
 0x662   : > { %v7666_v57 = vmax.f32 %v7624_v9, 0.0  ;;  %v7787_v51 = vsel %vm425_vm11, %v7701_v38, 0.0 }
 0x663   : > { %v7665_v24 = vmax.f32 %v7619_v18, 0.0  ;;  %7788 = vadd.xlane.f32.xlu1 %v7787_v51  ;;  %v10020_v35 = vpop.f32.mrb[164].mxu0  ;;  %v7784_v27 = vsel %vm425_vm11, %v7700_v49, 0.0 }
 0x664   : > { %v7703_v6 = vmul.f32 %v14343_v16, %v7666_v57  ;;  %v7634_v44 = vadd.f32 %v10020_v35, %v14337_v30  ;;  %v7628_v45 = vpop.f32.mrb[165].mxu0  ;;  %7785 = vadd.xlane.f32.xlu0 %v7784_v27 }
 0x665   : > { %v7702_v42 = vmul.f32 %v14343_v16, %v7665_v24  ;;  %v7629_v33 = vadd.f32 %v14337_v30, %v7628_v45  ;;  %v14443_v30 = vld [vmem:[%s14752_s3 + $0xe] ss:$0 sm:$0xff] }
 0x666   : > { %v7668_v59 = vmax.f32 %v7634_v44, 0.0  ;;  %v7793_v60 = vsel %vm425_vm11, %v7703_v6, 0.0 }
 0x667   : > { %v7667_v23 = vmax.f32 %v7629_v33, 0.0  ;;  %7794 = vadd.xlane.f32.xlu1 %v7793_v60  ;;  %v7790_v17 = vsel %vm425_vm11, %v7702_v42, 0.0 }
 0x668   : > { %v7705_v61 = vmul.f32 %v14343_v16, %v7668_v59  ;;  %7791 = vadd.xlane.f32.xlu0 %v7790_v17 }
 0x669   : > { %v7704_v32 = vmul.f32 %v14343_v16, %v7667_v23 }
 0x66a   : > { %v7799_v63 = vsel %vm425_vm11, %v7705_v61, 0.0 }
 0x66b   : > { %7800 = vadd.xlane.f32.xlu1 %v7799_v63  ;;  %v7796_v21 = vsel %vm425_vm11, %v7704_v32, 0.0 }
 0x66c   : > { %7797 = vadd.xlane.f32.xlu0 %v7796_v21 }
 0x6bc   : > { %v7711_v31 = vpop.xlane.xlu1 %7710 }
 0x6bd   : > { %v7808_v41 = vadd.f32 %v14443_v30, %v7711_v31  ;;  %v7708_v26 = vpop.xlane.xlu0 %7707 }
 0x6be   : > { %v7807_v3 = vadd.f32 %v14443_v30, %v7708_v26 }
 0x6bf   : > { %7859 = vperm.xlu1 %10264, %v7808_v41  }
 0x6c0   : > { %v7717_v48 = vpop.xlane.xlu1 %7716 }
 0x6c1   : > { %v7714_v16 = vpop.xlane.xlu0 %7713  ;;  %v7810_v52 = vadd.f32 %v14443_v30, %v7717_v48 }
 0x6c2   : > { %v7809_v25 = vadd.f32 %v14443_v30, %v7714_v16 }
 0x6c3   : > { %7854 = vperm.xlu1 %10264, %v7807_v3   ;;  %v14946_v3 = vld [vmem:[#allocation8_spill] sm:$0xff] }
 0x6c4   : > { %v7723_v14 = vpop.xlane.xlu1 %7722  ;;  %v7839_v16 = vadd.s32 128, %v14946_v3 }
 0x6c5   : > { %v7812_v53 = vadd.f32 %v14443_v30, %v7723_v14  ;;  %v7720_v22 = vpop.xlane.xlu0 %7719  ;;  %v7840_v14 = vmul.u32 32, %v10459_v7 }
 0x6c6   : > { %v7811_v15 = vadd.f32 %v14443_v30, %v7720_v22  ;;  %v8115_v22 = vld [vmem:[%s14751_s2 + $0x8] sm:$0xff] }
 0x6c7   : > { %7869 = vperm.xlu1 %10264, %v7810_v52   ;;  %7879 = vperm.xlu0 %10265, %v7812_v53   ;;  %vm7842_vm2 = vcmp.ge.s32.totalorder %v7839_v16, %v7840_v14  ;;  %v7843_v52 = vadd.s32 32, %v7840_v14  ;;  %vm7841_vm6 = vcmp.ge.s32.totalorder %v14946_v3, %v7840_v14  ;;  %v8114_v53 = vld [vmem:[%s14751_s2] sm:$0xff] }
 0x6c8   : > { %v7729_v10 = vpop.xlane.xlu1 %7728  ;;  %v10169_v7 = vpack.c.bf16 %v8115_v22, %v8114_v53 }
 0x6c9   : > { %v7814_v4 = vadd.f32 %v14443_v30, %v7729_v10  ;;  %v7726_v20 = vpop.xlane.xlu0 %7725  ;;  %vm7844_vm7 = vcmp.lt.s32.totalorder %v14946_v3, %v7843_v52  ;;  %vm7845_vm8 = vcmp.lt.s32.totalorder %v7839_v16, %v7843_v52  ;;  %v8117_v10 = vld [vmem:[%s14751_s2 + $0x18] sm:$0xff] }
 0x6ca   : > { %v7813_v34 = vadd.f32 %v14443_v30, %v7726_v20  ;;  %vm14493_vm9 = vmand %vm7842_vm2, %vm7845_vm8  ;;  %10170 = vmatpush3.bf16.msra.mxu0 %v10169_v7  ;;  %v8515_v20 = vld [vmem:[%s14750_s1 + $0x258] sm:$0xff] }
 0x6cb   : > { %7889 = vperm.xlu0 %10265, %v7814_v4   ;;  %7864 = vperm.xlu1 %10264, %v7809_v25   ;;  %v10366_v4 = vmov 1.0   ;;  %vm14500_vm10 = vmand %vm7841_vm6, %vm7844_vm7  ;;  %v8516_v25 = vld [vmem:[%s14750_s1 + $0x260] sm:$0xff] }
 0x6cc   : > { %v7735_v5 = vpop.xlane.xlu1 %7734  ;;  %8994 = vmatprep.mubr.msk.f32.mxu1 %vm14493_vm9, %v10366_v4  ;;  %10171 = vmatprep.subr.bf16.mxu0 %v14945_v58 }
 0x6cd   : > { %v7816_v13 = vadd.f32 %v14443_v30, %v7735_v5  ;;  %v7732_v2 = vpop.xlane.xlu0 %7731 }
 0x6ce   : > { %v7815_v54 = vadd.f32 %v14443_v30, %v7732_v2 }
 0x6cf   : > { %7899 = vperm.xlu0 %10265, %v7816_v13   ;;  %7874 = vperm.xlu1 %10264, %v7811_v15  }
 0x6d0   : > { %v7741_v50 = vpop.xlane.xlu1 %7740 }
 0x6d1   : > { %v7818_v29 = vadd.f32 %v14443_v30, %v7741_v50  ;;  %v7738_v12 = vpop.xlane.xlu0 %7737 }
 0x6d2   : > { %v7817_v1 = vadd.f32 %v14443_v30, %v7738_v12 }
 0x6d3   : > { %7909 = vperm.xlu0 %10265, %v7818_v29   ;;  %7884 = vperm.xlu1 %10264, %v7813_v34  }
 0x6d4   : > { %v7747_v43 = vpop.xlane.xlu1 %7746 }
 0x6d5   : > { %v7744_v8 = vpop.xlane.xlu0 %7743  ;;  %v7820_v37 = vadd.f32 %v14443_v30, %v7747_v43 }
 0x6d6   : > { %v7819_v19 = vadd.f32 %v14443_v30, %v7744_v8 }
 0x6d7   : > { %7894 = vperm.xlu1 %10264, %v7815_v54  }
 0x6d8   : > { %v7753_v62 = vpop.xlane.xlu1 %7752 }
 0x6d9   : > { %v7750_v36 = vpop.xlane.xlu0 %7749  ;;  %v7822_v31 = vadd.f32 %v14443_v30, %v7753_v62 }
 0x6da   : > { %v7821_v48 = vadd.f32 %v14443_v30, %v7750_v36 }
 0x6db   : > { %7904 = vperm.xlu1 %10264, %v7817_v1  }
 0x6dc   : > { %v7759_v0 = vpop.xlane.xlu1 %7758 }
 0x6dd   : > { %v7756_v46 = vpop.xlane.xlu0 %7755  ;;  %v7824_v11 = vadd.f32 %v14443_v30, %v7759_v0 }
 0x6de   : > { %v7823_v56 = vadd.f32 %v14443_v30, %v7756_v46 }
 0x6df   : > { %7914 = vperm.xlu1 %10264, %v7819_v19   ;;  %v14951_v19 = vld [vmem:[#allocation9_spill] sm:$0xff] }
 0x6e0   : > { %v7765_v39 = vpop.xlane.xlu1 %7764  ;;  %7934 = vperm.xlu0 %10265, %v7823_v56  }
 0x6e1   : > { %v7762_v47 = vpop.xlane.xlu0 %7761  ;;  %v7826_v38 = vadd.f32 %v14443_v30, %v7765_v39 }
 0x6e2   : > { %v7825_v18 = vadd.f32 %v14443_v30, %v7762_v47 }
 0x6e3   : > { %7939 = vperm.xlu1 %10264, %v7824_v11   ;;  %v14952_v11 = vld [vmem:[#allocation10_spill] sm:$0xff] }
 0x6e4   : > { %v7771_v28 = vpop.xlane.xlu1 %7770  ;;  %7919 = vperm.xlu0 %10265, %v7820_v37  }
 0x6e5   : > { %v7828_v9 = vadd.f32 %v14443_v30, %v7771_v28  ;;  %v7768_v40 = vpop.xlane.xlu0 %7767 }
 0x6e6   : > { %v7827_v35 = vadd.f32 %v14443_v30, %v7768_v40 }
 0x6e7   : > { %7949 = vperm.xlu1 %10264, %v7826_v38  }
 0x6e8   : > { %v7777_v49 = vpop.xlane.xlu1 %7776  ;;  %7959 = vperm.xlu0 %10265, %v7828_v9  }
 0x6e9   : > { %v7830_v57 = vadd.f32 %v14443_v30, %v7777_v49  ;;  %v7774_v51 = vpop.xlane.xlu0 %7773 }
 0x6ea   : > { %v7829_v45 = vadd.f32 %v14443_v30, %v7774_v51 }
 0x6eb   : > { %7944 = vperm.xlu1 %10264, %v7825_v18   ;;  %v14953_v18 = vld [vmem:[#allocation23_spill] sm:$0xff] }
 0x6ec   : > { %v7783_v24 = vpop.xlane.xlu1 %7782  ;;  %7969 = vperm.xlu0 %10265, %v7830_v57  }
 0x6ed   : > { %v7832_v27 = vadd.f32 %v14443_v30, %v7783_v24  ;;  %v7780_v6 = vpop.xlane.xlu0 %7779  ;;  %v14954_v24 = vld [vmem:[#allocation17_spill] sm:$0xff] }
 0x6ee   : > { %v7831_v60 = vadd.f32 %v14443_v30, %v7780_v6 }
 0x6ef   : > { %7954 = vperm.xlu1 %10264, %v7827_v35  }
 0x6f0   : > { %v7789_v44 = vpop.xlane.xlu1 %7788  ;;  %7979 = vperm.xlu0 %10265, %v7832_v27  }
 0x6f1   : > { %v7834_v42 = vadd.f32 %v14443_v30, %v7789_v44  ;;  %v7786_v33 = vpop.xlane.xlu0 %7785 }
 0x6f2   : > { %v7833_v32 = vadd.f32 %v14443_v30, %v7786_v33 }
 0x6f3   : > { %7964 = vperm.xlu1 %10264, %v7829_v45  }
 0x6f4   : > { %v7795_v59 = vpop.xlane.xlu1 %7794  ;;  %7989 = vperm.xlu0 %10265, %v7834_v42  }
 0x6f5   : > { %v7836_v23 = vadd.f32 %v14443_v30, %v7795_v59  ;;  %v7792_v17 = vpop.xlane.xlu0 %7791 }
 0x6f6   : > { %v7835_v21 = vadd.f32 %v14443_v30, %v7792_v17 }
 0x6f7   : > { %7974 = vperm.xlu1 %10264, %v7831_v60  }
 0x6f8   : > { %v7801_v61 = vpop.xlane.xlu1 %7800  ;;  %7999 = vperm.xlu0 %10265, %v7836_v23  }
 0x6f9   : > { %v7838_v63 = vadd.f32 %v14443_v30, %v7801_v61  ;;  %v7798_v41 = vpop.xlane.xlu0 %7797 }
 0x6fa   : > { %v7837_v26 = vadd.f32 %v14443_v30, %v7798_v41  ;;  %v8116_v30 = vld [vmem:[%s14751_s2 + $0x10] sm:$0xff] }
 0x6fb   : > { %7984 = vperm.xlu1 %10264, %v7833_v32   ;;  %v10172_v5 = vpack.c.bf16 %v8117_v10, %v8116_v30 }
 0x6fc   : > { %8009 = vperm.xlu0 %10265, %v7838_v63  }
 0x6fd   : > { %10173 = vmatpush3.bf16.msra.mxu0 %v10172_v5 }
 0x6fe   : > { %10037 = vmatprep.subr.mxu0 %v14944_v55 }
 0x6ff   : > { %7994 = vperm.xlu1 %10264, %v7835_v21  }
 0x700   : > { %7929 = vperm.xlu0 %10265, %v7822_v31  }
 0x703   : > { %8004 = vperm.xlu1 %10264, %v7837_v26  }
 0x707   : > { %7924 = vperm.xlu1 %10264, %v7821_v48  }
 0x73e   : > { %v7860_v15 = vpop.permute.xlu1 %7859 }
 0x73f   : > { %v8013_v28 = vmul.f32 %v14952_v11, %v7860_v15 }
 0x742   : > { %v7855_v13 = vpop.permute.xlu1 %7854 }
 0x743   : > { %v8012_v46 = vmul.f32 %v14951_v19, %v7855_v13 }
 0x745   : > { %v10138_v9 = vpack.c.bf16 %v8013_v28, %v8012_v46 }
 0x746   : > { %v7870_v2 = vpop.permute.xlu1 %7869  ;;  %v7880_v50 = vpop.permute.xlu0 %7879 }
 0x747   : > { %v8015_v44 = vmul.f32 %v14954_v24, %v7870_v2  ;;  %v8017_v61 = vmul.f32 %v14952_v11, %v7880_v50 }
 0x74a   : > { %v7865_v34 = vpop.permute.xlu1 %7864  ;;  %v7890_v12 = vpop.permute.xlu0 %7889 }
 0x74b   : > { %v8014_v57 = vmul.f32 %v14953_v18, %v7865_v34  ;;  %v8019_v3 = vmul.f32 %v14954_v24, %v7890_v12 }
 0x74d   : > { %v10142_v42 = vpack.c.bf16 %v8015_v44, %v8014_v57  ;;  %v8997_v44 = vld [vmem:[%s14752_s3 + $0xf] ss:$0 sm:$0xff] }
 0x74e   : > { %v7875_v29 = vpop.permute.xlu1 %7874  ;;  %v7900_v54 = vpop.permute.xlu0 %7899 }
 0x74f   : > { %v8016_v33 = vmul.f32 %v14951_v19, %v7875_v29  ;;  %v8021_v7 = vmul.f32 %v14952_v11, %v7900_v54 }
 0x751   : > { %v10146_v63 = vpack.c.bf16 %v8017_v61, %v8016_v33 }
 0x752   : > { %v7885_v43 = vpop.permute.xlu1 %7884  ;;  %v7910_v1 = vpop.permute.xlu0 %7909 }
 0x753   : > { %v8018_v21 = vmul.f32 %v14953_v18, %v7885_v43  ;;  %v8023_v29 = vmul.f32 %v14954_v24, %v7910_v1 }
 0x755   : > { %v10150_v14 = vpack.c.bf16 %v8019_v3, %v8018_v21 }
 0x756   : > { %v7895_v8 = vpop.permute.xlu1 %7894 }
 0x757   : > { %v8020_v52 = vmul.f32 %v14951_v19, %v7895_v8 }
 0x759   : > { %v10154_v15 = vpack.c.bf16 %v8021_v7, %v8020_v52  ;;  %v8419_v52 = vld [vmem:[%s14750_s1 + $0x1c8] sm:$0xff]  ;;  %v8420_v7 = vld [vmem:[%s14750_s1 + $0x1d0] sm:$0xff] }
 0x75a   : > { %v7905_v62 = vpop.permute.xlu1 %7904 }
 0x75b   : > { %v8022_v13 = vmul.f32 %v14953_v18, %v7905_v62 }
 0x75d   : > { %v10158_v43 = vpack.c.bf16 %v8023_v29, %v8022_v13  ;;  %v8404_v13 = vld [vmem:[%s14750_s1 + $0x150] sm:$0xff] }
 0x75e   : > { %v14506_v36 = vpop.permute.xlu1 %7914 }
 0x75f   : > { %v7935_v0 = vpop.permute.xlu0 %7934  ;;  %v8024_v62 = vmul.f32 %v14951_v19, %v14506_v36  ;;  %v8998_v36 = vld [vmem:[%s14752_s3 + $0x10] ss:$0 sm:$0xff] }
 0x760   : > { %v8028_v39 = vmul.f32 %v14951_v19, %v7935_v0  ;;  %8203 = vrot.lane.b32.xlu1 %v8998_v36, %s10367_s14  ;;  %v8412_v36 = vld [vmem:[%s14750_s1 + $0x190] sm:$0xff] }
 0x762   : > { %v7940_v56 = vpop.permute.xlu1 %7939 }
 0x763   : > { %v8029_v47 = vmul.f32 %v14952_v11, %v7940_v56  ;;  %v7920_v37 = vpop.permute.xlu0 %7919 }
 0x764   : > { %v8025_v8 = vmul.f32 %v14952_v11, %v7920_v37 }
 0x765   : > { %v10136_v38 = vpack.c.bf16 %v8029_v47, %v8028_v39 }
 0x766   : > { %v7950_v40 = vpop.permute.xlu1 %7949  ;;  %v10162_v47 = vpack.c.bf16 %v8025_v8, %v8024_v62  ;;  %v8407_v8 = vld [vmem:[%s14750_s1 + $0x168] sm:$0xff]  ;;  %v8408_v62 = vld [vmem:[%s14750_s1 + $0x170] sm:$0xff] }
 0x767   : > { %10137 = vmatprep.subr.bf16.mxu1 %v10136_v38  ;;  %v7960_v49 = vpop.permute.xlu0 %7959  ;;  %v8031_v35 = vmul.f32 %v14954_v24, %v7950_v40 }
 0x768   : > { %10139 = vmatpush3.bf16.msra.mxu1 %v10138_v9  ;;  %v8033_v60 = vmul.f32 %v14952_v11, %v7960_v49 }
 0x76a   : > { %v7945_v51 = vpop.permute.xlu1 %7944 }
 0x76b   : > { %v8030_v27 = vmul.f32 %v14953_v18, %v7945_v51  ;;  %v7970_v6 = vpop.permute.xlu0 %7969 }
 0x76c   : > { %v8035_v41 = vmul.f32 %v14954_v24, %v7970_v6  ;;  %v8999_v6 = vld [vmem:[%s14752_s3 + $0x11] ss:$0 sm:$0xff] }
 0x76d   : > { %v10140_v45 = vpack.c.bf16 %v8031_v35, %v8030_v27 }
 0x76e   : > { %v7955_v59 = vpop.permute.xlu1 %7954 }
 0x76f   : > { %v8032_v23 = vmul.f32 %v14951_v19, %v7955_v59  ;;  %10141 = vmatprep.subr.bf16.mxu1 %v10140_v45  ;;  %v7980_v17 = vpop.permute.xlu0 %7979 }
 0x770   : > { %10143 = vmatpush3.bf16.msra.mxu1 %v10142_v42  ;;  %v8037_v22 = vmul.f32 %v14952_v11, %v7980_v17 }
 0x771   : > { %v10144_v32 = vpack.c.bf16 %v8033_v60, %v8032_v23 }
 0x772   : > { %v7965_v31 = vpop.permute.xlu1 %7964 }
 0x773   : > { %v8034_v26 = vmul.f32 %v14953_v18, %v7965_v31  ;;  %10145 = vmatprep.subr.bf16.mxu1 %v10144_v32  ;;  %v7990_v48 = vpop.permute.xlu0 %7989 }
 0x774   : > { %10147 = vmatpush3.bf16.msra.mxu1 %v10146_v63  ;;  %v8039_v50 = vmul.f32 %v14954_v24, %v7990_v48 }
 0x775   : > { %v10148_v16 = vpack.c.bf16 %v8035_v41, %v8034_v26 }
 0x776   : > { %v7975_v53 = vpop.permute.xlu1 %7974 }
 0x777   : > { %v8036_v30 = vmul.f32 %v14951_v19, %v7975_v53  ;;  %10149 = vmatprep.subr.bf16.mxu1 %v10148_v16  ;;  %v8000_v10 = vpop.permute.xlu0 %7999  ;;  %v8402_v53 = vld [vmem:[%s14750_s1 + $0x140] sm:$0xff] }
 0x778   : > { %10151 = vmatpush3.bf16.msra.mxu1 %v10150_v14  ;;  %v8041_v46 = vmul.f32 %v14952_v11, %v8000_v10  ;;  %v8418_v14 = vld [vmem:[%s14750_s1 + $0x1c0] sm:$0xff]  ;;  %v8421_v10 = vld [vmem:[%s14750_s1 + $0x1d8] sm:$0xff] }
 0x779   : > { %v10152_v5 = vpack.c.bf16 %v8037_v22, %v8036_v30  ;;  %v10174_v22 = vpack.c.bf16 %v8419_v52, %v8418_v14  ;;  %v8403_v30 = vld [vmem:[%s14750_s1 + $0x148] sm:$0xff]  ;;  %v8514_v52 = vld [vmem:[%s14750_s1 + $0x250] sm:$0xff] }
 0x77a   : > { %v7985_v2 = vpop.permute.xlu1 %7984 }
 0x77b   : > { %v8038_v34 = vmul.f32 %v14953_v18, %v7985_v2  ;;  %10153 = vmatprep.subr.bf16.mxu1 %v10152_v5  ;;  %v8010_v54 = vpop.permute.xlu0 %8009  ;;  %v10176_v5 = vpack.c.bf16 %v8403_v30, %v8402_v53  ;;  %v8405_v2 = vld [vmem:[%s14750_s1 + $0x158] sm:$0xff]  ;;  %v8517_v53 = vld [vmem:[%s14750_s1 + $0x268] sm:$0xff] }
 0x77c   : > { %10155 = vmatpush3.bf16.msra.mxu1 %v10154_v15  ;;  %v8043_v1 = vmul.f32 %v14954_v24, %v8010_v54  ;;  %v10178_v15 = vpack.c.bf16 %v8421_v10, %v8420_v7  ;;  %v10180_v29 = vpack.c.bf16 %v8405_v2, %v8404_v13  ;;  %v8424_v54 = vld [vmem:[%s14750_s1 + $0x1f0] sm:$0xff] }
 0x77d   : > { %v10156_v12 = vpack.c.bf16 %v8039_v50, %v8038_v34  ;;  %v8422_v50 = vld [vmem:[%s14750_s1 + $0x1e0] sm:$0xff]  ;;  %v8423_v34 = vld [vmem:[%s14750_s1 + $0x1e8] sm:$0xff] }
 0x77e   : > { %v7995_v0 = vpop.permute.xlu1 %7994 }
 0x77f   : > { %v8040_v56 = vmul.f32 %v14951_v19, %v7995_v0  ;;  %10157 = vmatprep.subr.bf16.mxu1 %v10156_v12  ;;  %v7930_v37 = vpop.permute.xlu0 %7929  ;;  %v10182_v12 = vpack.c.bf16 %v8423_v34, %v8422_v50  ;;  %v8425_v0 = vld [vmem:[%s14750_s1 + $0x1f8] sm:$0xff] }
 0x780   : > { %10159 = vmatpush3.bf16.msra.mxu1 %v10158_v43  ;;  %v8027_v11 = vmul.f32 %v14954_v24, %v7930_v37  ;;  %v8406_v43 = vld [vmem:[%s14750_s1 + $0x160] sm:$0xff] }
 0x781   : > { %v10160_v39 = vpack.c.bf16 %v8041_v46, %v8040_v56  ;;  %v10184_v46 = vpack.c.bf16 %v8407_v8, %v8406_v43  ;;  %v10186_v56 = vpack.c.bf16 %v8425_v0, %v8424_v54  ;;  %v8410_v37 = vld [vmem:[%s14750_s1 + $0x180] sm:$0xff]  ;;  %v8591_v8 = vld [vmem:[%s14752_s3 + $0x13] sm:$0x1] }
 0x782   : > { %v8005_v28 = vpop.permute.xlu1 %8004 }
 0x783   : > { %v8042_v38 = vmul.f32 %v14953_v18, %v8005_v28  ;;  %10161 = vmatprep.subr.bf16.mxu1 %v10160_v39  ;;  %v8409_v39 = vld [vmem:[%s14750_s1 + $0x178] sm:$0xff]  ;;  %v8427_v28 = vld [vmem:[%s14750_s1 + $0x208] sm:$0xff] }
 0x784   : > { %10163 = vmatpush3.bf16.msra.mxu1 %v10162_v47  ;;  %v8426_v47 = vld [vmem:[%s14750_s1 + $0x200] sm:$0xff] }
 0x785   : > { %v10164_v9 = vpack.c.bf16 %v8043_v1, %v8042_v38  ;;  %v10188_v1 = vpack.c.bf16 %v8409_v39, %v8408_v62  ;;  %v10190_v38 = vpack.c.bf16 %v8427_v28, %v8426_v47 }
 0x786   : > { %v7925_v40 = vpop.permute.xlu1 %7924 }
 0x787   : > { %v8026_v49 = vmul.f32 %v14953_v18, %v7925_v40  ;;  %10165 = vmatprep.subr.bf16.mxu1 %v10164_v9  ;;  %v8411_v9 = vld [vmem:[%s14750_s1 + $0x188] sm:$0xff]  ;;  %v8428_v40 = vld [vmem:[%s14750_s1 + $0x210] sm:$0xff] }
 0x789   : > { %v10166_v57 = vpack.c.bf16 %v8027_v11, %v8026_v49  ;;  %v8429_v11 = vld [vmem:[%s14750_s1 + $0x218] sm:$0xff]  ;;  %v10192_v49 = vpack.c.bf16 %v8411_v9, %v8410_v37 }
 0x78b   : > { %10167 = vmatpush3.bf16.msra.mxu1 %v10166_v57  ;;  %v10194_v57 = vpack.c.bf16 %v8429_v11, %v8428_v40 }
 0x78c   : > { %10032 = vmatprep.subr.mxu1 %v14944_v55 }
 0x78e   : > { %8995 = vmatmul.mubr.msk.f32.vlgmr.msra.gmra.mrb[156].mxu1 %vm14500_vm10, %v10366_v4 }
 0x78f   : > { %10034 = vmatprep.mubr.msk.f32.mxu1 %vm10362_vm0, %v14944_v55 }
 0x7d2   : > { %v8204_v4 = vpop.permute.xlu1 %8203 }
 0x861   : > { %v9402_v19 = vpop.f32.mrb[156].mxu1 }
 0x862   : > { %v9403_v18 = vpop.f32.mrb[157].mxu1 }
 0x863   : > { %v14551_v51 = vadd.f32 %v9403_v18, %v9402_v19  ;;  %v8413_v19 = vld [vmem:[%s14750_s1 + $0x198] sm:$0xff] }
 0x864   : > { %v10196_v18 = vpack.c.bf16 %v8413_v19, %v8412_v36 }
 0x865   : > { %10030 = vmatmul.mubr.msk.f32.vlgmr.msra.gmra.mrb[166].mxu0 %vm425_vm11, %v14551_v51 }
 0x866   : > { %10039 = vmatprep.mubr.msk.f32.mxu0 %vm10362_vm0, %v14944_v55 }
 0x938   : > { %v8187_v24 = vpop.f32.mrb[166].mxu0 }
 0x939   : > { %v8206_v35 = vadd.f32 %v8204_v4, %v8187_v24  ;;  %v10031_v27 = vpop.f32.mrb[167].mxu0  ;;  %v8196_v42 = vadd.f32 %v8997_v44, %v8187_v24  ;;  %v8430_v4 = vld [vmem:[%s14750_s1 + $0x220] sm:$0xff] }
 0x93b   : > { %8218 = vrot.lane.b32.xlu0 %v8206_v35, %s10368_s20  ;;  %v8414_v35 = vld [vmem:[%s14750_s1 + $0x1a0] sm:$0xff] }
 0x93f   : > { %8213 = vrot.lane.b32.xlu0 %v8999_v6, %s10369_s27  ;;  %v8415_v6 = vld [vmem:[%s14750_s1 + $0x1a8] sm:$0xff] }
 0x940   : > { %v10200_v44 = vpack.c.bf16 %v8415_v6, %v8414_v35 }
 0x9ad   : > { %v8219_v45 = vpop.permute.xlu0 %8218 }
 0x9ae   : > { %10033 = vmatpush3.xpose.msk.msra.mxu1 %vm425_vm11, %v8219_v45  ;;  %v8432_v45 = vld [vmem:[%s14750_s1 + $0x230] sm:$0xff] }
 0x9af   : > { %10175 = vmatprep.subr.bf16.mxu1 %v10174_v22  ;;  %v10210_v22 = vpack.c.bf16 %v8517_v53, %v8516_v25 }
 0x9b1   : > { %10035 = vmatmul.mubr.msk.f32.vlgmr.msra.gmra.mrb[158].mxu1 %vm425_vm11, %v8196_v42  ;;  %v8214_v17 = vpop.permute.xlu0 %8213  ;;  %v8433_v42 = vld [vmem:[%s14750_s1 + $0x238] sm:$0xff] }
 0x9b2   : > { %v8216_v61 = vadd.f32 %v8214_v17, %v8187_v24  ;;  %10177 = vmatpush3.bf16.msra.mxu1 %v10176_v5  ;;  %v8431_v24 = vld [vmem:[%s14750_s1 + $0x228] sm:$0xff] }
 0x9b3   : > { %10179 = vmatprep.subr.bf16.mxu1 %v10178_v15  ;;  %v10198_v27 = vpack.c.bf16 %v8431_v24, %v8430_v4 }
 0x9b6   : > { %10181 = vmatpush3.bf16.msra.mxu1 %v10180_v29  ;;  %v8511_v29 = vld [vmem:[%s14752_s3 + $0x12] sm:$0x1] }
 0x9b7   : > { %10183 = vmatprep.subr.bf16.mxu1 %v10182_v12 }
 0x9ba   : > { %10185 = vmatpush3.bf16.msra.mxu1 %v10184_v46 }
 0x9bb   : > { %10187 = vmatprep.subr.bf16.mxu1 %v10186_v56 }
 0x9be   : > { %10189 = vmatpush3.bf16.msra.mxu1 %v10188_v1 }
 0x9bf   : > { %10191 = vmatprep.subr.bf16.mxu1 %v10190_v38 }
 0x9c2   : > { %10193 = vmatpush3.bf16.msra.mxu1 %v10192_v49 }
 0x9c3   : > { %10195 = vmatprep.subr.bf16.mxu1 %v10194_v57 }
 0x9c6   : > { %10197 = vmatpush3.bf16.msra.mxu1 %v10196_v18 }
 0x9c7   : > { %10199 = vmatprep.subr.bf16.mxu1 %v10198_v27 }
 0x9ca   : > { %10201 = vmatpush3.bf16.msra.mxu1 %v10200_v44 }
 0xa84   : > { %v8291_v33 = vpop.f32.mrb[158].mxu1 }
 0xa85   : > { %v8295_v59 = vmul.f32 0.17677669, %v8291_v33  ;;  %v10036_v60 = vpop.f32.mrb[159].mxu1  ;;  %v8416_v33 = vld [vmem:[%s14750_s1 + $0x1b0] sm:$0xff] }
 0xa86   : > { %v8417_v60 = vld [vmem:[%s14750_s1 + $0x1b8] sm:$0xff] }
 0xa87   : > { %v8297_v23 = vsel %vm8296_vm12, %v8295_v59, -inf }
 0xa88   : > { %8298 = vmax.xlane.f32.xlu1 %v8297_v23  ;;  %v10204_v23 = vpack.c.bf16 %v8417_v60, %v8416_v33 }
 0xa99   : > { %8309 = vrot.lane.b32.xlu1 %v8216_v61, %s10369_s27 }
 0xb15   : > { %v8299_v32 = vpop.xlane.xlu1 %8298 }
 0xb16   : > { %v8300_v63 = vsub.f32 %v8295_v59, %v8299_v32  ;;  %v10202_v59 = vpack.c.bf16 %v8433_v42, %v8432_v45 }
 0xb18   : > { %v8301_v21 = vmul.f32 1.442695, %v8300_v63  ;;  %10203 = vmatprep.subr.bf16.mxu1 %v10202_v59 }
 0xb19   : > { %v8310_v31 = vpop.permute.xlu1 %8309  ;;  %10205 = vmatpush3.bf16.msra.mxu1 %v10204_v23 }
 0xb1a   : > { %10266 = vpow2.f32 %v8301_v21  ;;  %10038 = vmatpush3.msra.mxu0 %v8310_v31 }
 0xb1b   : > { %10206 = vmatprep.subr.bf16.mxu0 %v14945_v58 }
 0xb24   : > { %v10267_v41 = vpop.eup %10266 }
 0xb25   : > { %v8303_v26 = vsel %vm8296_vm12, %v10267_v41, 0.0 }
 0xb26   : > { %8304 = vadd.xlane.f32.xlu0 %v8303_v26 }
 0xbb3   : > { %v8305_v48 = vpop.xlane.xlu0 %8304 }
 0xbb4   : > { %10268 = vrcp.f32 %v8305_v48 }
 0xbbe   : > { %v10269_v3 = vpop.eup %10268 }
 0xbbf   : > { %v8307_v16 = vmul.f32 %v10269_v3, %v10267_v41  ;;  %v8992_v41 = vsel %vm14500_vm10, 1.0, %v14944_v55 }
 0xbc1   : > { %10040 = vmatmul.mubr.msk.f32.vlgmr.msra.gmra.mrb[168].mxu0 %vm8296_vm12, %v8307_v16 }
 0xbc2   : > { %10050 = vmatprep.mubr.msk.f32.mxu0 %vm10362_vm0, %v14944_v55  ;;  %vm8396_vm0 = vcmask 523264  }
 0xc94   : > { %v8381_v17 = vpop.f32.mrb[168].mxu0 }
 0xc95   : > { %v8382_v61 = vadd.f32 %v14551_v51, %v8381_v17  ;;  %v10041_v32 = vpop.f32.mrb[169].mxu0  ;;  %v8993_v51 = vsel %vm14493_vm9, 1.0, %v14944_v55  ;;  %v10207_v55 = vpack.c.bf16 %v8515_v20, %v8514_v52 }
 0xc97   : > { %8389 = vrot.lane.b32.xlu1 %v8382_v61, %s10369_s27  ;;  %8386 = vrot.lane.b32.xlu0 %v8382_v61, %s10367_s14  ;;  %s8596_s27 = scalar_lea.sflag [#allocation5], %s186_s5 }
 0xc98   : > { %10208 = vmatpush3.bf16.msra.mxu0 %v10207_v55 }
 0xc99   : > { %10209 = vmatprep.subr.bf16.mxu0 %v14945_v58 }
 0xc9b   : > { %8392 = vrot.lane.b32.xlu1 %v8382_v61, %s10368_s20  ;;  %s14707_s20 = scalar_lea.hbm %s14753_s4, %s9004_s8 }
 0xc9c   : > { %10211 = vmatpush3.bf16.msra.mxu0 %v10210_v22 }
 0xd09   : > { %v8390_v63 = vpop.permute.xlu1 %8389  ;;  %v8387_v21 = vpop.permute.xlu0 %8386 }
 0xd0a   : > { %v8395_v31 = vsel %vm425_vm11, %v8382_v61, %v8387_v21 }
 0xd0b   : > { %v8397_v48 = vsel %vm8396_vm0, %v8395_v31, %v8390_v63 }
 0xd0d   : > { %v8393_v26 = vpop.permute.xlu1 %8392 }
 0xd0e   : > { %v8399_v3 = vsel %vm8398_vm13, %v8397_v48, %v8393_v26 }
 0xd0f   : > { %v8400_v16 = vmul.f32 %v8992_v41, %v8399_v3  ;;  %v8401_v14 = vmul.f32 %v8993_v51, %v8399_v3 }
 0xd11   : > { %8498 = vmatprep.mubr.f32.mxu1 %v8401_v14 }
 0xd12   : > { %8499 = vmatmul.mubr.f32.vlgmr.msra.gmra.mrb[160].mxu1 %v8400_v16 }
 0xde5   : > { %v9446_v30 = vpop.f32.mrb[160].mxu1 }
 0xde6   : > { %v9447_v7 = vpop.f32.mrb[161].mxu1 }
 0xde7   : > { %v9448_v10 = vadd.f32 %v9447_v7, %v9446_v30 }
 0xde9   : > { %v8504_v5 = vsel %vm425_vm11, %v9448_v10, 0.0 }
 0xdea   : > { %v8505_v15 = vrot.slane %v8504_v5, 4 }
 0xdec   : > { %v8506_v13 = vadd.f32 %v8505_v15, %v8504_v5 }
 0xdee   : > { %v8507_v2 = vrot.slane %v8506_v13, 2 }
 0xdf0   : > { %v8508_v50 = vadd.f32 %v8507_v2, %v8506_v13 }
 0xdf2   : > { %v8509_v34 = vrot.slane %v8508_v50, 1 }
 0xdf4   : > { %v8510_v12 = vadd.f32 %v8509_v34, %v8508_v50 }
 0xdf6   : > { %v8512_v43 = vadd.f32 %v8511_v29, %v8510_v12 }
 0xdf8   : > { %v8513_v58 = vmax.f32 %v8512_v43, 0.0 }
 0xdfa   : > { %10051 = vmatmul.mubr.msk.f32.vlgmr.msra.gmra.mrb[170].mxu0 %vm425_vm11, %v8513_v58 }
 0xecd   : > { %v8587_v54 = vpop.f32.mrb[170].mxu0 }
 0xece   : > { %v8592_v0 = vadd.f32 %v8591_v8, %v8587_v54  ;;  %v10052_v46 = vpop.f32.mrb[171].mxu0 }
 0xed0   : > { %8594 = vst.msk [vmem:[%s187_s9] sm:$0x1] %vm8593_vm14, %v8592_v0 }
 0xed1   : > { %10310 = shalt.err (!%p10307_p3)
}
 0xed2   : > { %s10311_s23 = scalar_lea.hbm %s14707_s20, 16  ;;  %s10315_s30 = scalar_lea.hbm %s14753_s4, 32 }
 0xed3   : > { %p10312_p4 = scmp.ne.s32.totalorder %s14707_s20, %s10311_s23  ;;  %p10316_p9 = scmp.lt.u32.totalorder %s14707_s20, %s14753_s4 }
 0xed4   : > { %p10317_p10 = scmp.lt.u32.totalorder %s10315_s30, %s10311_s23  ;;  %p10319_p12 = scmp.lt.u32.totalorder %s10311_s23, %s14707_s20 }
 0xed5   : > { %p10313_p7 = pnand %p10312_p4, %p10434_p5 }
 0xed6   : > { %p10318_p11 = por %p10317_p10, %p10316_p9 }
 0xed7   : > { %p10314_p8 = pneg %p10313_p7 }
 0xed8   : > { %p10320_p13 = por %p10319_p12, %p10318_p11 }
 0xeda   : > { %p10321_p0 = pnand %p10320_p13, %p10314_p8 }
 0xedc   : > { %10324 = shalt.err (!%p10321_p0)
}
 0xedd   : > { %10216 = dma.vmem_to_hbm [thread:$0]  (%p10434_p5), %s14709_s10, 16, %s14707_s20, %s8596_s27  }
 0xede PF: > { %p10222_p1 = scmp.ge.s32.totalorder %s10359_s18, 2  ;;  %s8620_s7 = sand.u32 1, %s10347_s15  }
 0xedf   : > { %s8621_s8 = scalar_lea.sflag [#allocation5], %s8620_s7 }
 0xee0   : > { %p10219_p2 = pnand %p10222_p1, %p10438_p6 }
 0xee2   : > { %10342 = dma.done.wait (!%p10219_p2), %s8621_s8, 16  }
 0xee3   : > { %10344 = vsyncadd (!%p10219_p2), %s8621_s8, 4294967280  ;;  %p14_p3 = scmp.ge.s32.totalorder %s10421_s21, 4   ;;  %s14955_s15 = smov %s10351_s16 }
 0xee4   : > { %s14956_s16 = smov %s10355_s17  ;;  %s14957_s17 = smov %s10432_s24 }
 0xee5   : > { %s14958_s18 = smov %s10421_s21  ;;  %16 = sbr.rel (!%p14_p3) target bundleno = 3 (0x3), region = 71 }
 0xeec   :  { %8625 = vsyncpa [#allocation5], 1 }
 0xeed   :  { %8627 = vsyncpa [#allocation5 + $0x1], 1 }

</bundles_post_ra>
